<compile_context>
chip_gen: v6e
topology: v6e:2x2x1
jax: 0.10.0
libtpu: 0.0.40
codegen_flags: <defaults>
</compile_context>

<pallas_src>
import functools

import numpy as np
import jax
import jax.numpy as jnp
from jax import lax
from jax.experimental import pallas as pl
from jax.experimental.pallas import tpu as pltpu


def _vmem_limit_bytes():
    # Generation-aware scoped-VMEM limit: ~half of physical, clamped.
    try:
        cap = int(getattr(pltpu.get_tpu_info(), "vmem_capacity_bytes", 0))
    except Exception:
        cap = 0
    if cap <= 0:
        cap = 64 * 1024 * 1024
    return int(min(96 * 1024 * 1024, max(32 * 1024 * 1024, cap // 2)))


VMEM_LIMIT = _vmem_limit_bytes()


def _compiler_params(semantics):
    return pltpu.CompilerParams(dimension_semantics=semantics,
                                vmem_limit_bytes=VMEM_LIMIT)


def _round_up(x, m):
    return ((x + m - 1) // m) * m


# ---------------------------------------------------------------------------
# 1x1 conv (+ folded BN + optional ReLU) as a row-tiled MXU matmul
# ---------------------------------------------------------------------------

def _pointwise_kernel(x_ref, w_ref, s_ref, b_ref, o_ref, *, relu):
    y = jnp.dot(x_ref[...].astype(jnp.bfloat16), w_ref[...],
                preferred_element_type=jnp.float32)
    y = y * s_ref[...] + b_ref[...]
    if relu:
        y = jnp.maximum(y, 0.0)
    o_ref[...] = y.astype(o_ref.dtype)


def pointwise_conv(x2d, w_bf16, scale, bias, relu,
                   out_dtype=jnp.bfloat16, tm_target=1024):
    M, Cin = x2d.shape
    Cout = w_bf16.shape[1]
    # M tile is always a multiple of 128; pad M up instead of shrinking tm.
    tm = min(tm_target, _round_up(M, 128))
    Mp = _round_up(M, tm)
    if Mp != M:
        x2d = jnp.pad(x2d, ((0, Mp - M), (0, 0)))
    out = pl.pallas_call(
        functools.partial(_pointwise_kernel, relu=relu),
        out_shape=jax.ShapeDtypeStruct((Mp, Cout), out_dtype),
        grid=(Mp // tm,),
        in_specs=[
            pl.BlockSpec((tm, Cin), lambda i: (i, 0)),
            pl.BlockSpec((Cin, Cout), lambda i: (0, 0)),
            pl.BlockSpec((1, Cout), lambda i: (0, 0)),
            pl.BlockSpec((1, Cout), lambda i: (0, 0)),
        ],
        out_specs=pl.BlockSpec((tm, Cout), lambda i: (i, 0)),
        compiler_params=_compiler_params(("parallel",)),
    )(x2d, w_bf16, scale, bias)
    return out if Mp == M else out[:M]


# ---------------------------------------------------------------------------
# 3x3 "same" conv (+ folded BN + ReLU); channel-concat of multiple inputs is
# fused into the contraction.  No im2col concat: 9 accumulating matmuls per
# input, each K = Cin, all on the MXU with f32 accumulation.
# ---------------------------------------------------------------------------

def _conv3x3_kernel(*args, H, W, n_in, relu):
    x_refs = args[:n_in]
    w_refs = args[n_in:2 * n_in]
    s_ref, b_ref, o_ref = args[2 * n_in:2 * n_in + 3]
    Cout = o_ref.shape[-1]
    acc = jnp.zeros((H * W, Cout), jnp.float32)
    for idx in range(n_in):
        xv = x_refs[idx][...]                       # (H+2, W+2, Cin) bf16
        for dy in range(3):
            rows = xv[dy:dy + H]                    # (H, W+2, Cin)
            for dx in range(3):
                tap = rows[:, dx:dx + W, :].reshape(H * W, -1)
                acc = acc + jnp.dot(tap, w_refs[idx][dy * 3 + dx],
                                    preferred_element_type=jnp.float32)
    y = acc * s_ref[...] + b_ref[...]
    if relu:
        y = jnp.maximum(y, 0.0)
    o_ref[...] = y.reshape(H, W, Cout).astype(o_ref.dtype)


def conv3x3_bn_relu(xs, ws, scale, bias, relu=True):
    # xs: one or two bf16 NHWC inputs (lane-aligned channels); ws: matching
    # per-input weight slabs of shape (9, Cin_i, Cout) in bf16.
    N, H, W, _ = xs[0].shape
    Cout = ws[0].shape[-1]
    # TODO(synk): row-tile with an in-kernel halo for large feature maps.
    xps = [jnp.pad(x, ((0, 0), (1, 1), (1, 1), (0, 0))) for x in xs]
    in_specs = []
    for x in xs:
        cin = int(x.shape[-1])
        in_specs.append(pl.BlockSpec((None, H + 2, W + 2, cin),
                                     lambda n: (n, 0, 0, 0)))
    for w in ws:
        in_specs.append(pl.BlockSpec(tuple(int(d) for d in w.shape),
                                     lambda n: (0, 0, 0)))
    in_specs += [
        pl.BlockSpec((1, Cout), lambda n: (0, 0)),
        pl.BlockSpec((1, Cout), lambda n: (0, 0)),
    ]
    return pl.pallas_call(
        functools.partial(_conv3x3_kernel, H=H, W=W, n_in=len(xs), relu=relu),
        out_shape=jax.ShapeDtypeStruct((N, H, W, Cout), jnp.bfloat16),
        grid=(N,),
        in_specs=in_specs,
        out_specs=pl.BlockSpec((None, H, W, Cout), lambda n: (n, 0, 0, 0)),
        compiler_params=_compiler_params(("parallel",)),
    )(*xps, *ws, scale, bias)


# ---------------------------------------------------------------------------
# Bilinear upsample (align_corners=True) — separable, both passes on the MXU
# ---------------------------------------------------------------------------

def interp_matrix(out_size, in_size):
    # Matches F.interpolate(mode='bilinear', align_corners=True); separable.
    A = np.zeros((out_size, in_size), np.float32)
    for o in range(out_size):
        src = 0.0 if out_size == 1 else o * (in_size - 1) / (out_size - 1)
        i0 = min(int(np.floor(src)), in_size - 1)
        i1 = min(i0 + 1, in_size - 1)
        f = src - i0
        A[o, i0] += 1.0 - f
        A[o, i1] += f
    return A


def _upsample_kernel(ah_ref, aw_ref, x_ref, o_ref):
    h, w, c = x_ref.shape
    Ho, Wo, _ = o_ref.shape
    xv = x_ref[...].astype(jnp.bfloat16)
    # H pass: one MXU matmul on the row-major view, (Ho,h) @ (h, w*c).
    u = jnp.dot(ah_ref[...], xv.reshape(h, w * c),
                preferred_element_type=jnp.float32)
    u = u.astype(jnp.bfloat16).reshape(Ho, w, c)
    # W pass: batched MXU matmul; AW broadcast once in-kernel (no HBM operand).
    awb = jnp.broadcast_to(aw_ref[...][None, :, :], (Ho, Wo, w))
    out = jnp.einsum('opj,ojc->opc', awb, u,
                     preferred_element_type=jnp.float32)
    o_ref[...] = out.astype(o_ref.dtype)


def bilinear_upsample(x, Ho, Wo, out_dtype=jnp.bfloat16):
    # x: (N, h, w, c) -> (N, Ho, Wo, c), align_corners=True.
    N, h, w, c = x.shape
    ah = jnp.asarray(interp_matrix(Ho, h)).astype(jnp.bfloat16)
    aw = jnp.asarray(interp_matrix(Wo, w)).astype(jnp.bfloat16)
    return pl.pallas_call(
        _upsample_kernel,
        out_shape=jax.ShapeDtypeStruct((N, Ho, Wo, c), out_dtype),
        grid=(N,),
        in_specs=[
            pl.BlockSpec((Ho, h), lambda n: (0, 0)),
            pl.BlockSpec((Wo, w), lambda n: (0, 0)),
            pl.BlockSpec((None, h, w, c), lambda n: (n, 0, 0, 0)),
        ],
        out_specs=pl.BlockSpec((None, Ho, Wo, c), lambda n: (n, 0, 0, 0)),
        compiler_params=_compiler_params(("parallel",)),
    )(ah, aw, x)


# ---------------------------------------------------------------------------
# Fused classifier (1x1 conv, with bias) + final bilinear upsample.
# Only the num_classes real channels are written to HBM.
# ---------------------------------------------------------------------------

def _classifier_upsample_kernel(ah_ref, aw_ref, x_ref, wc_ref, bc_ref, o_ref):
    h, w, cin = x_ref.shape
    Ho, Wo, nc = o_ref.shape
    # 1x1 classifier conv (x already bf16, weights bf16, f32 accumulation).
    y = jnp.dot(x_ref[...].reshape(h * w, cin), wc_ref[...],
                preferred_element_type=jnp.float32) + bc_ref[...]
    ncp = y.shape[-1]
    yb = y.astype(jnp.bfloat16).reshape(h, w * ncp)
    # H pass on the MXU.
    u = jnp.dot(ah_ref[...], yb, preferred_element_type=jnp.float32)
    u = u.astype(jnp.bfloat16).reshape(Ho, w, ncp)
    # W pass as a batched MXU matmul.
    awb = jnp.broadcast_to(aw_ref[...][None, :, :], (Ho, Wo, w))
    out = jnp.einsum('opj,ojc->opc', awb, u,
                     preferred_element_type=jnp.float32)
    # Store only the real classes (the lane padding never reaches HBM).
    o_ref[...] = out[:, :, :nc].astype(o_ref.dtype)


def classifier_upsample(x, wc, bc, Ho, Wo, num_classes):
    N, h, w, cin = x.shape
    ncp = wc.shape[1]
    ah = jnp.asarray(interp_matrix(Ho, h)).astype(jnp.bfloat16)
    aw = jnp.asarray(interp_matrix(Wo, w)).astype(jnp.bfloat16)
    return pl.pallas_call(
        _classifier_upsample_kernel,
        out_shape=jax.ShapeDtypeStruct((N, Ho, Wo, num_classes), jnp.float32),
        grid=(N,),
        in_specs=[
            pl.BlockSpec((Ho, h), lambda n: (0, 0)),
            pl.BlockSpec((Wo, w), lambda n: (0, 0)),
            pl.BlockSpec((None, h, w, cin), lambda n: (n, 0, 0, 0)),
            pl.BlockSpec((cin, ncp), lambda n: (0, 0)),
            pl.BlockSpec((1, ncp), lambda n: (0, 0)),
        ],
        out_specs=pl.BlockSpec((None, Ho, Wo, num_classes),
                               lambda n: (n, 0, 0, 0)),
        compiler_params=_compiler_params(("parallel",)),
    )(ah, aw, x, wc, bc)


# ---------------------------------------------------------------------------
# Decoder (+ final upsample) forward
# ---------------------------------------------------------------------------

def deeplabv3p_head_forward(x_aspp, low_level, q, num_classes, out_hw):
    N, h4, w4, Cll = low_level.shape
    # Decoder.conv1 (1x1, no bias) + BN1 + ReLU; 48 ch zero-padded to 128 lanes.
    ll = pointwise_conv(low_level.reshape(N * h4 * w4, Cll),
                        q['w1'], q['s1'], q['b1'],
                        relu=True).reshape(N, h4, w4, 128)          # bf16
    # Upsample ASPP features to the low-level spatial size (align_corners=True).
    up = bilinear_upsample(x_aspp, h4, w4)                          # bf16
    # output[0..2]: Conv3x3(48+128 -> 256) + BN + ReLU; concat fused via two
    # per-input weight slabs (no 176-ch intermediate in HBM).
    x = conv3x3_bn_relu([ll, up], [q['w2a'], q['w2b']], q['s2'], q['b2'])
    # output[3..5]: Conv3x3(256 -> 256) + BN + ReLU.
    x = conv3x3_bn_relu([x], [q['w3']], q['s3'], q['b3'])
    # output[6]: Dropout(0.1) -> identity in eval mode.
    # TODO(synk): dropout omitted (eval-mode identity); BN uses running stats.
    # output[7] + final 4x bilinear upsample, fused in one kernel; only the
    # num_classes real channels are written to HBM.
    return classifier_upsample(x, q['wc'], q['bc'],
                               out_hw[0], out_hw[1], num_classes)


# ---------------------------------------------------------------------------
# Parameter init (logical torch shapes) + packing for the Pallas path
# ---------------------------------------------------------------------------

def init_params(key, num_classes):
    ks = jax.random.split(key, 8)

    def w(k, shape, fan_in):
        return jax.random.normal(k, shape, jnp.float32) / np.sqrt(fan_in)

    def bn(k, c):
        k1, k2, k3, k4 = jax.random.split(k, 4)
        gamma = 1.0 + 0.1 * jax.random.normal(k1, (c,), jnp.float32)
        beta = 0.1 * jax.random.normal(k2, (c,), jnp.float32)
        mean = 0.1 * jax.random.normal(k3, (c,), jnp.float32)
        var = 1.0 + 0.5 * jax.random.uniform(k4, (c,), jnp.float32)
        s = gamma / jnp.sqrt(var + 1e-5)
        b = beta - mean * s
        return s, b

    p = {}
    p['conv1_w'] = w(ks[0], (128, 48), 128)          # Conv2d(128, 48, 1, bias=False)
    p['bn1_s'], p['bn1_b'] = bn(ks[1], 48)
    p['c2_w'] = w(ks[2], (9, 176, 256), 9 * 176)     # Conv2d(176, 256, 3, bias=False)
    p['bn2_s'], p['bn2_b'] = bn(ks[3], 256)
    p['c3_w'] = w(ks[4], (9, 256, 256), 9 * 256)     # Conv2d(256, 256, 3, bias=False)
    p['bn3_s'], p['bn3_b'] = bn(ks[5], 256)
    p['cls_w'] = w(ks[6], (256, num_classes), 256)   # Conv2d(256, nc, 1) with bias
    p['cls_b'] = 0.1 * jax.random.normal(ks[7], (num_classes,), jnp.float32)
    return p


def prepare_params(p, num_classes):
    q = {}
    # 1x1 conv: Cout 48 -> 128 lanes (zero-padded), bf16 weights.
    q['w1'] = jnp.pad(p['conv1_w'], ((0, 0), (0, 80))).astype(jnp.bfloat16)
    q['s1'] = jnp.pad(p['bn1_s'], (0, 80)).reshape(1, 128)
    q['b1'] = jnp.pad(p['bn1_b'], (0, 80)).reshape(1, 128)
    # First 3x3 conv split per concat input: ll part (48 real + 80 zero rows)
    # and upsampled-ASPP part (128 rows), each (9, 128, 256).
    q['w2a'] = jnp.pad(p['c2_w'][:, :48, :],
                       ((0, 0), (0, 80), (0, 0))).astype(jnp.bfloat16)
    q['w2b'] = p['c2_w'][:, 48:, :].astype(jnp.bfloat16)
    q['s2'] = p['bn2_s'].reshape(1, 256)
    q['b2'] = p['bn2_b'].reshape(1, 256)
    # Second 3x3 conv: (9, 256, 256).
    q['w3'] = p['c3_w'].astype(jnp.bfloat16)
    q['s3'] = p['bn3_s'].reshape(1, 256)
    q['b3'] = p['bn3_b'].reshape(1, 256)
    # Classifier: pad num_classes -> 128 lanes for the MXU (padding stays on
    # chip; only the real channels are stored by the fused kernel).
    ncp = max(128, _round_up(num_classes, 128))
    q['wc'] = jnp.pad(p['cls_w'],
                      ((0, 0), (0, ncp - num_classes))).astype(jnp.bfloat16)
    q['bc'] = jnp.pad(p['cls_b'], (0, ncp - num_classes)).reshape(1, ncp)
    return q


# ---------------------------------------------------------------------------
# Pure-JAX reference (emulates the bf16 rounding points of the Pallas path)
# ---------------------------------------------------------------------------

def _bf(x):
    return jnp.asarray(x, jnp.float32).astype(jnp.bfloat16).astype(jnp.float32)


def ref_forward(x_aspp, low_level, p, out_hw):
    def bn(x, s, b):
        return x * s.reshape(1, 1, 1, -1) + b.reshape(1, 1, 1, -1)

    def up(x, Ho, Wo):
        AH = _bf(jnp.asarray(interp_matrix(Ho, x.shape[1])))
        AW = _bf(jnp.asarray(interp_matrix(Wo, x.shape[2])))
        u = _bf(jnp.einsum('Oi,nijc->nOjc', AH, x))
        return jnp.einsum('Pj,nOjc->nOPc', AW, u)

    def conv3(x, w9):
        w = w9.reshape(3, 3, w9.shape[1], w9.shape[2])
        return lax.conv_general_dilated(
            x, w, (1, 1), 'SAME', dimension_numbers=('NHWC', 'HWIO', 'NHWC'))

    ll = _bf(jax.nn.relu(bn(jnp.einsum('nhwc,cd->nhwd', _bf(low_level),
                                       _bf(p['conv1_w'])),
                            p['bn1_s'], p['bn1_b'])))
    xu = _bf(up(_bf(x_aspp), low_level.shape[1], low_level.shape[2]))
    x = jnp.concatenate([ll, xu], axis=-1)
    x = _bf(jax.nn.relu(bn(conv3(x, _bf(p['c2_w'])), p['bn2_s'], p['bn2_b'])))
    x = _bf(jax.nn.relu(bn(conv3(x, _bf(p['c3_w'])), p['bn3_s'], p['bn3_b'])))
    y = _bf(jnp.einsum('nhwc,cd->nhwd', x, _bf(p['cls_w']))
            + p['cls_b'].reshape(1, 1, 1, -1))
    return up(y, out_hw[0], out_hw[1])


# ---------------------------------------------------------------------------

if __name__ == "__main__":
    key = jax.random.PRNGKey(0)
    k1, k2, k3 = jax.random.split(key, 3)

    num_classes = 8
    H_img, W_img = 32, 32            # conceptual input image: (2, 3, 32, 32) NCHW

    # Synthetic backbone/ASPP outputs (NHWC): ASPP output at stride 16 with 128
    # channels, low-level features at stride 4 with 128 channels.
    x_aspp = jax.random.normal(k1, (2, H_img // 16, W_img // 16, 128), jnp.float32)
    low_level = jax.random.normal(k2, (2, H_img // 4, W_img // 4, 128), jnp.float32)
    params = init_params(k3, num_classes)
    packed = prepare_params(params, num_classes)

    @jax.jit
    def run(xa, ll_feat, q):
        return deeplabv3p_head_forward(xa, ll_feat, q, num_classes, (H_img, W_img))

    out = jax.block_until_ready(run(x_aspp, low_level, packed))
    assert out.shape == (2, H_img, W_img, num_classes), out.shape

    ref = jax.block_until_ready(ref_forward(x_aspp, low_level, params,
                                            (H_img, W_img)))
    np.testing.assert_allclose(np.asarray(out), np.asarray(ref),
                               atol=2e-2, rtol=2e-2)

    print("KERNEL_OK")
</pallas_src>

<mosaic_0001>
module attributes {stable_mosaic.version = 11 : i64} {
  func.func @_upsample_kernel(%arg0: i32, %arg1: memref<8x2xbf16, #tpu.memory_space<vmem>>, %arg2: memref<8x2xbf16, #tpu.memory_space<vmem>>, %arg3: memref<1x2x2x128xf32, #tpu.memory_space<vmem>>, %arg4: memref<1x8x8x128xbf16, #tpu.memory_space<vmem>>) attributes {dimension_semantics = [#tpu.dimension_semantics<parallel>], iteration_bounds = array<i64: 2>, scalar_prefetch = 0 : i64, scratch_operands = 0 : i64, tpu.core_type = #tpu.core_type<tc>, window_params = [{pipeline_mode = #tpu.pipeline_mode<synchronous>, transform_indices = @transform_0, window_bounds = array<i64: 8, 2>}, {pipeline_mode = #tpu.pipeline_mode<synchronous>, transform_indices = @transform_1, window_bounds = array<i64: 8, 2>}, {transform_indices = @transform_2, window_bounds = array<i64: 1, 2, 2, 128>}, {transform_indices = @transform_3, window_bounds = array<i64: 1, 8, 8, 128>}]} {
    %c0 = arith.constant 0 : index
    %c0_0 = arith.constant 0 : index
    %c0_1 = arith.constant 0 : index
    %c0_2 = arith.constant 0 : index
    %0 = vector.load %arg3[%c0, %c0_0, %c0_1, %c0_2] : memref<1x2x2x128xf32, #tpu.memory_space<vmem>>, vector<1x2x2x128xf32>
    %1 = vector.shape_cast %0 : vector<1x2x2x128xf32> to vector<2x2x128xf32>
    %2 = arith.truncf %1 : vector<2x2x128xf32> to vector<2x2x128xbf16>
    %c0_3 = arith.constant 0 : index
    %c0_4 = arith.constant 0 : index
    %3 = vector.load %arg1[%c0_3, %c0_4] : memref<8x2xbf16, #tpu.memory_space<vmem>>, vector<8x2xbf16>
    %4 = vector.shape_cast %2 : vector<2x2x128xbf16> to vector<2x256xbf16>
    %cst = arith.constant dense<0.000000e+00> : vector<8x256xf32>
    %5 = tpu.matmul %3, %4, %cst {dimension_numbers = #tpu.dot_dimension_numbers<[1], [0], [0], [1], [0, 0, 1, 1], [], []>} : vector<8x2xbf16>, vector<2x256xbf16>, vector<8x256xf32> -> vector<8x256xf32>
    %6 = arith.truncf %5 : vector<8x256xf32> to vector<8x256xbf16>
    %7 = vector.shape_cast %6 : vector<8x256xbf16> to vector<8x2x128xbf16>
    %c0_5 = arith.constant 0 : index
    %c0_6 = arith.constant 0 : index
    %8 = vector.load %arg2[%c0_5, %c0_6] : memref<8x2xbf16, #tpu.memory_space<vmem>>, vector<8x2xbf16>
    %9 = vector.shape_cast %8 : vector<8x2xbf16> to vector<1x8x2xbf16>
    %10 = vector.shape_cast %9 : vector<1x8x2xbf16> to vector<1x8x2xbf16>
    %11 = vector.broadcast %10 : vector<1x8x2xbf16> to vector<8x8x2xbf16>
    "tpu.trace_start"() <{level = 10 : i32, message = "opj,ojc->opc"}> : () -> ()
    %cst_7 = arith.constant dense<0.000000e+00> : vector<8x8x128xf32>
    %12 = tpu.matmul %11, %7, %cst_7 {dimension_numbers = #tpu.dot_dimension_numbers<[2], [1], [1], [2], [0, 0, 0, 1, 1, 2], [0], [0]>} : vector<8x8x2xbf16>, vector<8x2x128xbf16>, vector<8x8x128xf32> -> vector<8x8x128xf32>
    "tpu.trace_stop"() : () -> ()
    %13 = arith.truncf %12 : vector<8x8x128xf32> to vector<8x8x128xbf16>
    %c0_8 = arith.constant 0 : index
    %c0_9 = arith.constant 0 : index
    %c0_10 = arith.constant 0 : index
    %c0_11 = arith.constant 0 : index
    %14 = vector.load %arg4[%c0_8, %c0_9, %c0_10, %c0_11] : memref<1x8x8x128xbf16, #tpu.memory_space<vmem>>, vector<1x8x8x128xbf16>
    %15 = vector.shape_cast %14 : vector<1x8x8x128xbf16> to vector<8x8x128xbf16>
    %16 = vector.shape_cast %13 : vector<8x8x128xbf16> to vector<1x8x8x128xbf16>
    tpu.vector_store %arg4[%c0_8, %c0_9, %c0_10, %c0_11], %16 {strides = array<i32>} : memref<1x8x8x128xbf16, #tpu.memory_space<vmem>>, vector<1x8x8x128xbf16>,
    return
  }
  func.func @transform_0(%arg0: i32) -> (i32, i32) {
    %c0_i32 = arith.constant 0 : i32
    %c0_i32_0 = arith.constant 0 : i32
    %c0_i32_1 = arith.constant 0 : i32
    return %c0_i32, %c0_i32_0 : i32, i32
  }
  func.func @transform_1(%arg0: i32) -> (i32, i32) {
    %c0_i32 = arith.constant 0 : i32
    %c0_i32_0 = arith.constant 0 : i32
    %c0_i32_1 = arith.constant 0 : i32
    return %c0_i32, %c0_i32_0 : i32, i32
  }
  func.func @transform_2(%arg0: i32) -> (i32, i32, i32, i32) {
    %c0_i32 = arith.constant 0 : i32
    %c0_i32_0 = arith.constant 0 : i32
    %c0_i32_1 = arith.constant 0 : i32
    %c0_i32_2 = arith.constant 0 : i32
    return %arg0, %c0_i32, %c0_i32_0, %c0_i32_1 : i32, i32, i32, i32
  }
  func.func @transform_3(%arg0: i32) -> (i32, i32, i32, i32) {
    %c0_i32 = arith.constant 0 : i32
    %c0_i32_0 = arith.constant 0 : i32
    %c0_i32_1 = arith.constant 0 : i32
    %c0_i32_2 = arith.constant 0 : i32
    return %arg0, %c0_i32, %c0_i32_0, %c0_i32_1 : i32, i32, i32, i32
  }
}

module attributes {stable_mosaic.version = 11 : i64} {
  func.func @_pointwise_kernel(%arg0: i32, %arg1: memref<128x128xf32, #tpu.memory_space<vmem>>, %arg2: memref<128x128xbf16, #tpu.memory_space<vmem>>, %arg3: memref<1x128xf32, #tpu.memory_space<vmem>>, %arg4: memref<1x128xf32, #tpu.memory_space<vmem>>, %arg5: memref<128x128xbf16, #tpu.memory_space<vmem>>) attributes {dimension_semantics = [#tpu.dimension_semantics<parallel>], iteration_bounds = array<i64: 1>, scalar_prefetch = 0 : i64, scratch_operands = 0 : i64, tpu.core_type = #tpu.core_type<tc>, window_params = [{transform_indices = @transform_0, window_bounds = array<i64: 128, 128>}, {pipeline_mode = #tpu.pipeline_mode<synchronous>, transform_indices = @transform_1, window_bounds = array<i64: 128, 128>}, {pipeline_mode = #tpu.pipeline_mode<synchronous>, transform_indices = @transform_2, window_bounds = array<i64: 1, 128>}, {pipeline_mode = #tpu.pipeline_mode<synchronous>, transform_indices = @transform_3, window_bounds = array<i64: 1, 128>}, {transform_indices = @transform_4, window_bounds = array<i64: 128, 128>}]} {
    %c0 = arith.constant 0 : index
    %c0_0 = arith.constant 0 : index
    %0 = vector.load %arg1[%c0, %c0_0] : memref<128x128xf32, #tpu.memory_space<vmem>>, vector<128x128xf32>
    %1 = arith.truncf %0 : vector<128x128xf32> to vector<128x128xbf16>
    %c0_1 = arith.constant 0 : index
    %c0_2 = arith.constant 0 : index
    %2 = vector.load %arg2[%c0_1, %c0_2] : memref<128x128xbf16, #tpu.memory_space<vmem>>, vector<128x128xbf16>
    %cst = arith.constant dense<0.000000e+00> : vector<128x128xf32>
    %3 = tpu.matmul %1, %2, %cst {dimension_numbers = #tpu.dot_dimension_numbers<[1], [0], [0], [1], [0, 0, 1, 1], [], []>} : vector<128x128xbf16>, vector<128x128xbf16>, vector<128x128xf32> -> vector<128x128xf32>
    %c0_3 = arith.constant 0 : index
    %c0_4 = arith.constant 0 : index
    %4 = vector.load %arg3[%c0_3, %c0_4] : memref<1x128xf32, #tpu.memory_space<vmem>>, vector<1x128xf32>
    %5 = vector.broadcast %4 : vector<1x128xf32> to vector<128x128xf32>
    %6 = arith.mulf %3, %5 : vector<128x128xf32>
    %c0_5 = arith.constant 0 : index
    %c0_6 = arith.constant 0 : index
    %7 = vector.load %arg4[%c0_5, %c0_6] : memref<1x128xf32, #tpu.memory_space<vmem>>, vector<1x128xf32>
    %8 = vector.broadcast %7 : vector<1x128xf32> to vector<128x128xf32>
    %9 = arith.addf %6, %8 : vector<128x128xf32>
    %cst_7 = arith.constant 0.000000e+00 : f32
    %10 = vector.broadcast %cst_7 : f32 to vector<128x128xf32>
    %11 = arith.maximumf %9, %10 : vector<128x128xf32>
    %12 = arith.truncf %11 : vector<128x128xf32> to vector<128x128xbf16>
    %c0_8 = arith.constant 0 : index
    %c0_9 = arith.constant 0 : index
    %13 = vector.load %arg5[%c0_8, %c0_9] : memref<128x128xbf16, #tpu.memory_space<vmem>>, vector<128x128xbf16>
    tpu.vector_store %arg5[%c0_8, %c0_9], %12 {strides = array<i32>} : memref<128x128xbf16, #tpu.memory_space<vmem>>, vector<128x128xbf16>,
    return
  }
  func.func @transform_0(%arg0: i32) -> (i32, i32) {
    %c0_i32 = arith.constant 0 : i32
    %c0_i32_0 = arith.constant 0 : i32
    return %arg0, %c0_i32 : i32, i32
  }
  func.func @transform_1(%arg0: i32) -> (i32, i32) {
    %c0_i32 = arith.constant 0 : i32
    %c0_i32_0 = arith.constant 0 : i32
    %c0_i32_1 = arith.constant 0 : i32
    return %c0_i32, %c0_i32_0 : i32, i32
  }
  func.func @transform_2(%arg0: i32) -> (i32, i32) {
    %c0_i32 = arith.constant 0 : i32
    %c0_i32_0 = arith.constant 0 : i32
    %c0_i32_1 = arith.constant 0 : i32
    return %c0_i32, %c0_i32_0 : i32, i32
  }
  func.func @transform_3(%arg0: i32) -> (i32, i32) {
    %c0_i32 = arith.constant 0 : i32
    %c0_i32_0 = arith.constant 0 : i32
    %c0_i32_1 = arith.constant 0 : i32
    return %c0_i32, %c0_i32_0 : i32, i32
  }
  func.func @transform_4(%arg0: i32) -> (i32, i32) {
    %c0_i32 = arith.constant 0 : i32
    %c0_i32_0 = arith.constant 0 : i32
    return %arg0, %c0_i32 : i32, i32
  }
}

module attributes {stable_mosaic.version = 11 : i64} {
  func.func @_conv3x3_kernel(%arg0: i32, %arg1: memref<1x10x10x128xbf16, #tpu.memory_space<vmem>>, %arg2: memref<1x10x10x128xbf16, #tpu.memory_space<vmem>>, %arg3: memref<9x128x256xbf16, #tpu.memory_space<vmem>>, %arg4: memref<9x128x256xbf16, #tpu.memory_space<vmem>>, %arg5: memref<1x256xf32, #tpu.memory_space<vmem>>, %arg6: memref<1x256xf32, #tpu.memory_space<vmem>>, %arg7: memref<1x8x8x256xbf16, #tpu.memory_space<vmem>>) attributes {dimension_semantics = [#tpu.dimension_semantics<parallel>], iteration_bounds = array<i64: 2>, scalar_prefetch = 0 : i64, scratch_operands = 0 : i64, tpu.core_type = #tpu.core_type<tc>, window_params = [{transform_indices = @transform_0, window_bounds = array<i64: 1, 10, 10, 128>}, {transform_indices = @transform_1, window_bounds = array<i64: 1, 10, 10, 128>}, {pipeline_mode = #tpu.pipeline_mode<synchronous>, transform_indices = @transform_2, window_bounds = array<i64: 9, 128, 256>}, {pipeline_mode = #tpu.pipeline_mode<synchronous>, transform_indices = @transform_3, window_bounds = array<i64: 9, 128, 256>}, {pipeline_mode = #tpu.pipeline_mode<synchronous>, transform_indices = @transform_4, window_bounds = array<i64: 1, 256>}, {pipeline_mode = #tpu.pipeline_mode<synchronous>, transform_indices = @transform_5, window_bounds = array<i64: 1, 256>}, {transform_indices = @transform_6, window_bounds = array<i64: 1, 8, 8, 256>}]} {
    %cst = arith.constant 0.000000e+00 : f32
    %0 = vector.broadcast %cst : f32 to vector<64x256xf32>
    %c0 = arith.constant 0 : index
    %c0_0 = arith.constant 0 : index
    %c0_1 = arith.constant 0 : index
    %c0_2 = arith.constant 0 : index
    %1 = vector.load %arg1[%c0, %c0_0, %c0_1, %c0_2] : memref<1x10x10x128xbf16, #tpu.memory_space<vmem>>, vector<1x10x10x128xbf16>
    %2 = vector.shape_cast %1 : vector<1x10x10x128xbf16> to vector<10x10x128xbf16>
    %3 = vector.extract_strided_slice %2 {offsets = [0, 0, 0], sizes = [8, 10, 128], strides = [1, 1, 1]} : vector<10x10x128xbf16> to vector<8x10x128xbf16>
    %4 = vector.extract_strided_slice %3 {offsets = [0, 0, 0], sizes = [8, 8, 128], strides = [1, 1, 1]} : vector<8x10x128xbf16> to vector<8x8x128xbf16>
    %5 = vector.shape_cast %4 : vector<8x8x128xbf16> to vector<64x128xbf16>
    %c0_3 = arith.constant 0 : index
    %c0_4 = arith.constant 0 : index
    %c0_5 = arith.constant 0 : index
    %6 = vector.load %arg3[%c0_3, %c0_4, %c0_5] : memref<9x128x256xbf16, #tpu.memory_space<vmem>>, vector<1x128x256xbf16>
    %7 = vector.shape_cast %6 : vector<1x128x256xbf16> to vector<128x256xbf16>
    %cst_6 = arith.constant dense<0.000000e+00> : vector<64x256xf32>
    %8 = tpu.matmul %5, %7, %cst_6 {dimension_numbers = #tpu.dot_dimension_numbers<[1], [0], [0], [1], [0, 0, 1, 1], [], []>} : vector<64x128xbf16>, vector<128x256xbf16>, vector<64x256xf32> -> vector<64x256xf32>
    %9 = arith.addf %0, %8 : vector<64x256xf32>
    %10 = vector.extract_strided_slice %3 {offsets = [0, 1, 0], sizes = [8, 8, 128], strides = [1, 1, 1]} : vector<8x10x128xbf16> to vector<8x8x128xbf16>
    %11 = vector.shape_cast %10 : vector<8x8x128xbf16> to vector<64x128xbf16>
    %c1 = arith.constant 1 : index
    %c0_7 = arith.constant 0 : index
    %c0_8 = arith.constant 0 : index
    %12 = vector.load %arg3[%c1, %c0_7, %c0_8] : memref<9x128x256xbf16, #tpu.memory_space<vmem>>, vector<1x128x256xbf16>
    %13 = vector.shape_cast %12 : vector<1x128x256xbf16> to vector<128x256xbf16>
    %cst_9 = arith.constant dense<0.000000e+00> : vector<64x256xf32>
    %14 = tpu.matmul %11, %13, %cst_9 {dimension_numbers = #tpu.dot_dimension_numbers<[1], [0], [0], [1], [0, 0, 1, 1], [], []>} : vector<64x128xbf16>, vector<128x256xbf16>, vector<64x256xf32> -> vector<64x256xf32>
    %15 = arith.addf %9, %14 : vector<64x256xf32>
    %16 = vector.extract_strided_slice %3 {offsets = [0, 2, 0], sizes = [8, 8, 128], strides = [1, 1, 1]} : vector<8x10x128xbf16> to vector<8x8x128xbf16>
    %17 = vector.shape_cast %16 : vector<8x8x128xbf16> to vector<64x128xbf16>
    %c2 = arith.constant 2 : index
    %c0_10 = arith.constant 0 : index
    %c0_11 = arith.constant 0 : index
    %18 = vector.load %arg3[%c2, %c0_10, %c0_11] : memref<9x128x256xbf16, #tpu.memory_space<vmem>>, vector<1x128x256xbf16>
    %19 = vector.shape_cast %18 : vector<1x128x256xbf16> to vector<128x256xbf16>
    %cst_12 = arith.constant dense<0.000000e+00> : vector<64x256xf32>
    %20 = tpu.matmul %17, %19, %cst_12 {dimension_numbers = #tpu.dot_dimension_numbers<[1], [0], [0], [1], [0, 0, 1, 1], [], []>} : vector<64x128xbf16>, vector<128x256xbf16>, vector<64x256xf32> -> vector<64x256xf32>
    %21 = arith.addf %15, %20 : vector<64x256xf32>
    %22 = vector.extract_strided_slice %2 {offsets = [1, 0, 0], sizes = [8, 10, 128], strides = [1, 1, 1]} : vector<10x10x128xbf16> to vector<8x10x128xbf16>
    %23 = vector.extract_strided_slice %22 {offsets = [0, 0, 0], sizes = [8, 8, 128], strides = [1, 1, 1]} : vector<8x10x128xbf16> to vector<8x8x128xbf16>
    %24 = vector.shape_cast %23 : vector<8x8x128xbf16> to vector<64x128xbf16>
    %c3 = arith.constant 3 : index
    %c0_13 = arith.constant 0 : index
    %c0_14 = arith.constant 0 : index
    %25 = vector.load %arg3[%c3, %c0_13, %c0_14] : memref<9x128x256xbf16, #tpu.memory_space<vmem>>, vector<1x128x256xbf16>
    %26 = vector.shape_cast %25 : vector<1x128x256xbf16> to vector<128x256xbf16>
    %cst_15 = arith.constant dense<0.000000e+00> : vector<64x256xf32>
    %27 = tpu.matmul %24, %26, %cst_15 {dimension_numbers = #tpu.dot_dimension_numbers<[1], [0], [0], [1], [0, 0, 1, 1], [], []>} : vector<64x128xbf16>, vector<128x256xbf16>, vector<64x256xf32> -> vector<64x256xf32>
    %28 = arith.addf %21, %27 : vector<64x256xf32>
    %29 = vector.extract_strided_slice %22 {offsets = [0, 1, 0], sizes = [8, 8, 128], strides = [1, 1, 1]} : vector<8x10x128xbf16> to vector<8x8x128xbf16>
    %30 = vector.shape_cast %29 : vector<8x8x128xbf16> to vector<64x128xbf16>
    %c4 = arith.constant 4 : index
    %c0_16 = arith.constant 0 : index
    %c0_17 = arith.constant 0 : index
    %31 = vector.load %arg3[%c4, %c0_16, %c0_17] : memref<9x128x256xbf16, #tpu.memory_space<vmem>>, vector<1x128x256xbf16>
    %32 = vector.shape_cast %31 : vector<1x128x256xbf16> to vector<128x256xbf16>
    %cst_18 = arith.constant dense<0.000000e+00> : vector<64x256xf32>
    %33 = tpu.matmul %30, %32, %cst_18 {dimension_numbers = #tpu.dot_dimension_numbers<[1], [0], [0], [1], [0, 0, 1, 1], [], []>} : vector<64x128xbf16>, vector<128x256xbf16>, vector<64x256xf32> -> vector<64x256xf32>
    %34 = arith.addf %28, %33 : vector<64x256xf32>
    %35 = vector.extract_strided_slice %22 {offsets = [0, 2, 0], sizes = [8, 8, 128], strides = [1, 1, 1]} : vector<8x10x128xbf16> to vector<8x8x128xbf16>
    %36 = vector.shape_cast %35 : vector<8x8x128xbf16> to vector<64x128xbf16>
    %c5 = arith.constant 5 : index
    %c0_19 = arith.constant 0 : index
    %c0_20 = arith.constant 0 : index
    %37 = vector.load %arg3[%c5, %c0_19, %c0_20] : memref<9x128x256xbf16, #tpu.memory_space<vmem>>, vector<1x128x256xbf16>
    %38 = vector.shape_cast %37 : vector<1x128x256xbf16> to vector<128x256xbf16>
    %cst_21 = arith.constant dense<0.000000e+00> : vector<64x256xf32>
    %39 = tpu.matmul %36, %38, %cst_21 {dimension_numbers = #tpu.dot_dimension_numbers<[1], [0], [0], [1], [0, 0, 1, 1], [], []>} : vector<64x128xbf16>, vector<128x256xbf16>, vector<64x256xf32> -> vector<64x256xf32>
    %40 = arith.addf %34, %39 : vector<64x256xf32>
    %41 = vector.extract_strided_slice %2 {offsets = [2, 0, 0], sizes = [8, 10, 128], strides = [1, 1, 1]} : vector<10x10x128xbf16> to vector<8x10x128xbf16>
    %42 = vector.extract_strided_slice %41 {offsets = [0, 0, 0], sizes = [8, 8, 128], strides = [1, 1, 1]} : vector<8x10x128xbf16> to vector<8x8x128xbf16>
    %43 = vector.shape_cast %42 : vector<8x8x128xbf16> to vector<64x128xbf16>
    %c6 = arith.constant 6 : index
    %c0_22 = arith.constant 0 : index
    %c0_23 = arith.constant 0 : index
    %44 = vector.load %arg3[%c6, %c0_22, %c0_23] : memref<9x128x256xbf16, #tpu.memory_space<vmem>>, vector<1x128x256xbf16>
    %45 = vector.shape_cast %44 : vector<1x128x256xbf16> to vector<128x256xbf16>
    %cst_24 = arith.constant dense<0.000000e+00> : vector<64x256xf32>
    %46 = tpu.matmul %43, %45, %cst_24 {dimension_numbers = #tpu.dot_dimension_numbers<[1], [0], [0], [1], [0, 0, 1, 1], [], []>} : vector<64x128xbf16>, vector<128x256xbf16>, vector<64x256xf32> -> vector<64x256xf32>
    %47 = arith.addf %40, %46 : vector<64x256xf32>
    %48 = vector.extract_strided_slice %41 {offsets = [0, 1, 0], sizes = [8, 8, 128], strides = [1, 1, 1]} : vector<8x10x128xbf16> to vector<8x8x128xbf16>
    %49 = vector.shape_cast %48 : vector<8x8x128xbf16> to vector<64x128xbf16>
    %c7 = arith.constant 7 : index
    %c0_25 = arith.constant 0 : index
    %c0_26 = arith.constant 0 : index
    %50 = vector.load %arg3[%c7, %c0_25, %c0_26] : memref<9x128x256xbf16, #tpu.memory_space<vmem>>, vector<1x128x256xbf16>
    %51 = vector.shape_cast %50 : vector<1x128x256xbf16> to vector<128x256xbf16>
    %cst_27 = arith.constant dense<0.000000e+00> : vector<64x256xf32>
    %52 = tpu.matmul %49, %51, %cst_27 {dimension_numbers = #tpu.dot_dimension_numbers<[1], [0], [0], [1], [0, 0, 1, 1], [], []>} : vector<64x128xbf16>, vector<128x256xbf16>, vector<64x256xf32> -> vector<64x256xf32>
    %53 = arith.addf %47, %52 : vector<64x256xf32>
    %54 = vector.extract_strided_slice %41 {offsets = [0, 2, 0], sizes = [8, 8, 128], strides = [1, 1, 1]} : vector<8x10x128xbf16> to vector<8x8x128xbf16>
    %55 = vector.shape_cast %54 : vector<8x8x128xbf16> to vector<64x128xbf16>
    %c8 = arith.constant 8 : index
    %c0_28 = arith.constant 0 : index
    %c0_29 = arith.constant 0 : index
    %56 = vector.load %arg3[%c8, %c0_28, %c0_29] : memref<9x128x256xbf16, #tpu.memory_space<vmem>>, vector<1x128x256xbf16>
    %57 = vector.shape_cast %56 : vector<1x128x256xbf16> to vector<128x256xbf16>
    %cst_30 = arith.constant dense<0.000000e+00> : vector<64x256xf32>
    %58 = tpu.matmul %55, %57, %cst_30 {dimension_numbers = #tpu.dot_dimension_numbers<[1], [0], [0], [1], [0, 0, 1, 1], [], []>} : vector<64x128xbf16>, vector<128x256xbf16>, vector<64x256xf32> -> vector<64x256xf32>
    %59 = arith.addf %53, %58 : vector<64x256xf32>
    %c0_31 = arith.constant 0 : index
    %c0_32 = arith.constant 0 : index
    %c0_33 = arith.constant 0 : index
    %c0_34 = arith.constant 0 : index
    %60 = vector.load %arg2[%c0_31, %c0_32, %c0_33, %c0_34] : memref<1x10x10x128xbf16, #tpu.memory_space<vmem>>, vector<1x10x10x128xbf16>
    %61 = vector.shape_cast %60 : vector<1x10x10x128xbf16> to vector<10x10x128xbf16>
    %62 = vector.extract_strided_slice %61 {offsets = [0, 0, 0], sizes = [8, 10, 128], strides = [1, 1, 1]} : vector<10x10x128xbf16> to vector<8x10x128xbf16>
    %63 = vector.extract_strided_slice %62 {offsets = [0, 0, 0], sizes = [8, 8, 128], strides = [1, 1, 1]} : vector<8x10x128xbf16> to vector<8x8x128xbf16>
    %64 = vector.shape_cast %63 : vector<8x8x128xbf16> to vector<64x128xbf16>
    %c0_35 = arith.constant 0 : index
    %c0_36 = arith.constant 0 : index
    %c0_37 = arith.constant 0 : index
    %65 = vector.load %arg4[%c0_35, %c0_36, %c0_37] : memref<9x128x256xbf16, #tpu.memory_space<vmem>>, vector<1x128x256xbf16>
    %66 = vector.shape_cast %65 : vector<1x128x256xbf16> to vector<128x256xbf16>
    %cst_38 = arith.constant dense<0.000000e+00> : vector<64x256xf32>
    %67 = tpu.matmul %64, %66, %cst_38 {dimension_numbers = #tpu.dot_dimension_numbers<[1], [0], [0], [1], [0, 0, 1, 1], [], []>} : vector<64x128xbf16>, vector<128x256xbf16>, vector<64x256xf32> -> vector<64x256xf32>
    %68 = arith.addf %59, %67 : vector<64x256xf32>
    %69 = vector.extract_strided_slice %62 {offsets = [0, 1, 0], sizes = [8, 8, 128], strides = [1, 1, 1]} : vector<8x10x128xbf16> to vector<8x8x128xbf16>
    %70 = vector.shape_cast %69 : vector<8x8x128xbf16> to vector<64x128xbf16>
    %c1_39 = arith.constant 1 : index
    %c0_40 = arith.constant 0 : index
    %c0_41 = arith.constant 0 : index
    %71 = vector.load %arg4[%c1_39, %c0_40, %c0_41] : memref<9x128x256xbf16, #tpu.memory_space<vmem>>, vector<1x128x256xbf16>
    %72 = vector.shape_cast %71 : vector<1x128x256xbf16> to vector<128x256xbf16>
    %cst_42 = arith.constant dense<0.000000e+00> : vector<64x256xf32>
    %73 = tpu.matmul %70, %72, %cst_42 {dimension_numbers = #tpu.dot_dimension_numbers<[1], [0], [0], [1], [0, 0, 1, 1], [], []>} : vector<64x128xbf16>, vector<128x256xbf16>, vector<64x256xf32> -> vector<64x256xf32>
    %74 = arith.addf %68, %73 : vector<64x256xf32>
    %75 = vector.extract_strided_slice %62 {offsets = [0, 2, 0], sizes = [8, 8, 128], strides = [1, 1, 1]} : vector<8x10x128xbf16> to vector<8x8x128xbf16>
    %76 = vector.shape_cast %75 : vector<8x8x128xbf16> to vector<64x128xbf16>
    %c2_43 = arith.constant 2 : index
    %c0_44 = arith.constant 0 : index
    %c0_45 = arith.constant 0 : index
    %77 = vector.load %arg4[%c2_43, %c0_44, %c0_45] : memref<9x128x256xbf16, #tpu.memory_space<vmem>>, vector<1x128x256xbf16>
    %78 = vector.shape_cast %77 : vector<1x128x256xbf16> to vector<128x256xbf16>
    %cst_46 = arith.constant dense<0.000000e+00> : vector<64x256xf32>
    %79 = tpu.matmul %76, %78, %cst_46 {dimension_numbers = #tpu.dot_dimension_numbers<[1], [0], [0], [1], [0, 0, 1, 1], [], []>} : vector<64x128xbf16>, vector<128x256xbf16>, vector<64x256xf32> -> vector<64x256xf32>
    %80 = arith.addf %74, %79 : vector<64x256xf32>
    %81 = vector.extract_strided_slice %61 {offsets = [1, 0, 0], sizes = [8, 10, 128], strides = [1, 1, 1]} : vector<10x10x128xbf16> to vector<8x10x128xbf16>
    %82 = vector.extract_strided_slice %81 {offsets = [0, 0, 0], sizes = [8, 8, 128], strides = [1, 1, 1]} : vector<8x10x128xbf16> to vector<8x8x128xbf16>
    %83 = vector.shape_cast %82 : vector<8x8x128xbf16> to vector<64x128xbf16>
    %c3_47 = arith.constant 3 : index
    %c0_48 = arith.constant 0 : index
    %c0_49 = arith.constant 0 : index
    %84 = vector.load %arg4[%c3_47, %c0_48, %c0_49] : memref<9x128x256xbf16, #tpu.memory_space<vmem>>, vector<1x128x256xbf16>
    %85 = vector.shape_cast %84 : vector<1x128x256xbf16> to vector<128x256xbf16>
    %cst_50 = arith.constant dense<0.000000e+00> : vector<64x256xf32>
    %86 = tpu.matmul %83, %85, %cst_50 {dimension_numbers = #tpu.dot_dimension_numbers<[1], [0], [0], [1], [0, 0, 1, 1], [], []>} : vector<64x128xbf16>, vector<128x256xbf16>, vector<64x256xf32> -> vector<64x256xf32>
    %87 = arith.addf %80, %86 : vector<64x256xf32>
    %88 = vector.extract_strided_slice %81 {offsets = [0, 1, 0], sizes = [8, 8, 128], strides = [1, 1, 1]} : vector<8x10x128xbf16> to vector<8x8x128xbf16>
    %89 = vector.shape_cast %88 : vector<8x8x128xbf16> to vector<64x128xbf16>
    %c4_51 = arith.constant 4 : index
    %c0_52 = arith.constant 0 : index
    %c0_53 = arith.constant 0 : index
    %90 = vector.load %arg4[%c4_51, %c0_52, %c0_53] : memref<9x128x256xbf16, #tpu.memory_space<vmem>>, vector<1x128x256xbf16>
    %91 = vector.shape_cast %90 : vector<1x128x256xbf16> to vector<128x256xbf16>
    %cst_54 = arith.constant dense<0.000000e+00> : vector<64x256xf32>
    %92 = tpu.matmul %89, %91, %cst_54 {dimension_numbers = #tpu.dot_dimension_numbers<[1], [0], [0], [1], [0, 0, 1, 1], [], []>} : vector<64x128xbf16>, vector<128x256xbf16>, vector<64x256xf32> -> vector<64x256xf32>
    %93 = arith.addf %87, %92 : vector<64x256xf32>
    %94 = vector.extract_strided_slice %81 {offsets = [0, 2, 0], sizes = [8, 8, 128], strides = [1, 1, 1]} : vector<8x10x128xbf16> to vector<8x8x128xbf16>
    %95 = vector.shape_cast %94 : vector<8x8x128xbf16> to vector<64x128xbf16>
    %c5_55 = arith.constant 5 : index
    %c0_56 = arith.constant 0 : index
    %c0_57 = arith.constant 0 : index
    %96 = vector.load %arg4[%c5_55, %c0_56, %c0_57] : memref<9x128x256xbf16, #tpu.memory_space<vmem>>, vector<1x128x256xbf16>
    %97 = vector.shape_cast %96 : vector<1x128x256xbf16> to vector<128x256xbf16>
    %cst_58 = arith.constant dense<0.000000e+00> : vector<64x256xf32>
    %98 = tpu.matmul %95, %97, %cst_58 {dimension_numbers = #tpu.dot_dimension_numbers<[1], [0], [0], [1], [0, 0, 1, 1], [], []>} : vector<64x128xbf16>, vector<128x256xbf16>, vector<64x256xf32> -> vector<64x256xf32>
    %99 = arith.addf %93, %98 : vector<64x256xf32>
    %100 = vector.extract_strided_slice %61 {offsets = [2, 0, 0], sizes = [8, 10, 128], strides = [1, 1, 1]} : vector<10x10x128xbf16> to vector<8x10x128xbf16>
    %101 = vector.extract_strided_slice %100 {offsets = [0, 0, 0], sizes = [8, 8, 128], strides = [1, 1, 1]} : vector<8x10x128xbf16> to vector<8x8x128xbf16>
    %102 = vector.shape_cast %101 : vector<8x8x128xbf16> to vector<64x128xbf16>
    %c6_59 = arith.constant 6 : index
    %c0_60 = arith.constant 0 : index
    %c0_61 = arith.constant 0 : index
    %103 = vector.load %arg4[%c6_59, %c0_60, %c0_61] : memref<9x128x256xbf16, #tpu.memory_space<vmem>>, vector<1x128x256xbf16>
    %104 = vector.shape_cast %103 : vector<1x128x256xbf16> to vector<128x256xbf16>
    %cst_62 = arith.constant dense<0.000000e+00> : vector<64x256xf32>
    %105 = tpu.matmul %102, %104, %cst_62 {dimension_numbers = #tpu.dot_dimension_numbers<[1], [0], [0], [1], [0, 0, 1, 1], [], []>} : vector<64x128xbf16>, vector<128x256xbf16>, vector<64x256xf32> -> vector<64x256xf32>
    %106 = arith.addf %99, %105 : vector<64x256xf32>
    %107 = vector.extract_strided_slice %100 {offsets = [0, 1, 0], sizes = [8, 8, 128], strides = [1, 1, 1]} : vector<8x10x128xbf16> to vector<8x8x128xbf16>
    %108 = vector.shape_cast %107 : vector<8x8x128xbf16> to vector<64x128xbf16>
    %c7_63 = arith.constant 7 : index
    %c0_64 = arith.constant 0 : index
    %c0_65 = arith.constant 0 : index
    %109 = vector.load %arg4[%c7_63, %c0_64, %c0_65] : memref<9x128x256xbf16, #tpu.memory_space<vmem>>, vector<1x128x256xbf16>
    %110 = vector.shape_cast %109 : vector<1x128x256xbf16> to vector<128x256xbf16>
    %cst_66 = arith.constant dense<0.000000e+00> : vector<64x256xf32>
    %111 = tpu.matmul %108, %110, %cst_66 {dimension_numbers = #tpu.dot_dimension_numbers<[1], [0], [0], [1], [0, 0, 1, 1], [], []>} : vector<64x128xbf16>, vector<128x256xbf16>, vector<64x256xf32> -> vector<64x256xf32>
    %112 = arith.addf %106, %111 : vector<64x256xf32>
    %113 = vector.extract_strided_slice %100 {offsets = [0, 2, 0], sizes = [8, 8, 128], strides = [1, 1, 1]} : vector<8x10x128xbf16> to vector<8x8x128xbf16>
    %114 = vector.shape_cast %113 : vector<8x8x128xbf16> to vector<64x128xbf16>
    %c8_67 = arith.constant 8 : index
    %c0_68 = arith.constant 0 : index
    %c0_69 = arith.constant 0 : index
    %115 = vector.load %arg4[%c8_67, %c0_68, %c0_69] : memref<9x128x256xbf16, #tpu.memory_space<vmem>>, vector<1x128x256xbf16>
    %116 = vector.shape_cast %115 : vector<1x128x256xbf16> to vector<128x256xbf16>
    %cst_70 = arith.constant dense<0.000000e+00> : vector<64x256xf32>
    %117 = tpu.matmul %114, %116, %cst_70 {dimension_numbers = #tpu.dot_dimension_numbers<[1], [0], [0], [1], [0, 0, 1, 1], [], []>} : vector<64x128xbf16>, vector<128x256xbf16>, vector<64x256xf32> -> vector<64x256xf32>
    %118 = arith.addf %112, %117 : vector<64x256xf32>
    %c0_71 = arith.constant 0 : index
    %c0_72 = arith.constant 0 : index
    %119 = vector.load %arg5[%c0_71, %c0_72] : memref<1x256xf32, #tpu.memory_space<vmem>>, vector<1x256xf32>
    %120 = vector.broadcast %119 : vector<1x256xf32> to vector<64x256xf32>
    %121 = arith.mulf %118, %120 : vector<64x256xf32>
    %c0_73 = arith.constant 0 : index
    %c0_74 = arith.constant 0 : index
    %122 = vector.load %arg6[%c0_73, %c0_74] : memref<1x256xf32, #tpu.memory_space<vmem>>, vector<1x256xf32>
    %123 = vector.broadcast %122 : vector<1x256xf32> to vector<64x256xf32>
    %124 = arith.addf %121, %123 : vector<64x256xf32>
    %cst_75 = arith.constant 0.000000e+00 : f32
    %125 = vector.broadcast %cst_75 : f32 to vector<64x256xf32>
    %126 = arith.maximumf %124, %125 : vector<64x256xf32>
    %127 = vector.shape_cast %126 : vector<64x256xf32> to vector<8x8x256xf32>
    %128 = arith.truncf %127 : vector<8x8x256xf32> to vector<8x8x256xbf16>
    %c0_76 = arith.constant 0 : index
    %c0_77 = arith.constant 0 : index
    %c0_78 = arith.constant 0 : index
    %c0_79 = arith.constant 0 : index
    %129 = vector.load %arg7[%c0_76, %c0_77, %c0_78, %c0_79] : memref<1x8x8x256xbf16, #tpu.memory_space<vmem>>, vector<1x8x8x256xbf16>
    %130 = vector.shape_cast %129 : vector<1x8x8x256xbf16> to vector<8x8x256xbf16>
    %131 = vector.shape_cast %128 : vector<8x8x256xbf16> to vector<1x8x8x256xbf16>
    tpu.vector_store %arg7[%c0_76, %c0_77, %c0_78, %c0_79], %131 {strides = array<i32>} : memref<1x8x8x256xbf16, #tpu.memory_space<vmem>>, vector<1x8x8x256xbf16>,
    return
  }
  func.func @transform_0(%arg0: i32) -> (i32, i32, i32, i32) {
    %c0_i32 = arith.constant 0 : i32
    %c0_i32_0 = arith.constant 0 : i32
    %c0_i32_1 = arith.constant 0 : i32
    %c0_i32_2 = arith.constant 0 : i32
    return %arg0, %c0_i32, %c0_i32_0, %c0_i32_1 : i32, i32, i32, i32
  }
  func.func @transform_1(%arg0: i32) -> (i32, i32, i32, i32) {
    %c0_i32 = arith.constant 0 : i32
    %c0_i32_0 = arith.constant 0 : i32
    %c0_i32_1 = arith.constant 0 : i32
    %c0_i32_2 = arith.constant 0 : i32
    return %arg0, %c0_i32, %c0_i32_0, %c0_i32_1 : i32, i32, i32, i32
  }
  func.func @transform_2(%arg0: i32) -> (i32, i32, i32) {
    %c0_i32 = arith.constant 0 : i32
    %c0_i32_0 = arith.constant 0 : i32
    %c0_i32_1 = arith.constant 0 : i32
    %c0_i32_2 = arith.constant 0 : i32
    return %c0_i32, %c0_i32_0, %c0_i32_1 : i32, i32, i32
  }
  func.func @transform_3(%arg0: i32) -> (i32, i32, i32) {
    %c0_i32 = arith.constant 0 : i32
    %c0_i32_0 = arith.constant 0 : i32
    %c0_i32_1 = arith.constant 0 : i32
    %c0_i32_2 = arith.constant 0 : i32
    return %c0_i32, %c0_i32_0, %c0_i32_1 : i32, i32, i32
  }
  func.func @transform_4(%arg0: i32) -> (i32, i32) {
    %c0_i32 = arith.constant 0 : i32
    %c0_i32_0 = arith.constant 0 : i32
    %c0_i32_1 = arith.constant 0 : i32
    return %c0_i32, %c0_i32_0 : i32, i32
  }
  func.func @transform_5(%arg0: i32) -> (i32, i32) {
    %c0_i32 = arith.constant 0 : i32
    %c0_i32_0 = arith.constant 0 : i32
    %c0_i32_1 = arith.constant 0 : i32
    return %c0_i32, %c0_i32_0 : i32, i32
  }
  func.func @transform_6(%arg0: i32) -> (i32, i32, i32, i32) {
    %c0_i32 = arith.constant 0 : i32
    %c0_i32_0 = arith.constant 0 : i32
    %c0_i32_1 = arith.constant 0 : i32
    %c0_i32_2 = arith.constant 0 : i32
    return %arg0, %c0_i32, %c0_i32_0, %c0_i32_1 : i32, i32, i32, i32
  }
}

module attributes {stable_mosaic.version = 11 : i64} {
  func.func @_conv3x3_kernel(%arg0: i32, %arg1: memref<1x10x10x256xbf16, #tpu.memory_space<vmem>>, %arg2: memref<9x256x256xbf16, #tpu.memory_space<vmem>>, %arg3: memref<1x256xf32, #tpu.memory_space<vmem>>, %arg4: memref<1x256xf32, #tpu.memory_space<vmem>>, %arg5: memref<1x8x8x256xbf16, #tpu.memory_space<vmem>>) attributes {dimension_semantics = [#tpu.dimension_semantics<parallel>], iteration_bounds = array<i64: 2>, scalar_prefetch = 0 : i64, scratch_operands = 0 : i64, tpu.core_type = #tpu.core_type<tc>, window_params = [{transform_indices = @transform_0, window_bounds = array<i64: 1, 10, 10, 256>}, {pipeline_mode = #tpu.pipeline_mode<synchronous>, transform_indices = @transform_1, window_bounds = array<i64: 9, 256, 256>}, {pipeline_mode = #tpu.pipeline_mode<synchronous>, transform_indices = @transform_2, window_bounds = array<i64: 1, 256>}, {pipeline_mode = #tpu.pipeline_mode<synchronous>, transform_indices = @transform_3, window_bounds = array<i64: 1, 256>}, {transform_indices = @transform_4, window_bounds = array<i64: 1, 8, 8, 256>}]} {
    %cst = arith.constant 0.000000e+00 : f32
    %0 = vector.broadcast %cst : f32 to vector<64x256xf32>
    %c0 = arith.constant 0 : index
    %c0_0 = arith.constant 0 : index
    %c0_1 = arith.constant 0 : index
    %c0_2 = arith.constant 0 : index
    %1 = vector.load %arg1[%c0, %c0_0, %c0_1, %c0_2] : memref<1x10x10x256xbf16, #tpu.memory_space<vmem>>, vector<1x10x10x256xbf16>
    %2 = vector.shape_cast %1 : vector<1x10x10x256xbf16> to vector<10x10x256xbf16>
    %3 = vector.extract_strided_slice %2 {offsets = [0, 0, 0], sizes = [8, 10, 256], strides = [1, 1, 1]} : vector<10x10x256xbf16> to vector<8x10x256xbf16>
    %4 = vector.extract_strided_slice %3 {offsets = [0, 0, 0], sizes = [8, 8, 256], strides = [1, 1, 1]} : vector<8x10x256xbf16> to vector<8x8x256xbf16>
    %5 = vector.shape_cast %4 : vector<8x8x256xbf16> to vector<64x256xbf16>
    %c0_3 = arith.constant 0 : index
    %c0_4 = arith.constant 0 : index
    %c0_5 = arith.constant 0 : index
    %6 = vector.load %arg2[%c0_3, %c0_4, %c0_5] : memref<9x256x256xbf16, #tpu.memory_space<vmem>>, vector<1x256x256xbf16>
    %7 = vector.shape_cast %6 : vector<1x256x256xbf16> to vector<256x256xbf16>
    %cst_6 = arith.constant dense<0.000000e+00> : vector<64x256xf32>
    %8 = tpu.matmul %5, %7, %cst_6 {dimension_numbers = #tpu.dot_dimension_numbers<[1], [0], [0], [1], [0, 0, 1, 1], [], []>} : vector<64x256xbf16>, vector<256x256xbf16>, vector<64x256xf32> -> vector<64x256xf32>
    %9 = arith.addf %0, %8 : vector<64x256xf32>
    %10 = vector.extract_strided_slice %3 {offsets = [0, 1, 0], sizes = [8, 8, 256], strides = [1, 1, 1]} : vector<8x10x256xbf16> to vector<8x8x256xbf16>
    %11 = vector.shape_cast %10 : vector<8x8x256xbf16> to vector<64x256xbf16>
    %c1 = arith.constant 1 : index
    %c0_7 = arith.constant 0 : index
    %c0_8 = arith.constant 0 : index
    %12 = vector.load %arg2[%c1, %c0_7, %c0_8] : memref<9x256x256xbf16, #tpu.memory_space<vmem>>, vector<1x256x256xbf16>
    %13 = vector.shape_cast %12 : vector<1x256x256xbf16> to vector<256x256xbf16>
    %cst_9 = arith.constant dense<0.000000e+00> : vector<64x256xf32>
    %14 = tpu.matmul %11, %13, %cst_9 {dimension_numbers = #tpu.dot_dimension_numbers<[1], [0], [0], [1], [0, 0, 1, 1], [], []>} : vector<64x256xbf16>, vector<256x256xbf16>, vector<64x256xf32> -> vector<64x256xf32>
    %15 = arith.addf %9, %14 : vector<64x256xf32>
    %16 = vector.extract_strided_slice %3 {offsets = [0, 2, 0], sizes = [8, 8, 256], strides = [1, 1, 1]} : vector<8x10x256xbf16> to vector<8x8x256xbf16>
    %17 = vector.shape_cast %16 : vector<8x8x256xbf16> to vector<64x256xbf16>
    %c2 = arith.constant 2 : index
    %c0_10 = arith.constant 0 : index
    %c0_11 = arith.constant 0 : index
    %18 = vector.load %arg2[%c2, %c0_10, %c0_11] : memref<9x256x256xbf16, #tpu.memory_space<vmem>>, vector<1x256x256xbf16>
    %19 = vector.shape_cast %18 : vector<1x256x256xbf16> to vector<256x256xbf16>
    %cst_12 = arith.constant dense<0.000000e+00> : vector<64x256xf32>
    %20 = tpu.matmul %17, %19, %cst_12 {dimension_numbers = #tpu.dot_dimension_numbers<[1], [0], [0], [1], [0, 0, 1, 1], [], []>} : vector<64x256xbf16>, vector<256x256xbf16>, vector<64x256xf32> -> vector<64x256xf32>
    %21 = arith.addf %15, %20 : vector<64x256xf32>
    %22 = vector.extract_strided_slice %2 {offsets = [1, 0, 0], sizes = [8, 10, 256], strides = [1, 1, 1]} : vector<10x10x256xbf16> to vector<8x10x256xbf16>
    %23 = vector.extract_strided_slice %22 {offsets = [0, 0, 0], sizes = [8, 8, 256], strides = [1, 1, 1]} : vector<8x10x256xbf16> to vector<8x8x256xbf16>
    %24 = vector.shape_cast %23 : vector<8x8x256xbf16> to vector<64x256xbf16>
    %c3 = arith.constant 3 : index
    %c0_13 = arith.constant 0 : index
    %c0_14 = arith.constant 0 : index
    %25 = vector.load %arg2[%c3, %c0_13, %c0_14] : memref<9x256x256xbf16, #tpu.memory_space<vmem>>, vector<1x256x256xbf16>
    %26 = vector.shape_cast %25 : vector<1x256x256xbf16> to vector<256x256xbf16>
    %cst_15 = arith.constant dense<0.000000e+00> : vector<64x256xf32>
    %27 = tpu.matmul %24, %26, %cst_15 {dimension_numbers = #tpu.dot_dimension_numbers<[1], [0], [0], [1], [0, 0, 1, 1], [], []>} : vector<64x256xbf16>, vector<256x256xbf16>, vector<64x256xf32> -> vector<64x256xf32>
    %28 = arith.addf %21, %27 : vector<64x256xf32>
    %29 = vector.extract_strided_slice %22 {offsets = [0, 1, 0], sizes = [8, 8, 256], strides = [1, 1, 1]} : vector<8x10x256xbf16> to vector<8x8x256xbf16>
    %30 = vector.shape_cast %29 : vector<8x8x256xbf16> to vector<64x256xbf16>
    %c4 = arith.constant 4 : index
    %c0_16 = arith.constant 0 : index
    %c0_17 = arith.constant 0 : index
    %31 = vector.load %arg2[%c4, %c0_16, %c0_17] : memref<9x256x256xbf16, #tpu.memory_space<vmem>>, vector<1x256x256xbf16>
    %32 = vector.shape_cast %31 : vector<1x256x256xbf16> to vector<256x256xbf16>
    %cst_18 = arith.constant dense<0.000000e+00> : vector<64x256xf32>
    %33 = tpu.matmul %30, %32, %cst_18 {dimension_numbers = #tpu.dot_dimension_numbers<[1], [0], [0], [1], [0, 0, 1, 1], [], []>} : vector<64x256xbf16>, vector<256x256xbf16>, vector<64x256xf32> -> vector<64x256xf32>
    %34 = arith.addf %28, %33 : vector<64x256xf32>
    %35 = vector.extract_strided_slice %22 {offsets = [0, 2, 0], sizes = [8, 8, 256], strides = [1, 1, 1]} : vector<8x10x256xbf16> to vector<8x8x256xbf16>
    %36 = vector.shape_cast %35 : vector<8x8x256xbf16> to vector<64x256xbf16>
    %c5 = arith.constant 5 : index
    %c0_19 = arith.constant 0 : index
    %c0_20 = arith.constant 0 : index
    %37 = vector.load %arg2[%c5, %c0_19, %c0_20] : memref<9x256x256xbf16, #tpu.memory_space<vmem>>, vector<1x256x256xbf16>
    %38 = vector.shape_cast %37 : vector<1x256x256xbf16> to vector<256x256xbf16>
    %cst_21 = arith.constant dense<0.000000e+00> : vector<64x256xf32>
    %39 = tpu.matmul %36, %38, %cst_21 {dimension_numbers = #tpu.dot_dimension_numbers<[1], [0], [0], [1], [0, 0, 1, 1], [], []>} : vector<64x256xbf16>, vector<256x256xbf16>, vector<64x256xf32> -> vector<64x256xf32>
    %40 = arith.addf %34, %39 : vector<64x256xf32>
    %41 = vector.extract_strided_slice %2 {offsets = [2, 0, 0], sizes = [8, 10, 256], strides = [1, 1, 1]} : vector<10x10x256xbf16> to vector<8x10x256xbf16>
    %42 = vector.extract_strided_slice %41 {offsets = [0, 0, 0], sizes = [8, 8, 256], strides = [1, 1, 1]} : vector<8x10x256xbf16> to vector<8x8x256xbf16>
    %43 = vector.shape_cast %42 : vector<8x8x256xbf16> to vector<64x256xbf16>
    %c6 = arith.constant 6 : index
    %c0_22 = arith.constant 0 : index
    %c0_23 = arith.constant 0 : index
    %44 = vector.load %arg2[%c6, %c0_22, %c0_23] : memref<9x256x256xbf16, #tpu.memory_space<vmem>>, vector<1x256x256xbf16>
    %45 = vector.shape_cast %44 : vector<1x256x256xbf16> to vector<256x256xbf16>
    %cst_24 = arith.constant dense<0.000000e+00> : vector<64x256xf32>
    %46 = tpu.matmul %43, %45, %cst_24 {dimension_numbers = #tpu.dot_dimension_numbers<[1], [0], [0], [1], [0, 0, 1, 1], [], []>} : vector<64x256xbf16>, vector<256x256xbf16>, vector<64x256xf32> -> vector<64x256xf32>
    %47 = arith.addf %40, %46 : vector<64x256xf32>
    %48 = vector.extract_strided_slice %41 {offsets = [0, 1, 0], sizes = [8, 8, 256], strides = [1, 1, 1]} : vector<8x10x256xbf16> to vector<8x8x256xbf16>
    %49 = vector.shape_cast %48 : vector<8x8x256xbf16> to vector<64x256xbf16>
    %c7 = arith.constant 7 : index
    %c0_25 = arith.constant 0 : index
    %c0_26 = arith.constant 0 : index
    %50 = vector.load %arg2[%c7, %c0_25, %c0_26] : memref<9x256x256xbf16, #tpu.memory_space<vmem>>, vector<1x256x256xbf16>
    %51 = vector.shape_cast %50 : vector<1x256x256xbf16> to vector<256x256xbf16>
    %cst_27 = arith.constant dense<0.000000e+00> : vector<64x256xf32>
    %52 = tpu.matmul %49, %51, %cst_27 {dimension_numbers = #tpu.dot_dimension_numbers<[1], [0], [0], [1], [0, 0, 1, 1], [], []>} : vector<64x256xbf16>, vector<256x256xbf16>, vector<64x256xf32> -> vector<64x256xf32>
    %53 = arith.addf %47, %52 : vector<64x256xf32>
    %54 = vector.extract_strided_slice %41 {offsets = [0, 2, 0], sizes = [8, 8, 256], strides = [1, 1, 1]} : vector<8x10x256xbf16> to vector<8x8x256xbf16>
    %55 = vector.shape_cast %54 : vector<8x8x256xbf16> to vector<64x256xbf16>
    %c8 = arith.constant 8 : index
    %c0_28 = arith.constant 0 : index
    %c0_29 = arith.constant 0 : index
    %56 = vector.load %arg2[%c8, %c0_28, %c0_29] : memref<9x256x256xbf16, #tpu.memory_space<vmem>>, vector<1x256x256xbf16>
    %57 = vector.shape_cast %56 : vector<1x256x256xbf16> to vector<256x256xbf16>
    %cst_30 = arith.constant dense<0.000000e+00> : vector<64x256xf32>
    %58 = tpu.matmul %55, %57, %cst_30 {dimension_numbers = #tpu.dot_dimension_numbers<[1], [0], [0], [1], [0, 0, 1, 1], [], []>} : vector<64x256xbf16>, vector<256x256xbf16>, vector<64x256xf32> -> vector<64x256xf32>
    %59 = arith.addf %53, %58 : vector<64x256xf32>
    %c0_31 = arith.constant 0 : index
    %c0_32 = arith.constant 0 : index
    %60 = vector.load %arg3[%c0_31, %c0_32] : memref<1x256xf32, #tpu.memory_space<vmem>>, vector<1x256xf32>
    %61 = vector.broadcast %60 : vector<1x256xf32> to vector<64x256xf32>
    %62 = arith.mulf %59, %61 : vector<64x256xf32>
    %c0_33 = arith.constant 0 : index
    %c0_34 = arith.constant 0 : index
    %63 = vector.load %arg4[%c0_33, %c0_34] : memref<1x256xf32, #tpu.memory_space<vmem>>, vector<1x256xf32>
    %64 = vector.broadcast %63 : vector<1x256xf32> to vector<64x256xf32>
    %65 = arith.addf %62, %64 : vector<64x256xf32>
    %cst_35 = arith.constant 0.000000e+00 : f32
    %66 = vector.broadcast %cst_35 : f32 to vector<64x256xf32>
    %67 = arith.maximumf %65, %66 : vector<64x256xf32>
    %68 = vector.shape_cast %67 : vector<64x256xf32> to vector<8x8x256xf32>
    %69 = arith.truncf %68 : vector<8x8x256xf32> to vector<8x8x256xbf16>
    %c0_36 = arith.constant 0 : index
    %c0_37 = arith.constant 0 : index
    %c0_38 = arith.constant 0 : index
    %c0_39 = arith.constant 0 : index
    %70 = vector.load %arg5[%c0_36, %c0_37, %c0_38, %c0_39] : memref<1x8x8x256xbf16, #tpu.memory_space<vmem>>, vector<1x8x8x256xbf16>
    %71 = vector.shape_cast %70 : vector<1x8x8x256xbf16> to vector<8x8x256xbf16>
    %72 = vector.shape_cast %69 : vector<8x8x256xbf16> to vector<1x8x8x256xbf16>
    tpu.vector_store %arg5[%c0_36, %c0_37, %c0_38, %c0_39], %72 {strides = array<i32>} : memref<1x8x8x256xbf16, #tpu.memory_space<vmem>>, vector<1x8x8x256xbf16>,
    return
  }
  func.func @transform_0(%arg0: i32) -> (i32, i32, i32, i32) {
    %c0_i32 = arith.constant 0 : i32
    %c0_i32_0 = arith.constant 0 : i32
    %c0_i32_1 = arith.constant 0 : i32
    %c0_i32_2 = arith.constant 0 : i32
    return %arg0, %c0_i32, %c0_i32_0, %c0_i32_1 : i32, i32, i32, i32
  }
  func.func @transform_1(%arg0: i32) -> (i32, i32, i32) {
    %c0_i32 = arith.constant 0 : i32
    %c0_i32_0 = arith.constant 0 : i32
    %c0_i32_1 = arith.constant 0 : i32
    %c0_i32_2 = arith.constant 0 : i32
    return %c0_i32, %c0_i32_0, %c0_i32_1 : i32, i32, i32
  }
  func.func @transform_2(%arg0: i32) -> (i32, i32) {
    %c0_i32 = arith.constant 0 : i32
    %c0_i32_0 = arith.constant 0 : i32
    %c0_i32_1 = arith.constant 0 : i32
    return %c0_i32, %c0_i32_0 : i32, i32
  }
  func.func @transform_3(%arg0: i32) -> (i32, i32) {
    %c0_i32 = arith.constant 0 : i32
    %c0_i32_0 = arith.constant 0 : i32
    %c0_i32_1 = arith.constant 0 : i32
    return %c0_i32, %c0_i32_0 : i32, i32
  }
  func.func @transform_4(%arg0: i32) -> (i32, i32, i32, i32) {
    %c0_i32 = arith.constant 0 : i32
    %c0_i32_0 = arith.constant 0 : i32
    %c0_i32_1 = arith.constant 0 : i32
    %c0_i32_2 = arith.constant 0 : i32
    return %arg0, %c0_i32, %c0_i32_0, %c0_i32_1 : i32, i32, i32, i32
  }
}

module attributes {stable_mosaic.version = 11 : i64} {
  func.func @_classifier_upsample_kernel(%arg0: i32, %arg1: memref<32x8xbf16, #tpu.memory_space<vmem>>, %arg2: memref<32x8xbf16, #tpu.memory_space<vmem>>, %arg3: memref<1x8x8x256xbf16, #tpu.memory_space<vmem>>, %arg4: memref<256x128xbf16, #tpu.memory_space<vmem>>, %arg5: memref<1x128xf32, #tpu.memory_space<vmem>>, %arg6: memref<1x32x32x8xf32, #tpu.memory_space<vmem>>) attributes {dimension_semantics = [#tpu.dimension_semantics<parallel>], iteration_bounds = array<i64: 2>, scalar_prefetch = 0 : i64, scratch_operands = 0 : i64, tpu.core_type = #tpu.core_type<tc>, window_params = [{pipeline_mode = #tpu.pipeline_mode<synchronous>, transform_indices = @transform_0, window_bounds = array<i64: 32, 8>}, {pipeline_mode = #tpu.pipeline_mode<synchronous>, transform_indices = @transform_1, window_bounds = array<i64: 32, 8>}, {transform_indices = @transform_2, window_bounds = array<i64: 1, 8, 8, 256>}, {pipeline_mode = #tpu.pipeline_mode<synchronous>, transform_indices = @transform_3, window_bounds = array<i64: 256, 128>}, {pipeline_mode = #tpu.pipeline_mode<synchronous>, transform_indices = @transform_4, window_bounds = array<i64: 1, 128>}, {transform_indices = @transform_5, window_bounds = array<i64: 1, 32, 32, 8>}]} {
    %c0 = arith.constant 0 : index
    %c0_0 = arith.constant 0 : index
    %c0_1 = arith.constant 0 : index
    %c0_2 = arith.constant 0 : index
    %0 = vector.load %arg3[%c0, %c0_0, %c0_1, %c0_2] : memref<1x8x8x256xbf16, #tpu.memory_space<vmem>>, vector<1x8x8x256xbf16>
    %1 = vector.shape_cast %0 : vector<1x8x8x256xbf16> to vector<8x8x256xbf16>
    %2 = vector.shape_cast %1 : vector<8x8x256xbf16> to vector<64x256xbf16>
    %c0_3 = arith.constant 0 : index
    %c0_4 = arith.constant 0 : index
    %3 = vector.load %arg4[%c0_3, %c0_4] : memref<256x128xbf16, #tpu.memory_space<vmem>>, vector<256x128xbf16>
    %cst = arith.constant dense<0.000000e+00> : vector<64x128xf32>
    %4 = tpu.matmul %2, %3, %cst {dimension_numbers = #tpu.dot_dimension_numbers<[1], [0], [0], [1], [0, 0, 1, 1], [], []>} : vector<64x256xbf16>, vector<256x128xbf16>, vector<64x128xf32> -> vector<64x128xf32>
    %c0_5 = arith.constant 0 : index
    %c0_6 = arith.constant 0 : index
    %5 = vector.load %arg5[%c0_5, %c0_6] : memref<1x128xf32, #tpu.memory_space<vmem>>, vector<1x128xf32>
    %6 = vector.broadcast %5 : vector<1x128xf32> to vector<64x128xf32>
    %7 = arith.addf %4, %6 : vector<64x128xf32>
    %8 = arith.truncf %7 : vector<64x128xf32> to vector<64x128xbf16>
    %9 = vector.shape_cast %8 : vector<64x128xbf16> to vector<8x1024xbf16>
    %c0_7 = arith.constant 0 : index
    %c0_8 = arith.constant 0 : index
    %10 = vector.load %arg1[%c0_7, %c0_8] : memref<32x8xbf16, #tpu.memory_space<vmem>>, vector<32x8xbf16>
    %cst_9 = arith.constant dense<0.000000e+00> : vector<32x1024xf32>
    %11 = tpu.matmul %10, %9, %cst_9 {dimension_numbers = #tpu.dot_dimension_numbers<[1], [0], [0], [1], [0, 0, 1, 1], [], []>} : vector<32x8xbf16>, vector<8x1024xbf16>, vector<32x1024xf32> -> vector<32x1024xf32>
    %12 = arith.truncf %11 : vector<32x1024xf32> to vector<32x1024xbf16>
    %13 = vector.shape_cast %12 : vector<32x1024xbf16> to vector<32x8x128xbf16>
    %c0_10 = arith.constant 0 : index
    %c0_11 = arith.constant 0 : index
    %14 = vector.load %arg2[%c0_10, %c0_11] : memref<32x8xbf16, #tpu.memory_space<vmem>>, vector<32x8xbf16>
    %15 = vector.shape_cast %14 : vector<32x8xbf16> to vector<1x32x8xbf16>
    %16 = vector.shape_cast %15 : vector<1x32x8xbf16> to vector<1x32x8xbf16>
    %17 = vector.broadcast %16 : vector<1x32x8xbf16> to vector<32x32x8xbf16>
    "tpu.trace_start"() <{level = 10 : i32, message = "opj,ojc->opc"}> : () -> ()
    %cst_12 = arith.constant dense<0.000000e+00> : vector<32x32x128xf32>
    %18 = tpu.matmul %17, %13, %cst_12 {dimension_numbers = #tpu.dot_dimension_numbers<[2], [1], [1], [2], [0, 0, 0, 1, 1, 2], [0], [0]>} : vector<32x32x8xbf16>, vector<32x8x128xbf16>, vector<32x32x128xf32> -> vector<32x32x128xf32>
    "tpu.trace_stop"() : () -> ()
    %19 = vector.extract_strided_slice %18 {offsets = [0, 0, 0], sizes = [32, 32, 8], strides = [1, 1, 1]} : vector<32x32x128xf32> to vector<32x32x8xf32>
    %c0_13 = arith.constant 0 : index
    %c0_14 = arith.constant 0 : index
    %c0_15 = arith.constant 0 : index
    %c0_16 = arith.constant 0 : index
    %20 = vector.load %arg6[%c0_13, %c0_14, %c0_15, %c0_16] : memref<1x32x32x8xf32, #tpu.memory_space<vmem>>, vector<1x32x32x8xf32>
    %21 = vector.shape_cast %20 : vector<1x32x32x8xf32> to vector<32x32x8xf32>
    %22 = vector.shape_cast %19 : vector<32x32x8xf32> to vector<1x32x32x8xf32>
    tpu.vector_store %arg6[%c0_13, %c0_14, %c0_15, %c0_16], %22 {strides = array<i32>} : memref<1x32x32x8xf32, #tpu.memory_space<vmem>>, vector<1x32x32x8xf32>,
    return
  }
  func.func @transform_0(%arg0: i32) -> (i32, i32) {
    %c0_i32 = arith.constant 0 : i32
    %c0_i32_0 = arith.constant 0 : i32
    %c0_i32_1 = arith.constant 0 : i32
    return %c0_i32, %c0_i32_0 : i32, i32
  }
  func.func @transform_1(%arg0: i32) -> (i32, i32) {
    %c0_i32 = arith.constant 0 : i32
    %c0_i32_0 = arith.constant 0 : i32
    %c0_i32_1 = arith.constant 0 : i32
    return %c0_i32, %c0_i32_0 : i32, i32
  }
  func.func @transform_2(%arg0: i32) -> (i32, i32, i32, i32) {
    %c0_i32 = arith.constant 0 : i32
    %c0_i32_0 = arith.constant 0 : i32
    %c0_i32_1 = arith.constant 0 : i32
    %c0_i32_2 = arith.constant 0 : i32
    return %arg0, %c0_i32, %c0_i32_0, %c0_i32_1 : i32, i32, i32, i32
  }
  func.func @transform_3(%arg0: i32) -> (i32, i32) {
    %c0_i32 = arith.constant 0 : i32
    %c0_i32_0 = arith.constant 0 : i32
    %c0_i32_1 = arith.constant 0 : i32
    return %c0_i32, %c0_i32_0 : i32, i32
  }
  func.func @transform_4(%arg0: i32) -> (i32, i32) {
    %c0_i32 = arith.constant 0 : i32
    %c0_i32_0 = arith.constant 0 : i32
    %c0_i32_1 = arith.constant 0 : i32
    return %c0_i32, %c0_i32_0 : i32, i32
  }
  func.func @transform_5(%arg0: i32) -> (i32, i32, i32, i32) {
    %c0_i32 = arith.constant 0 : i32
    %c0_i32_0 = arith.constant 0 : i32
    %c0_i32_1 = arith.constant 0 : i32
    %c0_i32_2 = arith.constant 0 : i32
    return %arg0, %c0_i32, %c0_i32_0, %c0_i32_1 : i32, i32, i32, i32
  }
}

</mosaic_0001>

<bundles_post_ra>
// kernel: run.6
= control target key start
LH: loop header
LB: loop body
LE: loop exit
PB: predicated region body
PF: predicated region fallthrough
CT: control target
= control target key end

     0   :  { %8 = vsyncpa [#allocation3], 0  ;;  %s1343_s0 = inlined_call_operand.hbm [shape: bf16[8,2], index: 0, kind: input, shape index: {}, may-alias: {0,1}]   ;;  %s1344_s1 = inlined_call_operand.hbm [shape: bf16[8,2], index: 1, kind: input, shape index: {}, may-alias: {0,1}]   ;;  %s1345_s2 = inlined_call_operand.hbm [shape: f32[2,2,2,128], index: 2, kind: input, shape index: {}]   ;;  %s1346_s3 = inlined_call_operand.vmem [shape: bf16[2,8,8,128], index: 3, kind: output, shape index: {}]  }
   0x1   :  { %9 = vsyncpa [#allocation5], 0  ;;  %s1138_s12 = smov 0   ;;  %s1140_s13 = smov 0  }
   0x2   :  { %s1142_s14 = smov 0   ;;  %s1144_s15 = smov 0  }
   0x3 LB: > { %s1157_s16 = sadd.s32 4294967295, %s1106_s15   ;;  %s1160_s17 = sadd.s32 1, %s1106_s15   ;;  %s1106_s15 = sphi %s1144_s15, %s1366_s15   ;;  %s1102_s14 = sphi %s1142_s14, %s1365_s14   ;;  %s1098_s13 = sphi %s1140_s13, %s1364_s13   ;;  %s1094_s12 = sphi %s1138_s12, %s1363_s12  }
   0x4   : > { %s61_s18 = ssub.s32 %s1106_s15, %s1160_s17  ;;  %s64_s19 = sadd.s32 1, %s1102_s14 }
   0x5   : > { %p62_p0 = scmp.eq.s32.totalorder %s61_s18, 0  ;;  %p71_p1 = scmp.ne.s32.totalorder %s1102_s14, %s1098_s13 }
   0x6   : > { %p72_p2 = scmp.eq.s32.totalorder %s1106_s15, 0  ;;  %p77_p3 = scmp.ne.s32.totalorder %s1098_s13, %s1094_s12 }
   0x7   : > { %s1170_s20 = scalar_select %p62_p0, %s1102_s14, %s64_s19  }
   0x8   : > { %p1172_p4 = por %p72_p2, %p71_p1  ;;  %p1347_p5 = scmp.eq.s32.totalorder %s1157_s16, 0 }
   0x9   : > { %p803_p6 = scmp.ge.s32.totalorder %s1106_s15, 1  ;;  %p114_p7 = scmp.lt.s32.totalorder %s1106_s15, 3 }
   0xa   : > { %p1181_p8 = por %p1347_p5, %p77_p3  ;;  %s1108_s24 = smov [#allocation2]  }
   0xb   : > { %p1185_p9 = pnand %p803_p6, %p114_p7  ;;  %s127_s25 = sshll.u32 %s1108_s24, 4  ;;  %s128_s25 = int_to_ptr.vmem [resolvable:$true] %s127_s25 }
   0xc   : > { %s1352_s22 = scalar_select %p1181_p8, 1, 0 }
   0xd   : > { %s1353_s23 = scalar_select %p1185_p9, 1, 0 }
   0xe   : > { %p927_p10 = pneg %p1185_p9  ;;  %p940_p11 = scmp.lt.s32.totalorder %s1106_s15, 2 }
   0xf   : > { %s1109_s27 = smov [#allocation4]   ;;  %s149_s30 = sand.u32 1, %s1106_s15  }
  0x10   : > { %p1194_p12 = pnand %p927_p10, %p1347_p5  ;;  %s138_s28 = sshll.u32 %s1109_s27, 4  ;;  %s139_s28 = int_to_ptr.vmem [resolvable:$true] %s138_s28 }
  0x11   : > { %p1200_p13 = pnand %p940_p11, %p1172_p4  ;;  %s995_s4 = scalar_lea.vmem %s128_s25, 64 }
  0x12   : > { %p986_p0 = pneg %p1194_p12  ;;  %p996_p1 = scmp.ne.s32.totalorder %s128_s25, %s995_s4 }
  0x13   : > { %s1355_s29 = scalar_select %p1200_p13, 1, 0 }
  0x14   : > { %p998_p2 = pnand %p996_p1, %p986_p0  ;;  %p1003_p6 = scmp.lt.s32.totalorder %s128_s25, %s128_s25 }
  0x15   : > { %p1004_p7 = scmp.lt.s32.totalorder %s995_s4, %s995_s4 }
  0x16   : > { %p999_p3 = pneg %p998_p2 }
  0x17   : > { %p1005_p10 = por %p1004_p7, %p1003_p6 }
  0x19   : > { %p1006_p5 = pnand %p1005_p10, %p999_p3 }
  0x1b   : > { %1009 = shalt.err (!%p1006_p5)
}
  0x1c   : > { %930 = dma.hbm_to_vmem [thread:$0]  (!%p1194_p12), %s1343_s0, 64, %s128_s25, [#allocation3]  }
  0x1d   : > { %s1021_s7 = scalar_lea.vmem %s139_s28, 64  ;;  %p1029_p1 = scmp.lt.s32.totalorder %s139_s28, %s139_s28 }
  0x1e   : > { %p1022_p4 = scmp.ne.s32.totalorder %s139_s28, %s1021_s7  ;;  %p1030_p2 = scmp.lt.s32.totalorder %s1021_s7, %s1021_s7 }
  0x20   : > { %p1024_p11 = pnand %p1022_p4, %p986_p0  ;;  %p1031_p9 = por %p1030_p2, %p1029_p1 }
  0x22   : > { %p1025_p8 = pneg %p1024_p11 }
  0x24   : > { %p1032_p13 = pnand %p1031_p9, %p1025_p8 }
  0x26   : > { %1035 = shalt.err (!%p1032_p13)
}
  0x27   : > { %933 = dma.hbm_to_vmem [thread:$0]  (!%p1194_p12), %s1344_s1, 64, %s139_s28, [#allocation5]  }
  0x28   : > { %s151_s10 = sand.u32 1, %s1102_s14   ;;  %s828_s11 = sshll.u32 %s1106_s15, 6 }
  0x29   : > { %s807_s12 = sshll.u32 %s151_s10, 2  ;;  %s1228_s21 = scalar_lea.hbm %s1345_s2, %s828_s11 }
  0x2a   : > { %s153_s24 = scalar_lea.vmem [#allocation6], %s807_s12  ;;  %s1232_s26 = scalar_lea.sflag [#allocation3], %s149_s30 }
  0x2b   : > { %s160_s25 = sshll.u32 %s153_s24, 4  ;;  %s1036_s27 = scalar_lea.hbm %s1228_s21, 64  ;;  %s1230_s25 = int_to_ptr.vmem [resolvable:$true] %s160_s25 }
  0x2c   : > { %p1037_p5 = scmp.ne.s32.totalorder %s1228_s21, %s1036_s27  ;;  %p1356_p8 = scmp.ne.s32.totalorder %s1355_s29, 0 }
  0x2d   : > { %s1041_s4 = scalar_lea.hbm %s1345_s2, 128  ;;  %p1042_p0 = scmp.lt.s32.totalorder %s1228_s21, %s1345_s2 }
  0x2e   : > { %p1038_p9 = pneg %p1356_p8  ;;  %p1043_p3 = scmp.lt.s32.totalorder %s1041_s4, %s1036_s27 }
  0x30   : > { %p1039_p12 = pnand %p1038_p9, %p1037_p5  ;;  %p1044_p6 = por %p1043_p3, %p1042_p0 }
  0x32   : > { %p1040_p13 = pneg %p1039_p12 }
  0x34   : > { %p1045_p7 = pnand %p1044_p6, %p1040_p13 }
  0x36   : > { %1048 = shalt.err (!%p1045_p7)
}
  0x37   : > { %s1049_s30 = scalar_lea.vmem %s1230_s25, 64  ;;  %s1110_s7 = smov [#allocation6]  }
  0x38   : > { %p1050_p10 = scmp.ne.s32.totalorder %s1230_s25, %s1049_s30  ;;  %s1054_s8 = sshll.u32 %s1110_s7, 4  ;;  %s1055_s8 = int_to_ptr.vmem [resolvable:$false] %s1054_s8 }
  0x39   : > { %s1056_s9 = scalar_lea.vmem %s1055_s8, 128  ;;  %p1057_p1 = scmp.lt.s32.totalorder %s1230_s25, %s1055_s8 }
  0x3a   : > { %p1052_p4 = pnand %p1050_p10, %p1038_p9  ;;  %p1058_p2 = scmp.lt.s32.totalorder %s1056_s9, %s1049_s30 }
  0x3c   : > { %p1053_p11 = pneg %p1052_p4  ;;  %p1059_p5 = por %p1058_p2, %p1057_p1 }
  0x3e   : > { %p1060_p12 = pnand %p1059_p5, %p1053_p11 }
  0x40   : > { %1063 = shalt.err (!%p1060_p12)
}
  0x41   : > { %s1111_s10 = smov 32   ;;  %s1112_s11 = smov 2  }
  0x42   : > { %937 = dma.hbm_to_vmem [thread:$0]  (!%p1356_p8), %s1228_s21, 64, %s1230_s25, %s1232_s26, %s1111_s10, %s1111_s10, %s1112_s11  }
  0x43   : > { %p1357_p9 = scmp.ne.s32.totalorder %s1353_s23, 0 }
  0x44   : > { %p1358_p13 = scmp.eq.s32.totalorder (!%p1357_p9), %s1157_s16, 0 }
  0x45   : > { %172 = sbr.rel (%p1357_p9) target bundleno = 527 (0x20f), region = 32 }
  0x4a   : > { %1081 = dma.done.wait (%p1358_p13), [#allocation3], 64   ;;  %p1359_p0 = pmov %p1358_p13 }
  0x4c   : > { %1083 = vsyncadd (%p1359_p0), [#allocation3], 4294967232  ;;  %p1360_p3 = pmov %p1359_p0 }
  0x4d   : > { %p1361_p6 = pmov %p1359_p0 }
  0x4e   : > { %1085 = dma.done.wait (%p1360_p3), [#allocation5], 64  }
  0x4f   : > { %1087 = vsyncadd (%p1361_p6), [#allocation5], 4294967232  ;;  %s182_s29 = sand.u32 1, %s1157_s16   ;;  %s184_s12 = sand.u32 1, %s1098_s13  }
  0x50   : > { %s813_s18 = sshll.u32 %s184_s12, 2  ;;  %s183_s23 = scalar_lea.sflag [#allocation3], %s182_s29 }
  0x51   : > { %s186_s19 = scalar_lea.vmem [#allocation6], %s813_s18  ;;  %p1362_p8 = scmp.ne.s32.totalorder %s1352_s22, 0 }
  0x53   : > { %1089 = dma.done.wait (%p1362_p8), %s183_s23, 64  }
  0x54   : > { %1091 = vsyncadd (%p1362_p8), %s183_s23, 4294967232  ;;  %v1113_v0 = vmov 0   ;;  %v215_v1 = vld [vmem:[%s186_s19] sm:$0x3]  ;;  %v216_v2 = vld [vmem:[%s186_s19 + $0x2] sm:$0x3]  ;;  %v282_v14 = vlaneseq }
  0x55   : > { %269 = vmatprep.mubr.bf16.mxu0 %v1113_v0  ;;  %v218_v3 = vpack.c.bf16 %v215_v1, %v215_v1  ;;  %v219_v4 = vpack.c.bf16 %v216_v2, %v216_v2  ;;  %vm230_vm0 = vcmask 1040384   ;;  %v217_v10 = vld [vmem:[#allocation2] sm:$0xf]  ;;  %vm226_vm1 = vcmask 15360   ;;  %v352_v44 = vld [vmem:[#allocation4] sm:$0xf] }
  0x56   : > { %v1114_v11 = vmov 0.0   ;;  %vm1115_vm2 = vmmov 0   ;;  %v1116_v12 = vmov 1983009808   ;;  %v1117_v15 = vmov 1934713408  }
  0x57   : > { %v223_v5 = vshrl.u32 %v218_v3, 16  ;;  %v224_v6 = vshrl.u32 %v219_v4, 16  ;;  %v222_v7 = vpack.i.b16 %v219_v4, %v218_v3  ;;  %869 = vmatprep.subr.bf16.mxu1 %v1114_v11  ;;  %871 = vmatprep.mubr.msk.bf16.mxu1 %vm1115_vm2, %v1114_v11  ;;  %v280_v13 = vunpack.c.l.s4 %v1116_v12  ;;  %p209_p7 = scmp.lt.s32.totalorder %s1157_s16, 1 }
  0x58   : > { %v288_v16 = vunpack.c.l.s4 %v1117_v15  ;;  %v283_v18 = vshrl.u32 %v282_v14, 7 }
  0x59   : > { %v225_v8 = vpack.i.b16 %v224_v6, %v223_v5  ;;  %v232_v9 = vsel %vm230_vm0, %v222_v7, 0  ;;  %v281_v17 = vunpack.c.0.s8 %v280_v13  ;;  %s1368_s16 = smov (!%p209_p7, %s1157_s16), 1 }
  0x5a   : > { %v289_v19 = vunpack.c.0.s8 %v288_v16  ;;  %s829_s22 = sshll.u32 %s1368_s16, 5 }
  0x5b   : > { %816 = vmatprep.subr.msk.bf16.mxu0 %vm230_vm0, %v225_v8  ;;  %v284_v20 = vsub.s32 %v281_v17, %v283_v18  ;;  %s1324_s25 = scalar_lea.vmem %s1346_s3, %s829_s22 }
  0x5c   : > { %252 = vmatpush1.bf16.msra.mxu0 %v232_v9  ;;  %v292_v23 = vsub.s32 %v289_v19, %v283_v18 }
  0x5d   : > { %875 = vmatprep.subr.bf16.mxu0 %v1114_v11 }
  0x5f   : > { %817 = vmatmul.mubr.msk.bf16.vlgmr.msra.gmra.mxu0 %vm226_vm1, %v217_v10 }
  0x60   : > { %877 = vmatprep.mubr.msk.bf16.mxu0 %vm1115_vm2, %v1114_v11 }
 0x11f   : > { %v271_v21 = vpop.f32.mrf.mxu0 }
 0x120   : > { %v278_v22 = vpack.c.bf16 %v271_v21, %v271_v21 }
 0x121   : > { %v273_v24 = vpop.f32.mrf.mxu0 }
 0x122   : > { %v285_v25 = vrot.slane %v278_v22, %v284_v20  ;;  %v303_v26 = vpack.c.bf16 %v273_v24, %v273_v24 }
 0x123   : > { %v275_v27 = vpop.f32.mrf.mxu0 }
 0x124   : > { %v293_v28 = vrot.slane %v285_v25, %v292_v23  ;;  %v310_v29 = vrot.slane %v303_v26, %v284_v20  ;;  %v286_v38 = vcombine.high %v285_v25, %v1113_v0 }
 0x125   : > { %v276_v30 = vpop.f32.mrf.mxu0 }
 0x126   : > { %v318_v31 = vrot.slane %v310_v29, %v292_v23  ;;  %v311_v32 = vcombine.high %v310_v29, %v1113_v0  ;;  %v301_v33 = vcombine.high %v293_v28, %v1113_v0  ;;  %v331_v35 = vshrl.u32 %v293_v28, 16 }
 0x127   : > { %v300_v48 = vrot.slane %v286_v38, %v292_v23 }
 0x128   : > { %v330_v34 = vpack.i.b16 %v318_v31, %v293_v28  ;;  %v332_v36 = vshrl.u32 %v318_v31, 16  ;;  %v326_v37 = vcombine.high %v318_v31, %v1113_v0  ;;  %v337_v39 = vshrl.u32 %v301_v33, 16 }
 0x129   : > { %v325_v45 = vrot.slane %v311_v32, %v292_v23  ;;  %v343_v53 = vshrl.u32 %v300_v48, 16  ;;  %v302_v57 = vcombine.high %v300_v48, %v1113_v0 }
 0x12a   : > { %v357_v40 = vsel %vm230_vm0, %v330_v34, 0  ;;  %v333_v41 = vpack.i.b16 %v332_v36, %v331_v35  ;;  %v336_v42 = vpack.i.b16 %v326_v37, %v301_v33  ;;  %v338_v43 = vshrl.u32 %v326_v37, 16 }
 0x12b   : > { %870 = vmatpush3.bf16.msra.mxu1 %v357_v40  ;;  %v344_v51 = vshrl.u32 %v325_v45, 16  ;;  %v342_v52 = vpack.i.b16 %v325_v45, %v300_v48  ;;  %v327_v55 = vcombine.high %v325_v45, %v1113_v0  ;;  %v349_v61 = vshrl.u32 %v302_v57, 16 }
 0x12c   : > { %v400_v46 = vsel %vm230_vm0, %v333_v41, 0  ;;  %881 = vmatprep.subr.bf16.mxu1 %v1114_v11  ;;  %v339_v47 = vpack.i.b16 %v338_v43, %v337_v39  ;;  %v443_v49 = vsel %vm230_vm0, %v336_v42, 0 }
 0x12d   : > { %876 = vmatpush3.bf16.msra.mxu0 %v400_v46  ;;  %v345_v54 = vpack.i.b16 %v344_v51, %v343_v53  ;;  %v529_v56 = vsel %vm230_vm0, %v342_v52, 0  ;;  %v350_v59 = vshrl.u32 %v327_v55, 16  ;;  %v348_v60 = vpack.i.b16 %v327_v55, %v302_v57 }
 0x12e   : > { %872 = vmatmul.mubr.msk.bf16.vlgmr.msra.gmra.mxu1 %vm226_vm1, %v352_v44  ;;  %887 = vmatprep.subr.bf16.mxu0 %v1114_v11  ;;  %v486_v50 = vsel %vm230_vm0, %v339_v47, 0 }
 0x12f   : > { %882 = vmatpush3.bf16.msra.mxu1 %v443_v49  ;;  %883 = vmatprep.mubr.msk.bf16.mxu1 %vm1115_vm2, %v1114_v11  ;;  %v572_v58 = vsel %vm230_vm0, %v345_v54, 0  ;;  %v351_v62 = vpack.i.b16 %v350_v59, %v349_v61  ;;  %v615_v63 = vsel %vm230_vm0, %v348_v60, 0 }
 0x130   : > { %878 = vmatmul.mubr.msk.bf16.vlgmr.msra.gmra.mxu0 %vm226_vm1, %v352_v44  ;;  %893 = vmatprep.subr.bf16.mxu1 %v1114_v11 }
 0x131   : > { %888 = vmatpush3.bf16.msra.mxu0 %v486_v50  ;;  %889 = vmatprep.mubr.msk.bf16.mxu0 %vm1115_vm2, %v1114_v11  ;;  %v658_v0 = vsel %vm230_vm0, %v351_v62, 0 }
 0x132   : > { %899 = vmatprep.subr.bf16.mxu0 %v1114_v11 }
 0x136   : > { %884 = vmatmul.mubr.msk.bf16.vlgmr.msra.gmra.mxu1 %vm226_vm1, %v352_v44 }
 0x137   : > { %894 = vmatpush3.bf16.msra.mxu1 %v529_v56  ;;  %895 = vmatprep.mubr.msk.bf16.mxu1 %vm1115_vm2, %v1114_v11 }
 0x138   : > { %890 = vmatmul.mubr.msk.bf16.vlgmr.msra.gmra.mxu0 %vm226_vm1, %v352_v44  ;;  %905 = vmatprep.subr.bf16.mxu1 %v1114_v11 }
 0x139   : > { %900 = vmatpush3.bf16.msra.mxu0 %v572_v58  ;;  %901 = vmatprep.mubr.msk.bf16.mxu0 %vm1115_vm2, %v1114_v11 }
 0x13a   : > { %911 = vmatprep.subr.bf16.mxu0 %v1114_v11 }
 0x13e   : > { %896 = vmatmul.mubr.msk.bf16.vlgmr.msra.gmra.mxu1 %vm226_vm1, %v352_v44 }
 0x13f   : > { %906 = vmatpush3.bf16.msra.mxu1 %v615_v63  ;;  %907 = vmatprep.mubr.msk.bf16.mxu1 %vm1115_vm2, %v1114_v11 }
 0x140   : > { %902 = vmatmul.mubr.msk.bf16.vlgmr.msra.gmra.mxu0 %vm226_vm1, %v352_v44 }
 0x141   : > { %912 = vmatpush3.bf16.msra.mxu0 %v658_v0  ;;  %913 = vmatprep.mubr.msk.bf16.mxu0 %vm1115_vm2, %v1114_v11 }
 0x146   : > { %908 = vmatmul.mubr.msk.bf16.vlgmr.msra.gmra.mxu1 %vm226_vm1, %v352_v44 }
 0x148   : > { %914 = vmatmul.mubr.msk.bf16.vlgmr.msra.gmra.mxu0 %vm226_vm1, %v352_v44 }
 0x1ee   : > { %v393_v1 = vpop.f32.mrf.mxu1 }
 0x1f0   : > { %v436_v2 = vpop.f32.mrf.mxu0  ;;  %v873_v3 = vpop.f32.mrf.mxu1 }
 0x1f1   : > { %v833_v4 = vpack.c.bf16 %v436_v2, %v393_v1 }
 0x1f2   : > { %v879_v5 = vpop.f32.mrf.mxu0  ;;  %v396_v6 = vpop.f32.mrf.mxu1 }
 0x1f3   : > { %834 = vst [vmem:[%s1324_s25] sm:$0xff] %v833_v4  }
 0x1f4   : > { %v439_v7 = vpop.f32.mrf.mxu0  ;;  %v874_v8 = vpop.f32.mrf.mxu1 }
 0x1f6   : > { %v880_v9 = vpop.f32.mrf.mxu0  ;;  %v479_v10 = vpop.f32.mrf.mxu1 }
 0x1f8   : > { %v522_v11 = vpop.f32.mrf.mxu0  ;;  %v885_v12 = vpop.f32.mrf.mxu1 }
 0x1f9   : > { %v838_v13 = vpack.c.bf16 %v522_v11, %v479_v10 }
 0x1fa   : > { %v891_v14 = vpop.f32.mrf.mxu0  ;;  %v482_v15 = vpop.f32.mrf.mxu1 }
 0x1fb   : > { %850 = vst [vmem:[%s1324_s25 + $0x8] sm:$0xff] %v838_v13  }
 0x1fc   : > { %v525_v16 = vpop.f32.mrf.mxu0  ;;  %v886_v17 = vpop.f32.mrf.mxu1 }
 0x1fe   : > { %v892_v18 = vpop.f32.mrf.mxu0  ;;  %v565_v19 = vpop.f32.mrf.mxu1 }
 0x200   : > { %v608_v20 = vpop.f32.mrf.mxu0  ;;  %v897_v21 = vpop.f32.mrf.mxu1 }
 0x201   : > { %v843_v22 = vpack.c.bf16 %v608_v20, %v565_v19 }
 0x202   : > { %v903_v23 = vpop.f32.mrf.mxu0  ;;  %v568_v24 = vpop.f32.mrf.mxu1 }
 0x203   : > { %851 = vst [vmem:[%s1324_s25 + $0x10] sm:$0xff] %v843_v22  }
 0x204   : > { %v611_v25 = vpop.f32.mrf.mxu0  ;;  %v898_v26 = vpop.f32.mrf.mxu1 }
 0x206   : > { %v904_v27 = vpop.f32.mrf.mxu0  ;;  %v651_v28 = vpop.f32.mrf.mxu1 }
 0x208   : > { %v694_v29 = vpop.f32.mrf.mxu0  ;;  %v909_v30 = vpop.f32.mrf.mxu1 }
 0x209   : > { %v848_v31 = vpack.c.bf16 %v694_v29, %v651_v28 }
 0x20a   : > { %v915_v32 = vpop.f32.mrf.mxu0  ;;  %v654_v33 = vpop.f32.mrf.mxu1 }
 0x20b   : > { %852 = vst [vmem:[%s1324_s25 + $0x18] sm:$0xff] %v848_v31  }
 0x20c   : > { %v697_v34 = vpop.f32.mrf.mxu0  ;;  %v910_v35 = vpop.f32.mrf.mxu1 }
 0x20e   : > { %v916_v36 = vpop.f32.mrf.mxu0 }
 0x20f PF: > { %p12_p10 = scmp.ge.s32.totalorder %s1160_s17, 4   ;;  %s1363_s12 = smov %s1098_s13 }
 0x210   : > { %s1364_s13 = smov %s1102_s14  ;;  %s1365_s14 = smov %s1170_s20 }
 0x211   : > { %s1366_s15 = smov %s1160_s17  ;;  %14 = sbr.rel (!%p12_p10) target bundleno = 3 (0x3), region = 79 }
 0x216   :  { %737 = vsyncpa [#allocation3], 1 }
 0x217   :  { %739 = vsyncpa [#allocation3 + $0x1], 1 }
 0x218   :  { %740 = vsyncpa [#allocation5], 1 }

// kernel: run.5
= control target key start
LH: loop header
LB: loop body
LE: loop exit
PB: predicated region body
PF: predicated region fallthrough
CT: control target
= control target key end

     0   :  { %9 = vsyncpa [#allocation3], 0  ;;  %s727_s0 = inlined_call_operand.hbm [shape: f32[128,128], index: 0, kind: input, shape index: {}]   ;;  %s728_s1 = inlined_call_operand.hbm [shape: bf16[128,128], index: 1, kind: input, shape index: {}]   ;;  %s729_s2 = inlined_call_operand.hbm [shape: f32[1,128], index: 2, kind: input, shape index: {}]   ;;  %s730_s3 = inlined_call_operand.hbm [shape: f32[1,128], index: 3, kind: input, shape index: {}]   ;;  %s731_s4 = inlined_call_operand.vmem [shape: bf16[128,128], index: 4, kind: output, shape index: {}]  }
   0x1   :  { %10 = vsyncpa [#allocation5], 0 }
   0x2   :  { %11 = vsyncpa [#allocation8], 0  ;;  %s658_s15 = smov [#allocation4]  }
   0x3   :  { %s29_s16 = sshll.u32 %s658_s15, 4  ;;  %s30_s16 = int_to_ptr.vmem [resolvable:$true] %s29_s16 }
   0x4   :  { %s580_s17 = scalar_lea.vmem %s30_s16, 1024  ;;  %p585_p1 = scmp.lt.s32.totalorder %s30_s16, %s30_s16 }
   0x5   :  { %p581_p0 = scmp.ne.s32.totalorder %s30_s16, %s580_s17  ;;  %p586_p2 = scmp.lt.s32.totalorder %s580_s17, %s580_s17 }
   0x7   :  { %p587_p3 = por %p586_p2, %p585_p1 }
   0x9   :  { %p588_p4 = pnand %p587_p3, %p581_p0 }
   0xb   :  { %591 = shalt.err (!%p588_p4)
}
   0xc   :  { %s659_s18 = smov 64   ;;  %s660_s19 = smov 4  }
   0xd   :  { %35 = dma.hbm_to_vmem [thread:$0]  %s728_s1, 1024, %s30_s16, [#allocation5], %s659_s18, %s659_s18, %s660_s19  }
   0xe   :  { %s661_s22 = smov [#allocation2]  }
   0xf   :  { %s17_s23 = sshll.u32 %s661_s22, 4  ;;  %s18_s23 = int_to_ptr.vmem [resolvable:$true] %s17_s23 }
  0x10   :  { %s600_s24 = scalar_lea.vmem %s18_s23, 2048  ;;  %p605_p6 = scmp.lt.s32.totalorder %s18_s23, %s18_s23 }
  0x11   :  { %p601_p5 = scmp.ne.s32.totalorder %s18_s23, %s600_s24  ;;  %p606_p7 = scmp.lt.s32.totalorder %s600_s24, %s600_s24 }
  0x13   :  { %p607_p8 = por %p606_p7, %p605_p6 }
  0x15   :  { %p608_p9 = pnand %p607_p8, %p601_p5 }
  0x17   :  { %611 = shalt.err (!%p608_p9)
}
  0x18   :  { %s662_s25 = smov 128   ;;  %s663_s26 = smov 8  }
  0x19   :  { %23 = dma.hbm_to_vmem [thread:$0]  %s727_s0, 2048, %s18_s23, [#allocation3], %s662_s25, %s662_s25, %s663_s26  }
  0x1a   :  { %s664_s29 = smov [#allocation6]   ;;  %s665_s5 = smov [#allocation7]  }
  0x1b   :  { %s42_s30 = sshll.u32 %s664_s29, 4  ;;  %s52_s1 = sshll.u32 %s665_s5, 4  ;;  %s43_s30 = int_to_ptr.vmem [resolvable:$true] %s42_s30  ;;  %s53_s1 = int_to_ptr.vmem [resolvable:$true] %s52_s1 }
  0x1c   :  { %s620_s6 = scalar_lea.vmem %s43_s30, 16  ;;  %s624_s7 = scalar_lea.vmem %s43_s30, 32 }
  0x1d   :  { %p621_p10 = scmp.ne.s32.totalorder %s43_s30, %s620_s6  ;;  %p625_p11 = scmp.lt.s32.totalorder %s43_s30, %s43_s30 }
  0x1e   :  { %p626_p12 = scmp.lt.s32.totalorder %s624_s7, %s620_s6 }
  0x20   :  { %p627_p13 = por %p626_p12, %p625_p11 }
  0x22   :  { %p628_p0 = pnand %p627_p13, %p621_p10 }
  0x24   :  { %631 = shalt.err (!%p628_p0)
}
  0x25   :  { %45 = dma.hbm_to_vmem [thread:$0]  %s729_s2, 16, %s43_s30, [#allocation5]  }
  0x26   :  { %s640_s10 = scalar_lea.vmem %s53_s1, 16  ;;  %s644_s0 = scalar_lea.vmem %s53_s1, 32 }
  0x27   :  { %p641_p1 = scmp.ne.s32.totalorder %s53_s1, %s640_s10  ;;  %p645_p2 = scmp.lt.s32.totalorder %s53_s1, %s53_s1 }
  0x28   :  { %p646_p3 = scmp.lt.s32.totalorder %s644_s0, %s640_s10 }
  0x2a   :  { %p647_p4 = por %p646_p3, %p645_p2 }
  0x2c   :  { %p648_p5 = pnand %p647_p4, %p641_p1 }
  0x2e   :  { %651 = shalt.err (!%p648_p5)
}
  0x2f   :  { %55 = dma.hbm_to_vmem [thread:$0]  %s730_s3, 16, %s53_s1, [#allocation8]  }
  0x30   :  { %652 = dma.done.wait [#allocation3], 2048  }
  0x31   :  { %653 = vsyncadd [#allocation3], 4294965248 }
  0x32   :  { %654 = dma.done.wait [#allocation5], 1040  }
  0x33   :  { %655 = vsyncadd [#allocation5], 4294966256 }
  0x34   :  { %656 = dma.done.wait [#allocation8], 16  }
  0x35   :  { %657 = vsyncadd [#allocation8], 4294967280  ;;  %v564_v0 = vld [vmem:[#allocation4 + $0x38] sm:$0xff]   ;;  %v565_v1 = vld [vmem:[#allocation4 + $0x30] sm:$0xff]  }
  0x36   :  { %508 = vmatprep.subr.bf16.mxu0 %v564_v0  ;;  %540 = vmatprep.subr.bf16.mxu1 %v564_v0  ;;  %v566_v2 = vld [vmem:[#allocation4 + $0x28] sm:$0xff]   ;;  %v567_v3 = vld [vmem:[#allocation4 + $0x20] sm:$0xff]   ;;  %v568_v10 = vld [vmem:[#allocation4 + $0x18] sm:$0xff]  }
  0x37   :  { %509 = vmatpush3.bf16.msra.mxu0 %v564_v0  ;;  %548 = vmatpush3.bf16.msra.mxu1 %v564_v0  ;;  %v69_v4 = vld [vmem:[#allocation2] sm:$0xff]  ;;  %v70_v5 = vld [vmem:[#allocation2 + $0x8] sm:$0xff]  ;;  %v569_v11 = vld [vmem:[#allocation4 + $0x10] sm:$0xff]  }
  0x38   :  { %510 = vmatprep.subr.bf16.mxu0 %v565_v1  ;;  %541 = vmatprep.subr.bf16.mxu1 %v565_v1  ;;  %v77_v6 = vld [vmem:[#allocation2 + $0x40] sm:$0xff]  ;;  %v85_v7 = vpack.c.bf16 %v70_v5, %v69_v4  ;;  %v78_v8 = vld [vmem:[#allocation2 + $0x48] sm:$0xff]  ;;  %v71_v14 = vld [vmem:[#allocation2 + $0x10] sm:$0xff] }
  0x39   :  { %v89_v9 = vpack.c.bf16 %v78_v8, %v77_v6  ;;  %v570_v12 = vld [vmem:[#allocation4 + $0x8] sm:$0xff]   ;;  %v571_v13 = vld [vmem:[#allocation4] sm:$0xff]   ;;  %v72_v15 = vld [vmem:[#allocation2 + $0x18] sm:$0xff] }
  0x3a   :  { %524 = vmatprep.mubr.bf16.mxu0 %v85_v7  ;;  %v79_v16 = vld [vmem:[#allocation2 + $0x50] sm:$0xff]  ;;  %v80_v17 = vld [vmem:[#allocation2 + $0x58] sm:$0xff]  ;;  %v73_v18 = vld [vmem:[#allocation2 + $0x20] sm:$0xff]  ;;  %v86_v22 = vpack.c.bf16 %v72_v15, %v71_v14 }
  0x3b   :  { %511 = vmatpush3.bf16.msra.mxu0 %v565_v1  ;;  %549 = vmatpush3.bf16.msra.mxu1 %v565_v1  ;;  %v74_v19 = vld [vmem:[#allocation2 + $0x28] sm:$0xff]  ;;  %v81_v20 = vld [vmem:[#allocation2 + $0x60] sm:$0xff]  ;;  %v90_v23 = vpack.c.bf16 %v80_v17, %v79_v16  ;;  %v75_v26 = vld [vmem:[#allocation2 + $0x30] sm:$0xff] }
  0x3c   :  { %512 = vmatprep.subr.bf16.mxu0 %v566_v2  ;;  %542 = vmatprep.subr.bf16.mxu1 %v566_v2  ;;  %v82_v21 = vld [vmem:[#allocation2 + $0x68] sm:$0xff]  ;;  %v87_v24 = vpack.c.bf16 %v74_v19, %v73_v18  ;;  %v76_v27 = vld [vmem:[#allocation2 + $0x38] sm:$0xff]  ;;  %v83_v28 = vld [vmem:[#allocation2 + $0x70] sm:$0xff] }
  0x3d   :  { %532 = vmatprep.mubr.bf16.mxu1 %v89_v9  ;;  %v91_v25 = vpack.c.bf16 %v82_v21, %v81_v20  ;;  %v84_v29 = vld [vmem:[#allocation2 + $0x78] sm:$0xff]  ;;  %v88_v30 = vpack.c.bf16 %v76_v27, %v75_v26  ;;  %v411_v32 = vld [vmem:[#allocation6] ss:$0 sm:$0xff]  ;;  %v412_v37 = vld [vmem:[#allocation7] ss:$0 sm:$0xff] }
  0x3e   :  { %v92_v31 = vpack.c.bf16 %v84_v29, %v83_v28 }
  0x3f   :  { %513 = vmatpush3.bf16.msra.mxu0 %v566_v2  ;;  %550 = vmatpush3.bf16.msra.mxu1 %v566_v2 }
  0x40   :  { %514 = vmatprep.subr.bf16.mxu0 %v567_v3  ;;  %543 = vmatprep.subr.bf16.mxu1 %v567_v3 }
  0x43   :  { %515 = vmatpush3.bf16.msra.mxu0 %v567_v3  ;;  %551 = vmatpush3.bf16.msra.mxu1 %v567_v3 }
  0x44   :  { %516 = vmatprep.subr.bf16.mxu0 %v568_v10  ;;  %544 = vmatprep.subr.bf16.mxu1 %v568_v10 }
  0x47   :  { %517 = vmatpush3.bf16.msra.mxu0 %v568_v10  ;;  %552 = vmatpush3.bf16.msra.mxu1 %v568_v10 }
  0x48   :  { %518 = vmatprep.subr.bf16.mxu0 %v569_v11  ;;  %545 = vmatprep.subr.bf16.mxu1 %v569_v11 }
  0x4b   :  { %519 = vmatpush3.bf16.msra.mxu0 %v569_v11  ;;  %553 = vmatpush3.bf16.msra.mxu1 %v569_v11 }
  0x4c   :  { %520 = vmatprep.subr.bf16.mxu0 %v570_v12  ;;  %546 = vmatprep.subr.bf16.mxu1 %v570_v12 }
  0x4f   :  { %521 = vmatpush3.bf16.msra.mxu0 %v570_v12  ;;  %554 = vmatpush3.bf16.msra.mxu1 %v570_v12 }
  0x50   :  { %522 = vmatprep.subr.bf16.mxu0 %v571_v13  ;;  %547 = vmatprep.subr.bf16.mxu1 %v571_v13 }
  0x53   :  { %523 = vmatpush3.bf16.msra.mxu0 %v571_v13  ;;  %555 = vmatpush3.bf16.msra.mxu1 %v571_v13 }
  0x56   :  { %525 = vmatmul.mubr.bf16.vlgmr.msra.gmra.mxu0 %v86_v22  ;;  %533 = vmatmul.mubr.bf16.vlgmr.msra.gmra.mxu1 %v90_v23 }
  0x57   :  { %528 = vmatprep.mubr.bf16.mxu0 %v87_v24  ;;  %536 = vmatprep.mubr.bf16.mxu1 %v91_v25 }
  0x5e   :  { %529 = vmatmul.mubr.bf16.gmra.mxu0 %v88_v30  ;;  %537 = vmatmul.mubr.bf16.gmra.mxu1 %v92_v31 }
 0x116   :  { %v526_v33 = vpop.f32.mrf.mxu0  ;;  %v534_v34 = vpop.f32.mrf.mxu1 }
 0x117   :  { %v263_v35 = vmul.f32 %v526_v33, %v411_v32  ;;  %v271_v36 = vmul.f32 %v534_v34, %v411_v32 }
 0x118   :  { %v191_v38 = vpop.f32.mrf.mxu0  ;;  %v223_v39 = vpop.f32.mrf.mxu1 }
 0x119   :  { %v261_v40 = vmul.f32 %v411_v32, %v191_v38  ;;  %v269_v41 = vmul.f32 %v411_v32, %v223_v39  ;;  %v286_v44 = vadd.f32 %v412_v37, %v263_v35  ;;  %v294_v45 = vadd.f32 %v412_v37, %v271_v36 }
 0x11a   :  { %v527_v42 = vpop.f32.mrf.mxu0  ;;  %v535_v43 = vpop.f32.mrf.mxu1 }
 0x11b   :  { %v264_v46 = vmul.f32 %v527_v42, %v411_v32  ;;  %v272_v47 = vmul.f32 %v535_v43, %v411_v32  ;;  %v284_v50 = vadd.f32 %v412_v37, %v261_v40  ;;  %v292_v51 = vadd.f32 %v412_v37, %v269_v41 }
 0x11c   :  { %v194_v48 = vpop.f32.mrf.mxu0  ;;  %v226_v49 = vpop.f32.mrf.mxu1  ;;  %v302_v58 = vmax.f32 %v286_v44, 0.0  ;;  %v310_v59 = vmax.f32 %v294_v45, 0.0 }
 0x11d   :  { %v262_v52 = vmul.f32 %v411_v32, %v194_v48  ;;  %v270_v53 = vmul.f32 %v411_v32, %v226_v49  ;;  %v287_v54 = vadd.f32 %v412_v37, %v264_v46  ;;  %v295_v55 = vadd.f32 %v412_v37, %v272_v47 }
 0x11e   :  { %v530_v56 = vpop.f32.mrf.mxu0  ;;  %v538_v57 = vpop.f32.mrf.mxu1  ;;  %v300_v4 = vmax.f32 %v284_v50, 0.0  ;;  %v308_v5 = vmax.f32 %v292_v51, 0.0 }
 0x11f   :  { %v285_v60 = vadd.f32 %v412_v37, %v262_v52  ;;  %v293_v61 = vadd.f32 %v412_v37, %v270_v53  ;;  %v303_v62 = vmax.f32 %v287_v54, 0.0  ;;  %v311_v63 = vmax.f32 %v295_v55, 0.0 }
 0x120   :  { %v267_v0 = vmul.f32 %v530_v56, %v411_v32  ;;  %v275_v1 = vmul.f32 %v538_v57, %v411_v32  ;;  %v207_v2 = vpop.f32.mrf.mxu0  ;;  %v239_v3 = vpop.f32.mrf.mxu1 }
 0x121   :  { %v301_v6 = vmax.f32 %v285_v60, 0.0  ;;  %v309_v7 = vmax.f32 %v293_v61, 0.0  ;;  %v453_v8 = vpack.c.bf16 %v303_v62, %v302_v58  ;;  %v473_v9 = vpack.c.bf16 %v311_v63, %v310_v59 }
 0x122   :  { %v265_v10 = vmul.f32 %v411_v32, %v207_v2  ;;  %v273_v11 = vmul.f32 %v411_v32, %v239_v3  ;;  %v531_v12 = vpop.f32.mrf.mxu0  ;;  %v539_v13 = vpop.f32.mrf.mxu1  ;;  %v290_v16 = vadd.f32 %v412_v37, %v267_v0  ;;  %v298_v17 = vadd.f32 %v412_v37, %v275_v1 }
 0x123   :  { %v448_v14 = vpack.c.bf16 %v301_v6, %v300_v4  ;;  %v468_v15 = vpack.c.bf16 %v309_v7, %v308_v5  ;;  %485 = vst [vmem:[%s731_s4 + $0x8] sm:$0xff] %v453_v8   ;;  %489 = vst [vmem:[%s731_s4 + $0x28] sm:$0xff] %v473_v9   ;;  %v268_v18 = vmul.f32 %v531_v12, %v411_v32 }
 0x124   :  { %v276_v19 = vmul.f32 %v539_v13, %v411_v32  ;;  %v210_v20 = vpop.f32.mrf.mxu0  ;;  %v242_v21 = vpop.f32.mrf.mxu1  ;;  %v288_v22 = vadd.f32 %v412_v37, %v265_v10  ;;  %v296_v23 = vadd.f32 %v412_v37, %v273_v11  ;;  %v306_v30 = vmax.f32 %v290_v16, 0.0 }
 0x125   :  { %449 = vst [vmem:[%s731_s4] sm:$0xff] %v448_v14   ;;  %488 = vst [vmem:[%s731_s4 + $0x20] sm:$0xff] %v468_v15   ;;  %v266_v24 = vmul.f32 %v411_v32, %v210_v20  ;;  %v274_v25 = vmul.f32 %v411_v32, %v242_v21  ;;  %v291_v26 = vadd.f32 %v412_v37, %v268_v18  ;;  %v314_v31 = vmax.f32 %v298_v17, 0.0 }
 0x126   :  { %v299_v27 = vadd.f32 %v412_v37, %v276_v19  ;;  %v304_v35 = vmax.f32 %v288_v22, 0.0  ;;  %v312_v36 = vmax.f32 %v296_v23, 0.0 }
 0x127   :  { %v289_v28 = vadd.f32 %v412_v37, %v266_v24  ;;  %v297_v29 = vadd.f32 %v412_v37, %v274_v25  ;;  %v307_v33 = vmax.f32 %v291_v26, 0.0 }
 0x128   :  { %v315_v34 = vmax.f32 %v299_v27, 0.0 }
 0x129   :  { %v305_v38 = vmax.f32 %v289_v28, 0.0  ;;  %v313_v39 = vmax.f32 %v297_v29, 0.0  ;;  %v463_v40 = vpack.c.bf16 %v307_v33, %v306_v30 }
 0x12a   :  { %v483_v41 = vpack.c.bf16 %v315_v34, %v314_v31 }
 0x12b   :  { %v458_v42 = vpack.c.bf16 %v305_v38, %v304_v35  ;;  %v478_v43 = vpack.c.bf16 %v313_v39, %v312_v36  ;;  %487 = vst [vmem:[%s731_s4 + $0x18] sm:$0xff] %v463_v40  }
 0x12c   :  { %491 = vst [vmem:[%s731_s4 + $0x38] sm:$0xff] %v483_v41  }
 0x12d   :  { %486 = vst [vmem:[%s731_s4 + $0x10] sm:$0xff] %v458_v42   ;;  %490 = vst [vmem:[%s731_s4 + $0x30] sm:$0xff] %v478_v43  }
 0x12e   :  { %400 = vsyncpa [#allocation3], 1 }
 0x12f   :  { %401 = vsyncpa [#allocation5], 1 }
 0x130   :  { %402 = vsyncpa [#allocation8], 1 }

// kernel: run.7
= control target key start
LH: loop header
LB: loop body
LE: loop exit
PB: predicated region body
PF: predicated region fallthrough
CT: control target
= control target key end

     0   :  { %11 = vsyncpa [#allocation3], 0  ;;  %s6665_s0 = inlined_call_operand.vmem [shape: bf16[2,10,10,128], index: 0, kind: input, shape index: {}]   ;;  %s6666_s1 = inlined_call_operand.vmem [shape: bf16[2,10,10,128], index: 1, kind: input, shape index: {}]   ;;  %s6667_s2 = inlined_call_operand.hbm [shape: bf16[9,128,256], index: 2, kind: input, shape index: {}]   ;;  %s6668_s3 = inlined_call_operand.hbm [shape: bf16[9,128,256], index: 3, kind: input, shape index: {}]   ;;  %s6669_s4 = inlined_call_operand.hbm [shape: f32[1,256], index: 4, kind: input, shape index: {}]   ;;  %s6670_s5 = inlined_call_operand.hbm [shape: f32[1,256], index: 5, kind: input, shape index: {}]   ;;  %s6671_s6 = inlined_call_operand.vmem [shape: bf16[2,8,8,256], index: 6, kind: output, shape index: {}]  }
   0x1   :  { %12 = vsyncpa [#allocation5], 0 }
   0x2   :  { %13 = vsyncpa [#allocation8], 0  ;;  %s5575_s21 = smov 0  }
   0x3 LB: > { %s5581_s22 = sadd.s32 4294967295, %s5531_s21   ;;  %p4510_p0 = scmp.ge.s32.totalorder %s5531_s21, 1  ;;  %s5531_s21 = sphi %s5575_s21, %s19_s21  }
   0x4   : > { %p186_p1 = scmp.lt.s32.totalorder %s5531_s21, 3  ;;  %p4936_p2 = scmp.eq.s32.totalorder %s5581_s22, 0 }
   0x5   : > { %s5533_s24 = smov [#allocation4]   ;;  %s5534_s26 = smov [#allocation2]  }
   0x6   : > { %p5586_p3 = pnand %p4510_p0, %p186_p1  ;;  %s211_s25 = sshll.u32 %s5533_s24, 4  ;;  %s212_s25 = int_to_ptr.vmem [resolvable:$true] %s211_s25 }
   0x7   : > { %s198_s27 = sshll.u32 %s5534_s26, 4  ;;  %s5535_s29 = smov [#allocation6]   ;;  %s5592_s27 = int_to_ptr.vmem [resolvable:$true] %s198_s27 }
   0x8   : > { %p4923_p4 = pneg %p5586_p3  ;;  %s225_s30 = sshll.u32 %s5535_s29, 4  ;;  %s5600_s30 = int_to_ptr.vmem [resolvable:$true] %s225_s30 }
   0x9   : > { %s5536_s7 = smov [#allocation7]   ;;  %s5420_s9 = scalar_lea.vmem %s212_s25, 18432 }
   0xa   : > { %p5596_p5 = pnand %p4936_p2, %p4923_p4  ;;  %s5602_s8 = sshll.u32 %s5536_s7, 4  ;;  %s237_s8 = int_to_ptr.vmem [resolvable:$true] %s5602_s8 }
   0xb   : > { %p5421_p7 = scmp.ne.s32.totalorder %s212_s25, %s5420_s9  ;;  %p5428_p10 = scmp.lt.s32.totalorder %s212_s25, %s212_s25 }
   0xc   : > { %p5411_p6 = pneg %p5596_p5  ;;  %p5429_p11 = scmp.lt.s32.totalorder %s5420_s9, %s5420_s9 }
   0xe   : > { %p5423_p8 = pnand %p5421_p7, %p5411_p6  ;;  %p5430_p12 = por %p5429_p11, %p5428_p10 }
  0x10   : > { %p5424_p9 = pneg %p5423_p8 }
  0x12   : > { %p5431_p13 = pnand %p5430_p12, %p5424_p9 }
  0x14   : > { %5434 = shalt.err (!%p5431_p13)
}
  0x15   : > { %s5537_s10 = smov 128   ;;  %s5538_s11 = smov 8  }
  0x16   : > { %4929 = dma.hbm_to_vmem [thread:$0]  (!%p5596_p5), %s6668_s3, 18432, %s212_s25, [#allocation5], %s5537_s10, %s5537_s10, %s5538_s11  }
  0x17   : > { %s5446_s14 = scalar_lea.vmem %s5592_s27, 18432  ;;  %p5454_p7 = scmp.lt.s32.totalorder %s5592_s27, %s5592_s27 }
  0x18   : > { %p5447_p0 = scmp.ne.s32.totalorder %s5592_s27, %s5446_s14  ;;  %p5455_p8 = scmp.lt.s32.totalorder %s5446_s14, %s5446_s14 }
  0x1a   : > { %p5449_p1 = pnand %p5447_p0, %p5411_p6  ;;  %p5456_p9 = por %p5455_p8, %p5454_p7 }
  0x1c   : > { %p5450_p4 = pneg %p5449_p1 }
  0x1e   : > { %p5457_p10 = pnand %p5456_p9, %p5450_p4 }
  0x20   : > { %5460 = shalt.err (!%p5457_p10)
}
  0x21   : > { %4926 = dma.hbm_to_vmem [thread:$0]  (!%p5596_p5), %s6667_s2, 18432, %s5592_s27, [#allocation3], %s5537_s10, %s5537_s10, %s5538_s11  }
  0x22   : > { %s5472_s17 = scalar_lea.vmem %s5600_s30, 32  ;;  %p5480_p0 = scmp.lt.s32.totalorder %s5600_s30, %s5600_s30 }
  0x23   : > { %p5473_p11 = scmp.ne.s32.totalorder %s5600_s30, %s5472_s17  ;;  %p5481_p1 = scmp.lt.s32.totalorder %s5472_s17, %s5472_s17 }
  0x25   : > { %p5475_p12 = pnand %p5473_p11, %p5411_p6  ;;  %p5482_p4 = por %p5481_p1, %p5480_p0 }
  0x27   : > { %p5476_p13 = pneg %p5475_p12 }
  0x29   : > { %p5483_p7 = pnand %p5482_p4, %p5476_p13 }
  0x2b   : > { %5486 = shalt.err (!%p5483_p7)
}
  0x2c   : > { %4932 = dma.hbm_to_vmem [thread:$0]  (!%p5596_p5), %s6669_s4, 32, %s5600_s30, [#allocation5]  }
  0x2d   : > { %s5498_s20 = scalar_lea.vmem %s237_s8, 32  ;;  %p5506_p11 = scmp.lt.s32.totalorder %s237_s8, %s237_s8 }
  0x2e   : > { %p5499_p8 = scmp.ne.s32.totalorder %s237_s8, %s5498_s20  ;;  %p5507_p12 = scmp.lt.s32.totalorder %s5498_s20, %s5498_s20 }
  0x30   : > { %p5501_p9 = pnand %p5499_p8, %p5411_p6  ;;  %p5508_p13 = por %p5507_p12, %p5506_p11 }
  0x32   : > { %p5502_p10 = pneg %p5501_p9 }
  0x34   : > { %p5509_p0 = pnand %p5508_p13, %p5502_p10 }
  0x36   : > { %5512 = shalt.err (!%p5509_p0)
}
  0x37   : > { %4935 = dma.hbm_to_vmem [thread:$0]  (!%p5596_p5), %s6670_s5, 32, %s237_s8, [#allocation8]  }
  0x38   : > { %265 = sbr.rel (%p5586_p3) target bundleno = 592 (0x250), region = 44 }
  0x3d   : > { %5518 = dma.done.wait (%p4936_p2), [#allocation3], 18432  }
  0x3e   : > { %5520 = vsyncadd (%p4936_p2), [#allocation3], 4294948864 }
  0x3f   : > { %5522 = dma.done.wait (%p4936_p2), [#allocation5], 18464  }
  0x40   : > { %5524 = vsyncadd (%p4936_p2), [#allocation5], 4294948832 }
  0x41   : > { %5526 = dma.done.wait (%p4936_p2), [#allocation8], 32  }
  0x42   : > { %5528 = vsyncadd (%p4936_p2), [#allocation8], 4294967264  ;;  %v5539_v0 = vmov 0   ;;  %v4959_v1 = vld [vmem:[#allocation2 + $0xf4] ss:$8 sps:$4 sm:$0xff]   ;;  %p312_p2 = scmp.lt.s32.totalorder %s5581_s22, 1 }
  0x43   : > { %624 = vmatprep.mubr.bf16.mxu0 %v5539_v0  ;;  %801 = vmatprep.mubr.bf16.mxu1 %v5539_v0  ;;  %v4961_v2 = vld [vmem:[#allocation2 + $0x74] ss:$8 sps:$4 sm:$0xff]   ;;  %v4963_v3 = vld [vmem:[#allocation2 + $0xf0] ss:$8 sps:$4 sm:$0xff]   ;;  %v4965_v5 = vld [vmem:[#allocation2 + $0xe4] ss:$8 sps:$4 sm:$0xff]  }
  0x44   : > { %592 = vmatprep.subr.bf16.mxu0 %v4959_v1  ;;  %v4964_v4 = vld [vmem:[#allocation2 + $0x70] ss:$8 sps:$4 sm:$0xff]   ;;  %769 = vmatprep.subr.bf16.mxu1 %v4961_v2  ;;  %v4967_v6 = vld [vmem:[#allocation2 + $0x64] ss:$8 sps:$4 sm:$0xff]   ;;  %v4969_v7 = vld [vmem:[#allocation2 + $0xe0] ss:$8 sps:$4 sm:$0xff]  }
  0x45   : > { %593 = vmatpush1.bf16.msra.mxu0 %v4963_v3  ;;  %770 = vmatpush1.bf16.msra.mxu1 %v4964_v4  ;;  %v4970_v8 = vld [vmem:[#allocation2 + $0x60] ss:$8 sps:$4 sm:$0xff]   ;;  %v4971_v9 = vld [vmem:[#allocation2 + $0xd4] ss:$8 sps:$4 sm:$0xff]   ;;  %v4975_v11 = vld [vmem:[#allocation2 + $0xd0] ss:$8 sps:$4 sm:$0xff]  }
  0x46   : > { %594 = vmatprep.subr.bf16.mxu0 %v4965_v5  ;;  %771 = vmatprep.subr.bf16.mxu1 %v4967_v6  ;;  %v4973_v10 = vld [vmem:[#allocation2 + $0x54] ss:$8 sps:$4 sm:$0xff]   ;;  %v4976_v12 = vld [vmem:[#allocation2 + $0x50] ss:$8 sps:$4 sm:$0xff]   ;;  %v4977_v13 = vld [vmem:[#allocation2 + $0xc4] ss:$8 sps:$4 sm:$0xff]  }
  0x47   : > { %v4979_v14 = vld [vmem:[#allocation2 + $0x44] ss:$8 sps:$4 sm:$0xff]   ;;  %s6723_s22 = smov (!%p312_p2, %s5581_s22), 1  ;;  %v4981_v15 = vld [vmem:[#allocation2 + $0xc0] ss:$8 sps:$4 sm:$0xff]   ;;  %vm850_vm3 = vcmask 1042432  }
  0x48   : > { %v4982_v16 = vld [vmem:[#allocation2 + $0x40] ss:$8 sps:$4 sm:$0xff]   ;;  %v4983_v17 = vld [vmem:[#allocation2 + $0xb4] ss:$8 sps:$4 sm:$0xff]   ;;  %s4906_s23 = smul.u32 80, %s6723_s22  ;;  %vm851_vm4 = vcmask 1046532  }
  0x49   : > { %595 = vmatpush1.bf16.msra.mxu0 %v4969_v7  ;;  %772 = vmatpush1.bf16.msra.mxu1 %v4970_v8  ;;  %v4985_v18 = vld [vmem:[#allocation2 + $0x34] ss:$8 sps:$4 sm:$0xff]   ;;  %v4987_v19 = vld [vmem:[#allocation2 + $0xb0] ss:$8 sps:$4 sm:$0xff]   ;;  %v4989_v21 = vld [vmem:[#allocation2 + $0xa4] ss:$8 sps:$4 sm:$0xff]  }
  0x4a   : > { %596 = vmatprep.subr.bf16.mxu0 %v4971_v9  ;;  %773 = vmatprep.subr.bf16.mxu1 %v4973_v10  ;;  %v4988_v20 = vld [vmem:[#allocation2 + $0x30] ss:$8 sps:$4 sm:$0xff]   ;;  %v4991_v22 = vld [vmem:[#allocation2 + $0x24] ss:$8 sps:$4 sm:$0xff]   ;;  %s5675_s28 = scalar_lea.vmem %s6665_s0, %s4906_s23  ;;  %vm364_vm0 = vsmask.f32 3328  ;;  %vm5827_vm5 = vmor %vm850_vm3, %vm851_vm4  ;;  %s5979_s7 = scalar_lea.vmem %s6666_s1, %s4906_s23 }
  0x4b   : > { %v4993_v23 = vld [vmem:[#allocation2 + $0xa0] ss:$8 sps:$4 sm:$0xff]   ;;  %vm365_vm1 = vsmask.f32 7440  ;;  %v4995_v25 = vld [vmem:[#allocation2 + $0x94] ss:$8 sps:$4 sm:$0xff]  }
  0x4c   : > { %v4994_v24 = vld [vmem:[#allocation2 + $0x20] ss:$8 sps:$4 sm:$0xff]   ;;  %v4997_v26 = vld [vmem:[#allocation2 + $0x14] ss:$8 sps:$4 sm:$0xff]   ;;  %v5681_v28 = vld [vmem:[%s5675_s28 + $0x4] sm:$0x1] }
  0x4d   : > { %597 = vmatpush1.bf16.msra.mxu0 %v4975_v11  ;;  %774 = vmatpush1.bf16.msra.mxu1 %v4976_v12  ;;  %v5678_v27 = vld [vmem:[%s5675_s28] sm:$0xf]  ;;  %v5684_v29 = vld [vmem:[%s5675_s28 + $0x8] sm:$0xf]  ;;  %v5687_v30 = vld [vmem:[%s5675_s28 + $0xc] sm:$0x1] }
  0x4e   : > { %598 = vmatprep.subr.bf16.mxu0 %v4977_v13  ;;  %775 = vmatprep.subr.bf16.mxu1 %v4979_v14  ;;  %v368_v31 = vshrl.u32 %v5678_v27, 16  ;;  %v371_v32 = vshll.u32 %v5678_v27, 16  ;;  %v377_v33 = vshll.u32 %v5681_v28, 16  ;;  %v382_v34 = vshrl.u32 %v5684_v29, 16  ;;  %v4999_v37 = vld [vmem:[#allocation2 + $0x90] ss:$8 sps:$4 sm:$0xff]   ;;  %vm5697_vm2 = vmor %vm364_vm0, %vm365_vm1 }
  0x4f   : > { %v385_v35 = vshll.u32 %v5684_v29, 16  ;;  %v391_v36 = vshll.u32 %v5687_v30, 16  ;;  %v5000_v38 = vld [vmem:[#allocation2 + $0x10] ss:$8 sps:$4 sm:$0xff]   ;;  %v5001_v41 = vld [vmem:[#allocation2 + $0x84] ss:$8 sps:$4 sm:$0xff]   ;;  %v4545_v57 = vcombine.low %v5678_v27, %v5684_v29 }
  0x50   : > { %v370_v39 = vrot.slane %v368_v31, 4  ;;  %v373_v40 = vrot.slane %v371_v32, 5  ;;  %v5003_v42 = vld [vmem:[#allocation2 + $0x4] ss:$8 sps:$4 sm:$0xff]   ;;  %v384_v43 = vrot.slane %v382_v34, 4  ;;  %v379_v46 = vrot.slane %v377_v33, 5 }
  0x51   : > { %599 = vmatpush1.bf16.msra.mxu0 %v4981_v15  ;;  %776 = vmatpush1.bf16.msra.mxu1 %v4982_v16  ;;  %v387_v44 = vrot.slane %v385_v35, 5  ;;  %v393_v49 = vrot.slane %v391_v36, 5  ;;  %v5005_v50 = vld [vmem:[#allocation2 + $0x80] ss:$8 sps:$4 sm:$0xff]   ;;  %v5010_v54 = vld [vmem:[#allocation2 + $0x174] ss:$8 sps:$4 sm:$0xff]  }
  0x52   : > { %600 = vmatprep.subr.bf16.mxu0 %v4983_v17  ;;  %777 = vmatprep.subr.bf16.mxu1 %v4985_v18  ;;  %v374_v45 = vor.u32 %v373_v40, %v370_v39  ;;  %v5006_v51 = vld [vmem:[#allocation2] ss:$8 sps:$4 sm:$0xff]   ;;  %v5013_v55 = vld [vmem:[#allocation2 + $0x1f4] ss:$8 sps:$4 sm:$0xff]   ;;  %v5008_v58 = vld [vmem:[#allocation2 + $0x170] ss:$8 sps:$4 sm:$0xff]  }
  0x53   : > { %v388_v48 = vor.u32 %v387_v44, %v384_v43  ;;  %v5011_v59 = vld [vmem:[#allocation2 + $0x1f0] ss:$8 sps:$4 sm:$0xff]   ;;  %v5709_v61 = vld [vmem:[%s5675_s28 + $0x14] sm:$0x1]  ;;  %v5719_v1 = vld [vmem:[%s5675_s28 + $0x1c] sm:$0x1] }
  0x54   : > { %v375_v52 = vrot.slane %v374_v45, 4  ;;  %v5706_v60 = vld [vmem:[%s5675_s28 + $0x10] sm:$0xf]  ;;  %v5712_v62 = vld [vmem:[%s5675_s28 + $0x18] sm:$0xf]  ;;  %v405_v4 = vshll.u32 %v5709_v61, 16 }
  0x55   : > { %601 = vmatpush1.bf16.msra.mxu0 %v4987_v19  ;;  %778 = vmatpush1.bf16.msra.mxu1 %v4988_v20  ;;  %v389_v53 = vrot.slane %v388_v48, 4  ;;  %v396_v2 = vshrl.u32 %v5706_v60, 16  ;;  %v399_v3 = vshll.u32 %v5706_v60, 16  ;;  %v5016_v6 = vld [vmem:[#allocation2 + $0x164] ss:$8 sps:$4 sm:$0xff]   ;;  %v410_v7 = vshrl.u32 %v5712_v62, 16 }
  0x56   : > { %602 = vmatprep.subr.bf16.mxu0 %v4989_v21  ;;  %779 = vmatprep.subr.bf16.mxu1 %v4991_v22  ;;  %v380_v56 = vsel %vm5697_vm2, %v375_v52, %v379_v46  ;;  %v413_v8 = vshll.u32 %v5712_v62, 16  ;;  %v419_v9 = vshll.u32 %v5719_v1, 16  ;;  %v5019_v10 = vld [vmem:[#allocation2 + $0x1e4] ss:$8 sps:$4 sm:$0xff]   ;;  %v407_v16 = vrot.slane %v405_v4, 5  ;;  %s4897_s8 = sshll.u32 %s6723_s22, 6 }
  0x57   : > { %v5716_v63 = vsel %vm5697_vm2, %v389_v53, %v393_v49  ;;  %v398_v11 = vrot.slane %v396_v2, 4  ;;  %v401_v12 = vrot.slane %v399_v3, 5  ;;  %v412_v13 = vrot.slane %v410_v7, 4  ;;  %v5014_v17 = vld [vmem:[#allocation2 + $0x160] ss:$8 sps:$4 sm:$0xff]   ;;  %s6608_s10 = scalar_lea.vmem %s6671_s6, %s4897_s8 }
  0x58   : > { %v4525_v5 = vcombine.low %v380_v56, %v5716_v63  ;;  %v415_v14 = vrot.slane %v413_v8, 5  ;;  %v5017_v18 = vld [vmem:[#allocation2 + $0x1e0] ss:$8 sps:$4 sm:$0xff]   ;;  %v421_v20 = vrot.slane %v419_v9, 5  ;;  %v5023_v22 = vld [vmem:[#allocation2 + $0x154] ss:$8 sps:$4 sm:$0xff]   ;;  %v5742_v34 = vcombine.low %v5706_v60, %v5712_v62 }
  0x59   : > { %603 = vmatpush1.bf16.msra.mxu0 %v4993_v23  ;;  %780 = vmatpush1.bf16.msra.mxu1 %v4994_v24  ;;  %v402_v15 = vor.u32 %v401_v12, %v398_v11  ;;  %v5026_v23 = vld [vmem:[#allocation2 + $0x1d4] ss:$8 sps:$4 sm:$0xff]   ;;  %v5731_v31 = vld [vmem:[%s5675_s28 + $0x20] sm:$0xf]  ;;  %v5734_v32 = vld [vmem:[%s5675_s28 + $0x24] sm:$0x1] }
  0x5a   : > { %604 = vmatprep.subr.bf16.mxu0 %v4995_v25  ;;  %781 = vmatprep.subr.bf16.mxu1 %v4997_v26  ;;  %v416_v19 = vor.u32 %v415_v14, %v412_v13  ;;  %v5021_v25 = vld [vmem:[#allocation2 + $0x150] ss:$8 sps:$4 sm:$0xff]   ;;  %v5745_v35 = vld [vmem:[%s5675_s28 + $0x28] sm:$0xf]  ;;  %v5748_v36 = vld [vmem:[%s5675_s28 + $0x2c] sm:$0x1] }
  0x5b   : > { %v403_v21 = vrot.slane %v402_v15, 4  ;;  %v5024_v26 = vld [vmem:[#allocation2 + $0x1d0] ss:$8 sps:$4 sm:$0xff]   ;;  %v5029_v40 = vld [vmem:[#allocation2 + $0x144] ss:$8 sps:$4 sm:$0xff]   ;;  %v441_v48 = vshll.u32 %v5745_v35, 16  ;;  %v5770_v3 = vcombine.low %v5731_v31, %v5745_v35 }
  0x5c   : > { %v417_v24 = vrot.slane %v416_v19, 4  ;;  %v5032_v44 = vld [vmem:[#allocation2 + $0x1c4] ss:$8 sps:$4 sm:$0xff]   ;;  %v5027_v49 = vld [vmem:[#allocation2 + $0x140] ss:$8 sps:$4 sm:$0xff]  }
  0x5d   : > { %605 = vmatpush1.bf16.msra.mxu0 %v4999_v37  ;;  %782 = vmatpush1.bf16.msra.mxu1 %v5000_v38  ;;  %v5738_v33 = vsel %vm5697_vm2, %v403_v21, %v407_v16  ;;  %v424_v37 = vshrl.u32 %v5731_v31, 16  ;;  %v427_v38 = vshll.u32 %v5731_v31, 16  ;;  %v5030_v52 = vld [vmem:[#allocation2 + $0x1c0] ss:$8 sps:$4 sm:$0xff]   ;;  %v5036_v56 = vld [vmem:[#allocation2 + $0x134] ss:$8 sps:$4 sm:$0xff]  }
  0x5e   : > { %606 = vmatprep.subr.bf16.mxu0 %v5001_v41  ;;  %783 = vmatprep.subr.bf16.mxu1 %v5003_v42  ;;  %v5754_v39 = vsel %vm5697_vm2, %v417_v24, %v421_v20  ;;  %v433_v41 = vshll.u32 %v5734_v32, 16  ;;  %v438_v42 = vshrl.u32 %v5745_v35, 16  ;;  %v5039_v2 = vld [vmem:[#allocation2 + $0x1b4] ss:$8 sps:$4 sm:$0xff]   ;;  %v5773_v4 = vld [vmem:[%s5675_s28 + $0x30] sm:$0xf] }
  0x5f   : > { %v5760_v43 = vcombine.low %v5738_v33, %v5754_v39  ;;  %v426_v45 = vrot.slane %v424_v37, 4  ;;  %v429_v46 = vrot.slane %v427_v38, 5  ;;  %v5034_v9 = vld [vmem:[#allocation2 + $0x130] ss:$8 sps:$4 sm:$0xff]   ;;  %v452_v11 = vshrl.u32 %v5773_v4, 16 }
  0x60   : > { %v455_v12 = vshll.u32 %v5773_v4, 16  ;;  %v5037_v13 = vld [vmem:[#allocation2 + $0x1b0] ss:$8 sps:$4 sm:$0xff]   ;;  %v5045_v19 = vld [vmem:[#allocation2 + $0x1a4] ss:$8 sps:$4 sm:$0xff]  }
  0x61   : > { %607 = vmatpush1.bf16.msra.mxu0 %v5005_v50  ;;  %784 = vmatpush1.bf16.msra.mxu1 %v5006_v51  ;;  %v440_v50 = vrot.slane %v438_v42, 4  ;;  %v447_v51 = vshll.u32 %v5748_v36, 16  ;;  %v430_v53 = vor.u32 %v429_v46, %v426_v45  ;;  %v454_v20 = vrot.slane %v452_v11, 4  ;;  %v5043_v38 = vld [vmem:[#allocation2 + $0x1a0] ss:$8 sps:$4 sm:$0xff]  }
  0x62   : > { %998 = vmatprep.subr.bf16.mxu0 %v5010_v54  ;;  %1194 = vmatprep.subr.bf16.mxu1 %v5013_v55  ;;  %v435_v54 = vrot.slane %v433_v41, 5  ;;  %v443_v55 = vrot.slane %v441_v48, 5  ;;  %v457_v21 = vrot.slane %v455_v12, 5  ;;  %v5040_v42 = vld [vmem:[#allocation2 + $0x120] ss:$8 sps:$4 sm:$0xff]  }
  0x63   : > { %v5052_v45 = vld [vmem:[#allocation2 + $0x194] ss:$8 sps:$4 sm:$0xff]  }
  0x64   : > { %625 = vmatmul.mubr.bf16.vlgmr.msra.gmra.mxu0 %v4525_v5  ;;  %802 = vmatmul.mubr.bf16.vlgmr.msra.gmra.mxu1 %v4545_v57  ;;  %v431_v57 = vrot.slane %v430_v53, 4  ;;  %v5776_v5 = vld [vmem:[%s5675_s28 + $0x34] sm:$0x1] }
  0x65   : > { %999 = vmatpush1.bf16.msra.mxu0 %v5008_v58  ;;  %1195 = vmatpush1.bf16.msra.mxu1 %v5011_v59  ;;  %v444_v58 = vor.u32 %v443_v55, %v440_v50  ;;  %v449_v59 = vrot.slane %v447_v51, 5  ;;  %v461_v14 = vshll.u32 %v5776_v5, 16  ;;  %v5049_v48 = vld [vmem:[#allocation2 + $0x114] ss:$8 sps:$4 sm:$0xff]  }
  0x66   : > { %1000 = vmatprep.subr.bf16.mxu0 %v5016_v6  ;;  %1196 = vmatprep.subr.bf16.mxu1 %v5019_v10  ;;  %v5779_v6 = vld [vmem:[%s5675_s28 + $0x38] sm:$0xf]  ;;  %v5783_v7 = vsel %vm5697_vm2, %v431_v57, %v435_v54  ;;  %v5786_v10 = vld [vmem:[%s5675_s28 + $0x3c] sm:$0x1]  ;;  %v5058_v57 = vld [vmem:[#allocation2 + $0x184] ss:$8 sps:$4 sm:$0xff]  }
  0x67   : > { %634 = vmatprep.mubr.bf16.mxu0 %v5539_v0  ;;  %811 = vmatprep.mubr.bf16.mxu1 %v5539_v0  ;;  %v445_v8 = vrot.slane %v444_v58, 4  ;;  %v466_v15 = vshrl.u32 %v5779_v6, 16  ;;  %v469_v16 = vshll.u32 %v5779_v6, 16  ;;  %v463_v37 = vrot.slane %v461_v14, 5  ;;  %v5050_v54 = vld [vmem:[#allocation2 + $0x190] ss:$8 sps:$4 sm:$0xff]  }
  0x68   : > { %v5813_v51 = vcombine.low %v5773_v4, %v5779_v6  ;;  %v4566_v58 = vrot.slane %v5684_v29, 9  ;;  %v5065_v11 = vld [vmem:[#allocation2 + $0x2f4] ss:$8 sps:$4 sm:$0xff]   ;;  %v4567_v14 = vrot.slane %v5706_v60, 9 }
  0x69   : > { %1001 = vmatpush1.bf16.msra.mxu0 %v5014_v17  ;;  %1197 = vmatpush1.bf16.msra.mxu1 %v5017_v18  ;;  %v475_v17 = vshll.u32 %v5786_v10, 16  ;;  %v5796_v18 = vsel %vm5697_vm2, %v445_v8, %v449_v59  ;;  %v468_v24 = vrot.slane %v466_v15, 4  ;;  %v5062_v12 = vld [vmem:[#allocation2 + $0x274] ss:$8 sps:$4 sm:$0xff]  }
  0x6a   : > { %1002 = vmatprep.subr.bf16.mxu0 %v5023_v22  ;;  %1198 = vmatprep.subr.bf16.mxu1 %v5026_v23  ;;  %v5800_v22 = vcombine.low %v5783_v7, %v5796_v18  ;;  %v5042_v23 = vld [vmem:[#allocation2 + $0x124] ss:$8 sps:$4 sm:$0xff]  }
  0x6b   : > { %v477_v41 = vrot.slane %v475_v17, 5  ;;  %v863_v17 = vrot.slane %v5709_v61, 5 }
  0x6c   : > { %635 = vmatmul.mubr.bf16.gmra.mxu0 %v5760_v43  ;;  %812 = vmatmul.mubr.bf16.gmra.mxu1 %v5742_v34 }
  0x6d   : > { %1003 = vmatpush1.bf16.msra.mxu0 %v5021_v25  ;;  %1199 = vmatpush1.bf16.msra.mxu1 %v5024_v26  ;;  %v471_v25 = vrot.slane %v469_v16, 5  ;;  %v458_v26 = vor.u32 %v457_v21, %v454_v20  ;;  %v5063_v16 = vld [vmem:[#allocation2 + $0x2f0] ss:$8 sps:$4 sm:$0xff]   ;;  %v5071_v21 = vld [vmem:[#allocation2 + $0x2e4] ss:$8 sps:$4 sm:$0xff]   ;;  %v5850_v61 = vsel %vm5827_vm5, %v4567_v14, %v863_v17 }
  0x6e   : > { %1004 = vmatprep.subr.bf16.mxu0 %v5029_v40  ;;  %1200 = vmatprep.subr.bf16.mxu1 %v5032_v44  ;;  %v5060_v20 = vld [vmem:[#allocation2 + $0x270] ss:$8 sps:$4 sm:$0xff]  }
  0x6f   : > { %644 = vmatprep.mubr.bf16.mxu0 %v5539_v0  ;;  %821 = vmatprep.mubr.bf16.mxu1 %v5539_v0  ;;  %v472_v40 = vor.u32 %v471_v25, %v468_v24  ;;  %v459_v44 = vrot.slane %v458_v26, 4  ;;  %v5068_v24 = vld [vmem:[#allocation2 + $0x264] ss:$8 sps:$4 sm:$0xff]   ;;  %v5078_v26 = vld [vmem:[#allocation2 + $0x2d4] ss:$8 sps:$4 sm:$0xff]  }
  0x71   : > { %1005 = vmatpush1.bf16.msra.mxu0 %v5027_v49  ;;  %1201 = vmatpush1.bf16.msra.mxu1 %v5030_v52  ;;  %v473_v46 = vrot.slane %v472_v40, 4  ;;  %v855_v49 = vrot.slane %v5681_v28, 5  ;;  %v5809_v50 = vsel %vm5697_vm2, %v459_v44, %v463_v37  ;;  %v859_v52 = vrot.slane %v5687_v30, 5  ;;  %v5055_v30 = vld [vmem:[#allocation2 + $0x104] ss:$8 sps:$4 sm:$0xff]  }
  0x72   : > { %1006 = vmatprep.subr.bf16.mxu0 %v5036_v56  ;;  %1202 = vmatprep.subr.bf16.mxu1 %v5039_v2  ;;  %v4565_v28 = vrot.slane %v5678_v27, 9  ;;  %v5047_v56 = vld [vmem:[#allocation2 + $0x110] ss:$8 sps:$4 sm:$0xff]   ;;  %v5056_v27 = vld [vmem:[#allocation2 + $0x180] ss:$8 sps:$4 sm:$0xff]   ;;  %v4594_v37 = vcombine.low %v5712_v62, %v5731_v31  ;;  %v4570_v44 = vrot.slane %v5745_v35, 9 }
  0x73   : > { %v5818_v53 = vsel %vm5697_vm2, %v473_v46, %v477_v41  ;;  %v5053_v2 = vld [vmem:[#allocation2 + $0x100] ss:$8 sps:$4 sm:$0xff]   ;;  %v5076_v40 = vld [vmem:[#allocation2 + $0x2d0] ss:$8 sps:$4 sm:$0xff]   ;;  %v4569_v41 = vrot.slane %v5731_v31, 9 }
  0x74   : > { %822 = vmatmul.mubr.bf16.gmra.mxu1 %v5770_v3  ;;  %645 = vmatmul.mubr.bf16.gmra.mxu0 %v5800_v22  ;;  %v5823_v55 = vcombine.low %v5809_v50, %v5818_v53  ;;  %v856_v8 = vsel %vm5827_vm5, %v4565_v28, %v855_v49  ;;  %v5084_v46 = vld [vmem:[#allocation2 + $0x2c4] ss:$8 sps:$4 sm:$0xff]   ;;  %v5082_v49 = vld [vmem:[#allocation2 + $0x2c0] ss:$8 sps:$4 sm:$0xff]   ;;  %v4595_v28 = vcombine.low %v5745_v35, %v5773_v4 }
  0x75   : > { %1203 = vmatpush1.bf16.msra.mxu1 %v5037_v13  ;;  %1007 = vmatpush1.bf16.msra.mxu0 %v5034_v9  ;;  %v5837_v9 = vsel %vm5827_vm5, %v4566_v58, %v859_v52  ;;  %v4593_v13 = vcombine.low %v5684_v29, %v5706_v60  ;;  %v5069_v29 = vld [vmem:[#allocation2 + $0x2e0] ss:$8 sps:$4 sm:$0xff]   ;;  %v4571_v58 = vrot.slane %v5773_v4, 9  ;;  %v5094_v35 = vld [vmem:[#allocation2 + $0x224] ss:$8 sps:$4 sm:$0xff]  }
  0x76   : > { %1204 = vmatprep.subr.bf16.mxu1 %v5045_v19  ;;  %1008 = vmatprep.subr.bf16.mxu0 %v5042_v23  ;;  %v4573_v15 = vcombine.low %v856_v8, %v5837_v9  ;;  %v4568_v19 = vrot.slane %v5712_v62, 9  ;;  %v867_v23 = vrot.slane %v5719_v1, 5  ;;  %v5066_v60 = vld [vmem:[#allocation2 + $0x260] ss:$8 sps:$4 sm:$0xff]   ;;  %v5075_v1 = vld [vmem:[#allocation2 + $0x254] ss:$8 sps:$4 sm:$0xff]  }
  0x77   : > { %654 = vmatprep.mubr.bf16.mxu0 %v5539_v0  ;;  %831 = vmatprep.mubr.bf16.mxu1 %v5539_v0  ;;  %v5081_v62 = vld [vmem:[#allocation2 + $0x244] ss:$8 sps:$4 sm:$0xff]   ;;  %v5079_v52 = vld [vmem:[#allocation2 + $0x240] ss:$8 sps:$4 sm:$0xff]  }
  0x78   : > { %v5854_v25 = vsel %vm5827_vm5, %v4568_v19, %v867_v23  ;;  %v5097_v8 = vld [vmem:[#allocation2 + $0x2a4] ss:$8 sps:$4 sm:$0xff]   ;;  %v5092_v4 = vld [vmem:[#allocation2 + $0x220] ss:$8 sps:$4 sm:$0xff]   ;;  %v5102_v19 = vld [vmem:[#allocation2 + $0x290] ss:$8 sps:$4 sm:$0xff]  }
  0x79   : > { %1205 = vmatpush1.bf16.msra.mxu1 %v5043_v38  ;;  %1009 = vmatpush1.bf16.msra.mxu0 %v5040_v42  ;;  %v5862_v38 = vcombine.low %v5850_v61, %v5854_v25  ;;  %v871_v42 = vrot.slane %v5734_v32, 5  ;;  %v5107_v23 = vld [vmem:[#allocation2 + $0x204] ss:$8 sps:$4 sm:$0xff]  }
  0x7a   : > { %1206 = vmatprep.subr.bf16.mxu1 %v5052_v45  ;;  %1010 = vmatprep.subr.bf16.mxu0 %v5049_v48  ;;  %v5073_v45 = vld [vmem:[#allocation2 + $0x250] ss:$8 sps:$4 sm:$0xff]   ;;  %v875_v48 = vrot.slane %v5748_v36, 5  ;;  %v5088_v36 = vld [vmem:[#allocation2 + $0x234] ss:$8 sps:$4 sm:$0xff]  }
  0x7b   : > { %v5871_v31 = vsel %vm5827_vm5, %v4569_v41, %v871_v42  ;;  %v5122_v41 = vld [vmem:[#allocation2 + $0x3e4] ss:$8 sps:$4 sm:$0xff]  }
  0x7c   : > { %832 = vmatmul.mubr.bf16.gmra.mxu1 %v5813_v51  ;;  %655 = vmatmul.mubr.bf16.gmra.mxu0 %v5823_v55  ;;  %v5875_v32 = vsel %vm5827_vm5, %v4570_v44, %v875_v48  ;;  %v5119_v42 = vld [vmem:[#allocation2 + $0x364] ss:$8 sps:$4 sm:$0xff]   ;;  %v5123_v48 = vld [vmem:[#allocation2 + $0x350] ss:$8 sps:$4 sm:$0xff]  }
  0x7d   : > { %1207 = vmatpush1.bf16.msra.mxu1 %v5050_v54  ;;  %1011 = vmatpush1.bf16.msra.mxu0 %v5047_v56  ;;  %v5091_v54 = vld [vmem:[#allocation2 + $0x2b4] ss:$8 sps:$4 sm:$0xff]   ;;  %v5883_v56 = vcombine.low %v5871_v31, %v5875_v32 }
  0x7e   : > { %1208 = vmatprep.subr.bf16.mxu1 %v5058_v57  ;;  %1012 = vmatprep.subr.bf16.mxu0 %v5055_v30  ;;  %v5089_v57 = vld [vmem:[#allocation2 + $0x2b0] ss:$8 sps:$4 sm:$0xff]   ;;  %v879_v30 = vrot.slane %v5776_v5, 5 }
  0x7f   : > { %1030 = vmatprep.mubr.bf16.mxu0 %v5539_v0  ;;  %1226 = vmatprep.mubr.bf16.mxu1 %v5539_v0 }
  0x80   : > { %v5895_v5 = vsel %vm5827_vm5, %v4571_v58, %v879_v30  ;;  %v5129_v58 = vld [vmem:[#allocation2 + $0x340] ss:$8 sps:$4 sm:$0xff]  }
  0x81   : > { %1209 = vmatpush1.bf16.msra.mxu1 %v5056_v27  ;;  %1013 = vmatpush1.bf16.msra.mxu0 %v5053_v2  ;;  %v4572_v27 = vrot.slane %v5779_v6, 9  ;;  %v5086_v2 = vld [vmem:[#allocation2 + $0x230] ss:$8 sps:$4 sm:$0xff]   ;;  %v5132_v30 = vld [vmem:[#allocation2 + $0x3c0] ss:$8 sps:$4 sm:$0xff]  }
  0x82   : > { %1603 = vmatprep.subr.bf16.mxu1 %v5065_v11  ;;  %1403 = vmatprep.subr.bf16.mxu0 %v5062_v12  ;;  %v883_v11 = vrot.slane %v5786_v10, 5  ;;  %v5095_v12 = vld [vmem:[#allocation2 + $0x2a0] ss:$8 sps:$4 sm:$0xff]   ;;  %v5104_v10 = vld [vmem:[#allocation2 + $0x294] ss:$8 sps:$4 sm:$0xff]  }
  0x84   : > { %1227 = vmatmul.mubr.bf16.vlgmr.msra.gmra.mxu1 %v4593_v13  ;;  %1031 = vmatmul.mubr.bf16.vlgmr.msra.gmra.mxu0 %v4573_v15  ;;  %v5891_v13 = vld [vmem:[%s5675_s28 + $0x40] sm:$0xf]  ;;  %v5899_v14 = vsel %vm5827_vm5, %v4572_v27, %v883_v11  ;;  %v5101_v15 = vld [vmem:[#allocation2 + $0x214] ss:$8 sps:$4 sm:$0xff]  }
  0x85   : > { %1604 = vmatpush1.bf16.msra.mxu1 %v5063_v16  ;;  %1404 = vmatpush1.bf16.msra.mxu0 %v5060_v20  ;;  %v4596_v16 = vcombine.low %v5779_v6, %v5891_v13  ;;  %v5907_v17 = vcombine.low %v5895_v5, %v5899_v14  ;;  %v5099_v20 = vld [vmem:[#allocation2 + $0x210] ss:$8 sps:$4 sm:$0xff]   ;;  %v5116_v6 = vld [vmem:[#allocation2 + $0x3f4] ss:$8 sps:$4 sm:$0xff]   ;;  %v1284_v44 = vshrl.u32 %v5891_v13, 16 }
  0x86   : > { %1605 = vmatprep.subr.bf16.mxu1 %v5071_v21  ;;  %1405 = vmatprep.subr.bf16.mxu0 %v5068_v24  ;;  %v5110_v21 = vld [vmem:[#allocation2 + $0x284] ss:$8 sps:$4 sm:$0xff]   ;;  %v5108_v24 = vld [vmem:[#allocation2 + $0x280] ss:$8 sps:$4 sm:$0xff]  }
  0x87   : > { %1040 = vmatprep.mubr.bf16.mxu0 %v5539_v0  ;;  %1236 = vmatprep.mubr.bf16.mxu1 %v5539_v0 }
  0x89   : > { %1606 = vmatpush1.bf16.msra.mxu1 %v5069_v29  ;;  %1406 = vmatpush1.bf16.msra.mxu0 %v5066_v60  ;;  %v5105_v29 = vld [vmem:[#allocation2 + $0x200] ss:$8 sps:$4 sm:$0xff]   ;;  %v5113_v60 = vld [vmem:[#allocation2 + $0x374] ss:$8 sps:$4 sm:$0xff]  }
  0x8a   : > { %1607 = vmatprep.subr.bf16.mxu1 %v5078_v26  ;;  %1407 = vmatprep.subr.bf16.mxu0 %v5075_v1  ;;  %v4634_v26 = vcombine.low %v5837_v9, %v5850_v61  ;;  %v4613_v1 = vcombine.low %v5716_v63, %v5738_v33  ;;  %v5120_v9 = vld [vmem:[#allocation2 + $0x3e0] ss:$8 sps:$4 sm:$0xff]   ;;  %v1287_v61 = vshll.u32 %v5891_v13, 16  ;;  %v5128_v63 = vld [vmem:[#allocation2 + $0x3d4] ss:$8 sps:$4 sm:$0xff]  }
  0x8b   : > { %v5125_v33 = vld [vmem:[#allocation2 + $0x354] ss:$8 sps:$4 sm:$0xff]  }
  0x8c   : > { %1237 = vmatmul.mubr.bf16.gmra.mxu1 %v4594_v37  ;;  %1041 = vmatmul.mubr.bf16.gmra.mxu0 %v5862_v38  ;;  %v5111_v37 = vld [vmem:[#allocation2 + $0x370] ss:$8 sps:$4 sm:$0xff]  }
  0x8d   : > { %1608 = vmatpush1.bf16.msra.mxu1 %v5076_v40  ;;  %1408 = vmatpush1.bf16.msra.mxu0 %v5073_v45  ;;  %v5114_v40 = vld [vmem:[#allocation2 + $0x3f0] ss:$8 sps:$4 sm:$0xff]   ;;  %v5117_v45 = vld [vmem:[#allocation2 + $0x360] ss:$8 sps:$4 sm:$0xff]  }
  0x8e   : > { %1609 = vmatprep.subr.bf16.mxu1 %v5084_v46  ;;  %1409 = vmatprep.subr.bf16.mxu0 %v5081_v62  ;;  %v4635_v46 = vcombine.low %v5854_v25, %v5871_v31  ;;  %v1286_v62 = vrot.slane %v1284_v44, 4  ;;  %v5140_v31 = vld [vmem:[#allocation2 + $0x3b4] ss:$8 sps:$4 sm:$0xff]   ;;  %v5167_v44 = vld [vmem:[#allocation2 + $0x464] ss:$8 sps:$4 sm:$0xff]  }
  0x8f   : > { %1050 = vmatprep.mubr.bf16.mxu0 %v5539_v0  ;;  %1246 = vmatprep.mubr.bf16.mxu1 %v5539_v0 }
  0x91   : > { %1610 = vmatpush1.bf16.msra.mxu1 %v5082_v49  ;;  %1410 = vmatpush1.bf16.msra.mxu0 %v5079_v52  ;;  %v4614_v49 = vcombine.low %v5754_v39, %v5783_v7  ;;  %v5126_v52 = vld [vmem:[#allocation2 + $0x3d0] ss:$8 sps:$4 sm:$0xff]   ;;  %v5137_v39 = vld [vmem:[#allocation2 + $0x334] ss:$8 sps:$4 sm:$0xff]   ;;  %v4636_v7 = vcombine.low %v5875_v32, %v5895_v5  ;;  %v5144_v32 = vld [vmem:[#allocation2 + $0x3a0] ss:$8 sps:$4 sm:$0xff]  }
  0x92   : > { %1611 = vmatprep.subr.bf16.mxu1 %v5091_v54  ;;  %1411 = vmatprep.subr.bf16.mxu0 %v5088_v36  ;;  %v5131_v54 = vld [vmem:[#allocation2 + $0x344] ss:$8 sps:$4 sm:$0xff]   ;;  %v1289_v36 = vrot.slane %v1287_v61, 5 }
  0x94   : > { %1247 = vmatmul.mubr.bf16.gmra.mxu1 %v4595_v28  ;;  %1051 = vmatmul.mubr.bf16.gmra.mxu0 %v5883_v56  ;;  %v5134_v28 = vld [vmem:[#allocation2 + $0x3c4] ss:$8 sps:$4 sm:$0xff]   ;;  %v1290_v25 = vor.u32 %v1289_v36, %v1286_v62  ;;  %v5177_v36 = vld [vmem:[#allocation2 + $0x440] ss:$8 sps:$4 sm:$0xff]  }
  0x95   : > { %1612 = vmatpush1.bf16.msra.mxu1 %v5089_v57  ;;  %1412 = vmatpush1.bf16.msra.mxu0 %v5086_v2  ;;  %v345_v57 = vld [vmem:[%s5675_s28 + $0x44] sm:$0x1]  ;;  %v4615_v2 = vcombine.low %v5796_v18, %v5809_v50  ;;  %v5141_v18 = vld [vmem:[#allocation2 + $0x320] ss:$8 sps:$4 sm:$0xff]  }
  0x96   : > { %1613 = vmatprep.subr.bf16.mxu1 %v5097_v8  ;;  %1413 = vmatprep.subr.bf16.mxu0 %v5094_v35  ;;  %v1293_v27 = vshll.u32 %v345_v57, 16  ;;  %v5138_v8 = vld [vmem:[#allocation2 + $0x3b0] ss:$8 sps:$4 sm:$0xff]   ;;  %v1291_v11 = vrot.slane %v1290_v25, 4  ;;  %v4633_v35 = vrot.slane %v5891_v13, 9 }
  0x97   : > { %1060 = vmatprep.mubr.bf16.mxu0 %v5539_v0  ;;  %1256 = vmatprep.mubr.bf16.mxu1 %v5539_v0  ;;  %v5185_v25 = vld [vmem:[#allocation2 + $0x434] ss:$8 sps:$4 sm:$0xff]  }
  0x99   : > { %1614 = vmatpush1.bf16.msra.mxu1 %v5095_v12  ;;  %1414 = vmatpush1.bf16.msra.mxu0 %v5092_v4  ;;  %v1495_v12 = vrot.slane %v345_v57, 5  ;;  %v5135_v4 = vld [vmem:[#allocation2 + $0x330] ss:$8 sps:$4 sm:$0xff]  }
  0x9a   : > { %1615 = vmatprep.subr.bf16.mxu1 %v5104_v10  ;;  %1415 = vmatprep.subr.bf16.mxu0 %v5101_v15  ;;  %v5146_v10 = vld [vmem:[#allocation2 + $0x3a4] ss:$8 sps:$4 sm:$0xff]   ;;  %v1295_v15 = vrot.slane %v1293_v27, 5 }
  0x9b   : > { %v5934_v5 = vsel %vm5827_vm5, %v4633_v35, %v1495_v12  ;;  %v5201_v35 = vld [vmem:[#allocation4 + $0x14] ss:$8 sps:$4 sm:$0xff]  }
  0x9c   : > { %1257 = vmatmul.mubr.bf16.gmra.mxu1 %v4596_v16  ;;  %1061 = vmatmul.mubr.bf16.gmra.mxu0 %v5907_v17  ;;  %v5143_v16 = vld [vmem:[#allocation2 + $0x324] ss:$8 sps:$4 sm:$0xff]   ;;  %v5938_v50 = vsel %vm5697_vm2, %v1291_v11, %v1295_v15  ;;  %v5198_v12 = vld [vmem:[#allocation2 + $0x414] ss:$8 sps:$4 sm:$0xff]  }
  0x9d   : > { %1616 = vmatpush1.bf16.msra.mxu1 %v5102_v19  ;;  %1416 = vmatpush1.bf16.msra.mxu0 %v5099_v20  ;;  %v5152_v19 = vld [vmem:[#allocation2 + $0x394] ss:$8 sps:$4 sm:$0xff]   ;;  %v5207_v15 = vld [vmem:[#allocation4 + $0x4] ss:$8 sps:$4 sm:$0xff]  }
  0x9e   : > { %1617 = vmatprep.subr.bf16.mxu1 %v5110_v21  ;;  %1417 = vmatprep.subr.bf16.mxu0 %v5107_v23  ;;  %v5149_v20 = vld [vmem:[#allocation2 + $0x314] ss:$8 sps:$4 sm:$0xff]   ;;  %v4637_v21 = vcombine.low %v5899_v14, %v5934_v5  ;;  %v4616_v23 = vcombine.low %v5818_v53, %v5938_v50 }
  0x9f   : > { %1435 = vmatprep.mubr.bf16.mxu0 %v5539_v0  ;;  %1635 = vmatprep.mubr.bf16.mxu1 %v5539_v0  ;;  %v5164_v14 = vld [vmem:[#allocation4 + $0x74] ss:$8 sps:$4 sm:$0xff]  }
  0xa0   : > { %v5161_v53 = vld [vmem:[#allocation2 + $0x474] ss:$8 sps:$4 sm:$0xff]  }
  0xa1   : > { %1618 = vmatpush1.bf16.msra.mxu1 %v5108_v24  ;;  %1418 = vmatpush1.bf16.msra.mxu0 %v5105_v29  ;;  %v5150_v24 = vld [vmem:[#allocation2 + $0x390] ss:$8 sps:$4 sm:$0xff]  }
  0xa2   : > { %1996 = vmatprep.subr.bf16.mxu1 %v5116_v6  ;;  %1793 = vmatprep.subr.bf16.mxu0 %v5113_v60  ;;  %v5147_v29 = vld [vmem:[#allocation2 + $0x310] ss:$8 sps:$4 sm:$0xff]   ;;  %v5158_v6 = vld [vmem:[#allocation2 + $0x384] ss:$8 sps:$4 sm:$0xff]  }
  0xa3   : > { %v5155_v60 = vld [vmem:[#allocation2 + $0x304] ss:$8 sps:$4 sm:$0xff]  }
  0xa4   : > { %1636 = vmatmul.mubr.bf16.vlgmr.msra.gmra.mxu1 %v4634_v26  ;;  %1436 = vmatmul.mubr.bf16.vlgmr.msra.gmra.mxu0 %v4613_v1  ;;  %v5156_v26 = vld [vmem:[#allocation2 + $0x380] ss:$8 sps:$4 sm:$0xff]  }
  0xa5   : > { %1997 = vmatpush1.bf16.msra.mxu1 %v5114_v40  ;;  %1794 = vmatpush1.bf16.msra.mxu0 %v5111_v37  ;;  %v5153_v1 = vld [vmem:[#allocation2 + $0x300] ss:$8 sps:$4 sm:$0xff]   ;;  %v5159_v37 = vld [vmem:[#allocation2 + $0x470] ss:$8 sps:$4 sm:$0xff]  }
  0xa6   : > { %1998 = vmatprep.subr.bf16.mxu1 %v5122_v41  ;;  %1795 = vmatprep.subr.bf16.mxu0 %v5119_v42  ;;  %v5162_v40 = vld [vmem:[#allocation4 + $0x70] ss:$8 sps:$4 sm:$0xff]   ;;  %v5170_v41 = vld [vmem:[#allocation4 + $0x64] ss:$8 sps:$4 sm:$0xff]   ;;  %v5949_v42 = vld [vmem:[%s5675_s28 + $0x48] sm:$0xf] }
  0xa7   : > { %1445 = vmatprep.mubr.bf16.mxu0 %v5539_v0  ;;  %1645 = vmatprep.mubr.bf16.mxu1 %v5539_v0  ;;  %v1886_v61 = vshll.u32 %v5949_v42, 16 }
  0xa9   : > { %1999 = vmatpush1.bf16.msra.mxu1 %v5120_v9  ;;  %1796 = vmatpush1.bf16.msra.mxu0 %v5117_v45  ;;  %v5168_v45 = vld [vmem:[#allocation4 + $0x60] ss:$8 sps:$4 sm:$0xff]   ;;  %v1883_v9 = vshrl.u32 %v5949_v42, 16  ;;  %v1888_v62 = vrot.slane %v1886_v61, 5 }
  0xaa   : > { %2000 = vmatprep.subr.bf16.mxu1 %v5128_v63  ;;  %1797 = vmatprep.subr.bf16.mxu0 %v5125_v33  ;;  %v5165_v63 = vld [vmem:[#allocation2 + $0x460] ss:$8 sps:$4 sm:$0xff]   ;;  %v5176_v33 = vld [vmem:[#allocation4 + $0x54] ss:$8 sps:$4 sm:$0xff]  }
  0xac   : > { %1646 = vmatmul.mubr.bf16.gmra.mxu1 %v4635_v46  ;;  %1446 = vmatmul.mubr.bf16.gmra.mxu0 %v4614_v49  ;;  %v5173_v46 = vld [vmem:[#allocation2 + $0x454] ss:$8 sps:$4 sm:$0xff]   ;;  %v5182_v49 = vld [vmem:[#allocation4 + $0x44] ss:$8 sps:$4 sm:$0xff]  }
  0xad   : > { %2001 = vmatpush1.bf16.msra.mxu1 %v5126_v52  ;;  %1798 = vmatpush1.bf16.msra.mxu0 %v5123_v48  ;;  %v1885_v48 = vrot.slane %v1883_v9, 4  ;;  %v5958_v52 = vld [vmem:[%s5675_s28 + $0x4c] sm:$0x1] }
  0xae   : > { %2002 = vmatprep.subr.bf16.mxu1 %v5134_v28  ;;  %1799 = vmatprep.subr.bf16.mxu0 %v5131_v54  ;;  %v5179_v54 = vld [vmem:[#allocation2 + $0x444] ss:$8 sps:$4 sm:$0xff]   ;;  %v5180_v28 = vld [vmem:[#allocation4 + $0x40] ss:$8 sps:$4 sm:$0xff]  }
  0xaf   : > { %1455 = vmatprep.mubr.bf16.mxu0 %v5539_v0  ;;  %1655 = vmatprep.mubr.bf16.mxu1 %v5539_v0  ;;  %v1889_v57 = vor.u32 %v1888_v62, %v1885_v48  ;;  %v6011_v48 = vld [vmem:[%s5979_s7 + $0x20] sm:$0xf]  ;;  %v6014_v62 = vld [vmem:[%s5979_s7 + $0x28] sm:$0xf] }
  0xb1   : > { %2003 = vmatpush1.bf16.msra.mxu1 %v5132_v30  ;;  %1800 = vmatpush1.bf16.msra.mxu0 %v5129_v58  ;;  %v1892_v58 = vshll.u32 %v5958_v52, 16  ;;  %v5188_v30 = vld [vmem:[#allocation4 + $0x34] ss:$8 sps:$4 sm:$0xff]   ;;  %v1890_v27 = vrot.slane %v1889_v57, 4 }
  0xb2   : > { %2004 = vmatprep.subr.bf16.mxu1 %v5140_v31  ;;  %1801 = vmatprep.subr.bf16.mxu0 %v5137_v39  ;;  %v5183_v31 = vld [vmem:[#allocation2 + $0x430] ss:$8 sps:$4 sm:$0xff]  }
  0xb3   : > { %v1894_v39 = vrot.slane %v1892_v58, 5  ;;  %v5237_v58 = vld [vmem:[#allocation4 + $0xb4] ss:$8 sps:$4 sm:$0xff]  }
  0xb4   : > { %1656 = vmatmul.mubr.bf16.gmra.mxu1 %v4636_v7  ;;  %1456 = vmatmul.mubr.bf16.gmra.mxu0 %v4615_v2  ;;  %v5191_v7 = vld [vmem:[#allocation2 + $0x424] ss:$8 sps:$4 sm:$0xff]   ;;  %v5189_v2 = vld [vmem:[#allocation2 + $0x420] ss:$8 sps:$4 sm:$0xff]  }
  0xb5   : > { %2005 = vmatpush1.bf16.msra.mxu1 %v5138_v8  ;;  %1802 = vmatpush1.bf16.msra.mxu0 %v5135_v4  ;;  %v5192_v8 = vld [vmem:[#allocation4 + $0x20] ss:$8 sps:$4 sm:$0xff]   ;;  %v1895_v11 = vsel %vm5697_vm2, %v1890_v27, %v1894_v39  ;;  %v5196_v4 = vld [vmem:[#allocation2 + $0x410] ss:$8 sps:$4 sm:$0xff]   ;;  %v5243_v27 = vld [vmem:[#allocation4 + $0xa4] ss:$8 sps:$4 sm:$0xff]  }
  0xb6   : > { %2006 = vmatprep.subr.bf16.mxu1 %v5146_v10  ;;  %1803 = vmatprep.subr.bf16.mxu0 %v5143_v16  ;;  %v5199_v10 = vld [vmem:[#allocation4 + $0x10] ss:$8 sps:$4 sm:$0xff]   ;;  %v5204_v16 = vld [vmem:[#allocation2 + $0x404] ss:$8 sps:$4 sm:$0xff]  }
  0xb7   : > { %1465 = vmatprep.mubr.bf16.mxu0 %v5539_v0  ;;  %1665 = vmatprep.mubr.bf16.mxu1 %v5539_v0 }
  0xb9   : > { %2007 = vmatpush1.bf16.msra.mxu1 %v5144_v32  ;;  %1804 = vmatpush1.bf16.msra.mxu0 %v5141_v18  ;;  %v5205_v32 = vld [vmem:[#allocation4] ss:$8 sps:$4 sm:$0xff]  }
  0xba   : > { %2008 = vmatprep.subr.bf16.mxu1 %v5152_v19  ;;  %1805 = vmatprep.subr.bf16.mxu0 %v5149_v20  ;;  %v5985_v18 = vld [vmem:[%s5979_s7 + $0x8] sm:$0xf]  ;;  %v5214_v19 = vld [vmem:[#allocation4 + $0x174] ss:$8 sps:$4 sm:$0xff]  }
  0xbb   : > { %v5211_v20 = vld [vmem:[#allocation4 + $0xf4] ss:$8 sps:$4 sm:$0xff]   ;;  %v2523_v61 = vshrl.u32 %v5985_v18, 16 }
  0xbc   : > { %1666 = vmatmul.mubr.bf16.gmra.mxu1 %v4637_v21  ;;  %1466 = vmatmul.mubr.bf16.gmra.mxu0 %v4616_v23  ;;  %v5209_v23 = vld [vmem:[#allocation4 + $0xf0] ss:$8 sps:$4 sm:$0xff]  }
  0xbd   : > { %2009 = vmatpush1.bf16.msra.mxu1 %v5150_v24  ;;  %1806 = vmatpush1.bf16.msra.mxu0 %v5147_v29  ;;  %v5212_v24 = vld [vmem:[#allocation4 + $0x170] ss:$8 sps:$4 sm:$0xff]   ;;  %v5220_v29 = vld [vmem:[#allocation4 + $0x164] ss:$8 sps:$4 sm:$0xff]  }
  0xbe   : > { %2010 = vmatprep.subr.bf16.mxu1 %v5158_v6  ;;  %1807 = vmatprep.subr.bf16.mxu0 %v5155_v60  ;;  %v5217_v6 = vld [vmem:[#allocation4 + $0xe4] ss:$8 sps:$4 sm:$0xff]  }
  0xbf   : > { %1825 = vmatprep.mubr.bf16.mxu0 %v5539_v0  ;;  %2028 = vmatprep.mubr.bf16.mxu1 %v5539_v0 }
  0xc1   : > { %2011 = vmatpush1.bf16.msra.mxu1 %v5156_v26  ;;  %1808 = vmatpush1.bf16.msra.mxu0 %v5153_v1  ;;  %v5218_v1 = vld [vmem:[#allocation4 + $0x160] ss:$8 sps:$4 sm:$0xff]  }
  0xc2   : > { %2419 = vmatprep.subr.bf16.mxu1 %v5164_v14  ;;  %2190 = vmatprep.subr.bf16.mxu0 %v5161_v53  ;;  %v5995_v14 = vld [vmem:[%s5979_s7 + $0x10] sm:$0xf]  ;;  %v5998_v53 = vld [vmem:[%s5979_s7 + $0x18] sm:$0xf] }
  0xc4   : > { %2029 = vmatmul.mubr.bf16.vlgmr.msra.gmra.mxu1 %v5760_v43  ;;  %1826 = vmatmul.mubr.bf16.vlgmr.msra.gmra.mxu0 %v5742_v34  ;;  %v5171_v43 = vld [vmem:[#allocation2 + $0x450] ss:$8 sps:$4 sm:$0xff]  }
  0xc5   : > { %2420 = vmatpush1.bf16.msra.mxu1 %v5162_v40  ;;  %2191 = vmatpush1.bf16.msra.mxu0 %v5159_v37  ;;  %v5174_v34 = vld [vmem:[#allocation4 + $0x50] ss:$8 sps:$4 sm:$0xff]   ;;  %v5215_v37 = vld [vmem:[#allocation4 + $0xe0] ss:$8 sps:$4 sm:$0xff]   ;;  %v5227_v40 = vld [vmem:[#allocation4 + $0x154] ss:$8 sps:$4 sm:$0xff]  }
  0xc6   : > { %2421 = vmatprep.subr.bf16.mxu1 %v5170_v41  ;;  %2192 = vmatprep.subr.bf16.mxu0 %v5167_v44  ;;  %v5224_v41 = vld [vmem:[#allocation4 + $0xd4] ss:$8 sps:$4 sm:$0xff]   ;;  %v6004_v44 = vcombine.low %v5995_v14, %v5998_v53 }
  0xc7   : > { %1835 = vmatprep.mubr.bf16.mxu0 %v5539_v0  ;;  %2038 = vmatprep.mubr.bf16.mxu1 %v5539_v0 }
  0xc9   : > { %2422 = vmatpush1.bf16.msra.mxu1 %v5168_v45  ;;  %2193 = vmatpush1.bf16.msra.mxu0 %v5165_v63  ;;  %v5222_v63 = vld [vmem:[#allocation4 + $0xd0] ss:$8 sps:$4 sm:$0xff]  }
  0xca   : > { %2423 = vmatprep.subr.bf16.mxu1 %v5176_v33  ;;  %2194 = vmatprep.subr.bf16.mxu0 %v5173_v46  ;;  %v5233_v33 = vld [vmem:[#allocation4 + $0x144] ss:$8 sps:$4 sm:$0xff]   ;;  %v2526_v46 = vshll.u32 %v5985_v18, 16 }
  0xcc   : > { %2039 = vmatmul.mubr.bf16.gmra.mxu1 %v5800_v22  ;;  %1836 = vmatmul.mubr.bf16.gmra.mxu0 %v5770_v3  ;;  %v5186_v22 = vld [vmem:[#allocation4 + $0x30] ss:$8 sps:$4 sm:$0xff]   ;;  %v5194_v3 = vld [vmem:[#allocation4 + $0x24] ss:$8 sps:$4 sm:$0xff]   ;;  %v2528_v57 = vrot.slane %v2526_v46, 5 }
  0xcd   : > { %2424 = vmatpush1.bf16.msra.mxu1 %v5174_v34  ;;  %2195 = vmatpush1.bf16.msra.mxu0 %v5171_v43  ;;  %v5230_v43 = vld [vmem:[#allocation4 + $0xc4] ss:$8 sps:$4 sm:$0xff]   ;;  %v5231_v34 = vld [vmem:[#allocation4 + $0x140] ss:$8 sps:$4 sm:$0xff]   ;;  %v2286_v46 = vld [vmem:[%s5979_s7 + $0x1c] sm:$0x1] }
  0xce   : > { %2425 = vmatprep.subr.bf16.mxu1 %v5182_v49  ;;  %2196 = vmatprep.subr.bf16.mxu0 %v5179_v54  ;;  %v2525_v49 = vrot.slane %v2523_v61, 4  ;;  %v5228_v54 = vld [vmem:[#allocation4 + $0xc0] ss:$8 sps:$4 sm:$0xff]  }
  0xcf   : > { %1845 = vmatprep.mubr.bf16.mxu0 %v5539_v0  ;;  %2048 = vmatprep.mubr.bf16.mxu1 %v5539_v0 }
  0xd1   : > { %2426 = vmatpush1.bf16.msra.mxu1 %v5180_v28  ;;  %2197 = vmatpush1.bf16.msra.mxu0 %v5177_v36  ;;  %v5240_v36 = vld [vmem:[#allocation4 + $0x134] ss:$8 sps:$4 sm:$0xff]  }
  0xd2   : > { %2427 = vmatprep.subr.bf16.mxu1 %v5188_v30  ;;  %2198 = vmatprep.subr.bf16.mxu0 %v5185_v25  ;;  %v5235_v30 = vld [vmem:[#allocation4 + $0xb0] ss:$8 sps:$4 sm:$0xff]   ;;  %v4688_v25 = vrot.slane %v5949_v42, 9 }
  0xd4   : > { %2049 = vmatmul.mubr.bf16.gmra.mxu1 %v5823_v55  ;;  %1846 = vmatmul.mubr.bf16.gmra.mxu0 %v5813_v51  ;;  %v4671_v55 = vcombine.low %v5938_v50, %v1895_v11  ;;  %v4654_v51 = vcombine.low %v5891_v13, %v5949_v42  ;;  %v5982_v13 = vld [vmem:[%s5979_s7] sm:$0xf]  ;;  %v2282_v11 = vld [vmem:[%s5979_s7 + $0xc] sm:$0x1]  ;;  %v2537_v42 = vshrl.u32 %v5995_v14, 16 }
  0xd5   : > { %2428 = vmatpush1.bf16.msra.mxu1 %v5186_v22  ;;  %2199 = vmatpush1.bf16.msra.mxu0 %v5183_v31  ;;  %v5202_v50 = vld [vmem:[#allocation2 + $0x400] ss:$8 sps:$4 sm:$0xff]   ;;  %v4706_v21 = vcombine.low %v5982_v13, %v5985_v18  ;;  %v2509_v60 = vshrl.u32 %v5982_v13, 16  ;;  %v2512_v26 = vshll.u32 %v5982_v13, 16  ;;  %v2088_v31 = vrot.slane %v5958_v52, 5 }
  0xd6   : > { %2429 = vmatprep.subr.bf16.mxu1 %v5194_v3  ;;  %2200 = vmatprep.subr.bf16.mxu0 %v5191_v7  ;;  %v5238_v22 = vld [vmem:[#allocation4 + $0x130] ss:$8 sps:$4 sm:$0xff]   ;;  %v4746_v39 = vrot.slane %v5982_v13, 9  ;;  %v5246_v3 = vld [vmem:[#allocation4 + $0x124] ss:$8 sps:$4 sm:$0xff]   ;;  %v2540_v52 = vshll.u32 %v5995_v14, 16 }
  0xd7   : > { %1855 = vmatprep.mubr.bf16.mxu0 %v5539_v0  ;;  %2058 = vmatprep.mubr.bf16.mxu1 %v5539_v0  ;;  %v2511_v45 = vrot.slane %v2509_v60, 4  ;;  %v2514_v9 = vrot.slane %v2512_v26, 5  ;;  %v2280_v7 = vld [vmem:[%s5979_s7 + $0x4] sm:$0x1]  ;;  %v5265_v13 = vld [vmem:[#allocation4 + $0x274] ss:$8 sps:$4 sm:$0xff]  }
  0xd9   : > { %2430 = vmatpush1.bf16.msra.mxu1 %v5192_v8  ;;  %2201 = vmatpush1.bf16.msra.mxu0 %v5189_v2  ;;  %v2515_v28 = vor.u32 %v2514_v9, %v2511_v45  ;;  %v2529_v8 = vor.u32 %v2528_v57, %v2525_v49  ;;  %v2565_v45 = vshrl.u32 %v6011_v48, 16  ;;  %v5257_v49 = vld [vmem:[#allocation4 + $0x100] ss:$8 sps:$4 sm:$0xff]  }
  0xda   : > { %2431 = vmatprep.subr.bf16.mxu1 %v5201_v35  ;;  %2202 = vmatprep.subr.bf16.mxu0 %v5198_v12  ;;  %v5241_v35 = vld [vmem:[#allocation4 + $0xa0] ss:$8 sps:$4 sm:$0xff]  }
  0xdb   : > { %v6026_v2 = vrot.slane %v2515_v28, 4  ;;  %v5244_v12 = vld [vmem:[#allocation4 + $0x120] ss:$8 sps:$4 sm:$0xff]   ;;  %v4749_v28 = vrot.slane %v5998_v53, 9 }
  0xdc   : > { %2059 = vmatmul.mubr.bf16.gmra.mxu1 %v4671_v55  ;;  %1856 = vmatmul.mubr.bf16.gmra.mxu0 %v4654_v51  ;;  %v2551_v55 = vshrl.u32 %v5998_v53, 16  ;;  %v2554_v51 = vshll.u32 %v5998_v53, 16 }
  0xdd   : > { %2432 = vmatpush1.bf16.msra.mxu1 %v5199_v10  ;;  %2203 = vmatpush1.bf16.msra.mxu0 %v5196_v4  ;;  %v6036_v4 = vld [vmem:[%s5979_s7 + $0x30] sm:$0xf]  ;;  %v6039_v10 = vld [vmem:[%s5979_s7 + $0x38] sm:$0xf] }
  0xde   : > { %2433 = vmatprep.subr.bf16.mxu1 %v5207_v15  ;;  %2204 = vmatprep.subr.bf16.mxu0 %v5204_v16  ;;  %v4747_v15 = vrot.slane %v5985_v18, 9  ;;  %v2089_v16 = vsel %vm5827_vm5, %v4688_v25, %v2088_v31  ;;  %v2553_v60 = vrot.slane %v2551_v55, 4  ;;  %v2556_v26 = vrot.slane %v2554_v51, 5  ;;  %v5271_v55 = vld [vmem:[#allocation4 + $0x264] ss:$8 sps:$4 sm:$0xff]  }
  0xdf   : > { %2222 = vmatprep.mubr.bf16.mxu0 %v5539_v0  ;;  %2451 = vmatprep.mubr.bf16.mxu1 %v5539_v0  ;;  %v2567_v25 = vrot.slane %v2565_v45, 4 }
  0xe1   : > { %2434 = vmatpush1.bf16.msra.mxu1 %v5205_v32  ;;  %2205 = vmatpush1.bf16.msra.mxu0 %v5202_v50  ;;  %v5253_v32 = vld [vmem:[#allocation4 + $0x114] ss:$8 sps:$4 sm:$0xff]   ;;  %v2518_v50 = vshll.u32 %v2280_v7, 16 }
  0xe2   : > { %2975 = vmatprep.subr.bf16.mxu1 %v5214_v19  ;;  %2733 = vmatprep.subr.bf16.mxu0 %v5211_v20  ;;  %v2530_v19 = vrot.slane %v2529_v8, 4  ;;  %v2532_v20 = vshll.u32 %v2282_v11, 16 }
  0xe3   : > { %v2520_v9 = vrot.slane %v2518_v50, 5 }
  0xe4   : > { %2452 = vmatmul.mubr.bf16.vlgmr.msra.gmra.mxu1 %v4706_v21  ;;  %2223 = vmatmul.mubr.bf16.vlgmr.msra.gmra.mxu0 %v5862_v38  ;;  %v5225_v38 = vld [vmem:[#allocation4 + $0x150] ss:$8 sps:$4 sm:$0xff]   ;;  %v2539_v21 = vrot.slane %v2537_v42, 4  ;;  %v2534_v61 = vrot.slane %v2532_v20, 5  ;;  %v5268_v20 = vld [vmem:[#allocation4 + $0x1e4] ss:$8 sps:$4 sm:$0xff]  }
  0xe5   : > { %2976 = vmatpush1.bf16.msra.mxu1 %v5212_v24  ;;  %2734 = vmatpush1.bf16.msra.mxu0 %v5209_v23  ;;  %v2542_v23 = vrot.slane %v2540_v52, 5  ;;  %v6048_v24 = vcombine.low %v6036_v4, %v6039_v10  ;;  %v2521_v31 = vsel %vm5697_vm2, %v6026_v2, %v2520_v9  ;;  %v5260_v2 = vld [vmem:[#allocation4 + $0x1f0] ss:$8 sps:$4 sm:$0xff]  }
  0xe6   : > { %2977 = vmatprep.subr.bf16.mxu1 %v5220_v29  ;;  %2735 = vmatprep.subr.bf16.mxu0 %v5217_v6  ;;  %v5248_v29 = vld [vmem:[#allocation4 + $0x90] ss:$8 sps:$4 sm:$0xff]  }
  0xe7   : > { %2232 = vmatprep.mubr.bf16.mxu0 %v5539_v0  ;;  %2461 = vmatprep.mubr.bf16.mxu1 %v5539_v0  ;;  %v5251_v6 = vld [vmem:[#allocation4 + $0x110] ss:$8 sps:$4 sm:$0xff]  }
  0xe8   : > { %v5263_v52 = vld [vmem:[#allocation4 + $0x270] ss:$8 sps:$4 sm:$0xff]  }
  0xe9   : > { %2978 = vmatpush1.bf16.msra.mxu1 %v5218_v1  ;;  %2736 = vmatpush1.bf16.msra.mxu0 %v5215_v37  ;;  %v4689_v1 = vcombine.low %v5934_v5, %v2089_v16  ;;  %v5256_v37 = vld [vmem:[#allocation4 + $0x84] ss:$8 sps:$4 sm:$0xff]   ;;  %v5254_v5 = vld [vmem:[#allocation4 + $0x80] ss:$8 sps:$4 sm:$0xff]  }
  0xea   : > { %2979 = vmatprep.subr.bf16.mxu1 %v5227_v40  ;;  %2737 = vmatprep.subr.bf16.mxu0 %v5224_v41  ;;  %v5259_v40 = vld [vmem:[#allocation4 + $0x104] ss:$8 sps:$4 sm:$0xff]   ;;  %v2832_v41 = vrot.slane %v2280_v7, 5 }
  0xec   : > { %2462 = vmatmul.mubr.bf16.gmra.mxu1 %v6004_v44  ;;  %2233 = vmatmul.mubr.bf16.gmra.mxu0 %v5883_v56  ;;  %v6020_v56 = vcombine.low %v6011_v48, %v6014_v62  ;;  %v2833_v57 = vsel %vm5827_vm5, %v4746_v39, %v2832_v41  ;;  %v5262_v39 = vld [vmem:[#allocation4 + $0x1f4] ss:$8 sps:$4 sm:$0xff]  }
  0xed   : > { %2980 = vmatpush1.bf16.msra.mxu1 %v5225_v38  ;;  %2738 = vmatpush1.bf16.msra.mxu0 %v5222_v63  ;;  %v2836_v38 = vrot.slane %v2282_v11, 5  ;;  %v2284_v63 = vld [vmem:[%s5979_s7 + $0x14] sm:$0x1] }
  0xee   : > { %2981 = vmatprep.subr.bf16.mxu1 %v5233_v33  ;;  %2739 = vmatprep.subr.bf16.mxu0 %v5230_v43  ;;  %v2568_v33 = vshll.u32 %v6011_v48, 16  ;;  %v2579_v43 = vshrl.u32 %v6014_v62, 16  ;;  %v2840_v51 = vrot.slane %v2284_v63, 5 }
  0xef   : > { %2242 = vmatprep.mubr.bf16.mxu0 %v5539_v0  ;;  %2471 = vmatprep.mubr.bf16.mxu1 %v5539_v0 }
  0xf0   : > { %v2570_v7 = vrot.slane %v2568_v33, 5  ;;  %v2581_v8 = vrot.slane %v2579_v43, 4  ;;  %v2610_v33 = vshll.u32 %v6039_v10, 16 }
  0xf1   : > { %2982 = vmatpush1.bf16.msra.mxu1 %v5231_v34  ;;  %2740 = vmatpush1.bf16.msra.mxu0 %v5228_v54  ;;  %v2582_v34 = vshll.u32 %v6014_v62, 16  ;;  %v2543_v54 = vor.u32 %v2542_v23, %v2539_v21 }
  0xf2   : > { %2983 = vmatprep.subr.bf16.mxu1 %v5240_v36  ;;  %2741 = vmatprep.subr.bf16.mxu0 %v5237_v58  ;;  %v4748_v36 = vrot.slane %v5995_v14, 9  ;;  %v6066_v58 = vsel %vm5827_vm5, %v4747_v15, %v2836_v38  ;;  %v2844_v15 = vrot.slane %v2286_v46, 5  ;;  %v2571_v21 = vor.u32 %v2570_v7, %v2567_v25  ;;  %v5280_v25 = vld [vmem:[#allocation4 + $0x1c4] ss:$8 sps:$4 sm:$0xff]  }
  0xf3   : > { %v2584_v11 = vrot.slane %v2582_v34, 5  ;;  %v4754_v42 = vcombine.low %v2833_v57, %v6066_v58  ;;  %v2607_v38 = vshrl.u32 %v6039_v10, 16 }
  0xf4   : > { %2472 = vmatmul.mubr.bf16.gmra.mxu1 %v6020_v56  ;;  %2243 = vmatmul.mubr.bf16.gmra.mxu0 %v5907_v17  ;;  %v5250_v17 = vld [vmem:[#allocation4 + $0x94] ss:$8 sps:$4 sm:$0xff]   ;;  %v2572_v43 = vrot.slane %v2571_v21, 4  ;;  %v5284_v21 = vld [vmem:[#allocation4 + $0x1b0] ss:$8 sps:$4 sm:$0xff]  }
  0xf5   : > { %2984 = vmatpush1.bf16.msra.mxu1 %v5238_v22  ;;  %2742 = vmatpush1.bf16.msra.mxu0 %v5235_v30  ;;  %v2557_v30 = vor.u32 %v2556_v26, %v2553_v60  ;;  %v6073_v22 = vsel %vm5697_vm2, %v2530_v19, %v2534_v61  ;;  %v2288_v19 = vld [vmem:[%s5979_s7 + $0x24] sm:$0x1]  ;;  %v2585_v23 = vor.u32 %v2584_v11, %v2581_v8  ;;  %v2593_v60 = vshrl.u32 %v6036_v4, 16  ;;  %v5277_v61 = vld [vmem:[#allocation4 + $0x254] ss:$8 sps:$4 sm:$0xff]  }
  0xf6   : > { %2985 = vmatprep.subr.bf16.mxu1 %v5246_v3  ;;  %2743 = vmatprep.subr.bf16.mxu0 %v5243_v27  ;;  %v2546_v27 = vshll.u32 %v2284_v63, 16  ;;  %v2560_v3 = vshll.u32 %v2286_v46, 16  ;;  %v2596_v26 = vshll.u32 %v6036_v4, 16  ;;  %v2574_v41 = vshll.u32 %v2288_v19, 16  ;;  %v5274_v46 = vld [vmem:[#allocation4 + $0x1d4] ss:$8 sps:$4 sm:$0xff]  }
  0xf7   : > { %2252 = vmatprep.mubr.bf16.mxu0 %v5539_v0  ;;  %2481 = vmatprep.mubr.bf16.mxu1 %v5539_v0  ;;  %v2586_v34 = vrot.slane %v2585_v23, 4  ;;  %v2609_v7 = vrot.slane %v2607_v38, 4  ;;  %v2612_v8 = vrot.slane %v2610_v33, 5  ;;  %v2292_v11 = vld [vmem:[%s5979_s7 + $0x34] sm:$0x1] }
  0xf8   : > { %v2548_v16 = vrot.slane %v2546_v27, 5  ;;  %v2562_v50 = vrot.slane %v2560_v3, 5  ;;  %v2598_v57 = vrot.slane %v2596_v26, 5  ;;  %v5283_v3 = vld [vmem:[#allocation4 + $0x244] ss:$8 sps:$4 sm:$0xff]   ;;  %v2856_v26 = vrot.slane %v2292_v11, 5 }
  0xf9   : > { %2986 = vmatpush1.bf16.msra.mxu1 %v5244_v12  ;;  %2744 = vmatpush1.bf16.msra.mxu0 %v5241_v35  ;;  %v2544_v35 = vrot.slane %v2543_v54, 4  ;;  %v4726_v12 = vcombine.low %v2521_v31, %v6073_v22  ;;  %v5272_v54 = vld [vmem:[#allocation4 + $0x1d0] ss:$8 sps:$4 sm:$0xff]   ;;  %v2576_v31 = vrot.slane %v2574_v41, 5  ;;  %v5295_v38 = vld [vmem:[#allocation4 + $0x224] ss:$8 sps:$4 sm:$0xff]  }
  0xfa   : > { %2987 = vmatprep.subr.bf16.mxu1 %v5253_v32  ;;  %2745 = vmatprep.subr.bf16.mxu0 %v5250_v17  ;;  %v2558_v32 = vrot.slane %v2557_v30, 4  ;;  %v2290_v17 = vld [vmem:[%s5979_s7 + $0x2c] sm:$0x1]  ;;  %v5287_v23 = vld [vmem:[#allocation4 + $0x230] ss:$8 sps:$4 sm:$0xff]  }
  0xfb   : > { %v6095_v45 = vsel %vm5697_vm2, %v2544_v35, %v2548_v16  ;;  %v2588_v63 = vshll.u32 %v2290_v17, 16  ;;  %v2852_v27 = vrot.slane %v2290_v17, 5  ;;  %v5281_v35 = vld [vmem:[#allocation4 + $0x240] ss:$8 sps:$4 sm:$0xff]   ;;  %v5289_v16 = vld [vmem:[#allocation4 + $0x234] ss:$8 sps:$4 sm:$0xff]  }
  0xfc   : > { %2482 = vmatmul.mubr.bf16.gmra.mxu1 %v6048_v24  ;;  %2253 = vmatmul.mubr.bf16.gmra.mxu0 %v4689_v1  ;;  %v5269_v1 = vld [vmem:[#allocation4 + $0x260] ss:$8 sps:$4 sm:$0xff]   ;;  %v6099_v9 = vsel %vm5697_vm2, %v2558_v32, %v2562_v50  ;;  %v2602_v32 = vshll.u32 %v2292_v11, 16  ;;  %v2613_v50 = vor.u32 %v2612_v8, %v2609_v7  ;;  %v5304_v7 = vld [vmem:[#allocation4 + $0x184] ss:$8 sps:$4 sm:$0xff]  }
  0xfd   : > { %2988 = vmatpush1.bf16.msra.mxu1 %v5251_v6  ;;  %2746 = vmatpush1.bf16.msra.mxu0 %v5248_v29  ;;  %v4750_v29 = vrot.slane %v6011_v48, 9  ;;  %v5266_v6 = vld [vmem:[#allocation4 + $0x1e0] ss:$8 sps:$4 sm:$0xff]   ;;  %v6111_v30 = vcombine.low %v6095_v45, %v6099_v9 }
  0xfe   : > { %2989 = vmatprep.subr.bf16.mxu1 %v5259_v40  ;;  %2747 = vmatprep.subr.bf16.mxu0 %v5256_v37  ;;  %v6086_v37 = vsel %vm5827_vm5, %v4748_v36, %v2840_v51  ;;  %v6090_v40 = vsel %vm5827_vm5, %v4749_v28, %v2844_v15  ;;  %v5275_v36 = vld [vmem:[#allocation4 + $0x250] ss:$8 sps:$4 sm:$0xff]   ;;  %v2595_v28 = vrot.slane %v2593_v60, 4  ;;  %v5305_v8 = vld [vmem:[#allocation4 + $0x200] ss:$8 sps:$4 sm:$0xff]  }
  0xff   : > { %2765 = vmatprep.mubr.bf16.mxu0 %v5539_v0  ;;  %3007 = vmatprep.mubr.bf16.mxu1 %v5539_v0  ;;  %v5302_v11 = vld [vmem:[#allocation4 + $0x180] ss:$8 sps:$4 sm:$0xff]  }
 0x101   : > { %2990 = vmatpush1.bf16.msra.mxu1 %v5257_v49  ;;  %2748 = vmatpush1.bf16.msra.mxu0 %v5254_v5  ;;  %v4751_v5 = vrot.slane %v6014_v62, 9  ;;  %v6107_v49 = vcombine.low %v6086_v37, %v6090_v40 }
 0x102   : > { %3380 = vmatprep.subr.bf16.mxu1 %v5265_v13  ;;  %3171 = vmatprep.subr.bf16.mxu0 %v5262_v39  ;;  %v2848_v13 = vrot.slane %v2288_v19, 5  ;;  %v2590_v39 = vrot.slane %v2588_v63, 5  ;;  %v2614_v63 = vrot.slane %v2613_v50, 4  ;;  %v5309_v50 = vld [vmem:[#allocation4 + $0x2f0] ss:$8 sps:$4 sm:$0xff]  }
 0x103   : > { %v6127_v51 = vsel %vm5827_vm5, %v4751_v5, %v2852_v27  ;;  %v5299_v27 = vld [vmem:[#allocation4 + $0x210] ss:$8 sps:$4 sm:$0xff]  }
 0x104   : > { %3008 = vmatmul.mubr.bf16.vlgmr.msra.gmra.mxu1 %v4754_v42  ;;  %2766 = vmatmul.mubr.bf16.vlgmr.msra.gmra.mxu0 %v4726_v12  ;;  %v2294_v42 = vld [vmem:[%s5979_s7 + $0x3c] sm:$0x1]  ;;  %v6119_v12 = vsel %vm5697_vm2, %v2572_v43, %v2576_v31  ;;  %v6131_v15 = vsel %vm5697_vm2, %v2586_v34, %v2590_v39  ;;  %v5293_v43 = vld [vmem:[#allocation4 + $0x220] ss:$8 sps:$4 sm:$0xff]   ;;  %v5307_v39 = vld [vmem:[#allocation4 + $0x204] ss:$8 sps:$4 sm:$0xff]  }
 0x105   : > { %3381 = vmatpush1.bf16.msra.mxu1 %v5263_v52  ;;  %3172 = vmatpush1.bf16.msra.mxu0 %v5260_v2  ;;  %v5278_v2 = vld [vmem:[#allocation4 + $0x1c0] ss:$8 sps:$4 sm:$0xff]   ;;  %v2599_v52 = vor.u32 %v2598_v57, %v2595_v28  ;;  %v2616_v19 = vshll.u32 %v2294_v42, 16  ;;  %v6142_v60 = vcombine.low %v6119_v12, %v6131_v15  ;;  %v2860_v41 = vrot.slane %v2294_v42, 5  ;;  %v5301_v57 = vld [vmem:[#allocation4 + $0x214] ss:$8 sps:$4 sm:$0xff]  }
 0x106   : > { %3382 = vmatprep.subr.bf16.mxu1 %v5271_v55  ;;  %3173 = vmatprep.subr.bf16.mxu0 %v5268_v20  ;;  %v6123_v55 = vsel %vm5827_vm5, %v4750_v29, %v2848_v13  ;;  %v5286_v20 = vld [vmem:[#allocation4 + $0x1b4] ss:$8 sps:$4 sm:$0xff]  }
 0x107   : > { %2775 = vmatprep.mubr.bf16.mxu0 %v5539_v0  ;;  %3017 = vmatprep.mubr.bf16.mxu1 %v5539_v0  ;;  %v6137_v17 = vcombine.low %v6123_v55, %v6127_v51  ;;  %v2600_v29 = vrot.slane %v2599_v52, 4  ;;  %v2618_v33 = vrot.slane %v2616_v19, 5  ;;  %v5314_v42 = vld [vmem:[#allocation4 + $0x374] ss:$8 sps:$4 sm:$0xff]   ;;  %v4794_v52 = vcombine.low %v6073_v22, %v6095_v45  ;;  %v5320_v19 = vld [vmem:[#allocation4 + $0x364] ss:$8 sps:$4 sm:$0xff]  }
 0x108   : > { %v5318_v22 = vld [vmem:[#allocation4 + $0x360] ss:$8 sps:$4 sm:$0xff]  }
 0x109   : > { %3383 = vmatpush1.bf16.msra.mxu1 %v5269_v1  ;;  %3174 = vmatpush1.bf16.msra.mxu0 %v5266_v6  ;;  %v4752_v6 = vrot.slane %v6036_v4, 9  ;;  %v4753_v1 = vrot.slane %v6039_v10, 9  ;;  %v6161_v28 = vsel %vm5697_vm2, %v2614_v63, %v2618_v33  ;;  %v4795_v33 = vcombine.low %v6099_v9, %v6119_v12  ;;  %v5330_v9 = vld [vmem:[#allocation4 + $0x2c4] ss:$8 sps:$4 sm:$0xff]  }
 0x10a   : > { %3384 = vmatprep.subr.bf16.mxu1 %v5277_v61  ;;  %3175 = vmatprep.subr.bf16.mxu0 %v5274_v46  ;;  %v2604_v61 = vrot.slane %v2602_v32, 5  ;;  %v5292_v46 = vld [vmem:[#allocation4 + $0x1a4] ss:$8 sps:$4 sm:$0xff]   ;;  %v6182_v32 = vld [vmem:[%s5979_s7 + $0x40] sm:$0xf] }
 0x10b   : > { %v6149_v34 = vsel %vm5827_vm5, %v4752_v6, %v2856_v26  ;;  %v6153_v5 = vsel %vm5827_vm5, %v4753_v1, %v2860_v41  ;;  %v3261_v45 = vshrl.u32 %v6182_v32, 16  ;;  %v5315_v26 = vld [vmem:[#allocation4 + $0x2e0] ss:$8 sps:$4 sm:$0xff]   ;;  %v5327_v1 = vld [vmem:[#allocation4 + $0x354] ss:$8 sps:$4 sm:$0xff]  }
 0x10c   : > { %3018 = vmatmul.mubr.bf16.gmra.mxu1 %v6107_v49  ;;  %2776 = vmatmul.mubr.bf16.gmra.mxu0 %v6111_v30  ;;  %v6167_v31 = vcombine.low %v6149_v34, %v6153_v5 }
 0x10d   : > { %3385 = vmatpush1.bf16.msra.mxu1 %v5275_v36  ;;  %3176 = vmatpush1.bf16.msra.mxu0 %v5272_v54  ;;  %v5290_v54 = vld [vmem:[#allocation4 + $0x1a0] ss:$8 sps:$4 sm:$0xff]   ;;  %v6157_v36 = vsel %vm5697_vm2, %v2600_v29, %v2604_v61 }
 0x10e   : > { %3386 = vmatprep.subr.bf16.mxu1 %v5283_v3  ;;  %3177 = vmatprep.subr.bf16.mxu0 %v5280_v25  ;;  %v5298_v25 = vld [vmem:[#allocation4 + $0x194] ss:$8 sps:$4 sm:$0xff]   ;;  %v6171_v13 = vcombine.low %v6157_v36, %v6161_v28  ;;  %v5296_v3 = vld [vmem:[#allocation4 + $0x190] ss:$8 sps:$4 sm:$0xff]  }
 0x10f   : > { %2785 = vmatprep.mubr.bf16.mxu0 %v5539_v0  ;;  %3027 = vmatprep.mubr.bf16.mxu1 %v5539_v0 }
 0x111   : > { %3387 = vmatpush1.bf16.msra.mxu1 %v5281_v35  ;;  %3178 = vmatpush1.bf16.msra.mxu0 %v5278_v2  ;;  %v5311_v2 = vld [vmem:[#allocation4 + $0x2f4] ss:$8 sps:$4 sm:$0xff]   ;;  %v4774_v35 = vcombine.low %v5985_v18, %v5995_v14  ;;  %v3264_v18 = vshll.u32 %v6182_v32, 16 }
 0x112   : > { %3388 = vmatprep.subr.bf16.mxu1 %v5289_v16  ;;  %3179 = vmatprep.subr.bf16.mxu0 %v5286_v20  ;;  %v5312_v16 = vld [vmem:[#allocation4 + $0x370] ss:$8 sps:$4 sm:$0xff]   ;;  %v5317_v20 = vld [vmem:[#allocation4 + $0x2e4] ss:$8 sps:$4 sm:$0xff]  }
 0x114   : > { %3028 = vmatmul.mubr.bf16.gmra.mxu1 %v6137_v17  ;;  %2786 = vmatmul.mubr.bf16.gmra.mxu0 %v6142_v60 }
 0x115   : > { %3389 = vmatpush1.bf16.msra.mxu1 %v5287_v23  ;;  %3180 = vmatpush1.bf16.msra.mxu0 %v5284_v21 }
 0x116   : > { %3390 = vmatprep.subr.bf16.mxu1 %v5295_v38  ;;  %3181 = vmatprep.subr.bf16.mxu0 %v5292_v46  ;;  %v5324_v38 = vld [vmem:[#allocation4 + $0x2d4] ss:$8 sps:$4 sm:$0xff]  }
 0x117   : > { %2795 = vmatprep.mubr.bf16.mxu0 %v5539_v0  ;;  %3037 = vmatprep.mubr.bf16.mxu1 %v5539_v0 }
 0x119   : > { %3391 = vmatpush1.bf16.msra.mxu1 %v5293_v43  ;;  %3182 = vmatpush1.bf16.msra.mxu0 %v5290_v54  ;;  %v4775_v43 = vcombine.low %v5998_v53, %v6011_v48  ;;  %v5325_v54 = vld [vmem:[#allocation4 + $0x350] ss:$8 sps:$4 sm:$0xff]   ;;  %v5331_v53 = vld [vmem:[#allocation4 + $0x340] ss:$8 sps:$4 sm:$0xff]  }
 0x11a   : > { %3392 = vmatprep.subr.bf16.mxu1 %v5301_v57  ;;  %3183 = vmatprep.subr.bf16.mxu0 %v5298_v25  ;;  %v3263_v57 = vrot.slane %v3261_v45, 4  ;;  %v3266_v25 = vrot.slane %v3264_v18, 5  ;;  %v4796_v45 = vcombine.low %v6131_v15, %v6157_v36 }
 0x11c   : > { %3038 = vmatmul.mubr.bf16.gmra.mxu1 %v6167_v31  ;;  %2796 = vmatmul.mubr.bf16.gmra.mxu0 %v6171_v13  ;;  %v3267_v48 = vor.u32 %v3266_v25, %v3263_v57  ;;  %v5344_v57 = vld [vmem:[#allocation4 + $0x320] ss:$8 sps:$4 sm:$0xff]  }
 0x11d   : > { %3393 = vmatpush1.bf16.msra.mxu1 %v5299_v27  ;;  %3184 = vmatpush1.bf16.msra.mxu0 %v5296_v3  ;;  %v6199_v27 = vld [vmem:[%s5979_s7 + $0x44] sm:$0x1] }
 0x11e   : > { %3394 = vmatprep.subr.bf16.mxu1 %v5307_v39  ;;  %3185 = vmatprep.subr.bf16.mxu0 %v5304_v7  ;;  %v5322_v7 = vld [vmem:[#allocation4 + $0x2d0] ss:$8 sps:$4 sm:$0xff]  }
 0x11f   : > { %3203 = vmatprep.mubr.bf16.mxu0 %v5539_v0  ;;  %3412 = vmatprep.mubr.bf16.mxu1 %v5539_v0 }
 0x121   : > { %3395 = vmatpush1.bf16.msra.mxu1 %v5305_v8  ;;  %3186 = vmatpush1.bf16.msra.mxu0 %v5302_v11  ;;  %v5333_v8 = vld [vmem:[#allocation4 + $0x344] ss:$8 sps:$4 sm:$0xff]  }
 0x122   : > { %3770 = vmatprep.subr.bf16.mxu1 %v5314_v42  ;;  %3580 = vmatprep.subr.bf16.mxu0 %v5311_v2 }
 0x124   : > { %v626_v21 = vpop.f32.mrf.mxu0  ;;  %v803_v23 = vpop.f32.mrf.mxu1  ;;  %3413 = vmatmul.mubr.bf16.vlgmr.msra.gmra.mxu1 %v4794_v52  ;;  %3204 = vmatmul.mubr.bf16.vlgmr.msra.gmra.mxu0 %v4774_v35  ;;  %v3270_v52 = vshll.u32 %v6199_v27, 16 }
 0x125   : > { %v6184_v29 = vadd.f32 %v803_v23, %v626_v21  ;;  %3771 = vmatpush1.bf16.msra.mxu1 %v5312_v16  ;;  %3581 = vmatpush1.bf16.msra.mxu0 %v5309_v50  ;;  %v5328_v50 = vld [vmem:[#allocation4 + $0x2c0] ss:$8 sps:$4 sm:$0xff]   ;;  %v5337_v21 = vld [vmem:[#allocation4 + $0x2b4] ss:$8 sps:$4 sm:$0xff]  }
 0x126   : > { %v628_v14 = vpop.f32.mrf.mxu0  ;;  %v805_v6 = vpop.f32.mrf.mxu1  ;;  %3772 = vmatprep.subr.bf16.mxu1 %v5320_v19  ;;  %3582 = vmatprep.subr.bf16.mxu0 %v5317_v20  ;;  %v5340_v19 = vld [vmem:[#allocation4 + $0x334] ss:$8 sps:$4 sm:$0xff]  }
 0x127   : > { %v6188_v41 = vadd.f32 %v805_v6, %v628_v14  ;;  %3213 = vmatprep.mubr.bf16.mxu0 %v5539_v0  ;;  %3422 = vmatprep.mubr.bf16.mxu1 %v5539_v0  ;;  %v4776_v14 = vcombine.low %v6014_v62, %v6036_v4  ;;  %v5338_v6 = vld [vmem:[#allocation4 + $0x330] ss:$8 sps:$4 sm:$0xff]  }
 0x128   : > { %v630_v61 = vpop.f32.mrf.mxu0  ;;  %v807_v63 = vpop.f32.mrf.mxu1 }
 0x129   : > { %v6194_v46 = vadd.f32 %v807_v63, %v630_v61  ;;  %3773 = vmatpush1.bf16.msra.mxu1 %v5318_v22  ;;  %3583 = vmatpush1.bf16.msra.mxu0 %v5315_v26  ;;  %v3268_v26 = vrot.slane %v3267_v48, 4  ;;  %v5335_v63 = vld [vmem:[#allocation4 + $0x2b0] ss:$8 sps:$4 sm:$0xff]   ;;  %v4777_v48 = vcombine.low %v6039_v10, %v6182_v32 }
 0x12a   : > { %v632_v3 = vpop.f32.mrf.mxu0  ;;  %v809_v39 = vpop.f32.mrf.mxu1  ;;  %3774 = vmatprep.subr.bf16.mxu1 %v5327_v1  ;;  %3584 = vmatprep.subr.bf16.mxu0 %v5324_v38  ;;  %v3272_v1 = vrot.slane %v3270_v52, 5  ;;  %v5351_v52 = vld [vmem:[#allocation4 + $0x310] ss:$8 sps:$4 sm:$0xff]  }
 0x12b   : > { %v6201_v11 = vadd.f32 %v809_v39, %v632_v3  ;;  %v5341_v3 = vld [vmem:[#allocation4 + $0x2a0] ss:$8 sps:$4 sm:$0xff]   ;;  %v5353_v39 = vld [vmem:[#allocation4 + $0x314] ss:$8 sps:$4 sm:$0xff]  }
 0x12c   : > { %v636_v12 = vpop.f32.mrf.mxu0  ;;  %v813_v42 = vpop.f32.mrf.mxu1  ;;  %3423 = vmatmul.mubr.bf16.gmra.mxu1 %v4795_v33  ;;  %3214 = vmatmul.mubr.bf16.gmra.mxu0 %v4775_v43  ;;  %v5346_v33 = vld [vmem:[#allocation4 + $0x324] ss:$8 sps:$4 sm:$0xff]   ;;  %v6220_v62 = vsel %vm5697_vm2, %v3268_v26, %v3272_v1  ;;  %v5354_v26 = vld [vmem:[#allocation4 + $0x280] ss:$8 sps:$4 sm:$0xff]   ;;  %v5365_v1 = vld [vmem:[#allocation4 + $0x474] ss:$8 sps:$4 sm:$0xff]  }
 0x12d   : > { %v6203_v2 = vadd.f32 %v813_v42, %v636_v12  ;;  %3775 = vmatpush1.bf16.msra.mxu1 %v5325_v54  ;;  %3585 = vmatpush1.bf16.msra.mxu0 %v5322_v7  ;;  %v5343_v54 = vld [vmem:[#allocation4 + $0x2a4] ss:$8 sps:$4 sm:$0xff]   ;;  %v4797_v42 = vcombine.low %v6161_v28, %v6220_v62 }
 0x12e   : > { %v638_v35 = vpop.f32.mrf.mxu0  ;;  %v815_v16 = vpop.f32.mrf.mxu1  ;;  %3776 = vmatprep.subr.bf16.mxu1 %v5333_v8  ;;  %3586 = vmatprep.subr.bf16.mxu0 %v5330_v9  ;;  %v5350_v8 = vld [vmem:[#allocation4 + $0x294] ss:$8 sps:$4 sm:$0xff]  }
 0x12f   : > { %v6206_v20 = vadd.f32 %v815_v16, %v638_v35  ;;  %3223 = vmatprep.mubr.bf16.mxu0 %v5539_v0  ;;  %3432 = vmatprep.mubr.bf16.mxu1 %v5539_v0 }
 0x130   : > { %v640_v23 = vpop.f32.mrf.mxu0  ;;  %v817_v22 = vpop.f32.mrf.mxu1 }
 0x131   : > { %v6212_v18 = vadd.f32 %v817_v22, %v640_v23  ;;  %3777 = vmatpush1.bf16.msra.mxu1 %v5331_v53  ;;  %3587 = vmatpush1.bf16.msra.mxu0 %v5328_v50  ;;  %v5348_v50 = vld [vmem:[#allocation4 + $0x290] ss:$8 sps:$4 sm:$0xff]   ;;  %v5356_v23 = vld [vmem:[#allocation4 + $0x284] ss:$8 sps:$4 sm:$0xff]  }
 0x132   : > { %v642_v38 = vpop.f32.mrf.mxu0  ;;  %v819_v61 = vpop.f32.mrf.mxu1  ;;  %3778 = vmatprep.subr.bf16.mxu1 %v5340_v19  ;;  %3588 = vmatprep.subr.bf16.mxu0 %v5337_v21  ;;  %v5359_v19 = vld [vmem:[#allocation4 + $0x304] ss:$8 sps:$4 sm:$0xff]  }
 0x133   : > { %v6216_v43 = vadd.f32 %v819_v61, %v642_v38  ;;  %v5362_v61 = vld [vmem:[#allocation4 + $0x3f4] ss:$8 sps:$4 sm:$0xff]  }
 0x134   : > { %v823_v15 = vpop.f32.mrf.mxu1  ;;  %3433 = vmatmul.mubr.bf16.gmra.mxu1 %v4796_v45  ;;  %v646_v36 = vpop.f32.mrf.mxu0  ;;  %3224 = vmatmul.mubr.bf16.gmra.mxu0 %v4776_v14  ;;  %v5357_v14 = vld [vmem:[#allocation4 + $0x300] ss:$8 sps:$4 sm:$0xff]  }
 0x135   : > { %3779 = vmatpush1.bf16.msra.mxu1 %v5338_v6  ;;  %v6222_v4 = vadd.f32 %v823_v15, %v646_v36  ;;  %3589 = vmatpush1.bf16.msra.mxu0 %v5335_v63  ;;  %v5363_v36 = vld [vmem:[#allocation4 + $0x470] ss:$8 sps:$4 sm:$0xff]  }
 0x136   : > { %v825_v25 = vpop.f32.mrf.mxu1  ;;  %3780 = vmatprep.subr.bf16.mxu1 %v5346_v33  ;;  %v648_v7 = vpop.f32.mrf.mxu0  ;;  %3590 = vmatprep.subr.bf16.mxu0 %v5343_v54  ;;  %v4815_v54 = vcombine.low %v6066_v58, %v6086_v37  ;;  %v5369_v58 = vld [vmem:[#allocation4 + $0x460] ss:$8 sps:$4 sm:$0xff]  }
 0x137   : > { %3233 = vmatprep.mubr.bf16.mxu0 %v5539_v0  ;;  %v6225_v9 = vadd.f32 %v825_v25, %v648_v7  ;;  %3442 = vmatprep.mubr.bf16.mxu1 %v5539_v0 }
 0x138   : > { %v827_v12 = vpop.f32.mrf.mxu1  ;;  %v650_v53 = vpop.f32.mrf.mxu0 }
 0x139   : > { %3781 = vmatpush1.bf16.msra.mxu1 %v5344_v57  ;;  %v6232_v35 = vadd.f32 %v827_v12, %v650_v53  ;;  %3591 = vmatpush1.bf16.msra.mxu0 %v5341_v3  ;;  %v5360_v3 = vld [vmem:[#allocation4 + $0x3f0] ss:$8 sps:$4 sm:$0xff]  }
 0x13a   : > { %v829_v16 = vpop.f32.mrf.mxu1  ;;  %3782 = vmatprep.subr.bf16.mxu1 %v5353_v39  ;;  %v652_v21 = vpop.f32.mrf.mxu0  ;;  %3592 = vmatprep.subr.bf16.mxu0 %v5350_v8  ;;  %v5371_v39 = vld [vmem:[#allocation4 + $0x464] ss:$8 sps:$4 sm:$0xff]  }
 0x13b   : > { %v6234_v22 = vadd.f32 %v829_v16, %v652_v21  ;;  %v5368_v8 = vld [vmem:[#allocation4 + $0x3e4] ss:$8 sps:$4 sm:$0xff]   ;;  %v5377_v16 = vld [vmem:[#allocation4 + $0x454] ss:$8 sps:$4 sm:$0xff]  }
 0x13c   : > { %v833_v45 = vpop.f32.mrf.mxu1  ;;  %3443 = vmatmul.mubr.bf16.gmra.mxu1 %v4797_v42  ;;  %v656_v28 = vpop.f32.mrf.mxu0  ;;  %3234 = vmatmul.mubr.bf16.gmra.mxu0 %v4777_v48 }
 0x13d   : > { %3783 = vmatpush1.bf16.msra.mxu1 %v5351_v52  ;;  %v6236_v10 = vadd.f32 %v833_v45, %v656_v28  ;;  %3593 = vmatpush1.bf16.msra.mxu0 %v5348_v50  ;;  %v5366_v52 = vld [vmem:[#allocation4 + $0x3e0] ss:$8 sps:$4 sm:$0xff]   ;;  %v5375_v28 = vld [vmem:[#allocation4 + $0x450] ss:$8 sps:$4 sm:$0xff]  }
 0x13e   : > { %v835_v6 = vpop.f32.mrf.mxu1  ;;  %3784 = vmatprep.subr.bf16.mxu1 %v5359_v19  ;;  %v658_v38 = vpop.f32.mrf.mxu0  ;;  %3594 = vmatprep.subr.bf16.mxu0 %v5356_v23  ;;  %v5374_v19 = vld [vmem:[#allocation4 + $0x3d4] ss:$8 sps:$4 sm:$0xff]  }
 0x13f   : > { %3612 = vmatprep.mubr.bf16.mxu0 %v5539_v0  ;;  %v6239_v63 = vadd.f32 %v835_v6, %v658_v38  ;;  %3802 = vmatprep.mubr.bf16.mxu1 %v5539_v0  ;;  %v5383_v38 = vld [vmem:[#allocation4 + $0x444] ss:$8 sps:$4 sm:$0xff]  }
 0x140   : > { %v837_v33 = vpop.f32.mrf.mxu1  ;;  %v660_v15 = vpop.f32.mrf.mxu0 }
 0x141   : > { %3785 = vmatpush1.bf16.msra.mxu1 %v5357_v14  ;;  %v6244_v57 = vadd.f32 %v837_v33, %v660_v15  ;;  %3595 = vmatpush1.bf16.msra.mxu0 %v5354_v26  ;;  %v5381_v15 = vld [vmem:[#allocation4 + $0x440] ss:$8 sps:$4 sm:$0xff]  }
 0x142   : > { %v839_v25 = vpop.f32.mrf.mxu1  ;;  %4167 = vmatprep.subr.bf16.mxu1 %v5365_v1  ;;  %v662_v7 = vpop.f32.mrf.mxu0  ;;  %3973 = vmatprep.subr.bf16.mxu0 %v5362_v61  ;;  %v5372_v1 = vld [vmem:[#allocation4 + $0x3d0] ss:$8 sps:$4 sm:$0xff]  }
 0x143   : > { %v6246_v12 = vadd.f32 %v839_v25, %v662_v7 }
 0x144   : > { %v1228_v42 = vpop.f32.mrf.mxu1  ;;  %3803 = vmatmul.mubr.bf16.vlgmr.msra.gmra.mxu1 %v6004_v44  ;;  %v1032_v53 = vpop.f32.mrf.mxu0  ;;  %3613 = vmatmul.mubr.bf16.vlgmr.msra.gmra.mxu0 %v4815_v54 }
 0x145   : > { %4168 = vmatpush1.bf16.msra.mxu1 %v5363_v36  ;;  %v1071_v37 = vadd.f32 %v1032_v53, %v6184_v29  ;;  %3974 = vmatpush1.bf16.msra.mxu0 %v5360_v3  ;;  %v4816_v29 = vcombine.low %v6090_v40, %v6123_v55  ;;  %v5378_v3 = vld [vmem:[#allocation4 + $0x3c0] ss:$8 sps:$4 sm:$0xff]  }
 0x146   : > { %v1230_v48 = vpop.f32.mrf.mxu1  ;;  %4169 = vmatprep.subr.bf16.mxu1 %v5371_v39  ;;  %v1034_v50 = vpop.f32.mrf.mxu0  ;;  %3975 = vmatprep.subr.bf16.mxu0 %v5368_v8  ;;  %v5389_v39 = vld [vmem:[#allocation4 + $0x434] ss:$8 sps:$4 sm:$0xff]  }
 0x147   : > { %3622 = vmatprep.mubr.bf16.mxu0 %v5539_v0  ;;  %v6251_v21 = vadd.f32 %v1228_v42, %v1071_v37  ;;  %v1072_v44 = vadd.f32 %v1034_v50, %v6188_v41  ;;  %3812 = vmatprep.mubr.bf16.mxu1 %v5539_v0  ;;  %v5380_v41 = vld [vmem:[#allocation4 + $0x3c4] ss:$8 sps:$4 sm:$0xff]   ;;  %v4814_v37 = vrot.slane %v6182_v32, 9  ;;  %v5384_v50 = vld [vmem:[#allocation4 + $0x3b0] ss:$8 sps:$4 sm:$0xff]  }
 0x148   : > { %v1232_v23 = vpop.f32.mrf.mxu1  ;;  %v1036_v45 = vpop.f32.mrf.mxu0 }
 0x149   : > { %4170 = vmatpush1.bf16.msra.mxu1 %v5369_v58  ;;  %v6257_v14 = vadd.f32 %v1230_v48, %v1072_v44  ;;  %v1073_v6 = vadd.f32 %v1036_v45, %v6194_v46  ;;  %3976 = vmatpush1.bf16.msra.mxu0 %v5366_v52  ;;  %v5387_v58 = vld [vmem:[#allocation4 + $0x430] ss:$8 sps:$4 sm:$0xff]   ;;  %v3472_v48 = vrot.slane %v6199_v27, 5  ;;  %v6284_v27 = vld [vmem:[%s5979_s7 + $0x48] sm:$0xf] }
 0x14a   : > { %v1234_v26 = vpop.f32.mrf.mxu1  ;;  %4171 = vmatprep.subr.bf16.mxu1 %v5377_v16  ;;  %v1038_v61 = vpop.f32.mrf.mxu0  ;;  %3977 = vmatprep.subr.bf16.mxu0 %v5374_v19  ;;  %v5395_v19 = vld [vmem:[#allocation4 + $0x424] ss:$8 sps:$4 sm:$0xff]  }
 0x14b   : > { %v6260_v33 = vadd.f32 %v1232_v23, %v1073_v6  ;;  %v1074_v54 = vadd.f32 %v1038_v61, %v6201_v11  ;;  %v5386_v11 = vld [vmem:[#allocation4 + $0x3b4] ss:$8 sps:$4 sm:$0xff]  }
 0x14c   : > { %v1238_v40 = vpop.f32.mrf.mxu1  ;;  %3813 = vmatmul.mubr.bf16.gmra.mxu1 %v6020_v56  ;;  %v1042_v55 = vpop.f32.mrf.mxu0  ;;  %3623 = vmatmul.mubr.bf16.gmra.mxu0 %v4816_v29  ;;  %v5399_v61 = vld [vmem:[#allocation4 + $0x394] ss:$8 sps:$4 sm:$0xff]  }
 0x14d   : > { %4172 = vmatpush1.bf16.msra.mxu1 %v5375_v28  ;;  %v6264_v46 = vadd.f32 %v1234_v26, %v1074_v54  ;;  %v1075_v36 = vadd.f32 %v1042_v55, %v6203_v2  ;;  %3978 = vmatpush1.bf16.msra.mxu0 %v5372_v1  ;;  %v4817_v2 = vcombine.low %v6127_v51, %v6149_v34  ;;  %v5392_v51 = vld [vmem:[#allocation4 + $0x3a4] ss:$8 sps:$4 sm:$0xff]  }
 0x14e   : > { %v1240_v25 = vpop.f32.mrf.mxu1  ;;  %4173 = vmatprep.subr.bf16.mxu1 %v5383_v38  ;;  %v1044_v7 = vpop.f32.mrf.mxu0  ;;  %3979 = vmatprep.subr.bf16.mxu0 %v5380_v41  ;;  %v6288_v28 = vsel %vm5827_vm5, %v4814_v37, %v3472_v48  ;;  %v5402_v38 = vld [vmem:[#allocation4 + $0x414] ss:$8 sps:$4 sm:$0xff]   ;;  %v5403_v48 = vld [vmem:[#allocation4 + $0x380] ss:$8 sps:$4 sm:$0xff]  }
 0x14f   : > { %3632 = vmatprep.mubr.bf16.mxu0 %v5539_v0  ;;  %v6268_v8 = vadd.f32 %v1238_v40, %v1075_v36  ;;  %v1076_v56 = vadd.f32 %v1044_v7, %v6206_v20  ;;  %3822 = vmatprep.mubr.bf16.mxu1 %v5539_v0  ;;  %v4818_v55 = vcombine.low %v6153_v5, %v6288_v28  ;;  %v5400_v36 = vld [vmem:[#allocation4 + $0x410] ss:$8 sps:$4 sm:$0xff]  }
 0x150   : > { %v1242_v42 = vpop.f32.mrf.mxu1  ;;  %v1046_v53 = vpop.f32.mrf.mxu0  ;;  %v5397_v7 = vld [vmem:[#allocation4 + $0x390] ss:$8 sps:$4 sm:$0xff]  }
 0x151   : > { %4174 = vmatpush1.bf16.msra.mxu1 %v5381_v15  ;;  %v6276_v52 = vadd.f32 %v1240_v25, %v1076_v56  ;;  %v1077_v16 = vadd.f32 %v1046_v53, %v6212_v18  ;;  %3980 = vmatpush1.bf16.msra.mxu0 %v5378_v3  ;;  %v5393_v18 = vld [vmem:[#allocation4 + $0x420] ss:$8 sps:$4 sm:$0xff]   ;;  %v5405_v56 = vld [vmem:[#allocation4 + $0x384] ss:$8 sps:$4 sm:$0xff]  }
 0x152   : > { %v1244_v20 = vpop.f32.mrf.mxu1  ;;  %4175 = vmatprep.subr.bf16.mxu1 %v5389_v39  ;;  %v1048_v44 = vpop.f32.mrf.mxu0  ;;  %3981 = vmatprep.subr.bf16.mxu0 %v5386_v11  ;;  %v5406_v53 = vld [vmem:[#allocation4 + $0x400] ss:$8 sps:$4 sm:$0xff]  }
 0x153   : > { %v6279_v34 = vadd.f32 %v1242_v42, %v1077_v16  ;;  %v1078_v23 = vadd.f32 %v1048_v44, %v6216_v43  ;;  %v5390_v43 = vld [vmem:[#allocation4 + $0x3a0] ss:$8 sps:$4 sm:$0xff]  }
 0x154   : > { %v1248_v29 = vpop.f32.mrf.mxu1  ;;  %3823 = vmatmul.mubr.bf16.gmra.mxu1 %v6048_v24  ;;  %v1052_v45 = vpop.f32.mrf.mxu0  ;;  %3633 = vmatmul.mubr.bf16.gmra.mxu0 %v4817_v2 }
 0x155   : > { %4176 = vmatpush1.bf16.msra.mxu1 %v5387_v58  ;;  %v6290_v6 = vadd.f32 %v1244_v20, %v1078_v23  ;;  %v1079_v26 = vadd.f32 %v1052_v45, %v6222_v4  ;;  %3982 = vmatpush1.bf16.msra.mxu0 %v5384_v50  ;;  %v4835_v4 = vcombine.low %v6182_v32, %v6284_v27 }
 0x156   : > { %v1250_v1 = vpop.f32.mrf.mxu1  ;;  %4177 = vmatprep.subr.bf16.mxu1 %v5395_v19  ;;  %v1054_v24 = vpop.f32.mrf.mxu0  ;;  %3983 = vmatprep.subr.bf16.mxu0 %v5392_v51 }
 0x157   : > { %3642 = vmatprep.mubr.bf16.mxu0 %v5539_v0  ;;  %v6294_v41 = vadd.f32 %v1248_v29, %v1079_v26  ;;  %v1080_v54 = vadd.f32 %v1054_v24, %v6225_v9  ;;  %3832 = vmatprep.mubr.bf16.mxu1 %v5539_v0  ;;  %v5408_v9 = vld [vmem:[#allocation4 + $0x404] ss:$8 sps:$4 sm:$0xff]   ;;  %v3860_v26 = vshrl.u32 %v6284_v27, 16 }
 0x158   : > { %v1252_v40 = vpop.f32.mrf.mxu1  ;;  %v1056_v15 = vpop.f32.mrf.mxu0 }
 0x159   : > { %4178 = vmatpush1.bf16.msra.mxu1 %v5393_v18  ;;  %v6302_v25 = vadd.f32 %v1250_v1, %v1080_v54  ;;  %v1081_v3 = vadd.f32 %v1056_v15, %v6232_v35  ;;  %3984 = vmatpush1.bf16.msra.mxu0 %v5390_v43  ;;  %v3862_v54 = vrot.slane %v3860_v26, 4 }
 0x15a   : > { %v1254_v39 = vpop.f32.mrf.mxu1  ;;  %4179 = vmatprep.subr.bf16.mxu1 %v5402_v38  ;;  %v1058_v11 = vpop.f32.mrf.mxu0  ;;  %3985 = vmatprep.subr.bf16.mxu0 %v5399_v61 }
 0x15b   : > { %v6305_v42 = vadd.f32 %v1252_v40, %v1081_v3  ;;  %v1082_v32 = vadd.f32 %v1058_v11, %v6234_v22 }
 0x15c   : > { %v1258_v5 = vpop.f32.mrf.mxu1  ;;  %3833 = vmatmul.mubr.bf16.gmra.mxu1 %v4835_v4  ;;  %v1062_v2 = vpop.f32.mrf.mxu0  ;;  %3643 = vmatmul.mubr.bf16.gmra.mxu0 %v4818_v55 }
 0x15d   : > { %4180 = vmatpush1.bf16.msra.mxu1 %v5400_v36  ;;  %v6308_v58 = vadd.f32 %v1254_v39, %v1082_v32  ;;  %v1083_v35 = vadd.f32 %v1062_v2, %v6236_v10  ;;  %3986 = vmatpush1.bf16.msra.mxu0 %v5397_v7  ;;  %v2298_v36 = vld [vmem:[%s5979_s7 + $0x4c] sm:$0x1] }
 0x15e   : > { %v1260_v37 = vpop.f32.mrf.mxu1  ;;  %4181 = vmatprep.subr.bf16.mxu1 %v5408_v9  ;;  %v1064_v16 = vpop.f32.mrf.mxu0  ;;  %3987 = vmatprep.subr.bf16.mxu0 %v5405_v56  ;;  %v3869_v11 = vshll.u32 %v2298_v36, 16 }
 0x15f   : > { %4005 = vmatprep.mubr.bf16.mxu0 %v5539_v0  ;;  %v6312_v20 = vadd.f32 %v1258_v5, %v1083_v35  ;;  %v1084_v22 = vadd.f32 %v1064_v16, %v6239_v63  ;;  %4199 = vmatprep.mubr.bf16.mxu1 %v5539_v0  ;;  %v4065_v35 = vrot.slane %v2298_v36, 5 }
 0x160   : > { %v1262_v50 = vpop.f32.mrf.mxu1  ;;  %v1066_v19 = vpop.f32.mrf.mxu0 }
 0x161   : > { %4182 = vmatpush1.bf16.msra.mxu1 %v5406_v53  ;;  %v6316_v44 = vadd.f32 %v1260_v37, %v1084_v22  ;;  %v1085_v10 = vadd.f32 %v1066_v19, %v6244_v57  ;;  %3988 = vmatpush1.bf16.msra.mxu0 %v5403_v48  ;;  %v3863_v57 = vshll.u32 %v6284_v27, 16  ;;  %v3871_v48 = vrot.slane %v3869_v11, 5 }
 0x162   : > { %v1264_v51 = vpop.f32.mrf.mxu1  ;;  %v1068_v23 = vpop.f32.mrf.mxu0 }
 0x163   : > { %v6319_v29 = vadd.f32 %v1262_v50, %v1085_v10  ;;  %v1086_v45 = vadd.f32 %v1068_v23, %v6246_v12  ;;  %v3865_v40 = vrot.slane %v3863_v57, 5 }
 0x164   : > { %v1637_v18 = vpop.f32.mrf.mxu1  ;;  %4200 = vmatmul.mubr.bf16.vlgmr.msra.gmra.mxu1 %v6107_v49  ;;  %v1437_v63 = vpop.f32.mrf.mxu0  ;;  %4006 = vmatmul.mubr.bf16.vlgmr.msra.gmra.mxu0 %v6111_v30 }
 0x165   : > { %4209 = vmatprep.mubr.bf16.mxu1 %v5539_v0  ;;  %v6327_v1 = vadd.f32 %v1264_v51, %v1086_v45  ;;  %v1476_v43 = vadd.f32 %v1437_v63, %v6251_v21  ;;  %4015 = vmatprep.mubr.bf16.mxu0 %v5539_v0 }
 0x166   : > { %v1639_v38 = vpop.f32.mrf.mxu1  ;;  %v1439_v12 = vpop.f32.mrf.mxu0 }
 0x167   : > { %v6331_v24 = vadd.f32 %v1637_v18, %v1476_v43  ;;  %v1477_v49 = vadd.f32 %v1439_v12, %v6257_v14  ;;  %v3866_v14 = vor.u32 %v3865_v40, %v3862_v54 }
 0x168   : > { %v1641_v30 = vpop.f32.mrf.mxu1  ;;  %v1441_v61 = vpop.f32.mrf.mxu0 }
 0x169   : > { %v6334_v4 = vadd.f32 %v1639_v38, %v1477_v49  ;;  %v1478_v55 = vadd.f32 %v1441_v61, %v6260_v33  ;;  %v3867_v37 = vrot.slane %v3866_v14, 4 }
 0x16a   : > { %v1643_v15 = vpop.f32.mrf.mxu1  ;;  %v1443_v3 = vpop.f32.mrf.mxu0 }
 0x16b   : > { %v6338_v21 = vadd.f32 %v1641_v30, %v1478_v55  ;;  %v1479_v39 = vadd.f32 %v1443_v3, %v6264_v46 }
 0x16c   : > { %v1647_v7 = vpop.f32.mrf.mxu1  ;;  %4210 = vmatmul.mubr.bf16.gmra.mxu1 %v6137_v17  ;;  %v1447_v9 = vpop.f32.mrf.mxu0  ;;  %4016 = vmatmul.mubr.bf16.gmra.mxu0 %v6142_v60  ;;  %v4869_v60 = vrot.slane %v6284_v27, 9 }
 0x16d   : > { %4219 = vmatprep.mubr.bf16.mxu1 %v5539_v0  ;;  %v6344_v56 = vadd.f32 %v1643_v15, %v1479_v39  ;;  %v1480_v33 = vadd.f32 %v1447_v9, %v6268_v8  ;;  %4025 = vmatprep.mubr.bf16.mxu0 %v5539_v0 }
 0x16e   : > { %v1649_v32 = vpop.f32.mrf.mxu1  ;;  %v1449_v5 = vpop.f32.mrf.mxu0  ;;  %v4066_v27 = vsel %vm5827_vm5, %v4869_v60, %v4065_v35 }
 0x16f   : > { %v6348_v2 = vadd.f32 %v1647_v7, %v1480_v33  ;;  %v1481_v46 = vadd.f32 %v1449_v5, %v6276_v52  ;;  %v4870_v26 = vcombine.low %v6288_v28, %v4066_v27 }
 0x170   : > { %v1651_v17 = vpop.f32.mrf.mxu1  ;;  %v1451_v53 = vpop.f32.mrf.mxu0 }
 0x171   : > { %v6352_v16 = vadd.f32 %v1649_v32, %v1481_v46  ;;  %v1482_v22 = vadd.f32 %v1451_v53, %v6279_v34  ;;  %v3872_v34 = vsel %vm5697_vm2, %v3867_v37, %v3871_v48 }
 0x172   : > { %v1653_v8 = vpop.f32.mrf.mxu1  ;;  %v1453_v50 = vpop.f32.mrf.mxu0  ;;  %v4852_v59 = vcombine.low %v6220_v62, %v3872_v34 }
 0x173   : > { %v6355_v19 = vadd.f32 %v1651_v17, %v1482_v22  ;;  %v1483_v10 = vadd.f32 %v1453_v50, %v6290_v6 }
 0x174   : > { %v1657_v51 = vpop.f32.mrf.mxu1  ;;  %4220 = vmatmul.mubr.bf16.gmra.mxu1 %v6167_v31  ;;  %v1457_v52 = vpop.f32.mrf.mxu0  ;;  %4026 = vmatmul.mubr.bf16.gmra.mxu0 %v6171_v13 }
 0x175   : > { %4229 = vmatprep.mubr.bf16.mxu1 %v5539_v0  ;;  %v6365_v23 = vadd.f32 %v1653_v8, %v1483_v10  ;;  %v1484_v45 = vadd.f32 %v1457_v52, %v6294_v41  ;;  %4035 = vmatprep.mubr.bf16.mxu0 %v5539_v0 }
 0x176   : > { %v1659_v18 = vpop.f32.mrf.mxu1  ;;  %v1459_v6 = vpop.f32.mrf.mxu0 }
 0x177   : > { %v6369_v31 = vadd.f32 %v1657_v51, %v1484_v45  ;;  %v1485_v13 = vadd.f32 %v1459_v6, %v6302_v25 }
 0x178   : > { %v1661_v63 = vpop.f32.mrf.mxu1  ;;  %v1461_v57 = vpop.f32.mrf.mxu0 }
 0x179   : > { %v6374_v47 = vadd.f32 %v1659_v18, %v1485_v13  ;;  %v1486_v43 = vadd.f32 %v1461_v57, %v6305_v42 }
 0x17a   : > { %v1663_v38 = vpop.f32.mrf.mxu1  ;;  %v1463_v41 = vpop.f32.mrf.mxu0 }
 0x17b   : > { %v6377_v12 = vadd.f32 %v1661_v63, %v1486_v43  ;;  %v1487_v0 = vadd.f32 %v1463_v41, %v6308_v58 }
 0x17c   : > { %v1667_v49 = vpop.f32.mrf.mxu1  ;;  %4230 = vmatmul.mubr.bf16.gmra.mxu1 %v4870_v26  ;;  %v1467_v30 = vpop.f32.mrf.mxu0  ;;  %4036 = vmatmul.mubr.bf16.gmra.mxu0 %v4852_v59 }
 0x17d   : > { %v1687_v25 = vadd.f32 %v1663_v38, %v1487_v0  ;;  %v1488_v28 = vadd.f32 %v1467_v30, %v6312_v20 }
 0x17e   : > { %v1669_v61 = vpop.f32.mrf.mxu1  ;;  %v1469_v62 = vpop.f32.mrf.mxu0 }
 0x17f   : > { %v1688_v54 = vadd.f32 %v1667_v49, %v1488_v28  ;;  %v1489_v40 = vadd.f32 %v1469_v62, %v6316_v44 }
 0x180   : > { %v1671_v55 = vpop.f32.mrf.mxu1  ;;  %v1471_v42 = vpop.f32.mrf.mxu0 }
 0x181   : > { %v1689_v15 = vadd.f32 %v1669_v61, %v1489_v40  ;;  %v1490_v36 = vadd.f32 %v1471_v42, %v6319_v29 }
 0x182   : > { %v1673_v3 = vpop.f32.mrf.mxu1  ;;  %v1473_v39 = vpop.f32.mrf.mxu0 }
 0x183   : > { %v1690_v58 = vadd.f32 %v1671_v55, %v1490_v36  ;;  %v1491_v7 = vadd.f32 %v1473_v39, %v6327_v1 }
 0x184   : > { %v2030_v9 = vpop.f32.mrf.mxu1  ;;  %v1827_v14 = vpop.f32.mrf.mxu0 }
 0x185   : > { %v1691_v11 = vadd.f32 %v1673_v3, %v1491_v7  ;;  %v1866_v20 = vadd.f32 %v1827_v14, %v6331_v24 }
 0x186   : > { %v2032_v33 = vpop.f32.mrf.mxu1  ;;  %v1829_v32 = vpop.f32.mrf.mxu0 }
 0x187   : > { %v2069_v5 = vadd.f32 %v2030_v9, %v1866_v20  ;;  %v1867_v44 = vadd.f32 %v1829_v32, %v6334_v4 }
 0x188   : > { %v2034_v46 = vpop.f32.mrf.mxu1  ;;  %v1831_v17 = vpop.f32.mrf.mxu0 }
 0x189   : > { %v2070_v53 = vadd.f32 %v2032_v33, %v1867_v44  ;;  %v1868_v29 = vadd.f32 %v1831_v17, %v6338_v21 }
 0x18a   : > { %v2036_v60 = vpop.f32.mrf.mxu1  ;;  %v1833_v35 = vpop.f32.mrf.mxu0 }
 0x18b   : > { %v2071_v37 = vadd.f32 %v2034_v46, %v1868_v29  ;;  %v1869_v1 = vadd.f32 %v1833_v35, %v6344_v56 }
 0x18c   : > { %v2040_v48 = vpop.f32.mrf.mxu1  ;;  %v1837_v22 = vpop.f32.mrf.mxu0 }
 0x18d   : > { %v2072_v8 = vadd.f32 %v2036_v60, %v1869_v1  ;;  %v1870_v24 = vadd.f32 %v1837_v22, %v6348_v2 }
 0x18e   : > { %v2042_v50 = vpop.f32.mrf.mxu1  ;;  %v1839_v10 = vpop.f32.mrf.mxu0 }
 0x18f   : > { %v2073_v51 = vadd.f32 %v2040_v48, %v1870_v24  ;;  %v1871_v4 = vadd.f32 %v1839_v10, %v6352_v16 }
 0x190   : > { %v2044_v52 = vpop.f32.mrf.mxu1  ;;  %v1841_v27 = vpop.f32.mrf.mxu0 }
 0x191   : > { %v2074_v34 = vadd.f32 %v2042_v50, %v1871_v4  ;;  %v1872_v21 = vadd.f32 %v1841_v27, %v6355_v19 }
 0x192   : > { %v2046_v45 = vpop.f32.mrf.mxu1  ;;  %v1843_v18 = vpop.f32.mrf.mxu0 }
 0x193   : > { %v2075_v6 = vadd.f32 %v2044_v52, %v1872_v21  ;;  %v1873_v56 = vadd.f32 %v1843_v18, %v6365_v23 }
 0x194   : > { %v2050_v13 = vpop.f32.mrf.mxu1  ;;  %v1847_v63 = vpop.f32.mrf.mxu0 }
 0x195   : > { %v2076_v26 = vadd.f32 %v2046_v45, %v1873_v56  ;;  %v1874_v2 = vadd.f32 %v1847_v63, %v6369_v31 }
 0x196   : > { %v2052_v59 = vpop.f32.mrf.mxu1  ;;  %v1849_v57 = vpop.f32.mrf.mxu0 }
 0x197   : > { %v2077_v43 = vadd.f32 %v2050_v13, %v1874_v2  ;;  %v1875_v16 = vadd.f32 %v1849_v57, %v6374_v47 }
 0x198   : > { %v2054_v38 = vpop.f32.mrf.mxu1  ;;  %v1851_v41 = vpop.f32.mrf.mxu0 }
 0x199   : > { %v2078_v0 = vadd.f32 %v2052_v59, %v1875_v16  ;;  %v1876_v19 = vadd.f32 %v1851_v41, %v6377_v12 }
 0x19a   : > { %v2056_v49 = vpop.f32.mrf.mxu1  ;;  %v1853_v30 = vpop.f32.mrf.mxu0 }
 0x19b   : > { %v2079_v28 = vadd.f32 %v2054_v38, %v1876_v19  ;;  %v1877_v61 = vadd.f32 %v1853_v30, %v1687_v25 }
 0x19c   : > { %v2060_v23 = vpop.f32.mrf.mxu1  ;;  %v1857_v62 = vpop.f32.mrf.mxu0 }
 0x19d   : > { %v2080_v40 = vadd.f32 %v2056_v49, %v1877_v61  ;;  %v1878_v55 = vadd.f32 %v1857_v62, %v1688_v54 }
 0x19e   : > { %v2062_v42 = vpop.f32.mrf.mxu1  ;;  %v1859_v31 = vpop.f32.mrf.mxu0 }
 0x19f   : > { %v2081_v36 = vadd.f32 %v2060_v23, %v1878_v55  ;;  %v1879_v3 = vadd.f32 %v1859_v31, %v1689_v15 }
 0x1a0   : > { %v2064_v39 = vpop.f32.mrf.mxu1  ;;  %v1861_v7 = vpop.f32.mrf.mxu0 }
 0x1a1   : > { %v2082_v47 = vadd.f32 %v2062_v42, %v1879_v3  ;;  %v1880_v9 = vadd.f32 %v1861_v7, %v1690_v58 }
 0x1a2   : > { %v2066_v14 = vpop.f32.mrf.mxu1  ;;  %v1863_v20 = vpop.f32.mrf.mxu0 }
 0x1a3   : > { %v2083_v33 = vadd.f32 %v2064_v39, %v1880_v9  ;;  %v1881_v12 = vadd.f32 %v1863_v20, %v1691_v11 }
 0x1a4   : > { %v2453_v32 = vpop.f32.mrf.mxu1  ;;  %v2224_v44 = vpop.f32.mrf.mxu0 }
 0x1a5   : > { %v2084_v46 = vadd.f32 %v2066_v14, %v1881_v12  ;;  %v2263_v25 = vadd.f32 %v2224_v44, %v2069_v5 }
 0x1a6   : > { %v2455_v17 = vpop.f32.mrf.mxu1  ;;  %v2226_v29 = vpop.f32.mrf.mxu0 }
 0x1a7   : > { %v2492_v60 = vadd.f32 %v2453_v32, %v2263_v25  ;;  %v2264_v54 = vadd.f32 %v2226_v29, %v2070_v53 }
 0x1a8   : > { %v2457_v35 = vpop.f32.mrf.mxu1  ;;  %v2228_v1 = vpop.f32.mrf.mxu0 }
 0x1a9   : > { %v2493_v48 = vadd.f32 %v2455_v17, %v2264_v54  ;;  %v2265_v15 = vadd.f32 %v2228_v1, %v2071_v37 }
 0x1aa   : > { %v2459_v22 = vpop.f32.mrf.mxu1  ;;  %v2230_v24 = vpop.f32.mrf.mxu0 }
 0x1ab   : > { %v2494_v50 = vadd.f32 %v2457_v35, %v2265_v15  ;;  %v2266_v58 = vadd.f32 %v2230_v24, %v2072_v8 }
 0x1ac   : > { %v2463_v10 = vpop.f32.mrf.mxu1  ;;  %v2234_v4 = vpop.f32.mrf.mxu0 }
 0x1ad   : > { %v2495_v52 = vadd.f32 %v2459_v22, %v2266_v58  ;;  %v2267_v11 = vadd.f32 %v2234_v4, %v2073_v51 }
 0x1ae   : > { %v2465_v27 = vpop.f32.mrf.mxu1  ;;  %v2236_v21 = vpop.f32.mrf.mxu0 }
 0x1af   : > { %v2496_v45 = vadd.f32 %v2463_v10, %v2267_v11  ;;  %v2268_v5 = vadd.f32 %v2236_v21, %v2074_v34 }
 0x1b0   : > { %v2467_v18 = vpop.f32.mrf.mxu1  ;;  %v2238_v56 = vpop.f32.mrf.mxu0 }
 0x1b1   : > { %v2497_v13 = vadd.f32 %v2465_v27, %v2268_v5  ;;  %v2269_v53 = vadd.f32 %v2238_v56, %v2075_v6 }
 0x1b2   : > { %v2469_v63 = vpop.f32.mrf.mxu1  ;;  %v2240_v2 = vpop.f32.mrf.mxu0 }
 0x1b3   : > { %v2498_v59 = vadd.f32 %v2467_v18, %v2269_v53  ;;  %v2270_v37 = vadd.f32 %v2240_v2, %v2076_v26 }
 0x1b4   : > { %v2473_v57 = vpop.f32.mrf.mxu1  ;;  %v2244_v16 = vpop.f32.mrf.mxu0 }
 0x1b5   : > { %v2499_v38 = vadd.f32 %v2469_v63, %v2270_v37  ;;  %v2271_v8 = vadd.f32 %v2244_v16, %v2077_v43 }
 0x1b6   : > { %v2475_v41 = vpop.f32.mrf.mxu1  ;;  %v2246_v19 = vpop.f32.mrf.mxu0 }
 0x1b7   : > { %v2500_v49 = vadd.f32 %v2473_v57, %v2271_v8  ;;  %v2272_v51 = vadd.f32 %v2246_v19, %v2078_v0 }
 0x1b8   : > { %v2477_v30 = vpop.f32.mrf.mxu1  ;;  %v2248_v61 = vpop.f32.mrf.mxu0 }
 0x1b9   : > { %v2501_v23 = vadd.f32 %v2475_v41, %v2272_v51  ;;  %v2273_v34 = vadd.f32 %v2248_v61, %v2079_v28 }
 0x1ba   : > { %v2479_v62 = vpop.f32.mrf.mxu1  ;;  %v2250_v55 = vpop.f32.mrf.mxu0 }
 0x1bb   : > { %v2502_v42 = vadd.f32 %v2477_v30, %v2273_v34  ;;  %v2274_v6 = vadd.f32 %v2250_v55, %v2080_v40 }
 0x1bc   : > { %v2483_v31 = vpop.f32.mrf.mxu1  ;;  %v2254_v3 = vpop.f32.mrf.mxu0 }
 0x1bd   : > { %v2503_v39 = vadd.f32 %v2479_v62, %v2274_v6  ;;  %v2275_v26 = vadd.f32 %v2254_v3, %v2081_v36 }
 0x1be   : > { %v2485_v7 = vpop.f32.mrf.mxu1  ;;  %v2256_v9 = vpop.f32.mrf.mxu0 }
 0x1bf   : > { %v2504_v14 = vadd.f32 %v2483_v31, %v2275_v26  ;;  %v2276_v43 = vadd.f32 %v2256_v9, %v2082_v47 }
 0x1c0   : > { %v2487_v20 = vpop.f32.mrf.mxu1  ;;  %v2258_v12 = vpop.f32.mrf.mxu0 }
 0x1c1   : > { %v2505_v32 = vadd.f32 %v2485_v7, %v2276_v43  ;;  %v2277_v0 = vadd.f32 %v2258_v12, %v2083_v33 }
 0x1c2   : > { %v2489_v44 = vpop.f32.mrf.mxu1  ;;  %v2260_v25 = vpop.f32.mrf.mxu0 }
 0x1c3   : > { %v2506_v17 = vadd.f32 %v2487_v20, %v2277_v0  ;;  %v2278_v28 = vadd.f32 %v2260_v25, %v2084_v46 }
 0x1c4   : > { %v3009_v29 = vpop.f32.mrf.mxu1  ;;  %v2767_v54 = vpop.f32.mrf.mxu0 }
 0x1c5   : > { %v2507_v35 = vadd.f32 %v2489_v44, %v2278_v28  ;;  %v2806_v40 = vadd.f32 %v2767_v54, %v2492_v60 }
 0x1c6   : > { %v3011_v1 = vpop.f32.mrf.mxu1  ;;  %v2769_v15 = vpop.f32.mrf.mxu0 }
 0x1c7   : > { %v6395_v22 = vadd.f32 %v3009_v29, %v2806_v40  ;;  %v2807_v36 = vadd.f32 %v2769_v15, %v2493_v48 }
 0x1c8   : > { %v3013_v24 = vpop.f32.mrf.mxu1  ;;  %v2771_v58 = vpop.f32.mrf.mxu0 }
 0x1c9   : > { %v6397_v47 = vadd.f32 %v3011_v1, %v2807_v36  ;;  %v2808_v10 = vadd.f32 %v2771_v58, %v2494_v50 }
 0x1ca   : > { %v3015_v4 = vpop.f32.mrf.mxu1  ;;  %v2773_v33 = vpop.f32.mrf.mxu0 }
 0x1cb   : > { %v6399_v11 = vadd.f32 %v3013_v24, %v2808_v10  ;;  %v2809_v27 = vadd.f32 %v2773_v33, %v2495_v52 }
 0x1cc   : > { %v3019_v46 = vpop.f32.mrf.mxu1  ;;  %v2777_v21 = vpop.f32.mrf.mxu0 }
 0x1cd   : > { %v6401_v5 = vadd.f32 %v3015_v4, %v2809_v27  ;;  %v2810_v60 = vadd.f32 %v2777_v21, %v2496_v45 }
 0x1ce   : > { %v3021_v18 = vpop.f32.mrf.mxu1  ;;  %v2779_v56 = vpop.f32.mrf.mxu0 }
 0x1cf   : > { %v6403_v53 = vadd.f32 %v3019_v46, %v2810_v60  ;;  %v2811_v48 = vadd.f32 %v2779_v56, %v2497_v13 }
 0x1d0   : > { %v3023_v63 = vpop.f32.mrf.mxu1  ;;  %v2781_v2 = vpop.f32.mrf.mxu0 }
 0x1d1   : > { %v6405_v37 = vadd.f32 %v3021_v18, %v2811_v48  ;;  %v2812_v50 = vadd.f32 %v2781_v2, %v2498_v59 }
 0x1d2   : > { %v3025_v57 = vpop.f32.mrf.mxu1  ;;  %v2783_v16 = vpop.f32.mrf.mxu0 }
 0x1d3   : > { %v6407_v8 = vadd.f32 %v3023_v63, %v2812_v50  ;;  %v2813_v52 = vadd.f32 %v2783_v16, %v2499_v38 }
 0x1d4   : > { %v3029_v41 = vpop.f32.mrf.mxu1  ;;  %v2787_v19 = vpop.f32.mrf.mxu0 }
 0x1d5   : > { %v6409_v51 = vadd.f32 %v3025_v57, %v2813_v52  ;;  %v2814_v45 = vadd.f32 %v2787_v19, %v2500_v49 }
 0x1d6   : > { %v3031_v30 = vpop.f32.mrf.mxu1  ;;  %v2789_v61 = vpop.f32.mrf.mxu0 }
 0x1d7   : > { %v6411_v34 = vadd.f32 %v3029_v41, %v2814_v45  ;;  %v2815_v13 = vadd.f32 %v2789_v61, %v2501_v23 }
 0x1d8   : > { %v3033_v62 = vpop.f32.mrf.mxu1  ;;  %v2791_v55 = vpop.f32.mrf.mxu0 }
 0x1d9   : > { %v6413_v6 = vadd.f32 %v3031_v30, %v2815_v13  ;;  %v2816_v59 = vadd.f32 %v2791_v55, %v2502_v42 }
 0x1da   : > { %v3035_v31 = vpop.f32.mrf.mxu1  ;;  %v2793_v3 = vpop.f32.mrf.mxu0 }
 0x1db   : > { %v6415_v26 = vadd.f32 %v3033_v62, %v2816_v59  ;;  %v2817_v38 = vadd.f32 %v2793_v3, %v2503_v39 }
 0x1dc   : > { %v3039_v7 = vpop.f32.mrf.mxu1  ;;  %v2797_v9 = vpop.f32.mrf.mxu0 }
 0x1dd   : > { %v6417_v43 = vadd.f32 %v3035_v31, %v2817_v38  ;;  %v2818_v49 = vadd.f32 %v2797_v9, %v2504_v14 }
 0x1de   : > { %v3041_v20 = vpop.f32.mrf.mxu1  ;;  %v2799_v12 = vpop.f32.mrf.mxu0 }
 0x1df   : > { %v6419_v0 = vadd.f32 %v3039_v7, %v2818_v49  ;;  %v2819_v23 = vadd.f32 %v2799_v12, %v2505_v32 }
 0x1e0   : > { %v3043_v44 = vpop.f32.mrf.mxu1  ;;  %v2801_v25 = vpop.f32.mrf.mxu0 }
 0x1e1   : > { %v6421_v28 = vadd.f32 %v3041_v20, %v2819_v23  ;;  %v2820_v42 = vadd.f32 %v2801_v25, %v2506_v17 }
 0x1e2   : > { %v3045_v29 = vpop.f32.mrf.mxu1  ;;  %v2803_v54 = vpop.f32.mrf.mxu0 }
 0x1e3   : > { %v6423_v40 = vadd.f32 %v3043_v44, %v2820_v42  ;;  %v2821_v39 = vadd.f32 %v2803_v54, %v2507_v35 }
 0x1e4   : > { %v6425_v1 = vpop.f32.mrf.mxu1  ;;  %v3205_v15 = vpop.f32.mrf.mxu0 }
 0x1e5   : > { %v6427_v36 = vadd.f32 %v3045_v29, %v2821_v39 }
 0x1e6   : > { %v6429_v14 = vpop.f32.mrf.mxu1  ;;  %v3207_v24 = vpop.f32.mrf.mxu0 }
 0x1e7   : > { %6678 = vst [vmem:[#allocation12_spill] sm:$0xff] %v6427_v36 }
 0x1e8   : > { %v6431_v58 = vpop.f32.mrf.mxu1  ;;  %v3209_v32 = vpop.f32.mrf.mxu0 }
 0x1ea   : > { %v6433_v10 = vpop.f32.mrf.mxu1  ;;  %v3211_v4 = vpop.f32.mrf.mxu0 }
 0x1ec   : > { %v6435_v17 = vpop.f32.mrf.mxu1  ;;  %v6437_v33 = vpop.f32.mrf.mxu0 }
 0x1ee   : > { %v6439_v27 = vpop.f32.mrf.mxu1  ;;  %v6441_v35 = vpop.f32.mrf.mxu0 }
 0x1f0   : > { %v6443_v46 = vpop.f32.mrf.mxu1  ;;  %v6445_v21 = vpop.f32.mrf.mxu0 }
 0x1f2   : > { %v6447_v60 = vpop.f32.mrf.mxu1  ;;  %v6449_v18 = vpop.f32.mrf.mxu0 }
 0x1f4   : > { %v6451_v56 = vpop.f32.mrf.mxu1  ;;  %v6453_v48 = vpop.f32.mrf.mxu0 }
 0x1f6   : > { %v6455_v63 = vpop.f32.mrf.mxu1  ;;  %v6457_v2 = vpop.f32.mrf.mxu0 }
 0x1f8   : > { %v6459_v50 = vpop.f32.mrf.mxu1  ;;  %v6461_v57 = vpop.f32.mrf.mxu0 }
 0x1fa   : > { %v6463_v16 = vpop.f32.mrf.mxu1  ;;  %v6465_v52 = vpop.f32.mrf.mxu0 }
 0x1fc   : > { %v6467_v41 = vpop.f32.mrf.mxu1  ;;  %v6469_v19 = vpop.f32.mrf.mxu0 }
 0x1fe   : > { %v6471_v45 = vpop.f32.mrf.mxu1  ;;  %v6473_v30 = vpop.f32.mrf.mxu0 }
 0x1ff   : > { %6679 = vst [vmem:[#allocation13_spill] sm:$0xff] %v6471_v45  ;;  %v4258_v45 = vlaneseq }
 0x200   : > { %v6475_v61 = vpop.f32.mrf.mxu1  ;;  %v6477_v13 = vpop.f32.mrf.mxu0 }
 0x201   : > { %6680 = vst [vmem:[#allocation14_spill] sm:$0xff] %v6475_v61  ;;  %6681 = vst [vmem:[#allocation15_spill] sm:$0xff] %v6477_v13 }
 0x202   : > { %v6479_v62 = vpop.f32.mrf.mxu1  ;;  %v6481_v55 = vpop.f32.mrf.mxu0 }
 0x203   : > { %6682 = vst [vmem:[#allocation16_spill] sm:$0xff] %v6479_v62  ;;  %6683 = vst [vmem:[#allocation17_spill] sm:$0xff] %v6481_v55 }
 0x204   : > { %v3804_v59 = vpop.f32.mrf.mxu1  ;;  %v3614_v31 = vpop.f32.mrf.mxu0 }
 0x206   : > { %v3806_v3 = vpop.f32.mrf.mxu1  ;;  %v3616_v38 = vpop.f32.mrf.mxu0 }
 0x208   : > { %v6483_v7 = vpop.f32.mrf.mxu1  ;;  %v3618_v9 = vpop.f32.mrf.mxu0 }
 0x20a   : > { %v6485_v49 = vpop.f32.mrf.mxu1  ;;  %v3620_v20 = vpop.f32.mrf.mxu0 }
 0x20c   : > { %v6487_v12 = vpop.f32.mrf.mxu1  ;;  %v6489_v23 = vpop.f32.mrf.mxu0 }
 0x20d   : > { %6684 = vst [vmem:[#allocation18_spill] sm:$0xff] %v6487_v12 }
 0x20e   : > { %v6491_v44 = vpop.f32.mrf.mxu1  ;;  %v6493_v25 = vpop.f32.mrf.mxu0 }
 0x20f   : > { %6685 = vst [vmem:[#allocation19_spill] sm:$0xff] %v6491_v44 }
 0x210   : > { %v6495_v42 = vpop.f32.mrf.mxu1  ;;  %v6497_v29 = vpop.f32.mrf.mxu0 }
 0x211   : > { %6686 = vst [vmem:[#allocation20_spill] sm:$0xff] %v6495_v42  ;;  %6687 = vst [vmem:[#allocation21_spill] sm:$0xff] %v6497_v29  ;;  %v3244_v42 = vadd.f32 %v3205_v15, %v6395_v22 }
 0x212   : > { %v6499_v54 = vpop.f32.mrf.mxu1  ;;  %v6501_v39 = vpop.f32.mrf.mxu0 }
 0x213   : > { %6688 = vst [vmem:[#allocation22_spill] sm:$0xff] %v6499_v54  ;;  %6689 = vst [vmem:[#allocation23_spill] sm:$0xff] %v6501_v39  ;;  %v4259_v39 = vshrl.u32 %v4258_v45, 7  ;;  %v3247_v45 = vadd.f32 %v3211_v4, %v6401_v5  ;;  %v3250_v5 = vadd.f32 %v6445_v21, %v6407_v8  ;;  %v3252_v8 = vadd.f32 %v6453_v48, %v6411_v34 }
 0x214   : > { %v6503_v62 = vpop.f32.mrf.mxu1  ;;  %v6505_v55 = vpop.f32.mrf.mxu0  ;;  %v3253_v21 = vadd.f32 %v6457_v2, %v6413_v6  ;;  %v3255_v34 = vadd.f32 %v6465_v52, %v6417_v43  ;;  %v3256_v6 = vadd.f32 %v6469_v19, %v6419_v0 }
 0x215   : > { %6690 = vst [vmem:[#allocation24_spill] sm:$0xff] %v6503_v62  ;;  %6691 = vst [vmem:[#allocation25_spill] sm:$0xff] %v6505_v55  ;;  %v3245_v62 = vadd.f32 %v3207_v24, %v6397_v47  ;;  %v4260_v22 = vsub.s32 0, %v4259_v39  ;;  %v4264_v15 = vsub.s32 1, %v4259_v39  ;;  %v4256_v24 = vld [vmem:[#allocation6] sm:$0x3] }
 0x216   : > { %v6507_v36 = vpop.f32.mrf.mxu1  ;;  %v6509_v61 = vpop.f32.mrf.mxu0 }
 0x217   : > { %6692 = vst [vmem:[#allocation26_spill] sm:$0xff] %v6507_v36  ;;  %6693 = vst [vmem:[#allocation27_spill] sm:$0xff] %v6509_v61  ;;  %v3453_v36 = vadd.f32 %v6425_v1, %v3244_v42  ;;  %v3246_v61 = vadd.f32 %v3209_v32, %v6399_v11  ;;  %v3248_v1 = vadd.f32 %v6437_v33, %v6403_v53 }
 0x218   : > { %v6511_v44 = vpop.f32.mrf.mxu1  ;;  %v6513_v12 = vpop.f32.mrf.mxu0  ;;  %v3249_v32 = vadd.f32 %v6441_v35, %v6405_v37  ;;  %v6552_v53 = vrot.slane %v4256_v24, %v4264_v15  ;;  %v3456_v33 = vadd.f32 %v6433_v10, %v3247_v45 }
 0x219   : > { %6694 = vst [vmem:[#allocation28_spill] sm:$0xff] %v6511_v44  ;;  %6695 = vst [vmem:[#allocation29_spill] sm:$0xff] %v6513_v12  ;;  %v3455_v11 = vadd.f32 %v6431_v58, %v3246_v61  ;;  %v3251_v58 = vadd.f32 %v6449_v18, %v6409_v51  ;;  %v3459_v18 = vadd.f32 %v6443_v46, %v3250_v5 }
 0x21a   : > { %v6516_v29 = vpop.f32.mrf.mxu1  ;;  %v6518_v54 = vpop.f32.mrf.mxu0  ;;  %v3462_v46 = vadd.f32 %v6455_v63, %v3253_v21  ;;  %v3257_v63 = vadd.f32 %v6473_v30, %v6421_v28 }
 0x21b   : > { %6696 = vst [vmem:[#allocation30_spill] sm:$0xff] %v6516_v29  ;;  %6697 = vst [vmem:[#allocation31_spill] sm:$0xff] %v6518_v54  ;;  %v3454_v29 = vadd.f32 %v6429_v14, %v3245_v62  ;;  %v3653_v54 = vadd.f32 %v3614_v31, %v3453_v36  ;;  %v6548_v14 = vrot.slane %v4256_v24, %v4260_v22 }
 0x21c   : > { %v6521_v13 = vpop.f32.mrf.mxu1  ;;  %v6523_v55 = vpop.f32.mrf.mxu0  ;;  %v3655_v35 = vadd.f32 %v3618_v9, %v3455_v11  ;;  %v3457_v62 = vadd.f32 %v6435_v17, %v3248_v1  ;;  %v3254_v17 = vadd.f32 %v6461_v57, %v6415_v26  ;;  %v3460_v2 = vadd.f32 %v6447_v60, %v3251_v58  ;;  %v6700_v11 = vld [vmem:[#allocation15_spill] sm:$0xff] }
 0x21d   : > { %6698 = vst [vmem:[#allocation32_spill] sm:$0xff] %v6521_v13  ;;  %v4284_v13 = vld [vmem:[#allocation7] sm:$0x3]  ;;  %v3654_v39 = vadd.f32 %v3616_v38, %v3454_v29  ;;  %v3843_v37 = vadd.f32 %v3804_v59, %v3653_v54  ;;  %v3458_v29 = vadd.f32 %v6439_v27, %v3249_v32  ;;  %v3461_v9 = vadd.f32 %v6451_v56, %v3252_v8  ;;  %v6701_v32 = vld [vmem:[#allocation18_spill] sm:$0xff]  ;;  %v6705_v8 = vld [vmem:[#allocation13_spill] sm:$0xff] }
 0x21e   : > { %v6527_v44 = vpop.f32.mrf.mxu1  ;;  %v6529_v12 = vpop.f32.mrf.mxu0  ;;  %v6550_v4 = vrot.slane %v4284_v13, %v4260_v22  ;;  %v6562_v38 = vrot.slane %v4284_v13, %v4264_v15  ;;  %v3656_v22 = vadd.f32 %v3620_v20, %v3456_v33  ;;  %v3845_v27 = vadd.f32 %v6483_v7, %v3655_v35 }
 0x21f   : > { %6699 = vst [vmem:[#allocation33_spill] sm:$0xff] %v6527_v44  ;;  %v3844_v10 = vadd.f32 %v3806_v3, %v3654_v39  ;;  %v3657_v26 = vadd.f32 %v6489_v23, %v3457_v62  ;;  %v3658_v57 = vadd.f32 %v6493_v25, %v3458_v29  ;;  %v3463_v7 = vadd.f32 %v6459_v50, %v3254_v17 }
 0x220   : > { %v6533_v47 = vpop.f32.mrf.mxu1  ;;  %v6537_v42 = vpop.f32.mrf.mxu0  ;;  %v3846_v52 = vadd.f32 %v6485_v49, %v3656_v22  ;;  %v3464_v54 = vadd.f32 %v6463_v16, %v3255_v34  ;;  %v6583_v56 = vadd.f32 %v6467_v41, %v3256_v6  ;;  %v3258_v50 = vadd.f32 %v6700_v11, %v6423_v40  ;;  %v6702_v16 = vld [vmem:[#allocation19_spill] sm:$0xff]  ;;  %v6703_v41 = vld [vmem:[#allocation21_spill] sm:$0xff]  ;;  %v6707_v6 = vld [vmem:[#allocation14_spill] sm:$0xff] }
 0x221   : > { %v3847_v39 = vadd.f32 %v6701_v32, %v3657_v26  ;;  %v3848_v5 = vadd.f32 %v6702_v16, %v3658_v57  ;;  %v3659_v33 = vadd.f32 %v6703_v41, %v3459_v18  ;;  %v3466_v21 = vadd.f32 %v6705_v8, %v3257_v63  ;;  %v6710_v26 = vld [vmem:[#allocation22_spill] sm:$0xff]  ;;  %v6712_v63 = vld [vmem:[#allocation29_spill] sm:$0xff] }
 0x222   : > { %v6542_v44 = vpop.f32.mrf.mxu1  ;;  %v6546_v36 = vpop.f32.mrf.mxu0  ;;  %v6713_v32 = vld [vmem:[#allocation26_spill] sm:$0xff]  ;;  %v6714_v16 = vld [vmem:[#allocation31_spill] sm:$0xff] }
 0x224   : > { %v4201_v61 = vpop.f32.mrf.mxu1  ;;  %v4007_v31 = vpop.f32.mrf.mxu0 }
 0x225   : > { %v4046_v45 = vadd.f32 %v4007_v31, %v3843_v37  ;;  %v6704_v37 = vld [vmem:[#allocation23_spill] sm:$0xff]  ;;  %v6706_v31 = vld [vmem:[#allocation25_spill] sm:$0xff] }
 0x226   : > { %v4203_v51 = vpop.f32.mrf.mxu1  ;;  %v4009_v48 = vpop.f32.mrf.mxu0  ;;  %v3660_v28 = vadd.f32 %v6704_v37, %v3460_v2  ;;  %v3661_v40 = vadd.f32 %v6706_v31, %v3461_v9  ;;  %v6708_v2 = vld [vmem:[#allocation20_spill] sm:$0xff] }
 0x227   : > { %v4240_v13 = vadd.f32 %v4201_v61, %v4046_v45  ;;  %v4047_v59 = vadd.f32 %v4009_v48, %v3844_v10  ;;  %v3467_v48 = vadd.f32 %v6707_v6, %v3258_v50  ;;  %v6717_v31 = vld [vmem:[#allocation28_spill] sm:$0xff] }
 0x228   : > { %v4205_v3 = vpop.f32.mrf.mxu1  ;;  %v4011_v43 = vpop.f32.mrf.mxu0  ;;  %v3850_v57 = vadd.f32 %v6710_v26, %v3660_v28 }
 0x229   : > { %v4268_v0 = vmul.f32 %v6548_v14, %v4240_v13  ;;  %v4241_v19 = vadd.f32 %v4203_v51, %v4047_v59  ;;  %v4048_v60 = vadd.f32 %v4011_v43, %v3845_v27  ;;  %v3849_v27 = vadd.f32 %v6708_v2, %v3659_v33  ;;  %v6709_v13 = vld [vmem:[#allocation27_spill] sm:$0xff] }
 0x22a   : > { %v4207_v20 = vpop.f32.mrf.mxu1  ;;  %v4013_v23 = vpop.f32.mrf.mxu0  ;;  %v3662_v59 = vadd.f32 %v6709_v13, %v3462_v46  ;;  %v3665_v2 = vadd.f32 %v6523_v55, %v6583_v56 }
 0x22b   : > { %v4296_v25 = vadd.f32 %v6550_v4, %v4268_v0  ;;  %v4269_v49 = vmul.f32 %v6552_v53, %v4241_v19  ;;  %v4242_v15 = vadd.f32 %v4205_v3, %v4048_v60  ;;  %v4049_v24 = vadd.f32 %v4013_v23, %v3846_v52  ;;  %v6711_v60 = vld [vmem:[#allocation24_spill] sm:$0xff] }
 0x22c   : > { %v4211_v1 = vpop.f32.mrf.mxu1  ;;  %v4017_v58 = vpop.f32.mrf.mxu0  ;;  %v3663_v23 = vadd.f32 %v6712_v63, %v3463_v7 }
 0x22d   : > { %v4297_v30 = vadd.f32 %v6562_v38, %v4269_v49  ;;  %v4270_v35 = vmul.f32 %v6548_v14, %v4242_v15  ;;  %v4243_v61 = vadd.f32 %v4207_v20, %v4049_v24  ;;  %v4312_v29 = vmax.f32 %v4296_v25, 0.0 }
 0x22e   : > { %v4213_v62 = vpop.f32.mrf.mxu1  ;;  %v4050_v10 = vadd.f32 %v4017_v58, %v3847_v39  ;;  %v4019_v22 = vpop.f32.mrf.mxu0  ;;  %v3851_v20 = vadd.f32 %v6711_v60, %v3661_v40  ;;  %v3852_v39 = vadd.f32 %v6713_v32, %v3662_v59  ;;  %v3853_v40 = vadd.f32 %v6717_v31, %v3663_v23 }
 0x22f   : > { %v4313_v45 = vmax.f32 %v4297_v30, 0.0  ;;  %v4298_v51 = vadd.f32 %v6550_v4, %v4270_v35  ;;  %v4271_v18 = vmul.f32 %v6552_v53, %v4243_v61  ;;  %v4051_v17 = vadd.f32 %v4019_v22, %v3848_v5  ;;  %v6715_v61 = vld [vmem:[#allocation12_spill] sm:$0xff] }
 0x230   : > { %v4215_v34 = vpop.f32.mrf.mxu1  ;;  %v4244_v3 = vadd.f32 %v4211_v1, %v4050_v10  ;;  %v4021_v9 = vpop.f32.mrf.mxu0  ;;  %v3664_v5 = vadd.f32 %v6714_v16, %v3464_v54 }
 0x231   : > { %v4898_v43 = vpack.c.bf16 %v4313_v45, %v4312_v29  ;;  %v4299_v52 = vadd.f32 %v6562_v38, %v4271_v18  ;;  %v4245_v0 = vadd.f32 %v4213_v62, %v4051_v17  ;;  %v4052_v25 = vadd.f32 %v4021_v9, %v3849_v27  ;;  %v6716_v62 = vld [vmem:[#allocation17_spill] sm:$0xff] }
 0x232   : > { %v4217_v19 = vpop.f32.mrf.mxu1  ;;  %v4272_v46 = vmul.f32 %v6548_v14, %v4244_v3  ;;  %v4023_v49 = vpop.f32.mrf.mxu0  ;;  %v4314_v15 = vmax.f32 %v4298_v51, 0.0  ;;  %v3259_v8 = vadd.f32 %v6716_v62, %v6715_v61  ;;  %v3666_v27 = vadd.f32 %v6529_v12, %v3466_v21 }
 0x233   : > { %4392 = vst [vmem:[%s6608_s10] sm:$0xff] %v4898_v43  ;;  %v4315_v24 = vmax.f32 %v4299_v52, 0.0  ;;  %v4273_v1 = vmul.f32 %v6552_v53, %v4245_v0  ;;  %v4053_v11 = vadd.f32 %v4023_v49, %v3850_v57  ;;  %v4246_v33 = vadd.f32 %v4215_v34, %v4052_v25  ;;  %v6718_v34 = vld [vmem:[#allocation30_spill] sm:$0xff]  ;;  %v6719_v52 = vld [vmem:[#allocation16_spill] sm:$0xff] }
 0x234   : > { %v4221_v50 = vpop.f32.mrf.mxu1  ;;  %v4300_v41 = vadd.f32 %v6550_v4, %v4272_v46  ;;  %v4027_v7 = vpop.f32.mrf.mxu0  ;;  %v3854_v6 = vadd.f32 %v6718_v34, %v3664_v5  ;;  %v3468_v0 = vadd.f32 %v6719_v52, %v3259_v8  ;;  %v6720_v46 = vld [vmem:[#allocation32_spill] sm:$0xff] }
 0x235   : > { %v4899_v58 = vpack.c.bf16 %v4315_v24, %v4314_v15  ;;  %v4301_v37 = vadd.f32 %v6562_v38, %v4273_v1  ;;  %v4247_v28 = vadd.f32 %v4217_v19, %v4053_v11  ;;  %v4054_v30 = vadd.f32 %v4027_v7, %v3851_v20  ;;  %v6721_v1 = vld [vmem:[#allocation33_spill] sm:$0xff] }
 0x236   : > { %v4223_v35 = vpop.f32.mrf.mxu1  ;;  %v4316_v29 = vmax.f32 %v4300_v41, 0.0  ;;  %v4274_v10 = vmul.f32 %v6548_v14, %v4246_v33  ;;  %v4029_v22 = vpop.f32.mrf.mxu0  ;;  %v3667_v19 = vadd.f32 %v6537_v42, %v3467_v48  ;;  %v3855_v25 = vadd.f32 %v6720_v46, %v3665_v2 }
 0x237   : > { %4393 = vst [vmem:[%s6608_s10 + $0x8] sm:$0xff] %v4899_v58  ;;  %v4317_v54 = vmax.f32 %v4301_v37, 0.0  ;;  %v4275_v45 = vmul.f32 %v6552_v53, %v4247_v28  ;;  %v4248_v51 = vadd.f32 %v4221_v50, %v4054_v30  ;;  %v4055_v18 = vadd.f32 %v4029_v22, %v3852_v39 }
 0x238   : > { %v4225_v17 = vpop.f32.mrf.mxu1  ;;  %v4302_v13 = vadd.f32 %v6550_v4, %v4274_v10  ;;  %v4031_v59 = vpop.f32.mrf.mxu0  ;;  %v3668_v49 = vadd.f32 %v6546_v36, %v3468_v0  ;;  %v3856_v42 = vadd.f32 %v6721_v1, %v3666_v27  ;;  %v3857_v39 = vadd.f32 %v6533_v47, %v3667_v19 }
 0x239   : > { %v4900_v3 = vpack.c.bf16 %v4317_v54, %v4316_v29  ;;  %v4303_v9 = vadd.f32 %v6562_v38, %v4275_v45  ;;  %v4276_v26 = vmul.f32 %v6548_v14, %v4248_v51  ;;  %v4249_v57 = vadd.f32 %v4223_v35, %v4055_v18 }
 0x23a   : > { %v4227_v43 = vpop.f32.mrf.mxu1  ;;  %v4318_v60 = vmax.f32 %v4302_v13, 0.0  ;;  %v4056_v20 = vadd.f32 %v4031_v59, %v3853_v40  ;;  %v4033_v63 = vpop.f32.mrf.mxu0  ;;  %v3858_v37 = vadd.f32 %v6542_v44, %v3668_v49 }
 0x23b   : > { %4394 = vst [vmem:[%s6608_s10 + $0x10] sm:$0xff] %v4900_v3  ;;  %v4319_v55 = vmax.f32 %v4303_v9, 0.0  ;;  %v4304_v12 = vadd.f32 %v6550_v4, %v4276_v26  ;;  %v4277_v56 = vmul.f32 %v6552_v53, %v4249_v57  ;;  %v4057_v21 = vadd.f32 %v4033_v63, %v3854_v6 }
 0x23c   : > { %v4231_v23 = vpop.f32.mrf.mxu1  ;;  %v4250_v15 = vadd.f32 %v4225_v17, %v4056_v20  ;;  %v4037_v24 = vpop.f32.mrf.mxu0 }
 0x23d   : > { %v4901_v48 = vpack.c.bf16 %v4319_v55, %v4318_v60  ;;  %v4305_v11 = vadd.f32 %v6562_v38, %v4277_v56  ;;  %v4251_v50 = vadd.f32 %v4227_v43, %v4057_v21  ;;  %v4058_v5 = vadd.f32 %v4037_v24, %v3855_v25 }
 0x23e   : > { %v4233_v32 = vpop.f32.mrf.mxu1  ;;  %v4278_v16 = vmul.f32 %v6548_v14, %v4250_v15  ;;  %v4039_v41 = vpop.f32.mrf.mxu0  ;;  %v4320_v33 = vmax.f32 %v4304_v12, 0.0 }
 0x23f   : > { %4395 = vst [vmem:[%s6608_s10 + $0x18] sm:$0xff] %v4901_v48  ;;  %v4321_v7 = vmax.f32 %v4305_v11, 0.0  ;;  %v4279_v36 = vmul.f32 %v6552_v53, %v4251_v50  ;;  %v4059_v58 = vadd.f32 %v4039_v41, %v3856_v42  ;;  %v4252_v30 = vadd.f32 %v4231_v23, %v4058_v5 }
 0x240   : > { %v4306_v28 = vadd.f32 %v6550_v4, %v4278_v16  ;;  %v4041_v35 = vpop.f32.mrf.mxu0  ;;  %v4235_v61 = vpop.f32.mrf.mxu1 }
 0x241   : > { %v4902_v62 = vpack.c.bf16 %v4321_v7, %v4320_v33  ;;  %v4307_v47 = vadd.f32 %v6562_v38, %v4279_v36  ;;  %v4253_v8 = vadd.f32 %v4233_v32, %v4059_v58  ;;  %v4060_v31 = vadd.f32 %v4041_v35, %v3857_v39 }
 0x242   : > { %v4322_v40 = vmax.f32 %v4306_v28, 0.0  ;;  %v4280_v29 = vmul.f32 %v6548_v14, %v4252_v30  ;;  %v4043_v10 = vpop.f32.mrf.mxu0  ;;  %v4237_v18 = vpop.f32.mrf.mxu1 }
 0x243   : > { %4396 = vst [vmem:[%s6608_s10 + $0x20] sm:$0xff] %v4902_v62  ;;  %v4323_v22 = vmax.f32 %v4307_v47, 0.0  ;;  %v4281_v54 = vmul.f32 %v6552_v53, %v4253_v8  ;;  %v4254_v44 = vadd.f32 %v4235_v61, %v4060_v31  ;;  %v4061_v45 = vadd.f32 %v4043_v10, %v3858_v37 }
 0x244   : > { %v4308_v51 = vadd.f32 %v6550_v4, %v4280_v29 }
 0x245   : > { %v4903_v17 = vpack.c.bf16 %v4323_v22, %v4322_v40  ;;  %v4309_v34 = vadd.f32 %v6562_v38, %v4281_v54  ;;  %v4282_v6 = vmul.f32 %v6548_v14, %v4254_v44  ;;  %v4255_v2 = vadd.f32 %v4237_v18, %v4061_v45 }
 0x246   : > { %v4324_v27 = vmax.f32 %v4308_v51, 0.0 }
 0x247   : > { %4397 = vst [vmem:[%s6608_s10 + $0x28] sm:$0xff] %v4903_v17  ;;  %v4325_v13 = vmax.f32 %v4309_v34, 0.0  ;;  %v4310_v59 = vadd.f32 %v6550_v4, %v4282_v6  ;;  %v4283_v3 = vmul.f32 %v6552_v53, %v4255_v2 }
 0x249   : > { %v4904_v9 = vpack.c.bf16 %v4325_v13, %v4324_v27  ;;  %v4311_v26 = vadd.f32 %v6562_v38, %v4283_v3  ;;  %v4326_v57 = vmax.f32 %v4310_v59, 0.0 }
 0x24b   : > { %4398 = vst [vmem:[%s6608_s10 + $0x30] sm:$0xff] %v4904_v9  ;;  %v4327_v43 = vmax.f32 %v4311_v26, 0.0 }
 0x24d   : > { %v4905_v52 = vpack.c.bf16 %v4327_v43, %v4326_v57 }
 0x24f   : > { %4399 = vst [vmem:[%s6608_s10 + $0x38] sm:$0xff] %v4905_v52 }
 0x250 PF: > { %s19_s21 = sadd.s32 1, %s5531_s21  }
 0x251   : > { %p16_p3 = scmp.ge.s32.totalorder %s19_s21, 4  }
 0x253   :  { %18 = sbr.rel (!%p16_p3) target bundleno = 3 (0x3), region = 110 }
 0x258   :  { %4421 = vsyncpa [#allocation3], 1 }
 0x259   :  { %4423 = vsyncpa [#allocation3 + $0x1], 1 }
 0x25a   :  { %4424 = vsyncpa [#allocation5], 1 }
 0x25b   :  { %4425 = vsyncpa [#allocation8], 1 }

// kernel: run.9
= control target key start
LH: loop header
LB: loop body
LE: loop exit
PB: predicated region body
PF: predicated region fallthrough
CT: control target
= control target key end

     0   :  { %s3643_s18 = smov 0   ;;  %s4368_s0 = inlined_call_operand.vmem [shape: bf16[32,8], index: 0, kind: input, shape index: {}, may-alias: {0,1}]   ;;  %s4369_s1 = inlined_call_operand.vmem [shape: bf16[32,8], index: 1, kind: input, shape index: {}, may-alias: {0,1}]   ;;  %s4370_s2 = inlined_call_operand.vmem [shape: bf16[2,8,8,256], index: 2, kind: input, shape index: {}]   ;;  %s4371_s3 = inlined_call_operand.vmem [shape: bf16[256,128], index: 3, kind: input, shape index: {}]   ;;  %s4372_s4 = inlined_call_operand.vmem [shape: f32[1,128], index: 4, kind: input, shape index: {}]   ;;  %s4373_s5 = inlined_call_operand.vmem [shape: f32[2,32,32,8], index: 5, kind: output, shape index: {}]  }
   0x1 LB: > { %s3063_s19 = sadd.s32 4294967295, %s3607_s18   ;;  %p3067_p0 = scmp.ge.s32.totalorder %s3607_s18, 1  ;;  %s3607_s18 = sphi %s3643_s18, %s15_s18  }
   0x2   : > { %p187_p1 = scmp.lt.s32.totalorder %s3607_s18, 3 }
   0x4   : > { %p188_p2 = pnand %p3067_p0, %p187_p1 }
   0x5   : > { %p215_p3 = scmp.lt.s32.totalorder (!%p188_p2), %s3063_s19, 1 }
   0x6   : > { %191 = sbr.rel (%p188_p2) target bundleno = 879 (0x36f), region = 40 }
   0xb   : > { %v3569_v0 = vld [vmem:[%s4371_s3 + $0x78] sm:$0xff]   ;;  %v3571_v2 = vld [vmem:[%s4371_s3 + $0x70] sm:$0xff]   ;;  %v3573_v4 = vld [vmem:[%s4371_s3 + $0x68] sm:$0xff]   ;;  %s4375_s19 = smov (!%p215_p3, %s3063_s19), 1  ;;  %v3609_v24 = vmov 0   ;;  %vm607_vm0 = vcmask 1043456  }
   0xc   : > { %v3570_v1 = vld [vmem:[%s4371_s3 + $0x38] sm:$0xff]   ;;  %3197 = vmatprep.subr.bf16.mxu0 %v3569_v0  ;;  %v3572_v3 = vld [vmem:[%s4371_s3 + $0x30] sm:$0xff]   ;;  %v3574_v5 = vld [vmem:[%s4371_s3 + $0x28] sm:$0xff]   ;;  %s3195_s11 = sshll.u32 %s4375_s19, 6  ;;  %664 = vmatprep.mubr.bf16.mxu1 %v3609_v24  ;;  %vm600_vm1 = vcmask 64512   ;;  %s3196_s20 = sshll.u32 %s4375_s19, 10 }
   0xd   : > { %3198 = vmatpush3.bf16.msra.mxu0 %v3570_v1  ;;  %v3575_v6 = vld [vmem:[%s4371_s3 + $0x60] sm:$0xff]   ;;  %v3577_v8 = vld [vmem:[%s4371_s3 + $0x58] sm:$0xff]   ;;  %s3684_s16 = scalar_lea.vmem %s4370_s2, %s3195_s11  ;;  %v3579_v10 = vld [vmem:[%s4371_s3 + $0x50] sm:$0xff]   ;;  %s4107_s23 = scalar_lea.vmem %s4373_s5, %s3196_s20 }
   0xe   : > { %3199 = vmatprep.subr.bf16.mxu0 %v3571_v2  ;;  %v3576_v7 = vld [vmem:[%s4371_s3 + $0x20] sm:$0xff]   ;;  %v3578_v9 = vld [vmem:[%s4371_s3 + $0x18] sm:$0xff]   ;;  %v3580_v12 = vld [vmem:[%s4371_s3 + $0x10] sm:$0xff]  }
   0xf   : > { %v3587_v11 = vld [vmem:[%s3684_s16 + $0x4] ss:$8 sps:$4 sm:$0xff]   ;;  %v3585_v17 = vld [vmem:[%s3684_s16] ss:$8 sps:$4 sm:$0xff]   ;;  %v3588_v18 = vld [vmem:[%s3684_s16 + $0x14] ss:$8 sps:$4 sm:$0xff]  }
  0x10   : > { %441 = vmatprep.mubr.bf16.mxu0 %v3587_v11  ;;  %v3581_v13 = vld [vmem:[%s4371_s3 + $0x48] sm:$0xff]   ;;  %v3583_v15 = vld [vmem:[%s4371_s3 + $0x40] sm:$0xff]   ;;  %v3590_v19 = vld [vmem:[%s3684_s16 + $0x10] ss:$8 sps:$4 sm:$0xff]  }
  0x11   : > { %3200 = vmatpush3.bf16.msra.mxu0 %v3572_v3  ;;  %v3582_v14 = vld [vmem:[%s4371_s3 + $0x8] sm:$0xff]   ;;  %v3584_v16 = vld [vmem:[%s4371_s3] sm:$0xff]   ;;  %v3594_v22 = vld [vmem:[%s3684_s16 + $0x34] ss:$8 sps:$4 sm:$0xff]  }
  0x12   : > { %3201 = vmatprep.subr.bf16.mxu0 %v3573_v4  ;;  %v3591_v20 = vld [vmem:[%s3684_s16 + $0x24] ss:$8 sps:$4 sm:$0xff]   ;;  %v3593_v21 = vld [vmem:[%s3684_s16 + $0x20] ss:$8 sps:$4 sm:$0xff]   ;;  %v3596_v23 = vld [vmem:[%s3684_s16 + $0x30] ss:$8 sps:$4 sm:$0xff]  }
  0x13   : > { %v3072_v37 = vld [vmem:[%s4372_s4] ss:$0 sm:$0xff] }
  0x15   : > { %3202 = vmatpush3.bf16.msra.mxu0 %v3574_v5  ;;  %v3610_v5 = vmov 1966171168  }
  0x16   : > { %3203 = vmatprep.subr.bf16.mxu0 %v3575_v6  ;;  %v537_v6 = vunpack.c.l.s4 %v3610_v5 }
  0x19   : > { %3204 = vmatpush3.bf16.msra.mxu0 %v3576_v7  ;;  %v539_v7 = vlaneseq }
  0x1a   : > { %3205 = vmatprep.subr.bf16.mxu0 %v3577_v8 }
  0x1d   : > { %3206 = vmatpush3.bf16.msra.mxu0 %v3578_v9 }
  0x1e   : > { %3207 = vmatprep.subr.bf16.mxu0 %v3579_v10 }
  0x21   : > { %3208 = vmatpush3.bf16.msra.mxu0 %v3580_v12 }
  0x22   : > { %3209 = vmatprep.subr.bf16.mxu0 %v3581_v13  ;;  %v538_v13 = vunpack.c.0.s8 %v537_v6 }
  0x25   : > { %3210 = vmatpush3.bf16.msra.mxu0 %v3582_v14  ;;  %v3719_v14 = vshrl.u32 %v539_v7, 7 }
  0x26   : > { %3211 = vmatprep.subr.bf16.mxu0 %v3583_v15 }
  0x29   : > { %3212 = vmatpush3.bf16.msra.mxu0 %v3584_v16 }
  0x2c   : > { %442 = vmatmul.mubr.bf16.vlgmr.msra.gmra.mxu0 %v3585_v17 }
  0x2d   : > { %449 = vmatprep.mubr.bf16.mxu0 %v3588_v18 }
  0x34   : > { %450 = vmatmul.mubr.bf16.gmra.mxu0 %v3590_v19 }
  0x35   : > { %457 = vmatprep.mubr.bf16.mxu0 %v3591_v20 }
  0x3c   : > { %458 = vmatmul.mubr.bf16.gmra.mxu0 %v3593_v21  ;;  %v541_v21 = vsub.s32 %v538_v13, %v3719_v14 }
  0x3d   : > { %465 = vmatprep.mubr.bf16.mxu0 %v3594_v22 }
  0x44   : > { %466 = vmatmul.mubr.bf16.gmra.mxu0 %v3596_v23 }
  0xec   : > { %v3213_v25 = vpop.f32.mrf.mxu0 }
  0xee   : > { %v3214_v26 = vpop.f32.mrf.mxu0 }
  0xef   : > { %v3215_v39 = vadd.f32 %v3214_v26, %v3213_v25 }
  0xf0   : > { %v3216_v27 = vpop.f32.mrf.mxu0 }
  0xf1   : > { %v444_v46 = vadd.f32 %v3215_v39, %v3072_v37 }
  0xf2   : > { %v3217_v28 = vpop.f32.mrf.mxu0 }
  0xf3   : > { %v3218_v35 = vadd.f32 %v3217_v28, %v3216_v27 }
  0xf4   : > { %v3219_v29 = vpop.f32.mrf.mxu0 }
  0xf5   : > { %v447_v42 = vadd.f32 %v3218_v35, %v3072_v37 }
  0xf6   : > { %v3220_v30 = vpop.f32.mrf.mxu0 }
  0xf7   : > { %v3221_v36 = vadd.f32 %v3220_v30, %v3219_v29  ;;  %v474_v50 = vpack.c.bf16 %v447_v42, %v444_v46 }
  0xf8   : > { %v3222_v31 = vpop.f32.mrf.mxu0 }
  0xf9   : > { %v452_v43 = vadd.f32 %v3221_v36, %v3072_v37  ;;  %v480_v57 = vunpack.i.h.s16 %v474_v50 }
  0xfa   : > { %v3223_v32 = vpop.f32.mrf.mxu0 }
  0xfb   : > { %v3224_v33 = vadd.f32 %v3223_v32, %v3222_v31  ;;  %v3097_v63 = vpack.c.b16 %v480_v57, %v474_v50 }
  0xfc   : > { %v3225_v34 = vpop.f32.mrf.mxu0 }
  0xfd   : > { %v455_v40 = vadd.f32 %v3224_v33, %v3072_v37  ;;  %v483_v8 = vunpack.i.h.s16 %v3097_v63 }
  0xfe   : > { %v3226_v38 = vpop.f32.mrf.mxu0 }
  0xff   : > { %v3227_v44 = vadd.f32 %v3226_v38, %v3225_v34  ;;  %v475_v47 = vpack.c.bf16 %v455_v40, %v452_v43  ;;  %v3098_v15 = vpack.c.b16 %v483_v8, %v3097_v63  ;;  %v3597_v40 = vld [vmem:[%s4368_s0] sm:$0xff]  }
 0x100   : > { %v3228_v41 = vpop.f32.mrf.mxu0 }
 0x101   : > { %v460_v51 = vadd.f32 %v3227_v44, %v3072_v37  ;;  %v490_v54 = vunpack.i.h.s16 %v475_v47  ;;  %v486_v22 = vunpack.i.h.s16 %v3098_v15  ;;  %v3598_v44 = vld [vmem:[%s4368_s0 + $0x8] sm:$0xff]  }
 0x102   : > { %v3229_v45 = vpop.f32.mrf.mxu0 }
 0x103   : > { %v3230_v48 = vadd.f32 %v3229_v45, %v3228_v41  ;;  %v3100_v61 = vpack.c.b16 %v490_v54, %v475_v47 }
 0x104   : > { %v3231_v49 = vpop.f32.mrf.mxu0 }
 0x105   : > { %v463_v52 = vadd.f32 %v3230_v48, %v3072_v37  ;;  %v493_v3 = vunpack.i.h.s16 %v3100_v61 }
 0x106   : > { %v3232_v53 = vpop.f32.mrf.mxu0 }
 0x107   : > { %v476_v55 = vpack.c.bf16 %v463_v52, %v460_v51  ;;  %v3233_v59 = vadd.f32 %v3232_v53, %v3231_v49  ;;  %v3101_v11 = vpack.c.b16 %v493_v3, %v3100_v61  ;;  %v3754_v51 = vld [vmem:[%s4369_s1] sm:$0xff]  }
 0x108   : > { %v3234_v56 = vpop.f32.mrf.mxu0  ;;  %3335 = vmatprep.mubr.msk.bf16.mxu0 %vm600_vm1, %v3754_v51 }
 0x109   : > { %v500_v58 = vunpack.i.h.s16 %v476_v55  ;;  %v468_v1 = vadd.f32 %v3233_v59, %v3072_v37  ;;  %v496_v18 = vunpack.i.h.s16 %v3101_v11  ;;  %v3111_v20 = vpack.c.b16 %v3101_v11, %v3098_v15 }
 0x10a   : > { %v3235_v60 = vpop.f32.mrf.mxu0 }
 0x10b   : > { %v3236_v62 = vadd.f32 %v3235_v60, %v3234_v56  ;;  %v3103_v0 = vpack.c.b16 %v500_v58, %v476_v55  ;;  %v3112_v27 = vpack.c.b16 %v496_v18, %v486_v22  ;;  %v542_v29 = vrot.slane %v3111_v20, %v541_v21 }
 0x10c   : > { %v3611_v22 = vmov 1983009808  }
 0x10d   : > { %v471_v2 = vadd.f32 %v3236_v62, %v3072_v37  ;;  %v503_v9 = vunpack.i.h.s16 %v3103_v0  ;;  %v549_v36 = vrot.slane %v3112_v27, %v541_v21 }
 0x10f   : > { %v477_v4 = vpack.c.bf16 %v471_v2, %v468_v1  ;;  %v3104_v16 = vpack.c.b16 %v503_v9, %v3103_v0 }
 0x111   : > { %v510_v10 = vunpack.i.h.s16 %v477_v4  ;;  %v506_v23 = vunpack.i.h.s16 %v3104_v16 }
 0x113   : > { %v3106_v12 = vpack.c.b16 %v510_v10, %v477_v4 }
 0x115   : > { %v513_v17 = vunpack.i.h.s16 %v3106_v12 }
 0x117   : > { %v3107_v19 = vpack.c.b16 %v513_v17, %v3106_v12 }
 0x119   : > { %v516_v25 = vunpack.i.h.s16 %v3107_v19  ;;  %v3113_v26 = vpack.c.b16 %v3107_v19, %v3104_v16 }
 0x11b   : > { %v3114_v28 = vpack.c.b16 %v516_v25, %v506_v23  ;;  %v556_v30 = vrot.slane %v3113_v26, %v541_v21  ;;  %v927_v23 = vunpack.c.l.s4 %v3611_v22 }
 0x11d   : > { %v565_v31 = vcombine.high %v542_v29, %v556_v30  ;;  %v564_v32 = vcombine.low %v542_v29, %v556_v30  ;;  %v563_v33 = vrot.slane %v3114_v28, %v541_v21  ;;  %v928_v27 = vunpack.c.0.s8 %v927_v23 }
 0x11e   : > { %v3612_v28 = vmov 1934713408  }
 0x11f   : > { %v588_v34 = vrot.slane %v565_v31, %v541_v21  ;;  %v574_v35 = vrot.slane %v564_v32, %v541_v21  ;;  %v567_v41 = vcombine.high %v549_v36, %v563_v33  ;;  %v566_v45 = vcombine.low %v549_v36, %v563_v33 }
 0x120   : > { %v959_v29 = vunpack.c.l.s4 %v3612_v28 }
 0x121   : > { %v598_v37 = vcombine.high %v588_v34, %v588_v34  ;;  %3115 = vmatprep.subr.msk.bf16.mxu1 %vm607_vm0, %v588_v34  ;;  %v596_v38 = vcombine.high %v574_v35, %v574_v35  ;;  %v609_v39 = vsel %vm607_vm0, %v574_v35, 0  ;;  %v595_v43 = vrot.slane %v567_v41, %v541_v21 }
 0x122   : > { %647 = vmatpush1.bf16.msra.mxu1 %v609_v39  ;;  %v581_v46 = vrot.slane %v566_v45, %v541_v21  ;;  %v960_v39 = vunpack.c.0.s8 %v959_v29 }
 0x123   : > { %3118 = vmatprep.subr.msk.bf16.mxu1 %vm607_vm0, %v598_v37  ;;  %v615_v42 = vsel %vm607_vm0, %v596_v38, 0  ;;  %v599_v48 = vcombine.high %v595_v43, %v595_v43  ;;  %v3765_v38 = vsub.s32 %v928_v27, %v3719_v14 }
 0x124   : > { %v621_v47 = vsel %vm607_vm0, %v581_v46, 0  ;;  %v597_v49 = vcombine.high %v581_v46, %v581_v46 }
 0x125   : > { %3116 = vmatmul.mubr.msk.bf16.vlgmr.msra.gmra.mxu1 %vm600_vm1, %v3597_v40 }
 0x126   : > { %700 = vmatpush1.bf16.msra.mxu1 %v615_v42  ;;  %674 = vmatprep.mubr.bf16.mxu1 %v3609_v24  ;;  %v627_v50 = vsel %vm607_vm0, %v597_v49, 0 }
 0x127   : > { %3121 = vmatprep.subr.msk.bf16.mxu1 %vm607_vm0, %v595_v43 }
 0x12d   : > { %3117 = vmatmul.mubr.msk.bf16.gmra.mxu1 %vm600_vm1, %v3598_v44 }
 0x12e   : > { %717 = vmatprep.mubr.bf16.mxu1 %v3609_v24 }
 0x135   : > { %3119 = vmatmul.mubr.msk.bf16.vlgmr.msra.gmra.mxu1 %vm600_vm1, %v3597_v40 }
 0x136   : > { %753 = vmatpush1.bf16.msra.mxu1 %v621_v47  ;;  %727 = vmatprep.mubr.bf16.mxu1 %v3609_v24 }
 0x137   : > { %3124 = vmatprep.subr.msk.bf16.mxu1 %vm607_vm0, %v599_v48 }
 0x13d   : > { %3120 = vmatmul.mubr.msk.bf16.gmra.mxu1 %vm600_vm1, %v3598_v44 }
 0x13e   : > { %770 = vmatprep.mubr.bf16.mxu1 %v3609_v24 }
 0x145   : > { %3122 = vmatmul.mubr.msk.bf16.vlgmr.msra.gmra.mxu1 %vm600_vm1, %v3597_v40 }
 0x146   : > { %806 = vmatpush1.bf16.msra.mxu1 %v627_v50  ;;  %780 = vmatprep.mubr.bf16.mxu1 %v3609_v24 }
 0x14d   : > { %3123 = vmatmul.mubr.msk.bf16.gmra.mxu1 %vm600_vm1, %v3598_v44 }
 0x14e   : > { %823 = vmatprep.mubr.bf16.mxu1 %v3609_v24 }
 0x155   : > { %3125 = vmatmul.mubr.msk.bf16.vlgmr.msra.gmra.mxu1 %vm600_vm1, %v3597_v40 }
 0x156   : > { %833 = vmatprep.mubr.bf16.mxu1 %v3609_v24 }
 0x15d   : > { %3126 = vmatmul.mubr.msk.bf16.gmra.mxu1 %vm600_vm1, %v3598_v44 }
 0x15e   : > { %3341 = vmatprep.mubr.msk.bf16.mxu1 %vm600_vm1, %v3754_v51 }
 0x1e5   : > { %v666_v52 = vpop.f32.mrf.mxu1 }
 0x1e7   : > { %v668_v53 = vpop.f32.mrf.mxu1 }
 0x1e9   : > { %v670_v54 = vpop.f32.mrf.mxu1 }
 0x1ea   : > { %v844_v47 = vpack.c.bf16 %v670_v54, %v666_v52 }
 0x1eb   : > { %v672_v55 = vpop.f32.mrf.mxu1 }
 0x1ec   : > { %v845_v40 = vpack.c.bf16 %v672_v55, %v668_v53 }
 0x1ed   : > { %v676_v56 = vpop.f32.mrf.mxu1 }
 0x1ee   : > { %v3775_v55 = vpack.i.b16 %v845_v40, %v844_v47 }
 0x1ef   : > { %v678_v57 = vpop.f32.mrf.mxu1 }
 0x1f1   : > { %v680_v58 = vpop.f32.mrf.mxu1 }
 0x1f2   : > { %v852_v59 = vpack.c.bf16 %v680_v58, %v676_v56 }
 0x1f3   : > { %v682_v60 = vpop.f32.mrf.mxu1 }
 0x1f4   : > { %v853_v61 = vpack.c.bf16 %v682_v60, %v678_v57  ;;  %v896_v63 = vshrl.u32 %v852_v59, 16  ;;  %v865_v60 = vshrl.u32 %v845_v40, 16  ;;  %v3817_v40 = vld [vmem:[%s4369_s1 + $0x8] sm:$0xff]  }
 0x1f5   : > { %v719_v62 = vpop.f32.mrf.mxu1 }
 0x1f6   : > { %v894_v0 = vpack.i.b16 %v853_v61, %v852_v59  ;;  %v897_v1 = vshrl.u32 %v853_v61, 16 }
 0x1f7   : > { %v721_v2 = vpop.f32.mrf.mxu1 }
 0x1f8   : > { %v898_v3 = vpack.i.b16 %v897_v1, %v896_v63 }
 0x1f9   : > { %v723_v4 = vpop.f32.mrf.mxu1 }
 0x1fa   : > { %v846_v48 = vpack.c.bf16 %v723_v4, %v719_v62 }
 0x1fb   : > { %v725_v5 = vpop.f32.mrf.mxu1 }
 0x1fc   : > { %v847_v43 = vpack.c.bf16 %v725_v5, %v721_v2  ;;  %v864_v2 = vshrl.u32 %v844_v47, 16  ;;  %v872_v4 = vshrl.u32 %v846_v48, 16 }
 0x1fd   : > { %v729_v6 = vpop.f32.mrf.mxu1 }
 0x1fe   : > { %v873_v52 = vshrl.u32 %v847_v43, 16  ;;  %v3783_v5 = vpack.i.b16 %v847_v43, %v846_v48 }
 0x1ff   : > { %v731_v7 = vpop.f32.mrf.mxu1 }
 0x201   : > { %v733_v8 = vpop.f32.mrf.mxu1 }
 0x202   : > { %v854_v9 = vpack.c.bf16 %v733_v8, %v729_v6 }
 0x203   : > { %v735_v10 = vpop.f32.mrf.mxu1 }
 0x204   : > { %v855_v11 = vpack.c.bf16 %v735_v10, %v731_v7  ;;  %v904_v13 = vshrl.u32 %v854_v9, 16 }
 0x205   : > { %v772_v12 = vpop.f32.mrf.mxu1 }
 0x206   : > { %v3760_v15 = vpack.i.b16 %v855_v11, %v854_v9  ;;  %v905_v16 = vshrl.u32 %v855_v11, 16  ;;  %v3791_v11 = vpack.i.b16 %v865_v60, %v864_v2 }
 0x207   : > { %v774_v17 = vpop.f32.mrf.mxu1 }
 0x208   : > { %v3762_v18 = vpack.i.b16 %v905_v16, %v904_v13  ;;  %v3793_v13 = vpack.i.b16 %v873_v52, %v872_v4 }
 0x209   : > { %v776_v19 = vpop.f32.mrf.mxu1 }
 0x20a   : > { %v848_v41 = vpack.c.bf16 %v776_v19, %v772_v12 }
 0x20b   : > { %v778_v20 = vpop.f32.mrf.mxu1 }
 0x20c   : > { %v849_v33 = vpack.c.bf16 %v778_v20, %v774_v17  ;;  %v880_v61 = vshrl.u32 %v848_v41, 16 }
 0x20d   : > { %v782_v21 = vpop.f32.mrf.mxu1 }
 0x20e   : > { %v3767_v49 = vpack.i.b16 %v849_v33, %v848_v41  ;;  %v881_v50 = vshrl.u32 %v849_v33, 16 }
 0x20f   : > { %v784_v25 = vpop.f32.mrf.mxu1 }
 0x210   : > { %v3785_v6 = vpack.i.b16 %v881_v50, %v880_v61  ;;  %v924_v7 = vcombine.low %v3775_v55, %v3767_v49 }
 0x211   : > { %v786_v26 = vpop.f32.mrf.mxu1 }
 0x212   : > { %v856_v30 = vpack.c.bf16 %v786_v26, %v782_v21  ;;  %v992_v19 = vcombine.low %v3791_v11, %v3785_v6  ;;  %v3802_v21 = vsub.s32 %v960_v39, %v3719_v14  ;;  %v932_v22 = vrot.slane %v924_v7, %v3765_v38 }
 0x213   : > { %v788_v31 = vpop.f32.mrf.mxu1 }
 0x214   : > { %v857_v32 = vpack.c.bf16 %v788_v31, %v784_v25  ;;  %v912_v35 = vshrl.u32 %v856_v30, 16  ;;  %v1000_v29 = vrot.slane %v992_v19, %v3765_v38 }
 0x215   : > { %v825_v34 = vpop.f32.mrf.mxu1 }
 0x216   : > { %v910_v36 = vpack.i.b16 %v857_v32, %v856_v30  ;;  %v913_v37 = vshrl.u32 %v857_v32, 16 }
 0x217   : > { %v827_v42 = vpop.f32.mrf.mxu1 }
 0x218   : > { %v914_v44 = vpack.i.b16 %v913_v37, %v912_v35  ;;  %v1060_v45 = vcombine.low %v894_v0, %v910_v36  ;;  %v1061_v46 = vcombine.high %v894_v0, %v910_v36 }
 0x219   : > { %v829_v56 = vpop.f32.mrf.mxu1 }
 0x21a   : > { %v3770_v57 = vrot.slane %v1060_v45, %v3765_v38  ;;  %v3773_v58 = vrot.slane %v1061_v46, %v3765_v38  ;;  %v1128_v59 = vcombine.low %v898_v3, %v914_v44  ;;  %v1129_v53 = vcombine.high %v898_v3, %v914_v44 }
 0x21b   : > { %v850_v63 = vpack.c.bf16 %v829_v56, %v825_v34  ;;  %v831_v0 = vpop.f32.mrf.mxu1 }
 0x21c   : > { %v3778_v54 = vrot.slane %v1128_v59, %v3765_v38  ;;  %v3781_v62 = vrot.slane %v1129_v53, %v3765_v38  ;;  %v851_v1 = vpack.c.bf16 %v831_v0, %v827_v42 }
 0x21d   : > { %v835_v3 = vpop.f32.mrf.mxu1  ;;  %v888_v8 = vshrl.u32 %v850_v63, 16 }
 0x21e   : > { %v3789_v9 = vpack.i.b16 %v851_v1, %v850_v63  ;;  %v889_v10 = vshrl.u32 %v851_v1, 16 }
 0x21f   : > { %v837_v12 = vpop.f32.mrf.mxu1 }
 0x220   : > { %v3795_v16 = vpack.i.b16 %v889_v10, %v888_v8  ;;  %v940_v17 = vcombine.low %v3783_v5, %v3789_v9  ;;  %v941_v1 = vcombine.high %v3783_v5, %v3789_v9  ;;  %v925_v5 = vcombine.high %v3775_v55, %v3767_v49 }
 0x221   : > { %v839_v20 = vpop.f32.mrf.mxu1 }
 0x222   : > { %v948_v23 = vrot.slane %v940_v17, %v3765_v38  ;;  %v1008_v25 = vcombine.low %v3793_v13, %v3795_v16  ;;  %v858_v26 = vpack.c.bf16 %v839_v20, %v835_v3  ;;  %v955_v7 = vrot.slane %v941_v1, %v3765_v38 }
 0x223   : > { %v841_v27 = vpop.f32.mrf.mxu1  ;;  %v1009_v9 = vcombine.high %v3793_v13, %v3795_v16  ;;  %v993_v13 = vcombine.high %v3791_v11, %v3785_v6 }
 0x224   : > { %v956_v28 = vcombine.low %v932_v22, %v948_v23  ;;  %v1016_v30 = vrot.slane %v1008_v25, %v3765_v38  ;;  %v920_v31 = vshrl.u32 %v858_v26, 16  ;;  %v859_v32 = vpack.c.bf16 %v841_v27, %v837_v12 }
 0x225   : > { %v957_v33 = vcombine.high %v932_v22, %v948_v23  ;;  %v939_v12 = vrot.slane %v925_v5, %v3765_v38  ;;  %v1023_v23 = vrot.slane %v1009_v9, %v3765_v38 }
 0x226   : > { %v964_v14 = vrot.slane %v956_v28, %v3802_v21  ;;  %v918_v34 = vpack.i.b16 %v859_v32, %v858_v26  ;;  %v921_v35 = vshrl.u32 %v859_v32, 16  ;;  %v1024_v36 = vcombine.low %v1000_v29, %v1016_v30 }
 0x227   : > { %v971_v45 = vrot.slane %v957_v33, %v3802_v21  ;;  %v1025_v53 = vcombine.high %v1000_v29, %v1016_v30  ;;  %v972_v20 = vcombine.low %v939_v12, %v955_v7  ;;  %v973_v33 = vcombine.high %v939_v12, %v955_v7 }
 0x228   : > { %3525 = vmatprep.subr.msk.bf16.mxu0 %vm607_vm0, %v964_v14  ;;  %v1217_v37 = vsel %vm607_vm0, %v964_v14, 0  ;;  %v988_v39 = vcombine.high %v964_v14, %v3609_v24  ;;  %v922_v41 = vpack.i.b16 %v921_v35, %v920_v31  ;;  %v1076_v42 = vcombine.low %v3760_v15, %v918_v34 }
 0x229   : > { %v1077_v43 = vcombine.high %v3760_v15, %v918_v34  ;;  %3334 = vmatpush3.bf16.msra.mxu0 %v1217_v37  ;;  %v1032_v44 = vrot.slane %v1024_v36, %v3802_v21  ;;  %v1425_v49 = vsel %vm607_vm0, %v971_v45, 0  ;;  %v989_v55 = vcombine.high %v971_v45, %v3609_v24 }
 0x22a   : > { %3527 = vmatprep.subr.msk.bf16.mxu0 %vm607_vm0, %v988_v39  ;;  %v1084_v46 = vrot.slane %v1076_v42, %v3765_v38  ;;  %v1144_v48 = vcombine.low %v3762_v18, %v922_v41  ;;  %v1145_v50 = vcombine.high %v3762_v18, %v922_v41  ;;  %v1321_v59 = vsel %vm607_vm0, %v988_v39, 0 }
 0x22b   : > { %v1091_v47 = vrot.slane %v1077_v43, %v3765_v38  ;;  %3526 = vmatprep.subr.msk.bf16.mxu1 %vm607_vm0, %v1032_v44  ;;  %v1269_v56 = vsel %vm607_vm0, %v1032_v44, 0  ;;  %v1056_v15 = vcombine.high %v1032_v44, %v3609_v24  ;;  %v1529_v27 = vsel %vm607_vm0, %v989_v55, 0 }
 0x22c   : > { %3336 = vmatmul.mubr.msk.bf16.vlgmr.msra.gmra.mxu0 %vm600_vm1, %v3817_v40  ;;  %v1092_v60 = vcombine.low %v3770_v57, %v1084_v46  ;;  %v1093_v61 = vcombine.high %v3770_v57, %v1084_v46  ;;  %3340 = vmatpush3.bf16.msra.mxu1 %v1269_v56  ;;  %v1152_v0 = vrot.slane %v1144_v48, %v3765_v38 }
 0x22d   : > { %v1108_v63 = vcombine.low %v3773_v58, %v1091_v47  ;;  %v1109_v18 = vcombine.high %v3773_v58, %v1091_v47  ;;  %v1159_v52 = vrot.slane %v1145_v50, %v3765_v38  ;;  %3528 = vmatprep.subr.msk.bf16.mxu1 %vm607_vm0, %v1056_v15  ;;  %3346 = vmatpush3.bf16.msra.mxu0 %v1321_v59  ;;  %v1373_v57 = vsel %vm607_vm0, %v1056_v15, 0 }
 0x22e   : > { %3529 = vmatprep.subr.msk.bf16.mxu0 %vm607_vm0, %v971_v45  ;;  %3347 = vmatprep.mubr.msk.bf16.mxu0 %vm600_vm1, %v3754_v51  ;;  %v1039_v58 = vrot.slane %v1025_v53, %v3802_v21  ;;  %v3851_v2 = vrot.slane %v1092_v60, %v3802_v21  ;;  %v1160_v4 = vcombine.low %v3778_v54, %v1152_v0 }
 0x22f   : > { %3342 = vmatmul.mubr.msk.bf16.vlgmr.msra.gmra.mxu1 %vm600_vm1, %v3817_v40  ;;  %v3864_v8 = vrot.slane %v1093_v61, %v3802_v21  ;;  %v1161_v10 = vcombine.high %v3778_v54, %v1152_v0  ;;  %v3877_v17 = vrot.slane %v1108_v63, %v3802_v21  ;;  %v1176_v19 = vcombine.low %v3781_v62, %v1159_v52 }
 0x230   : > { %3352 = vmatpush3.bf16.msra.mxu1 %v1373_v57  ;;  %3353 = vmatprep.mubr.msk.bf16.mxu1 %vm600_vm1, %v3754_v51  ;;  %v3860_v3 = vrot.slane %v1160_v4, %v3802_v21  ;;  %v3887_v54 = vrot.slane %v1109_v18, %v3802_v21  ;;  %v1177_v22 = vcombine.high %v3781_v62, %v1159_v52  ;;  %v1477_v6 = vsel %vm607_vm0, %v1039_v58, 0 }
 0x231   : > { %3530 = vmatprep.subr.msk.bf16.mxu1 %vm607_vm0, %v1039_v58  ;;  %v3883_v16 = vrot.slane %v1161_v10, %v3802_v21  ;;  %v1057_v11 = vcombine.high %v1039_v58, %v3609_v24  ;;  %v3896_v25 = vrot.slane %v1176_v19, %v3802_v21  ;;  %v1007_v62 = vrot.slane %v993_v13, %v3765_v38 }
 0x232   : > { %v3901_v26 = vrot.slane %v1177_v22, %v3802_v21  ;;  %v980_v28 = vrot.slane %v972_v20, %v3802_v21  ;;  %v987_v36 = vrot.slane %v973_v33, %v3802_v21  ;;  %v2049_v47 = vsel %vm607_vm0, %v3851_v2, 0 }
 0x233   : > { %v1040_v29 = vcombine.low %v1007_v62, %v1023_v23  ;;  %v1581_v38 = vsel %vm607_vm0, %v1057_v11, 0  ;;  %v1041_v37 = vcombine.high %v1007_v62, %v1023_v23  ;;  %v1124_v48 = vcombine.high %v3851_v2, %v3609_v24 }
 0x234   : > { %3348 = vmatmul.mubr.msk.bf16.vlgmr.msra.gmra.mxu0 %vm600_vm1, %v3817_v40  ;;  %v1633_v31 = vsel %vm607_vm0, %v980_v28, 0  ;;  %v990_v32 = vcombine.high %v980_v28, %v3609_v24  ;;  %v1841_v42 = vsel %vm607_vm0, %v987_v36, 0  ;;  %v991_v43 = vcombine.high %v987_v36, %v3609_v24 }
 0x235   : > { %3358 = vmatpush3.bf16.msra.mxu0 %v1425_v49  ;;  %3359 = vmatprep.mubr.msk.bf16.mxu0 %vm600_vm1, %v3754_v51  ;;  %v1048_v30 = vrot.slane %v1040_v29, %v3802_v21  ;;  %v1055_v41 = vrot.slane %v1041_v37, %v3802_v21  ;;  %v2101_v50 = vsel %vm607_vm0, %v3860_v3, 0  ;;  %v1192_v56 = vcombine.high %v3860_v3, %v3609_v24 }
 0x236   : > { %3531 = vmatprep.subr.msk.bf16.mxu0 %vm607_vm0, %v989_v55  ;;  %v1737_v35 = vsel %vm607_vm0, %v990_v32, 0  ;;  %v1945_v45 = vsel %vm607_vm0, %v991_v43, 0  ;;  %v2153_v15 = vsel %vm607_vm0, %v1124_v48, 0  ;;  %v2257_v53 = vsel %vm607_vm0, %v3864_v8, 0 }
 0x237   : > { %3354 = vmatmul.mubr.msk.bf16.vlgmr.msra.gmra.mxu1 %vm600_vm1, %v3817_v40  ;;  %v1685_v14 = vsel %vm607_vm0, %v1048_v30, 0  ;;  %v1058_v34 = vcombine.high %v1048_v30, %v3609_v24  ;;  %v1893_v21 = vsel %vm607_vm0, %v1055_v41, 0  ;;  %v1059_v44 = vcombine.high %v1055_v41, %v3609_v24 }
 0x238   : > { %3364 = vmatpush3.bf16.msra.mxu1 %v1477_v6  ;;  %3365 = vmatprep.mubr.msk.bf16.mxu1 %vm600_vm1, %v3754_v51  ;;  %v2205_v59 = vsel %vm607_vm0, %v1192_v56, 0  ;;  %v1125_v60 = vcombine.high %v3864_v8, %v3609_v24  ;;  %v2309_v61 = vsel %vm607_vm0, %v3883_v16, 0  ;;  %v1193_v63 = vcombine.high %v3883_v16, %v3609_v24 }
 0x239   : > { %3532 = vmatprep.subr.msk.bf16.mxu1 %vm607_vm0, %v1057_v11  ;;  %v1789_v39 = vsel %vm607_vm0, %v1058_v34, 0  ;;  %v1997_v46 = vsel %vm607_vm0, %v1059_v44, 0  ;;  %v2465_v52 = vsel %vm607_vm0, %v3877_v17, 0  ;;  %v1126_v1 = vcombine.high %v3877_v17, %v3609_v24 }
 0x23a   : > { %v2361_v18 = vsel %vm607_vm0, %v1125_v60, 0  ;;  %v2413_v0 = vsel %vm607_vm0, %v1193_v63, 0  ;;  %v2517_v57 = vsel %vm607_vm0, %v3896_v25, 0  ;;  %v1194_v58 = vcombine.high %v3896_v25, %v3609_v24 }
 0x23b   : > { %v2673_v5 = vsel %vm607_vm0, %v3887_v54, 0  ;;  %v2725_v7 = vsel %vm607_vm0, %v3901_v26, 0 }
 0x23c   : > { %3360 = vmatmul.mubr.msk.bf16.vlgmr.msra.gmra.mxu0 %vm600_vm1, %v3817_v40  ;;  %v2621_v4 = vsel %vm607_vm0, %v1194_v58, 0 }
 0x23d   : > { %3370 = vmatpush3.bf16.msra.mxu0 %v1529_v27  ;;  %3371 = vmatprep.mubr.msk.bf16.mxu0 %vm600_vm1, %v3754_v51 }
 0x23e   : > { %3533 = vmatprep.subr.msk.bf16.mxu0 %vm607_vm0, %v980_v28 }
 0x23f   : > { %3366 = vmatmul.mubr.msk.bf16.vlgmr.msra.gmra.mxu1 %vm600_vm1, %v3817_v40 }
 0x240   : > { %3376 = vmatpush3.bf16.msra.mxu1 %v1581_v38  ;;  %3377 = vmatprep.mubr.msk.bf16.mxu1 %vm600_vm1, %v3754_v51 }
 0x241   : > { %3534 = vmatprep.subr.msk.bf16.mxu1 %vm607_vm0, %v1048_v30 }
 0x244   : > { %3372 = vmatmul.mubr.msk.bf16.vlgmr.msra.gmra.mxu0 %vm600_vm1, %v3817_v40 }
 0x245   : > { %3382 = vmatpush3.bf16.msra.mxu0 %v1633_v31  ;;  %3383 = vmatprep.mubr.msk.bf16.mxu0 %vm600_vm1, %v3754_v51 }
 0x246   : > { %3535 = vmatprep.subr.msk.bf16.mxu0 %vm607_vm0, %v990_v32 }
 0x247   : > { %3378 = vmatmul.mubr.msk.bf16.vlgmr.msra.gmra.mxu1 %vm600_vm1, %v3817_v40 }
 0x248   : > { %3388 = vmatpush3.bf16.msra.mxu1 %v1685_v14  ;;  %3389 = vmatprep.mubr.msk.bf16.mxu1 %vm600_vm1, %v3754_v51 }
 0x249   : > { %3536 = vmatprep.subr.msk.bf16.mxu1 %vm607_vm0, %v1058_v34 }
 0x24c   : > { %3384 = vmatmul.mubr.msk.bf16.vlgmr.msra.gmra.mxu0 %vm600_vm1, %v3817_v40 }
 0x24d   : > { %3394 = vmatpush3.bf16.msra.mxu0 %v1737_v35  ;;  %3395 = vmatprep.mubr.msk.bf16.mxu0 %vm600_vm1, %v3754_v51 }
 0x24e   : > { %3537 = vmatprep.subr.msk.bf16.mxu0 %vm607_vm0, %v987_v36 }
 0x24f   : > { %3390 = vmatmul.mubr.msk.bf16.vlgmr.msra.gmra.mxu1 %vm600_vm1, %v3817_v40 }
 0x250   : > { %3400 = vmatpush3.bf16.msra.mxu1 %v1789_v39  ;;  %3401 = vmatprep.mubr.msk.bf16.mxu1 %vm600_vm1, %v3754_v51 }
 0x251   : > { %3538 = vmatprep.subr.msk.bf16.mxu1 %vm607_vm0, %v1055_v41 }
 0x254   : > { %3396 = vmatmul.mubr.msk.bf16.vlgmr.msra.gmra.mxu0 %vm600_vm1, %v3817_v40 }
 0x255   : > { %3406 = vmatpush3.bf16.msra.mxu0 %v1841_v42  ;;  %3407 = vmatprep.mubr.msk.bf16.mxu0 %vm600_vm1, %v3754_v51 }
 0x256   : > { %3539 = vmatprep.subr.msk.bf16.mxu0 %vm607_vm0, %v991_v43 }
 0x257   : > { %3402 = vmatmul.mubr.msk.bf16.vlgmr.msra.gmra.mxu1 %vm600_vm1, %v3817_v40 }
 0x258   : > { %3412 = vmatpush3.bf16.msra.mxu1 %v1893_v21  ;;  %3413 = vmatprep.mubr.msk.bf16.mxu1 %vm600_vm1, %v3754_v51 }
 0x259   : > { %3540 = vmatprep.subr.msk.bf16.mxu1 %vm607_vm0, %v1059_v44 }
 0x25c   : > { %3408 = vmatmul.mubr.msk.bf16.vlgmr.msra.gmra.mxu0 %vm600_vm1, %v3817_v40 }
 0x25d   : > { %3418 = vmatpush3.bf16.msra.mxu0 %v1945_v45  ;;  %3419 = vmatprep.mubr.msk.bf16.mxu0 %vm600_vm1, %v3754_v51 }
 0x25e   : > { %3541 = vmatprep.subr.msk.bf16.mxu0 %vm607_vm0, %v3851_v2  ;;  %v2569_v2 = vsel %vm607_vm0, %v1126_v1, 0 }
 0x25f   : > { %3414 = vmatmul.mubr.msk.bf16.vlgmr.msra.gmra.mxu1 %vm600_vm1, %v3817_v40 }
 0x260   : > { %3424 = vmatpush3.bf16.msra.mxu1 %v1997_v46  ;;  %3425 = vmatprep.mubr.msk.bf16.mxu1 %vm600_vm1, %v3754_v51 }
 0x261   : > { %3542 = vmatprep.subr.msk.bf16.mxu1 %vm607_vm0, %v3860_v3  ;;  %v1127_v3 = vcombine.high %v3887_v54, %v3609_v24 }
 0x263   : > { %v2777_v9 = vsel %vm607_vm0, %v1127_v3, 0 }
 0x264   : > { %3420 = vmatmul.mubr.msk.bf16.vlgmr.msra.gmra.mxu0 %vm600_vm1, %v3817_v40 }
 0x265   : > { %3430 = vmatpush3.bf16.msra.mxu0 %v2049_v47  ;;  %3431 = vmatprep.mubr.msk.bf16.mxu0 %vm600_vm1, %v3754_v51 }
 0x266   : > { %3543 = vmatprep.subr.msk.bf16.mxu0 %vm607_vm0, %v1124_v48 }
 0x267   : > { %3426 = vmatmul.mubr.msk.bf16.vlgmr.msra.gmra.mxu1 %vm600_vm1, %v3817_v40 }
 0x268   : > { %3436 = vmatpush3.bf16.msra.mxu1 %v2101_v50  ;;  %3437 = vmatprep.mubr.msk.bf16.mxu1 %vm600_vm1, %v3754_v51 }
 0x269   : > { %3544 = vmatprep.subr.msk.bf16.mxu1 %vm607_vm0, %v1192_v56 }
 0x26c   : > { %3432 = vmatmul.mubr.msk.bf16.vlgmr.msra.gmra.mxu0 %vm600_vm1, %v3817_v40 }
 0x26d   : > { %3442 = vmatpush3.bf16.msra.mxu0 %v2153_v15  ;;  %3443 = vmatprep.mubr.msk.bf16.mxu0 %vm600_vm1, %v3754_v51 }
 0x26e   : > { %3545 = vmatprep.subr.msk.bf16.mxu0 %vm607_vm0, %v3864_v8  ;;  %v1195_v8 = vcombine.high %v3901_v26, %v3609_v24 }
 0x26f   : > { %3438 = vmatmul.mubr.msk.bf16.vlgmr.msra.gmra.mxu1 %vm600_vm1, %v3817_v40 }
 0x270   : > { %3448 = vmatpush3.bf16.msra.mxu1 %v2205_v59  ;;  %3449 = vmatprep.mubr.msk.bf16.mxu1 %vm600_vm1, %v3754_v51  ;;  %v2829_v24 = vsel %vm607_vm0, %v1195_v8, 0 }
 0x271   : > { %3546 = vmatprep.subr.msk.bf16.mxu1 %vm607_vm0, %v3883_v16 }
 0x274   : > { %3444 = vmatmul.mubr.msk.bf16.vlgmr.msra.gmra.mxu0 %vm600_vm1, %v3817_v40 }
 0x275   : > { %3454 = vmatpush3.bf16.msra.mxu0 %v2257_v53  ;;  %3455 = vmatprep.mubr.msk.bf16.mxu0 %vm600_vm1, %v3754_v51 }
 0x276   : > { %3547 = vmatprep.subr.msk.bf16.mxu0 %vm607_vm0, %v1125_v60 }
 0x277   : > { %3450 = vmatmul.mubr.msk.bf16.vlgmr.msra.gmra.mxu1 %vm600_vm1, %v3817_v40 }
 0x278   : > { %3460 = vmatpush3.bf16.msra.mxu1 %v2309_v61  ;;  %3461 = vmatprep.mubr.msk.bf16.mxu1 %vm600_vm1, %v3754_v51 }
 0x279   : > { %3548 = vmatprep.subr.msk.bf16.mxu1 %vm607_vm0, %v1193_v63 }
 0x27c   : > { %3456 = vmatmul.mubr.msk.bf16.vlgmr.msra.gmra.mxu0 %vm600_vm1, %v3817_v40 }
 0x27d   : > { %3466 = vmatpush3.bf16.msra.mxu0 %v2361_v18  ;;  %3467 = vmatprep.mubr.msk.bf16.mxu0 %vm600_vm1, %v3754_v51 }
 0x27e   : > { %3549 = vmatprep.subr.msk.bf16.mxu0 %vm607_vm0, %v3877_v17 }
 0x27f   : > { %3462 = vmatmul.mubr.msk.bf16.vlgmr.msra.gmra.mxu1 %vm600_vm1, %v3817_v40 }
 0x280   : > { %3472 = vmatpush3.bf16.msra.mxu1 %v2413_v0  ;;  %3473 = vmatprep.mubr.msk.bf16.mxu1 %vm600_vm1, %v3754_v51 }
 0x281   : > { %3550 = vmatprep.subr.msk.bf16.mxu1 %vm607_vm0, %v3896_v25 }
 0x284   : > { %3468 = vmatmul.mubr.msk.bf16.vlgmr.msra.gmra.mxu0 %vm600_vm1, %v3817_v40 }
 0x285   : > { %3478 = vmatpush3.bf16.msra.mxu0 %v2465_v52  ;;  %3479 = vmatprep.mubr.msk.bf16.mxu0 %vm600_vm1, %v3754_v51 }
 0x286   : > { %3551 = vmatprep.subr.msk.bf16.mxu0 %vm607_vm0, %v1126_v1 }
 0x287   : > { %3474 = vmatmul.mubr.msk.bf16.vlgmr.msra.gmra.mxu1 %vm600_vm1, %v3817_v40 }
 0x288   : > { %3484 = vmatpush3.bf16.msra.mxu1 %v2517_v57  ;;  %3485 = vmatprep.mubr.msk.bf16.mxu1 %vm600_vm1, %v3754_v51 }
 0x289   : > { %3552 = vmatprep.subr.msk.bf16.mxu1 %vm607_vm0, %v1194_v58 }
 0x28c   : > { %3480 = vmatmul.mubr.msk.bf16.vlgmr.msra.gmra.mxu0 %vm600_vm1, %v3817_v40 }
 0x28d   : > { %3490 = vmatpush3.bf16.msra.mxu0 %v2569_v2  ;;  %3491 = vmatprep.mubr.msk.bf16.mxu0 %vm600_vm1, %v3754_v51 }
 0x28e   : > { %3553 = vmatprep.subr.msk.bf16.mxu0 %vm607_vm0, %v3887_v54 }
 0x28f   : > { %3486 = vmatmul.mubr.msk.bf16.vlgmr.msra.gmra.mxu1 %vm600_vm1, %v3817_v40 }
 0x290   : > { %3496 = vmatpush3.bf16.msra.mxu1 %v2621_v4  ;;  %3497 = vmatprep.mubr.msk.bf16.mxu1 %vm600_vm1, %v3754_v51 }
 0x291   : > { %3554 = vmatprep.subr.msk.bf16.mxu1 %vm607_vm0, %v3901_v26 }
 0x294   : > { %3492 = vmatmul.mubr.msk.bf16.vlgmr.msra.gmra.mxu0 %vm600_vm1, %v3817_v40 }
 0x295   : > { %3502 = vmatpush3.bf16.msra.mxu0 %v2673_v5  ;;  %3503 = vmatprep.mubr.msk.bf16.mxu0 %vm600_vm1, %v3754_v51 }
 0x296   : > { %3555 = vmatprep.subr.msk.bf16.mxu0 %vm607_vm0, %v1127_v3 }
 0x297   : > { %3498 = vmatmul.mubr.msk.bf16.vlgmr.msra.gmra.mxu1 %vm600_vm1, %v3817_v40 }
 0x298   : > { %3508 = vmatpush3.bf16.msra.mxu1 %v2725_v7  ;;  %3509 = vmatprep.mubr.msk.bf16.mxu1 %vm600_vm1, %v3754_v51 }
 0x299   : > { %3556 = vmatprep.subr.msk.bf16.mxu1 %vm607_vm0, %v1195_v8 }
 0x29c   : > { %3504 = vmatmul.mubr.msk.bf16.vlgmr.msra.gmra.mxu0 %vm600_vm1, %v3817_v40 }
 0x29d   : > { %3514 = vmatpush3.bf16.msra.mxu0 %v2777_v9  ;;  %3515 = vmatprep.mubr.msk.bf16.mxu0 %vm600_vm1, %v3754_v51 }
 0x29f   : > { %3510 = vmatmul.mubr.msk.bf16.vlgmr.msra.gmra.mxu1 %vm600_vm1, %v3817_v40 }
 0x2a0   : > { %3520 = vmatpush3.bf16.msra.mxu1 %v2829_v24  ;;  %3521 = vmatprep.mubr.msk.bf16.mxu1 %vm600_vm1, %v3754_v51 }
 0x2a4   : > { %3516 = vmatmul.mubr.msk.bf16.vlgmr.msra.gmra.mxu0 %vm600_vm1, %v3817_v40 }
 0x2a7   : > { %3522 = vmatmul.mubr.msk.bf16.vlgmr.msra.gmra.mxu1 %vm600_vm1, %v3817_v40 }
 0x2ec   : > { %v3337_v51 = vpop.f32.mrf.mxu0 }
 0x2ed   : > { %2882 = vst.msk [vmem:[%s4107_s23 + $0x10] sm:$0xff] %vm600_vm1, %v3337_v51 }
 0x2ee   : > { %v1253_v49 = vpop.f32.mrf.mxu0 }
 0x2ef   : > { %2880 = vst.msk [vmem:[%s4107_s23] sm:$0xff] %vm600_vm1, %v1253_v49  ;;  %v3343_v40 = vpop.f32.mrf.mxu1 }
 0x2f0   : > { %v3338_v55 = vpop.f32.mrf.mxu0  ;;  %2886 = vst.msk [vmem:[%s4107_s23 + $0x30] sm:$0xff] %vm600_vm1, %v3343_v40 }
 0x2f1   : > { %2883 = vst.msk [vmem:[%s4107_s23 + $0x18] sm:$0xff] %vm600_vm1, %v3338_v55  ;;  %v1305_v10 = vpop.f32.mrf.mxu1 }
 0x2f2   : > { %v1256_v12 = vpop.f32.mrf.mxu0  ;;  %2884 = vst.msk [vmem:[%s4107_s23 + $0x20] sm:$0xff] %vm600_vm1, %v1305_v10 }
 0x2f3   : > { %2881 = vst.msk [vmem:[%s4107_s23 + $0x8] sm:$0xff] %vm600_vm1, %v1256_v12  ;;  %v3344_v17 = vpop.f32.mrf.mxu1 }
 0x2f4   : > { %v3349_v13 = vpop.f32.mrf.mxu0  ;;  %2887 = vst.msk [vmem:[%s4107_s23 + $0x38] sm:$0xff] %vm600_vm1, %v3344_v17 }
 0x2f5   : > { %2890 = vst.msk [vmem:[%s4107_s23 + $0x50] sm:$0xff] %vm600_vm1, %v3349_v13  ;;  %v1308_v16 = vpop.f32.mrf.mxu1 }
 0x2f6   : > { %v1357_v19 = vpop.f32.mrf.mxu0  ;;  %2885 = vst.msk [vmem:[%s4107_s23 + $0x28] sm:$0xff] %vm600_vm1, %v1308_v16 }
 0x2f7   : > { %2888 = vst.msk [vmem:[%s4107_s23 + $0x40] sm:$0xff] %vm600_vm1, %v1357_v19  ;;  %v3355_v54 = vpop.f32.mrf.mxu1 }
 0x2f8   : > { %v3350_v20 = vpop.f32.mrf.mxu0  ;;  %2894 = vst.msk [vmem:[%s4107_s23 + $0x70] sm:$0xff] %vm600_vm1, %v3355_v54 }
 0x2f9   : > { %2891 = vst.msk [vmem:[%s4107_s23 + $0x58] sm:$0xff] %vm600_vm1, %v3350_v20  ;;  %v1409_v22 = vpop.f32.mrf.mxu1 }
 0x2fa   : > { %v1360_v23 = vpop.f32.mrf.mxu0  ;;  %2892 = vst.msk [vmem:[%s4107_s23 + $0x60] sm:$0xff] %vm600_vm1, %v1409_v22 }
 0x2fb   : > { %2889 = vst.msk [vmem:[%s4107_s23 + $0x48] sm:$0xff] %vm600_vm1, %v1360_v23  ;;  %v3356_v6 = vpop.f32.mrf.mxu1 }
 0x2fc   : > { %v3361_v11 = vpop.f32.mrf.mxu0  ;;  %2895 = vst.msk [vmem:[%s4107_s23 + $0x78] sm:$0xff] %vm600_vm1, %v3356_v6 }
 0x2fd   : > { %2898 = vst.msk [vmem:[%s4107_s23 + $0x90] sm:$0xff] %vm600_vm1, %v3361_v11  ;;  %v1412_v25 = vpop.f32.mrf.mxu1 }
 0x2fe   : > { %v1461_v26 = vpop.f32.mrf.mxu0  ;;  %2893 = vst.msk [vmem:[%s4107_s23 + $0x68] sm:$0xff] %vm600_vm1, %v1412_v25 }
 0x2ff   : > { %2896 = vst.msk [vmem:[%s4107_s23 + $0x80] sm:$0xff] %vm600_vm1, %v1461_v26  ;;  %v3367_v62 = vpop.f32.mrf.mxu1 }
 0x300   : > { %v3362_v27 = vpop.f32.mrf.mxu0  ;;  %2902 = vst.msk [vmem:[%s4107_s23 + $0xb0] sm:$0xff] %vm600_vm1, %v3367_v62 }
 0x301   : > { %2899 = vst.msk [vmem:[%s4107_s23 + $0x98] sm:$0xff] %vm600_vm1, %v3362_v27  ;;  %v1513_v28 = vpop.f32.mrf.mxu1 }
 0x302   : > { %v1464_v29 = vpop.f32.mrf.mxu0  ;;  %2900 = vst.msk [vmem:[%s4107_s23 + $0xa0] sm:$0xff] %vm600_vm1, %v1513_v28 }
 0x303   : > { %2897 = vst.msk [vmem:[%s4107_s23 + $0x88] sm:$0xff] %vm600_vm1, %v1464_v29  ;;  %v3368_v38 = vpop.f32.mrf.mxu1 }
 0x304   : > { %v3373_v30 = vpop.f32.mrf.mxu0  ;;  %2903 = vst.msk [vmem:[%s4107_s23 + $0xb8] sm:$0xff] %vm600_vm1, %v3368_v38 }
 0x305   : > { %2906 = vst.msk [vmem:[%s4107_s23 + $0xd0] sm:$0xff] %vm600_vm1, %v3373_v30  ;;  %v1516_v31 = vpop.f32.mrf.mxu1 }
 0x306   : > { %v1565_v32 = vpop.f32.mrf.mxu0  ;;  %2901 = vst.msk [vmem:[%s4107_s23 + $0xa8] sm:$0xff] %vm600_vm1, %v1516_v31 }
 0x307   : > { %2904 = vst.msk [vmem:[%s4107_s23 + $0xc0] sm:$0xff] %vm600_vm1, %v1565_v32  ;;  %v3379_v33 = vpop.f32.mrf.mxu1 }
 0x308   : > { %v3374_v14 = vpop.f32.mrf.mxu0  ;;  %2910 = vst.msk [vmem:[%s4107_s23 + $0xf0] sm:$0xff] %vm600_vm1, %v3379_v33 }
 0x309   : > { %2907 = vst.msk [vmem:[%s4107_s23 + $0xd8] sm:$0xff] %vm600_vm1, %v3374_v14  ;;  %v1617_v34 = vpop.f32.mrf.mxu1 }
 0x30a   : > { %v1568_v35 = vpop.f32.mrf.mxu0  ;;  %2908 = vst.msk [vmem:[%s4107_s23 + $0xe0] sm:$0xff] %vm600_vm1, %v1617_v34 }
 0x30b   : > { %2905 = vst.msk [vmem:[%s4107_s23 + $0xc8] sm:$0xff] %vm600_vm1, %v1568_v35  ;;  %v3380_v36 = vpop.f32.mrf.mxu1 }
 0x30c   : > { %v3385_v37 = vpop.f32.mrf.mxu0  ;;  %2911 = vst.msk [vmem:[%s4107_s23 + $0xf8] sm:$0xff] %vm600_vm1, %v3380_v36 }
 0x30d   : > { %2914 = vst.msk [vmem:[%s4107_s23 + $0x110] sm:$0xff] %vm600_vm1, %v3385_v37  ;;  %v1620_v39 = vpop.f32.mrf.mxu1 }
 0x30e   : > { %v1669_v41 = vpop.f32.mrf.mxu0  ;;  %2909 = vst.msk [vmem:[%s4107_s23 + $0xe8] sm:$0xff] %vm600_vm1, %v1620_v39 }
 0x30f   : > { %2912 = vst.msk [vmem:[%s4107_s23 + $0x100] sm:$0xff] %vm600_vm1, %v1669_v41  ;;  %v3391_v42 = vpop.f32.mrf.mxu1 }
 0x310   : > { %v3386_v43 = vpop.f32.mrf.mxu0  ;;  %2918 = vst.msk [vmem:[%s4107_s23 + $0x130] sm:$0xff] %vm600_vm1, %v3391_v42 }
 0x311   : > { %2915 = vst.msk [vmem:[%s4107_s23 + $0x118] sm:$0xff] %vm600_vm1, %v3386_v43  ;;  %v1721_v21 = vpop.f32.mrf.mxu1 }
 0x312   : > { %v1672_v44 = vpop.f32.mrf.mxu0  ;;  %2916 = vst.msk [vmem:[%s4107_s23 + $0x120] sm:$0xff] %vm600_vm1, %v1721_v21 }
 0x313   : > { %2913 = vst.msk [vmem:[%s4107_s23 + $0x108] sm:$0xff] %vm600_vm1, %v1672_v44  ;;  %v3392_v45 = vpop.f32.mrf.mxu1 }
 0x314   : > { %v3397_v46 = vpop.f32.mrf.mxu0  ;;  %2919 = vst.msk [vmem:[%s4107_s23 + $0x138] sm:$0xff] %vm600_vm1, %v3392_v45 }
 0x315   : > { %2922 = vst.msk [vmem:[%s4107_s23 + $0x150] sm:$0xff] %vm600_vm1, %v3397_v46  ;;  %v1724_v47 = vpop.f32.mrf.mxu1 }
 0x316   : > { %v1773_v48 = vpop.f32.mrf.mxu0  ;;  %2917 = vst.msk [vmem:[%s4107_s23 + $0x128] sm:$0xff] %vm600_vm1, %v1724_v47 }
 0x317   : > { %2920 = vst.msk [vmem:[%s4107_s23 + $0x140] sm:$0xff] %vm600_vm1, %v1773_v48  ;;  %v3403_v50 = vpop.f32.mrf.mxu1 }
 0x318   : > { %v3398_v56 = vpop.f32.mrf.mxu0  ;;  %2926 = vst.msk [vmem:[%s4107_s23 + $0x170] sm:$0xff] %vm600_vm1, %v3403_v50 }
 0x319   : > { %2923 = vst.msk [vmem:[%s4107_s23 + $0x158] sm:$0xff] %vm600_vm1, %v3398_v56  ;;  %v1825_v15 = vpop.f32.mrf.mxu1 }
 0x31a   : > { %v1776_v59 = vpop.f32.mrf.mxu0  ;;  %2924 = vst.msk [vmem:[%s4107_s23 + $0x160] sm:$0xff] %vm600_vm1, %v1825_v15 }
 0x31b   : > { %2921 = vst.msk [vmem:[%s4107_s23 + $0x148] sm:$0xff] %vm600_vm1, %v1776_v59  ;;  %v3404_v53 = vpop.f32.mrf.mxu1 }
 0x31c   : > { %v3409_v60 = vpop.f32.mrf.mxu0  ;;  %2927 = vst.msk [vmem:[%s4107_s23 + $0x178] sm:$0xff] %vm600_vm1, %v3404_v53 }
 0x31d   : > { %2930 = vst.msk [vmem:[%s4107_s23 + $0x190] sm:$0xff] %vm600_vm1, %v3409_v60  ;;  %v1828_v61 = vpop.f32.mrf.mxu1 }
 0x31e   : > { %v1877_v63 = vpop.f32.mrf.mxu0  ;;  %2925 = vst.msk [vmem:[%s4107_s23 + $0x168] sm:$0xff] %vm600_vm1, %v1828_v61 }
 0x31f   : > { %2928 = vst.msk [vmem:[%s4107_s23 + $0x180] sm:$0xff] %vm600_vm1, %v1877_v63  ;;  %v3415_v18 = vpop.f32.mrf.mxu1 }
 0x320   : > { %v3410_v0 = vpop.f32.mrf.mxu0  ;;  %2934 = vst.msk [vmem:[%s4107_s23 + $0x1b0] sm:$0xff] %vm600_vm1, %v3415_v18 }
 0x321   : > { %2931 = vst.msk [vmem:[%s4107_s23 + $0x198] sm:$0xff] %vm600_vm1, %v3410_v0  ;;  %v1929_v52 = vpop.f32.mrf.mxu1 }
 0x322   : > { %v1880_v1 = vpop.f32.mrf.mxu0  ;;  %2932 = vst.msk [vmem:[%s4107_s23 + $0x1a0] sm:$0xff] %vm600_vm1, %v1929_v52 }
 0x323   : > { %2929 = vst.msk [vmem:[%s4107_s23 + $0x188] sm:$0xff] %vm600_vm1, %v1880_v1  ;;  %v3416_v57 = vpop.f32.mrf.mxu1 }
 0x324   : > { %v3421_v58 = vpop.f32.mrf.mxu0  ;;  %2935 = vst.msk [vmem:[%s4107_s23 + $0x1b8] sm:$0xff] %vm600_vm1, %v3416_v57 }
 0x325   : > { %2938 = vst.msk [vmem:[%s4107_s23 + $0x1d0] sm:$0xff] %vm600_vm1, %v3421_v58  ;;  %v1932_v2 = vpop.f32.mrf.mxu1 }
 0x326   : > { %v1981_v4 = vpop.f32.mrf.mxu0  ;;  %2933 = vst.msk [vmem:[%s4107_s23 + $0x1a8] sm:$0xff] %vm600_vm1, %v1932_v2 }
 0x327   : > { %2936 = vst.msk [vmem:[%s4107_s23 + $0x1c0] sm:$0xff] %vm600_vm1, %v1981_v4  ;;  %v3427_v5 = vpop.f32.mrf.mxu1 }
 0x328   : > { %v3422_v3 = vpop.f32.mrf.mxu0  ;;  %2942 = vst.msk [vmem:[%s4107_s23 + $0x1f0] sm:$0xff] %vm600_vm1, %v3427_v5 }
 0x329   : > { %2939 = vst.msk [vmem:[%s4107_s23 + $0x1d8] sm:$0xff] %vm600_vm1, %v3422_v3  ;;  %v2033_v7 = vpop.f32.mrf.mxu1 }
 0x32a   : > { %v1984_v8 = vpop.f32.mrf.mxu0  ;;  %2940 = vst.msk [vmem:[%s4107_s23 + $0x1e0] sm:$0xff] %vm600_vm1, %v2033_v7 }
 0x32b   : > { %2937 = vst.msk [vmem:[%s4107_s23 + $0x1c8] sm:$0xff] %vm600_vm1, %v1984_v8  ;;  %v3428_v9 = vpop.f32.mrf.mxu1 }
 0x32c   : > { %v3433_v24 = vpop.f32.mrf.mxu0  ;;  %2943 = vst.msk [vmem:[%s4107_s23 + $0x1f8] sm:$0xff] %vm600_vm1, %v3428_v9 }
 0x32d   : > { %2946 = vst.msk [vmem:[%s4107_s23 + $0x210] sm:$0xff] %vm600_vm1, %v3433_v24  ;;  %v2036_v51 = vpop.f32.mrf.mxu1 }
 0x32e   : > { %v2085_v49 = vpop.f32.mrf.mxu0  ;;  %2941 = vst.msk [vmem:[%s4107_s23 + $0x1e8] sm:$0xff] %vm600_vm1, %v2036_v51 }
 0x32f   : > { %2944 = vst.msk [vmem:[%s4107_s23 + $0x200] sm:$0xff] %vm600_vm1, %v2085_v49  ;;  %v3439_v40 = vpop.f32.mrf.mxu1 }
 0x330   : > { %v3434_v55 = vpop.f32.mrf.mxu0  ;;  %2950 = vst.msk [vmem:[%s4107_s23 + $0x230] sm:$0xff] %vm600_vm1, %v3439_v40 }
 0x331   : > { %2947 = vst.msk [vmem:[%s4107_s23 + $0x218] sm:$0xff] %vm600_vm1, %v3434_v55  ;;  %v2137_v10 = vpop.f32.mrf.mxu1 }
 0x332   : > { %v2088_v12 = vpop.f32.mrf.mxu0  ;;  %2948 = vst.msk [vmem:[%s4107_s23 + $0x220] sm:$0xff] %vm600_vm1, %v2137_v10 }
 0x333   : > { %2945 = vst.msk [vmem:[%s4107_s23 + $0x208] sm:$0xff] %vm600_vm1, %v2088_v12  ;;  %v3440_v17 = vpop.f32.mrf.mxu1 }
 0x334   : > { %v3445_v13 = vpop.f32.mrf.mxu0  ;;  %2951 = vst.msk [vmem:[%s4107_s23 + $0x238] sm:$0xff] %vm600_vm1, %v3440_v17 }
 0x335   : > { %2954 = vst.msk [vmem:[%s4107_s23 + $0x250] sm:$0xff] %vm600_vm1, %v3445_v13  ;;  %v2140_v16 = vpop.f32.mrf.mxu1 }
 0x336   : > { %v2189_v19 = vpop.f32.mrf.mxu0  ;;  %2949 = vst.msk [vmem:[%s4107_s23 + $0x228] sm:$0xff] %vm600_vm1, %v2140_v16 }
 0x337   : > { %2952 = vst.msk [vmem:[%s4107_s23 + $0x240] sm:$0xff] %vm600_vm1, %v2189_v19  ;;  %v3451_v54 = vpop.f32.mrf.mxu1 }
 0x338   : > { %v3446_v20 = vpop.f32.mrf.mxu0  ;;  %2958 = vst.msk [vmem:[%s4107_s23 + $0x270] sm:$0xff] %vm600_vm1, %v3451_v54 }
 0x339   : > { %2955 = vst.msk [vmem:[%s4107_s23 + $0x258] sm:$0xff] %vm600_vm1, %v3446_v20  ;;  %v2241_v22 = vpop.f32.mrf.mxu1 }
 0x33a   : > { %v2192_v23 = vpop.f32.mrf.mxu0  ;;  %2956 = vst.msk [vmem:[%s4107_s23 + $0x260] sm:$0xff] %vm600_vm1, %v2241_v22 }
 0x33b   : > { %2953 = vst.msk [vmem:[%s4107_s23 + $0x248] sm:$0xff] %vm600_vm1, %v2192_v23  ;;  %v3452_v6 = vpop.f32.mrf.mxu1 }
 0x33c   : > { %v3457_v11 = vpop.f32.mrf.mxu0  ;;  %2959 = vst.msk [vmem:[%s4107_s23 + $0x278] sm:$0xff] %vm600_vm1, %v3452_v6 }
 0x33d   : > { %2962 = vst.msk [vmem:[%s4107_s23 + $0x290] sm:$0xff] %vm600_vm1, %v3457_v11  ;;  %v2244_v25 = vpop.f32.mrf.mxu1 }
 0x33e   : > { %v2293_v26 = vpop.f32.mrf.mxu0  ;;  %2957 = vst.msk [vmem:[%s4107_s23 + $0x268] sm:$0xff] %vm600_vm1, %v2244_v25 }
 0x33f   : > { %2960 = vst.msk [vmem:[%s4107_s23 + $0x280] sm:$0xff] %vm600_vm1, %v2293_v26  ;;  %v3463_v62 = vpop.f32.mrf.mxu1 }
 0x340   : > { %v3458_v27 = vpop.f32.mrf.mxu0  ;;  %2966 = vst.msk [vmem:[%s4107_s23 + $0x2b0] sm:$0xff] %vm600_vm1, %v3463_v62 }
 0x341   : > { %2963 = vst.msk [vmem:[%s4107_s23 + $0x298] sm:$0xff] %vm600_vm1, %v3458_v27  ;;  %v2345_v28 = vpop.f32.mrf.mxu1 }
 0x342   : > { %v2296_v29 = vpop.f32.mrf.mxu0  ;;  %2964 = vst.msk [vmem:[%s4107_s23 + $0x2a0] sm:$0xff] %vm600_vm1, %v2345_v28 }
 0x343   : > { %2961 = vst.msk [vmem:[%s4107_s23 + $0x288] sm:$0xff] %vm600_vm1, %v2296_v29  ;;  %v3464_v38 = vpop.f32.mrf.mxu1 }
 0x344   : > { %v3469_v30 = vpop.f32.mrf.mxu0  ;;  %2967 = vst.msk [vmem:[%s4107_s23 + $0x2b8] sm:$0xff] %vm600_vm1, %v3464_v38 }
 0x345   : > { %2970 = vst.msk [vmem:[%s4107_s23 + $0x2d0] sm:$0xff] %vm600_vm1, %v3469_v30  ;;  %v2348_v31 = vpop.f32.mrf.mxu1 }
 0x346   : > { %v2397_v32 = vpop.f32.mrf.mxu0  ;;  %2965 = vst.msk [vmem:[%s4107_s23 + $0x2a8] sm:$0xff] %vm600_vm1, %v2348_v31 }
 0x347   : > { %2968 = vst.msk [vmem:[%s4107_s23 + $0x2c0] sm:$0xff] %vm600_vm1, %v2397_v32  ;;  %v3475_v33 = vpop.f32.mrf.mxu1 }
 0x348   : > { %v3470_v14 = vpop.f32.mrf.mxu0  ;;  %2974 = vst.msk [vmem:[%s4107_s23 + $0x2f0] sm:$0xff] %vm600_vm1, %v3475_v33 }
 0x349   : > { %2971 = vst.msk [vmem:[%s4107_s23 + $0x2d8] sm:$0xff] %vm600_vm1, %v3470_v14  ;;  %v2449_v34 = vpop.f32.mrf.mxu1 }
 0x34a   : > { %v2400_v35 = vpop.f32.mrf.mxu0  ;;  %2972 = vst.msk [vmem:[%s4107_s23 + $0x2e0] sm:$0xff] %vm600_vm1, %v2449_v34 }
 0x34b   : > { %2969 = vst.msk [vmem:[%s4107_s23 + $0x2c8] sm:$0xff] %vm600_vm1, %v2400_v35  ;;  %v3476_v36 = vpop.f32.mrf.mxu1 }
 0x34c   : > { %v3481_v37 = vpop.f32.mrf.mxu0  ;;  %2975 = vst.msk [vmem:[%s4107_s23 + $0x2f8] sm:$0xff] %vm600_vm1, %v3476_v36 }
 0x34d   : > { %2978 = vst.msk [vmem:[%s4107_s23 + $0x310] sm:$0xff] %vm600_vm1, %v3481_v37  ;;  %v2452_v39 = vpop.f32.mrf.mxu1 }
 0x34e   : > { %v2501_v41 = vpop.f32.mrf.mxu0  ;;  %2973 = vst.msk [vmem:[%s4107_s23 + $0x2e8] sm:$0xff] %vm600_vm1, %v2452_v39 }
 0x34f   : > { %2976 = vst.msk [vmem:[%s4107_s23 + $0x300] sm:$0xff] %vm600_vm1, %v2501_v41  ;;  %v3487_v42 = vpop.f32.mrf.mxu1 }
 0x350   : > { %v3482_v43 = vpop.f32.mrf.mxu0  ;;  %2982 = vst.msk [vmem:[%s4107_s23 + $0x330] sm:$0xff] %vm600_vm1, %v3487_v42 }
 0x351   : > { %2979 = vst.msk [vmem:[%s4107_s23 + $0x318] sm:$0xff] %vm600_vm1, %v3482_v43  ;;  %v2553_v21 = vpop.f32.mrf.mxu1 }
 0x352   : > { %v2504_v44 = vpop.f32.mrf.mxu0  ;;  %2980 = vst.msk [vmem:[%s4107_s23 + $0x320] sm:$0xff] %vm600_vm1, %v2553_v21 }
 0x353   : > { %2977 = vst.msk [vmem:[%s4107_s23 + $0x308] sm:$0xff] %vm600_vm1, %v2504_v44  ;;  %v3488_v45 = vpop.f32.mrf.mxu1 }
 0x354   : > { %v3493_v46 = vpop.f32.mrf.mxu0  ;;  %2983 = vst.msk [vmem:[%s4107_s23 + $0x338] sm:$0xff] %vm600_vm1, %v3488_v45 }
 0x355   : > { %2986 = vst.msk [vmem:[%s4107_s23 + $0x350] sm:$0xff] %vm600_vm1, %v3493_v46  ;;  %v2556_v47 = vpop.f32.mrf.mxu1 }
 0x356   : > { %v2605_v48 = vpop.f32.mrf.mxu0  ;;  %2981 = vst.msk [vmem:[%s4107_s23 + $0x328] sm:$0xff] %vm600_vm1, %v2556_v47 }
 0x357   : > { %2984 = vst.msk [vmem:[%s4107_s23 + $0x340] sm:$0xff] %vm600_vm1, %v2605_v48  ;;  %v3499_v50 = vpop.f32.mrf.mxu1 }
 0x358   : > { %v3494_v56 = vpop.f32.mrf.mxu0  ;;  %2990 = vst.msk [vmem:[%s4107_s23 + $0x370] sm:$0xff] %vm600_vm1, %v3499_v50 }
 0x359   : > { %2987 = vst.msk [vmem:[%s4107_s23 + $0x358] sm:$0xff] %vm600_vm1, %v3494_v56  ;;  %v2657_v15 = vpop.f32.mrf.mxu1 }
 0x35a   : > { %v2608_v59 = vpop.f32.mrf.mxu0  ;;  %2988 = vst.msk [vmem:[%s4107_s23 + $0x360] sm:$0xff] %vm600_vm1, %v2657_v15 }
 0x35b   : > { %2985 = vst.msk [vmem:[%s4107_s23 + $0x348] sm:$0xff] %vm600_vm1, %v2608_v59  ;;  %v3500_v53 = vpop.f32.mrf.mxu1 }
 0x35c   : > { %v3505_v60 = vpop.f32.mrf.mxu0  ;;  %2991 = vst.msk [vmem:[%s4107_s23 + $0x378] sm:$0xff] %vm600_vm1, %v3500_v53 }
 0x35d   : > { %2994 = vst.msk [vmem:[%s4107_s23 + $0x390] sm:$0xff] %vm600_vm1, %v3505_v60  ;;  %v2660_v61 = vpop.f32.mrf.mxu1 }
 0x35e   : > { %v2709_v63 = vpop.f32.mrf.mxu0  ;;  %2989 = vst.msk [vmem:[%s4107_s23 + $0x368] sm:$0xff] %vm600_vm1, %v2660_v61 }
 0x35f   : > { %2992 = vst.msk [vmem:[%s4107_s23 + $0x380] sm:$0xff] %vm600_vm1, %v2709_v63  ;;  %v3511_v18 = vpop.f32.mrf.mxu1 }
 0x360   : > { %v3506_v0 = vpop.f32.mrf.mxu0  ;;  %2998 = vst.msk [vmem:[%s4107_s23 + $0x3b0] sm:$0xff] %vm600_vm1, %v3511_v18 }
 0x361   : > { %2995 = vst.msk [vmem:[%s4107_s23 + $0x398] sm:$0xff] %vm600_vm1, %v3506_v0  ;;  %v2761_v52 = vpop.f32.mrf.mxu1 }
 0x362   : > { %v2712_v1 = vpop.f32.mrf.mxu0  ;;  %2996 = vst.msk [vmem:[%s4107_s23 + $0x3a0] sm:$0xff] %vm600_vm1, %v2761_v52 }
 0x363   : > { %2993 = vst.msk [vmem:[%s4107_s23 + $0x388] sm:$0xff] %vm600_vm1, %v2712_v1  ;;  %v3512_v57 = vpop.f32.mrf.mxu1 }
 0x364   : > { %v3517_v58 = vpop.f32.mrf.mxu0  ;;  %2999 = vst.msk [vmem:[%s4107_s23 + $0x3b8] sm:$0xff] %vm600_vm1, %v3512_v57 }
 0x365   : > { %3002 = vst.msk [vmem:[%s4107_s23 + $0x3d0] sm:$0xff] %vm600_vm1, %v3517_v58  ;;  %v2764_v2 = vpop.f32.mrf.mxu1 }
 0x366   : > { %v2813_v4 = vpop.f32.mrf.mxu0  ;;  %2997 = vst.msk [vmem:[%s4107_s23 + $0x3a8] sm:$0xff] %vm600_vm1, %v2764_v2 }
 0x367   : > { %3000 = vst.msk [vmem:[%s4107_s23 + $0x3c0] sm:$0xff] %vm600_vm1, %v2813_v4  ;;  %v3523_v5 = vpop.f32.mrf.mxu1 }
 0x368   : > { %v3518_v3 = vpop.f32.mrf.mxu0  ;;  %3006 = vst.msk [vmem:[%s4107_s23 + $0x3f0] sm:$0xff] %vm600_vm1, %v3523_v5 }
 0x369   : > { %3003 = vst.msk [vmem:[%s4107_s23 + $0x3d8] sm:$0xff] %vm600_vm1, %v3518_v3  ;;  %v2865_v7 = vpop.f32.mrf.mxu1 }
 0x36a   : > { %v2816_v8 = vpop.f32.mrf.mxu0  ;;  %3004 = vst.msk [vmem:[%s4107_s23 + $0x3e0] sm:$0xff] %vm600_vm1, %v2865_v7 }
 0x36b   : > { %3001 = vst.msk [vmem:[%s4107_s23 + $0x3c8] sm:$0xff] %vm600_vm1, %v2816_v8  ;;  %v3524_v9 = vpop.f32.mrf.mxu1 }
 0x36c   : > { %3007 = vst.msk [vmem:[%s4107_s23 + $0x3f8] sm:$0xff] %vm600_vm1, %v3524_v9 }
 0x36d   : > { %v2868_v24 = vpop.f32.mrf.mxu1 }
 0x36e   : > { %3005 = vst.msk [vmem:[%s4107_s23 + $0x3e8] sm:$0xff] %vm600_vm1, %v2868_v24 }
 0x36f PF: > { %s15_s18 = sadd.s32 1, %s3607_s18  }
 0x370   : > { %p12_p4 = scmp.ge.s32.totalorder %s15_s18, 4  }
 0x372   :  { %14 = sbr.rel (!%p12_p4) target bundleno = 1 (0x1), region = 70 }

// kernel: run.8
= control target key start
LH: loop header
LB: loop body
LE: loop exit
PB: predicated region body
PF: predicated region fallthrough
CT: control target
= control target key end

     0   :  { %s4455_s15 = smov 0   ;;  %s6036_s0 = inlined_call_operand.vmem [shape: bf16[2,10,10,256], index: 0, kind: input, shape index: {}]   ;;  %s6037_s1 = inlined_call_operand.vmem [shape: bf16[9,256,256], index: 1, kind: input, shape index: {}]   ;;  %s6038_s2 = inlined_call_operand.vmem [shape: f32[1,256], index: 2, kind: input, shape index: {}]   ;;  %s6039_s3 = inlined_call_operand.vmem [shape: f32[1,256], index: 3, kind: input, shape index: {}]   ;;  %s6040_s4 = inlined_call_operand.vmem [shape: bf16[2,8,8,256], index: 4, kind: output, shape index: {}]  }
   0x1 LB: > { %s3296_s16 = sadd.s32 4294967295, %s4428_s15   ;;  %p3300_p0 = scmp.ge.s32.totalorder %s4428_s15, 1  ;;  %s4428_s15 = sphi %s4455_s15, %s14_s15  }
   0x2   : > { %p162_p1 = scmp.lt.s32.totalorder %s4428_s15, 3 }
   0x4   : > { %p163_p2 = pnand %p3300_p0, %p162_p1 }
   0x6   : > { %166 = sbr.rel (%p163_p2) target bundleno = 552 (0x228), region = 36 }
   0xb   : > { %v3972_v0 = vld [vmem:[%s6037_s1 + $0x174] ss:$8 sps:$4 sm:$0xff]   ;;  %v3976_v2 = vld [vmem:[%s6037_s1 + $0x170] ss:$8 sps:$4 sm:$0xff]   ;;  %v3978_v4 = vld [vmem:[%s6037_s1 + $0x164] ss:$8 sps:$4 sm:$0xff]  }
   0xc   : > { %v3974_v1 = vld [vmem:[%s6037_s1 + $0x74] ss:$8 sps:$4 sm:$0xff]   ;;  %590 = vmatprep.subr.bf16.mxu0 %v3972_v0  ;;  %v3977_v3 = vld [vmem:[%s6037_s1 + $0x70] ss:$8 sps:$4 sm:$0xff]   ;;  %v3980_v5 = vld [vmem:[%s6037_s1 + $0x64] ss:$8 sps:$4 sm:$0xff]  }
   0xd   : > { %863 = vmatprep.subr.bf16.mxu1 %v3974_v1  ;;  %591 = vmatpush1.bf16.msra.mxu0 %v3976_v2  ;;  %v3982_v6 = vld [vmem:[%s6037_s1 + $0x160] ss:$8 sps:$4 sm:$0xff]   ;;  %v3984_v8 = vld [vmem:[%s6037_s1 + $0x154] ss:$8 sps:$4 sm:$0xff]   ;;  %v3988_v10 = vld [vmem:[%s6037_s1 + $0x150] ss:$8 sps:$4 sm:$0xff]  }
   0xe   : > { %864 = vmatpush1.bf16.msra.mxu1 %v3977_v3  ;;  %592 = vmatprep.subr.bf16.mxu0 %v3978_v4  ;;  %v3983_v7 = vld [vmem:[%s6037_s1 + $0x60] ss:$8 sps:$4 sm:$0xff]   ;;  %v3986_v9 = vld [vmem:[%s6037_s1 + $0x54] ss:$8 sps:$4 sm:$0xff]   ;;  %v3989_v11 = vld [vmem:[%s6037_s1 + $0x50] ss:$8 sps:$4 sm:$0xff]  }
   0xf   : > { %865 = vmatprep.subr.bf16.mxu1 %v3980_v5  ;;  %v3990_v12 = vld [vmem:[%s6037_s1 + $0x144] ss:$8 sps:$4 sm:$0xff]   ;;  %v3994_v14 = vld [vmem:[%s6037_s1 + $0x140] ss:$8 sps:$4 sm:$0xff]   ;;  %v3996_v16 = vld [vmem:[%s6037_s1 + $0x134] ss:$8 sps:$4 sm:$0xff]  }
  0x10   : > { %v3992_v13 = vld [vmem:[%s6037_s1 + $0x44] ss:$8 sps:$4 sm:$0xff]   ;;  %v3995_v15 = vld [vmem:[%s6037_s1 + $0x40] ss:$8 sps:$4 sm:$0xff]   ;;  %v3998_v17 = vld [vmem:[%s6037_s1 + $0x34] ss:$8 sps:$4 sm:$0xff]  }
  0x11   : > { %593 = vmatpush1.bf16.msra.mxu0 %v3982_v6  ;;  %v4000_v18 = vld [vmem:[%s6037_s1 + $0x130] ss:$8 sps:$4 sm:$0xff]   ;;  %v4002_v20 = vld [vmem:[%s6037_s1 + $0x124] ss:$8 sps:$4 sm:$0xff]   ;;  %v4006_v22 = vld [vmem:[%s6037_s1 + $0x120] ss:$8 sps:$4 sm:$0xff]  }
  0x12   : > { %866 = vmatpush1.bf16.msra.mxu1 %v3983_v7  ;;  %594 = vmatprep.subr.bf16.mxu0 %v3984_v8  ;;  %v4001_v19 = vld [vmem:[%s6037_s1 + $0x30] ss:$8 sps:$4 sm:$0xff]   ;;  %v4004_v21 = vld [vmem:[%s6037_s1 + $0x24] ss:$8 sps:$4 sm:$0xff]   ;;  %v4007_v23 = vld [vmem:[%s6037_s1 + $0x20] ss:$8 sps:$4 sm:$0xff]  }
  0x13   : > { %867 = vmatprep.subr.bf16.mxu1 %v3986_v9  ;;  %v4008_v24 = vld [vmem:[%s6037_s1 + $0x114] ss:$8 sps:$4 sm:$0xff]   ;;  %v4012_v26 = vld [vmem:[%s6037_s1 + $0x110] ss:$8 sps:$4 sm:$0xff]   ;;  %v4014_v28 = vld [vmem:[%s6037_s1 + $0x104] ss:$8 sps:$4 sm:$0xff]  }
  0x14   : > { %v4010_v25 = vld [vmem:[%s6037_s1 + $0x14] ss:$8 sps:$4 sm:$0xff]   ;;  %v4013_v27 = vld [vmem:[%s6037_s1 + $0x10] ss:$8 sps:$4 sm:$0xff]   ;;  %v4016_v29 = vld [vmem:[%s6037_s1 + $0x4] ss:$8 sps:$4 sm:$0xff]  }
  0x15   : > { %595 = vmatpush1.bf16.msra.mxu0 %v3988_v10  ;;  %v4018_v30 = vld [vmem:[%s6037_s1 + $0x100] ss:$8 sps:$4 sm:$0xff]   ;;  %p188_p3 = scmp.lt.s32.totalorder %s3296_s16, 1  ;;  %v4020_v32 = vld [vmem:[%s6037_s1 + $0x1f4] ss:$8 sps:$4 sm:$0xff]   ;;  %vm944_vm3 = vcmask 1042432  }
  0x16   : > { %868 = vmatpush1.bf16.msra.mxu1 %v3989_v11  ;;  %596 = vmatprep.subr.bf16.mxu0 %v3990_v12  ;;  %v4019_v31 = vld [vmem:[%s6037_s1] ss:$8 sps:$4 sm:$0xff]   ;;  %v4022_v33 = vld [vmem:[%s6037_s1 + $0xf4] ss:$8 sps:$4 sm:$0xff]   ;;  %v4024_v34 = vld [vmem:[%s6037_s1 + $0x1f0] ss:$8 sps:$4 sm:$0xff]  }
  0x17   : > { %869 = vmatprep.subr.bf16.mxu1 %v3992_v13  ;;  %v4025_v35 = vld [vmem:[%s6037_s1 + $0xf0] ss:$8 sps:$4 sm:$0xff]   ;;  %s6090_s16 = smov (!%p188_p3, %s3296_s16), 1  ;;  %v4026_v36 = vld [vmem:[%s6037_s1 + $0x1e4] ss:$8 sps:$4 sm:$0xff]   ;;  %vm945_vm4 = vcmask 1046532  }
  0x18   : > { %v4028_v37 = vld [vmem:[%s6037_s1 + $0xe4] ss:$8 sps:$4 sm:$0xff]   ;;  %v4030_v38 = vld [vmem:[%s6037_s1 + $0x1e0] ss:$8 sps:$4 sm:$0xff]   ;;  %s3963_s23 = smul.u32 160, %s6090_s16  ;;  %vm4921_vm5 = vmor %vm944_vm3, %vm945_vm4  ;;  %s3922_s19 = sshll.u32 %s6090_s16, 6 }
  0x19   : > { %597 = vmatpush1.bf16.msra.mxu0 %v3994_v14  ;;  %v4031_v39 = vld [vmem:[%s6037_s1 + $0xe0] ss:$8 sps:$4 sm:$0xff]   ;;  %v4032_v40 = vld [vmem:[%s6037_s1 + $0x1d4] ss:$8 sps:$4 sm:$0xff]   ;;  %v4036_v42 = vld [vmem:[%s6037_s1 + $0x1d0] ss:$8 sps:$4 sm:$0xff]   ;;  %s5997_s16 = scalar_lea.vmem %s6040_s4, %s3922_s19 }
  0x1a   : > { %870 = vmatpush1.bf16.msra.mxu1 %v3995_v15  ;;  %598 = vmatprep.subr.bf16.mxu0 %v3996_v16  ;;  %v4034_v41 = vld [vmem:[%s6037_s1 + $0xd4] ss:$8 sps:$4 sm:$0xff]   ;;  %v4037_v43 = vld [vmem:[%s6037_s1 + $0xd0] ss:$8 sps:$4 sm:$0xff]   ;;  %s4605_s10 = scalar_lea.vmem %s6036_s0, %s3963_s23  ;;  %v4038_v44 = vld [vmem:[%s6037_s1 + $0x1c4] ss:$8 sps:$4 sm:$0xff]  }
  0x1b   : > { %871 = vmatprep.subr.bf16.mxu1 %v3998_v17  ;;  %vm250_vm0 = vsmask.f32 3328  ;;  %v4040_v45 = vld [vmem:[%s6037_s1 + $0xc4] ss:$8 sps:$4 sm:$0xff]   ;;  %vm251_vm1 = vsmask.f32 7440 }
  0x1c   : > { %v4042_v46 = vld [vmem:[%s6037_s1 + $0x1c0] ss:$8 sps:$4 sm:$0xff]   ;;  %v4044_v49 = vld [vmem:[%s6037_s1 + $0x1b4] ss:$8 sps:$4 sm:$0xff]   ;;  %v4048_v1 = vld [vmem:[%s6037_s1 + $0x1b0] ss:$8 sps:$4 sm:$0xff]  }
  0x1d   : > { %599 = vmatpush1.bf16.msra.mxu0 %v4000_v18  ;;  %v4043_v47 = vld [vmem:[%s6037_s1 + $0xc0] ss:$8 sps:$4 sm:$0xff]   ;;  %v4046_v50 = vld [vmem:[%s6037_s1 + $0xb4] ss:$8 sps:$4 sm:$0xff]   ;;  %v4049_v2 = vld [vmem:[%s6037_s1 + $0xb0] ss:$8 sps:$4 sm:$0xff]  }
  0x1e   : > { %872 = vmatpush1.bf16.msra.mxu1 %v4001_v19  ;;  %600 = vmatprep.subr.bf16.mxu0 %v4002_v20  ;;  %v4620_v48 = vld [vmem:[%s4605_s10] sm:$0xff]  ;;  %v4629_v51 = vld [vmem:[%s4605_s10 + $0x8] sm:$0x11]  ;;  %v4632_v52 = vld [vmem:[%s4605_s10 + $0x10] sm:$0xff] }
  0x1f   : > { %873 = vmatprep.subr.bf16.mxu1 %v4004_v21  ;;  %v4635_v53 = vld [vmem:[%s4605_s10 + $0x18] sm:$0x11]  ;;  %v254_v54 = vshrl.u32 %v4620_v48, 16  ;;  %v4639_v55 = vld [vmem:[%s4605_s10 + $0x20] sm:$0xff]  ;;  %v4642_v56 = vld [vmem:[%s4605_s10 + $0x28] sm:$0x11]  ;;  %v3377_v60 = vcombine.high %v4620_v48, %v4632_v52 }
  0x20   : > { %v257_v57 = vshll.u32 %v4620_v48, 16  ;;  %v263_v58 = vshll.u32 %v4629_v51, 16  ;;  %v268_v59 = vshrl.u32 %v4632_v52, 16  ;;  %v271_v62 = vshll.u32 %v4632_v52, 16  ;;  %v4050_v6 = vld [vmem:[%s6037_s1 + $0x1a4] ss:$8 sps:$4 sm:$0xff]   ;;  %vm4668_vm2 = vmor %vm250_vm0, %vm251_vm1 }
  0x21   : > { %601 = vmatpush1.bf16.msra.mxu0 %v4006_v22  ;;  %v256_v61 = vrot.slane %v254_v54, 4  ;;  %v277_v63 = vshll.u32 %v4635_v53, 16  ;;  %v282_v0 = vshrl.u32 %v4639_v55, 16  ;;  %v285_v5 = vshll.u32 %v4639_v55, 16  ;;  %895 = vmatprep.mubr.bf16.mxu1 %v3377_v60  ;;  %v4052_v13 = vld [vmem:[%s6037_s1 + $0xa4] ss:$8 sps:$4 sm:$0xff]  }
  0x22   : > { %874 = vmatpush1.bf16.msra.mxu1 %v4007_v23  ;;  %602 = vmatprep.subr.bf16.mxu0 %v4008_v24  ;;  %v259_v3 = vrot.slane %v257_v57, 5  ;;  %v270_v4 = vrot.slane %v268_v59, 4  ;;  %v273_v7 = vrot.slane %v271_v62, 5  ;;  %v291_v9 = vshll.u32 %v4642_v56, 16  ;;  %v4054_v20 = vld [vmem:[%s6037_s1 + $0x1a0] ss:$8 sps:$4 sm:$0xff]  }
  0x23   : > { %875 = vmatprep.subr.bf16.mxu1 %v4010_v25  ;;  %v284_v8 = vrot.slane %v282_v0, 4  ;;  %v265_v11 = vrot.slane %v263_v58, 5  ;;  %v287_v12 = vrot.slane %v285_v5, 5  ;;  %v279_v16 = vrot.slane %v277_v63, 5  ;;  %v4055_v21 = vld [vmem:[%s6037_s1 + $0xa0] ss:$8 sps:$4 sm:$0xff]  }
  0x24   : > { %v260_v10 = vor.u32 %v259_v3, %v256_v61  ;;  %v274_v15 = vor.u32 %v273_v7, %v270_v4  ;;  %v293_v19 = vrot.slane %v291_v9, 5  ;;  %v4056_v23 = vld [vmem:[%s6037_s1 + $0x194] ss:$8 sps:$4 sm:$0xff]   ;;  %v4082_v54 = vld [vmem:[%s6037_s1 + $0x250] ss:$8 sps:$4 sm:$0xff]   ;;  %v949_v9 = vrot.slane %v4629_v51, 5 }
  0x25   : > { %603 = vmatpush1.bf16.msra.mxu0 %v4012_v26  ;;  %v288_v18 = vor.u32 %v287_v12, %v284_v8  ;;  %v4058_v26 = vld [vmem:[%s6037_s1 + $0x94] ss:$8 sps:$4 sm:$0xff]   ;;  %v4085_v63 = vld [vmem:[%s6037_s1 + $0x350] ss:$8 sps:$4 sm:$0xff]   ;;  %v4090_v0 = vld [vmem:[%s6037_s1 + $0x244] ss:$8 sps:$4 sm:$0xff]  }
  0x26   : > { %876 = vmatpush1.bf16.msra.mxu1 %v4013_v27  ;;  %604 = vmatprep.subr.bf16.mxu0 %v4014_v28  ;;  %v261_v17 = vrot.slane %v260_v10, 4  ;;  %v275_v22 = vrot.slane %v274_v15, 4  ;;  %v4754_v57 = vld [vmem:[%s4605_s10 + $0x30] sm:$0xff]  ;;  %v4757_v58 = vld [vmem:[%s4605_s10 + $0x38] sm:$0x11]  ;;  %v4795_v12 = vld [vmem:[%s4605_s10 + $0x40] sm:$0xff] }
  0x27   : > { %877 = vmatprep.subr.bf16.mxu1 %v4016_v29  ;;  %v289_v25 = vrot.slane %v288_v18, 4  ;;  %v296_v59 = vshrl.u32 %v4754_v57, 16  ;;  %v299_v60 = vshll.u32 %v4754_v57, 16  ;;  %v4763_v61 = vcombine.high %v4639_v55, %v4754_v57  ;;  %v4088_v5 = vld [vmem:[%s6037_s1 + $0x240] ss:$8 sps:$4 sm:$0xff]  }
  0x28   : > { %v266_v24 = vsel %vm4668_vm2, %v261_v17, %v265_v11  ;;  %v4688_v27 = vsel %vm4668_vm2, %v275_v22, %v279_v16  ;;  %v4767_v62 = vcombine.low %v4639_v55, %v4754_v57  ;;  %v4096_v10 = vld [vmem:[%s6037_s1 + $0x234] ss:$8 sps:$4 sm:$0xff]   ;;  %v4798_v15 = vld [vmem:[%s4605_s10 + $0x48] sm:$0x11]  ;;  %v310_v18 = vshrl.u32 %v4795_v12, 16 }
  0x29   : > { %605 = vmatpush1.bf16.msra.mxu0 %v4018_v30  ;;  %v4692_v28 = vsel %vm4668_vm2, %v289_v25, %v293_v19  ;;  %v3337_v29 = vcombine.high %v266_v24, %v4688_v27  ;;  %v4060_v30 = vld [vmem:[%s6037_s1 + $0x190] ss:$8 sps:$4 sm:$0xff]   ;;  %v298_v3 = vrot.slane %v296_v59, 4  ;;  %v301_v4 = vrot.slane %v299_v60, 5  ;;  %v4099_v11 = vld [vmem:[%s6037_s1 + $0x334] ss:$8 sps:$4 sm:$0xff]  }
  0x2a   : > { %878 = vmatpush1.bf16.msra.mxu1 %v4019_v31  ;;  %606 = vmatprep.subr.bf16.mxu0 %v4020_v32  ;;  %v4061_v31 = vld [vmem:[%s6037_s1 + $0x90] ss:$8 sps:$4 sm:$0xff]   ;;  %v3600_v32 = vcombine.low %v4688_v27, %v4692_v28  ;;  %v313_v19 = vshll.u32 %v4795_v12, 16  ;;  %v4862_v60 = vld [vmem:[%s4605_s10 + $0x60] sm:$0xff] }
  0x2b   : > { %879 = vmatprep.subr.bf16.mxu1 %v4022_v33  ;;  %v4062_v33 = vld [vmem:[%s6037_s1 + $0x184] ss:$8 sps:$4 sm:$0xff]   ;;  %622 = vmatprep.mubr.bf16.mxu0 %v3337_v29  ;;  %v302_v7 = vor.u32 %v301_v4, %v298_v3  ;;  %v4801_v16 = vld [vmem:[%s4605_s10 + $0x50] sm:$0xff]  ;;  %v4804_v17 = vld [vmem:[%s4605_s10 + $0x58] sm:$0x11]  ;;  %v338_v3 = vshrl.u32 %v4862_v60, 16 }
  0x2c   : > { %v4094_v22 = vld [vmem:[%s6037_s1 + $0x230] ss:$8 sps:$4 sm:$0xff]   ;;  %v333_v25 = vshll.u32 %v4804_v17, 16  ;;  %v341_v4 = vshll.u32 %v4862_v60, 16 }
  0x2d   : > { %607 = vmatpush2.bf16.msra.mxu0 %v4024_v34  ;;  %v4064_v34 = vld [vmem:[%s6037_s1 + $0x84] ss:$8 sps:$4 sm:$0xff]   ;;  %v4097_v29 = vld [vmem:[%s6037_s1 + $0x330] ss:$8 sps:$4 sm:$0xff]  }
  0x2e   : > { %880 = vmatpush2.bf16.msra.mxu1 %v4025_v35  ;;  %608 = vmatprep.subr.bf16.mxu0 %v4026_v36  ;;  %v4066_v35 = vld [vmem:[%s6037_s1 + $0x180] ss:$8 sps:$4 sm:$0xff]  }
  0x2f   : > { %881 = vmatprep.subr.bf16.mxu1 %v4028_v37  ;;  %v4067_v36 = vld [vmem:[%s6037_s1 + $0x80] ss:$8 sps:$4 sm:$0xff]   ;;  %v4072_v37 = vld [vmem:[%s6037_s1 + $0x274] ss:$8 sps:$4 sm:$0xff]  }
  0x31   : > { %609 = vmatpush2.bf16.msra.mxu0 %v4030_v38  ;;  %v4075_v38 = vld [vmem:[%s6037_s1 + $0x374] ss:$8 sps:$4 sm:$0xff]  }
  0x32   : > { %882 = vmatpush2.bf16.msra.mxu1 %v4031_v39  ;;  %610 = vmatprep.subr.bf16.mxu0 %v4032_v40  ;;  %v3336_v39 = vcombine.low %v266_v24, %v4688_v27  ;;  %v3376_v40 = vcombine.low %v4620_v48, %v4632_v52  ;;  %v327_v24 = vshll.u32 %v4801_v16, 16 }
  0x33   : > { %883 = vmatprep.subr.bf16.mxu1 %v4034_v41  ;;  %v4070_v41 = vld [vmem:[%s6037_s1 + $0x270] ss:$8 sps:$4 sm:$0xff]  }
  0x35   : > { %611 = vmatpush2.bf16.msra.mxu0 %v4036_v42  ;;  %v4073_v42 = vld [vmem:[%s6037_s1 + $0x370] ss:$8 sps:$4 sm:$0xff]  }
  0x36   : > { %884 = vmatpush2.bf16.msra.mxu1 %v4037_v43  ;;  %612 = vmatprep.subr.bf16.mxu0 %v4038_v44  ;;  %v4078_v43 = vld [vmem:[%s6037_s1 + $0x264] ss:$8 sps:$4 sm:$0xff]   ;;  %v3601_v44 = vcombine.high %v4688_v27, %v4692_v28  ;;  %v4293_v27 = vld [vmem:[%s6037_s1 + $0x754] ss:$8 sps:$4 sm:$0xff]  }
  0x37   : > { %885 = vmatprep.subr.bf16.mxu1 %v4040_v45  ;;  %v4081_v45 = vld [vmem:[%s6037_s1 + $0x364] ss:$8 sps:$4 sm:$0xff]  }
  0x39   : > { %613 = vmatpush2.bf16.msra.mxu0 %v4042_v46  ;;  %v4076_v46 = vld [vmem:[%s6037_s1 + $0x260] ss:$8 sps:$4 sm:$0xff]  }
  0x3a   : > { %886 = vmatpush2.bf16.msra.mxu1 %v4043_v47  ;;  %614 = vmatprep.subr.bf16.mxu0 %v4044_v49  ;;  %v4079_v47 = vld [vmem:[%s6037_s1 + $0x360] ss:$8 sps:$4 sm:$0xff]   ;;  %v4084_v49 = vld [vmem:[%s6037_s1 + $0x254] ss:$8 sps:$4 sm:$0xff]  }
  0x3b   : > { %887 = vmatprep.subr.bf16.mxu1 %v4046_v50  ;;  %v4087_v50 = vld [vmem:[%s6037_s1 + $0x354] ss:$8 sps:$4 sm:$0xff]  }
  0x3d   : > { %615 = vmatpush2.bf16.msra.mxu0 %v4048_v1  ;;  %v305_v1 = vshll.u32 %v4757_v58, 16 }
  0x3e   : > { %888 = vmatpush2.bf16.msra.mxu1 %v4049_v2  ;;  %616 = vmatprep.subr.bf16.mxu0 %v4050_v6  ;;  %v4093_v2 = vld [vmem:[%s6037_s1 + $0x344] ss:$8 sps:$4 sm:$0xff]   ;;  %v4091_v6 = vld [vmem:[%s6037_s1 + $0x340] ss:$8 sps:$4 sm:$0xff]  }
  0x3f   : > { %889 = vmatprep.subr.bf16.mxu1 %v4052_v13  ;;  %v307_v8 = vrot.slane %v305_v1, 5  ;;  %v303_v13 = vrot.slane %v302_v7, 4  ;;  %v4868_v1 = vld [vmem:[%s4605_s10 + $0x70] sm:$0xff] }
  0x40   : > { %v352_v7 = vshrl.u32 %v4868_v1, 16 }
  0x41   : > { %617 = vmatpush2.bf16.msra.mxu0 %v4054_v20  ;;  %v319_v20 = vshll.u32 %v4798_v15, 16 }
  0x42   : > { %890 = vmatpush2.bf16.msra.mxu1 %v4055_v21  ;;  %618 = vmatprep.subr.bf16.mxu0 %v4056_v23  ;;  %v324_v21 = vshrl.u32 %v4801_v16, 16  ;;  %v4815_v23 = vsel %vm4668_vm2, %v303_v13, %v307_v8  ;;  %v355_v8 = vshll.u32 %v4868_v1, 16  ;;  %v4109_v13 = vld [vmem:[%s6037_s1 + $0x310] ss:$8 sps:$4 sm:$0xff]  }
  0x43   : > { %891 = vmatprep.subr.bf16.mxu1 %v4058_v26  ;;  %v4821_v26 = vcombine.high %v4795_v12, %v4801_v16 }
  0x45   : > { %619 = vmatpush2.bf16.msra.mxu0 %v4060_v30  ;;  %v4828_v30 = vcombine.high %v4692_v28, %v4815_v23 }
  0x46   : > { %892 = vmatpush2.bf16.msra.mxu1 %v4061_v31  ;;  %620 = vmatprep.subr.bf16.mxu0 %v4062_v33  ;;  %v4832_v31 = vcombine.low %v4692_v28, %v4815_v23  ;;  %v312_v33 = vrot.slane %v310_v18, 4  ;;  %v4288_v28 = vld [vmem:[%s6037_s1 + $0x650] ss:$8 sps:$4 sm:$0xff]  }
  0x47   : > { %893 = vmatprep.subr.bf16.mxu1 %v4064_v34  ;;  %v315_v34 = vrot.slane %v313_v19, 5 }
  0x49   : > { %621 = vmatpush2.bf16.msra.mxu0 %v4066_v35  ;;  %v4102_v35 = vld [vmem:[%s6037_s1 + $0x224] ss:$8 sps:$4 sm:$0xff]  }
  0x4a   : > { %894 = vmatpush2.bf16.msra.mxu1 %v4067_v36  ;;  %1204 = vmatprep.subr.bf16.mxu0 %v4072_v37  ;;  %v4105_v36 = vld [vmem:[%s6037_s1 + $0x324] ss:$8 sps:$4 sm:$0xff]   ;;  %v326_v37 = vrot.slane %v324_v21, 4  ;;  %v343_v21 = vrot.slane %v341_v4, 5 }
  0x4b   : > { %1505 = vmatprep.subr.bf16.mxu1 %v4075_v38  ;;  %v329_v38 = vrot.slane %v327_v24, 5  ;;  %v4117_v24 = vld [vmem:[%s6037_s1 + $0x304] ss:$8 sps:$4 sm:$0xff]  }
  0x4c   : > { %623 = vmatmul.mubr.bf16.vlgmr.msra.gmra.mxu0 %v3336_v39  ;;  %v953_v39 = vrot.slane %v4635_v53, 5  ;;  %v4121_v53 = vld [vmem:[%s6037_s1 + $0x3f0] ss:$8 sps:$4 sm:$0xff]  }
  0x4d   : > { %896 = vmatmul.mubr.bf16.vlgmr.msra.gmra.mxu1 %v3376_v40  ;;  %1205 = vmatpush1.bf16.msra.mxu0 %v4070_v41  ;;  %v4100_v40 = vld [vmem:[%s6037_s1 + $0x220] ss:$8 sps:$4 sm:$0xff]   ;;  %v316_v41 = vor.u32 %v315_v34, %v312_v33 }
  0x4e   : > { %1506 = vmatpush1.bf16.msra.mxu1 %v4073_v42  ;;  %1206 = vmatprep.subr.bf16.mxu0 %v4078_v43  ;;  %v321_v42 = vrot.slane %v319_v20, 5  ;;  %v4848_v43 = vcombine.low %v4795_v12, %v4801_v16  ;;  %v340_v20 = vrot.slane %v338_v3, 4 }
  0x4f   : > { %1507 = vmatprep.subr.bf16.mxu1 %v4081_v45  ;;  %905 = vmatprep.mubr.bf16.mxu1 %v4763_v61  ;;  %v4103_v45 = vld [vmem:[%s6037_s1 + $0x320] ss:$8 sps:$4 sm:$0xff]   ;;  %v317_v59 = vrot.slane %v316_v41, 4 }
  0x50   : > { %632 = vmatprep.mubr.bf16.mxu0 %v4828_v30  ;;  %v344_v33 = vor.u32 %v343_v21, %v340_v20  ;;  %v4126_v21 = vld [vmem:[%s6037_s1 + $0x2e0] ss:$8 sps:$4 sm:$0xff]  }
  0x51   : > { %1207 = vmatpush1.bf16.msra.mxu0 %v4076_v46  ;;  %v330_v46 = vor.u32 %v329_v38, %v326_v37 }
  0x52   : > { %1508 = vmatpush1.bf16.msra.mxu1 %v4079_v47  ;;  %1208 = vmatprep.subr.bf16.mxu0 %v4084_v49  ;;  %v335_v47 = vrot.slane %v333_v25, 5  ;;  %v3416_v49 = vrot.slane %v4620_v48, 9  ;;  %v4871_v48 = vld [vmem:[%s4605_s10 + $0x78] sm:$0x11]  ;;  %v354_v25 = vrot.slane %v352_v7, 4 }
  0x53   : > { %1509 = vmatprep.subr.bf16.mxu1 %v4087_v50  ;;  %v4108_v50 = vld [vmem:[%s6037_s1 + $0x214] ss:$8 sps:$4 sm:$0xff]  }
  0x54   : > { %633 = vmatmul.mubr.bf16.gmra.mxu0 %v4832_v31  ;;  %v4950_v4 = vsel %vm4921_vm5, %v3416_v49, %v949_v9  ;;  %v4118_v49 = vld [vmem:[%s6037_s1 + $0x2f0] ss:$8 sps:$4 sm:$0xff]  }
  0x55   : > { %906 = vmatmul.mubr.bf16.gmra.mxu1 %v4767_v62  ;;  %1209 = vmatpush1.bf16.msra.mxu0 %v4082_v54  ;;  %v4111_v54 = vld [vmem:[%s6037_s1 + $0x314] ss:$8 sps:$4 sm:$0xff]  }
  0x56   : > { %1510 = vmatpush1.bf16.msra.mxu1 %v4085_v63  ;;  %1210 = vmatprep.subr.bf16.mxu0 %v4090_v0  ;;  %v331_v63 = vrot.slane %v330_v46, 4  ;;  %v4865_v0 = vld [vmem:[%s4605_s10 + $0x68] sm:$0x11] }
  0x57   : > { %1511 = vmatprep.subr.bf16.mxu1 %v4093_v2  ;;  %915 = vmatprep.mubr.bf16.mxu1 %v4821_v26  ;;  %v4875_v2 = vsel %vm4668_vm2, %v317_v59, %v321_v42  ;;  %v4115_v46 = vld [vmem:[%s6037_s1 + $0x300] ss:$8 sps:$4 sm:$0xff]   ;;  %v4123_v59 = vld [vmem:[%s6037_s1 + $0x3f4] ss:$8 sps:$4 sm:$0xff]  }
  0x58   : > { %v3603_v42 = vcombine.high %v4815_v23, %v4875_v2 }
  0x59   : > { %1211 = vmatpush1.bf16.msra.mxu0 %v4088_v5  ;;  %v347_v5 = vshll.u32 %v4865_v0, 16 }
  0x5a   : > { %1512 = vmatpush1.bf16.msra.mxu1 %v4091_v6  ;;  %1212 = vmatprep.subr.bf16.mxu0 %v4096_v10  ;;  %v4883_v6 = vsel %vm4668_vm2, %v331_v63, %v335_v47  ;;  %v361_v10 = vshll.u32 %v4871_v48, 16  ;;  %v345_v47 = vrot.slane %v344_v33, 4  ;;  %v4135_v33 = vld [vmem:[%s6037_s1 + $0x3d0] ss:$8 sps:$4 sm:$0xff]  }
  0x5b   : > { %1513 = vmatprep.subr.bf16.mxu1 %v4099_v11  ;;  %v4106_v11 = vld [vmem:[%s6037_s1 + $0x210] ss:$8 sps:$4 sm:$0xff]   ;;  %v4896_v18 = vcombine.high %v4875_v2, %v4883_v6  ;;  %v4900_v19 = vcombine.low %v4875_v2, %v4883_v6  ;;  %v349_v34 = vrot.slane %v347_v5, 5  ;;  %v3529_v5 = vcombine.high %v4632_v52, %v4639_v55 }
  0x5c   : > { %v363_v38 = vrot.slane %v361_v10, 5 }
  0x5d   : > { %1213 = vmatpush1.bf16.msra.mxu0 %v4094_v22  ;;  %916 = vmatmul.mubr.bf16.gmra.mxu1 %v4848_v43  ;;  %v4114_v22 = vld [vmem:[%s6037_s1 + $0x204] ss:$8 sps:$4 sm:$0xff]   ;;  %v4943_v3 = vsel %vm4668_vm2, %v345_v47, %v349_v34  ;;  %v4146_v47 = vld [vmem:[%s6037_s1 + $0x2b0] ss:$8 sps:$4 sm:$0xff]  }
  0x5e   : > { %1514 = vmatpush1.bf16.msra.mxu1 %v4097_v29  ;;  %1214 = vmatprep.subr.bf16.mxu0 %v4102_v35  ;;  %v357_v29 = vrot.slane %v355_v8, 5  ;;  %v4911_v35 = vcombine.high %v4862_v60, %v4868_v1  ;;  %v3605_v51 = vcombine.high %v4883_v6, %v4943_v3  ;;  %v3604_v9 = vcombine.low %v4883_v6, %v4943_v3  ;;  %v4142_v34 = vld [vmem:[%s6037_s1 + $0x2c4] ss:$8 sps:$4 sm:$0xff]   ;;  %v4317_v6 = vld [vmem:[%s6037_s1 + $0x714] ss:$8 sps:$4 sm:$0xff]  }
  0x5f   : > { %1515 = vmatprep.subr.bf16.mxu1 %v4105_v36  ;;  %642 = vmatprep.mubr.bf16.mxu0 %v4896_v18  ;;  %v3417_v36 = vrot.slane %v4632_v52, 9 }
  0x60   : > { %643 = vmatmul.mubr.bf16.gmra.mxu0 %v4900_v19  ;;  %v358_v37 = vor.u32 %v357_v29, %v354_v25  ;;  %925 = vmatprep.mubr.bf16.mxu1 %v4911_v35  ;;  %v4137_v25 = vld [vmem:[%s6037_s1 + $0x3d4] ss:$8 sps:$4 sm:$0xff]   ;;  %v4132_v29 = vld [vmem:[%s6037_s1 + $0x2d0] ss:$8 sps:$4 sm:$0xff]  }
  0x61   : > { %1215 = vmatpush1.bf16.msra.mxu0 %v4100_v40  ;;  %v4917_v40 = vcombine.low %v4862_v60, %v4868_v1  ;;  %v4963_v8 = vsel %vm4921_vm5, %v3417_v36, %v953_v39  ;;  %v4145_v36 = vld [vmem:[%s6037_s1 + $0x3c4] ss:$8 sps:$4 sm:$0xff]  }
  0x62   : > { %1516 = vmatpush1.bf16.msra.mxu1 %v4103_v45  ;;  %1216 = vmatprep.subr.bf16.mxu0 %v4108_v50  ;;  %v4112_v45 = vld [vmem:[%s6037_s1 + $0x200] ss:$8 sps:$4 sm:$0xff]   ;;  %v3602_v50 = vcombine.low %v4815_v23, %v4875_v2  ;;  %v359_v63 = vrot.slane %v358_v37, 4  ;;  %v3457_v20 = vcombine.high %v4950_v4, %v4963_v8  ;;  %v4302_v23 = vld [vmem:[%s6037_s1 + $0x634] ss:$8 sps:$4 sm:$0xff]  }
  0x63   : > { %1517 = vmatprep.subr.bf16.mxu1 %v4111_v54  ;;  %v4120_v54 = vld [vmem:[%s6037_s1 + $0x2f4] ss:$8 sps:$4 sm:$0xff]   ;;  %v4140_v37 = vld [vmem:[%s6037_s1 + $0x2c0] ss:$8 sps:$4 sm:$0xff]  }
  0x64   : > { %v4956_v7 = vsel %vm4668_vm2, %v359_v63, %v363_v38  ;;  %v4143_v38 = vld [vmem:[%s6037_s1 + $0x3c0] ss:$8 sps:$4 sm:$0xff]   ;;  %v4159_v63 = vld [vmem:[%s6037_s1 + $0x3a4] ss:$8 sps:$4 sm:$0xff]   ;;  %v4305_v2 = vld [vmem:[%s6037_s1 + $0x734] ss:$8 sps:$4 sm:$0xff]  }
  0x65   : > { %1217 = vmatpush1.bf16.msra.mxu0 %v4106_v11  ;;  %926 = vmatmul.mubr.bf16.gmra.mxu1 %v4917_v40  ;;  %v4977_v39 = vcombine.high %v4943_v3, %v4956_v7  ;;  %v4981_v10 = vcombine.low %v4943_v3, %v4956_v7  ;;  %v4128_v11 = vld [vmem:[%s6037_s1 + $0x2e4] ss:$8 sps:$4 sm:$0xff]  }
  0x66   : > { %1518 = vmatpush1.bf16.msra.mxu1 %v4109_v13  ;;  %1218 = vmatprep.subr.bf16.mxu0 %v4114_v22  ;;  %v4131_v13 = vld [vmem:[%s6037_s1 + $0x3e4] ss:$8 sps:$4 sm:$0xff]   ;;  %v4129_v22 = vld [vmem:[%s6037_s1 + $0x3e0] ss:$8 sps:$4 sm:$0xff]  }
  0x67   : > { %1519 = vmatprep.subr.bf16.mxu1 %v4117_v24  ;;  %652 = vmatprep.mubr.bf16.mxu0 %v4977_v39  ;;  %v4134_v24 = vld [vmem:[%s6037_s1 + $0x2d4] ss:$8 sps:$4 sm:$0xff]  }
  0x68   : > { %1537 = vmatprep.mubr.bf16.mxu1 %v3529_v5  ;;  %653 = vmatmul.mubr.bf16.gmra.mxu0 %v4981_v10  ;;  %v4154_v5 = vld [vmem:[%s6037_s1 + $0x2a0] ss:$8 sps:$4 sm:$0xff]  }
  0x69   : > { %1219 = vmatpush1.bf16.msra.mxu0 %v4112_v45  ;;  %1236 = vmatprep.mubr.bf16.mxu0 %v3457_v20  ;;  %v4148_v45 = vld [vmem:[%s6037_s1 + $0x2b4] ss:$8 sps:$4 sm:$0xff]   ;;  %v4163_v20 = vld [vmem:[%s6037_s1 + $0x390] ss:$8 sps:$4 sm:$0xff]  }
  0x6a   : > { %1520 = vmatpush1.bf16.msra.mxu1 %v4115_v46  ;;  %1220 = vmatprep.subr.bf16.mxu0 %v4120_v54  ;;  %v4151_v46 = vld [vmem:[%s6037_s1 + $0x3b4] ss:$8 sps:$4 sm:$0xff]   ;;  %v4149_v54 = vld [vmem:[%s6037_s1 + $0x3b0] ss:$8 sps:$4 sm:$0xff]  }
  0x6b   : > { %1521 = vmatprep.subr.bf16.mxu1 %v4123_v59  ;;  %v4156_v59 = vld [vmem:[%s6037_s1 + $0x2a4] ss:$8 sps:$4 sm:$0xff]  }
  0x6d   : > { %1221 = vmatpush2.bf16.msra.mxu0 %v4118_v49  ;;  %v4157_v49 = vld [vmem:[%s6037_s1 + $0x3a0] ss:$8 sps:$4 sm:$0xff]  }
  0x6e   : > { %1522 = vmatpush2.bf16.msra.mxu1 %v4121_v53  ;;  %1222 = vmatprep.subr.bf16.mxu0 %v4128_v11  ;;  %v4162_v53 = vld [vmem:[%s6037_s1 + $0x294] ss:$8 sps:$4 sm:$0xff]  }
  0x6f   : > { %1523 = vmatprep.subr.bf16.mxu1 %v4131_v13  ;;  %v4165_v11 = vld [vmem:[%s6037_s1 + $0x394] ss:$8 sps:$4 sm:$0xff]   ;;  %v4160_v13 = vld [vmem:[%s6037_s1 + $0x290] ss:$8 sps:$4 sm:$0xff]  }
  0x71   : > { %1223 = vmatpush2.bf16.msra.mxu0 %v4126_v21  ;;  %v4168_v21 = vld [vmem:[%s6037_s1 + $0x284] ss:$8 sps:$4 sm:$0xff]  }
  0x72   : > { %1524 = vmatpush2.bf16.msra.mxu1 %v4129_v22  ;;  %1224 = vmatprep.subr.bf16.mxu0 %v4134_v24  ;;  %v4171_v22 = vld [vmem:[%s6037_s1 + $0x384] ss:$8 sps:$4 sm:$0xff]   ;;  %v3418_v24 = vrot.slane %v4639_v55, 9 }
  0x73   : > { %1525 = vmatprep.subr.bf16.mxu1 %v4137_v25  ;;  %v4166_v25 = vld [vmem:[%s6037_s1 + $0x280] ss:$8 sps:$4 sm:$0xff]  }
  0x75   : > { %1225 = vmatpush2.bf16.msra.mxu0 %v4132_v29  ;;  %v957_v29 = vrot.slane %v4642_v56, 5  ;;  %v4179_v56 = vld [vmem:[%s6037_s1 + $0x574] ss:$8 sps:$4 sm:$0xff]  }
  0x76   : > { %1526 = vmatpush2.bf16.msra.mxu1 %v4135_v33  ;;  %1226 = vmatprep.subr.bf16.mxu0 %v4142_v34  ;;  %v3419_v33 = vrot.slane %v4754_v57, 9  ;;  %v961_v34 = vrot.slane %v4757_v58, 5  ;;  %v3528_v58 = vcombine.low %v4632_v52, %v4639_v55  ;;  %v4182_v52 = vld [vmem:[%s6037_s1 + $0x464] ss:$8 sps:$4 sm:$0xff]  }
  0x77   : > { %1527 = vmatprep.subr.bf16.mxu1 %v4145_v36  ;;  %v4169_v36 = vld [vmem:[%s6037_s1 + $0x380] ss:$8 sps:$4 sm:$0xff]   ;;  %v4185_v55 = vld [vmem:[%s6037_s1 + $0x564] ss:$8 sps:$4 sm:$0xff]  }
  0x79   : > { %1227 = vmatpush2.bf16.msra.mxu0 %v4140_v37  ;;  %v4176_v37 = vld [vmem:[%s6037_s1 + $0x474] ss:$8 sps:$4 sm:$0xff]  }
  0x7a   : > { %1528 = vmatpush2.bf16.msra.mxu1 %v4143_v38  ;;  %1228 = vmatprep.subr.bf16.mxu0 %v4148_v45  ;;  %v3456_v38 = vcombine.low %v4950_v4, %v4963_v8  ;;  %v4174_v45 = vld [vmem:[%s6037_s1 + $0x470] ss:$8 sps:$4 sm:$0xff]  }
  0x7b   : > { %1529 = vmatprep.subr.bf16.mxu1 %v4151_v46  ;;  %v5090_v46 = vsel %vm4921_vm5, %v3418_v24, %v957_v29  ;;  %v4177_v4 = vld [vmem:[%s6037_s1 + $0x570] ss:$8 sps:$4 sm:$0xff]  }
  0x7c   : > { %v4189_v29 = vld [vmem:[%s6037_s1 + $0x550] ss:$8 sps:$4 sm:$0xff]  }
  0x7d   : > { %1229 = vmatpush2.bf16.msra.mxu0 %v4146_v47  ;;  %v5094_v47 = vsel %vm4921_vm5, %v3419_v33, %v961_v34  ;;  %v4196_v33 = vld [vmem:[%s6037_s1 + $0x444] ss:$8 sps:$4 sm:$0xff]   ;;  %v3533_v34 = vcombine.high %v4801_v16, %v4862_v60 }
  0x7e   : > { %1530 = vmatpush2.bf16.msra.mxu1 %v4149_v54  ;;  %1230 = vmatprep.subr.bf16.mxu0 %v4156_v59  ;;  %v5107_v54 = vcombine.high %v5090_v46, %v5094_v47  ;;  %v3531_v59 = vcombine.high %v4754_v57, %v4795_v12 }
  0x7f   : > { %1531 = vmatprep.subr.bf16.mxu1 %v4159_v63  ;;  %v3420_v63 = vrot.slane %v4795_v12, 9 }
  0x81   : > { %1231 = vmatpush2.bf16.msra.mxu0 %v4154_v5  ;;  %v4180_v5 = vld [vmem:[%s6037_s1 + $0x460] ss:$8 sps:$4 sm:$0xff]  }
  0x82   : > { %1532 = vmatpush2.bf16.msra.mxu1 %v4157_v49  ;;  %1232 = vmatprep.subr.bf16.mxu0 %v4162_v53  ;;  %v965_v49 = vrot.slane %v4798_v15, 5  ;;  %v3421_v53 = vrot.slane %v4801_v16, 9  ;;  %v4191_v15 = vld [vmem:[%s6037_s1 + $0x554] ss:$8 sps:$4 sm:$0xff]  }
  0x83   : > { %1533 = vmatprep.subr.bf16.mxu1 %v4165_v11  ;;  %v969_v11 = vrot.slane %v4804_v17, 5  ;;  %v5130_v17 = vcombine.low %v5090_v46, %v5094_v47 }
  0x84   : > { %v5139_v24 = vsel %vm4921_vm5, %v3420_v63, %v965_v49  ;;  %v4203_v49 = vld [vmem:[%s6037_s1 + $0x530] ss:$8 sps:$4 sm:$0xff]  }
  0x85   : > { %1233 = vmatpush2.bf16.msra.mxu0 %v4160_v13  ;;  %v4183_v13 = vld [vmem:[%s6037_s1 + $0x560] ss:$8 sps:$4 sm:$0xff]  }
  0x86   : > { %1534 = vmatpush2.bf16.msra.mxu1 %v4163_v20  ;;  %1234 = vmatprep.subr.bf16.mxu0 %v4168_v21  ;;  %v4188_v20 = vld [vmem:[%s6037_s1 + $0x454] ss:$8 sps:$4 sm:$0xff]   ;;  %v4186_v21 = vld [vmem:[%s6037_s1 + $0x450] ss:$8 sps:$4 sm:$0xff]  }
  0x87   : > { %1535 = vmatprep.subr.bf16.mxu1 %v4171_v22  ;;  %v3530_v22 = vcombine.low %v4754_v57, %v4795_v12  ;;  %v4199_v57 = vld [vmem:[%s6037_s1 + $0x544] ss:$8 sps:$4 sm:$0xff]  }
  0x89   : > { %1235 = vmatpush2.bf16.msra.mxu0 %v4166_v25  ;;  %v5143_v25 = vsel %vm4921_vm5, %v3421_v53, %v969_v11 }
  0x8a   : > { %1536 = vmatpush2.bf16.msra.mxu1 %v4169_v36  ;;  %1819 = vmatprep.subr.bf16.mxu0 %v4176_v37  ;;  %v5156_v12 = vcombine.high %v5139_v24, %v5143_v25  ;;  %v3422_v36 = vrot.slane %v4862_v60, 9  ;;  %v4194_v37 = vld [vmem:[%s6037_s1 + $0x440] ss:$8 sps:$4 sm:$0xff]  }
  0x8b   : > { %2124 = vmatprep.subr.bf16.mxu1 %v4179_v56  ;;  %v973_v56 = vrot.slane %v4865_v0, 5  ;;  %v4205_v0 = vld [vmem:[%s6037_s1 + $0x534] ss:$8 sps:$4 sm:$0xff]  }
  0x8c   : > { %1237 = vmatmul.mubr.bf16.vlgmr.msra.gmra.mxu0 %v3456_v38  ;;  %v3423_v38 = vrot.slane %v4868_v1, 9 }
  0x8d   : > { %1538 = vmatmul.mubr.bf16.vlgmr.msra.gmra.mxu1 %v3528_v58  ;;  %1820 = vmatpush1.bf16.msra.mxu0 %v4174_v45  ;;  %v977_v58 = vrot.slane %v4871_v48, 5  ;;  %v4197_v45 = vld [vmem:[%s6037_s1 + $0x540] ss:$8 sps:$4 sm:$0xff]   ;;  %v5180_v48 = vcombine.low %v5139_v24, %v5143_v25 }
  0x8e   : > { %2125 = vmatpush1.bf16.msra.mxu1 %v4177_v4  ;;  %1821 = vmatprep.subr.bf16.mxu0 %v4182_v52  ;;  %v4202_v4 = vld [vmem:[%s6037_s1 + $0x434] ss:$8 sps:$4 sm:$0xff]   ;;  %v4200_v52 = vld [vmem:[%s6037_s1 + $0x430] ss:$8 sps:$4 sm:$0xff]  }
  0x8f   : > { %2126 = vmatprep.subr.bf16.mxu1 %v4185_v55  ;;  %1246 = vmatprep.mubr.bf16.mxu0 %v5107_v54  ;;  %v3532_v55 = vcombine.low %v4801_v16, %v4862_v60  ;;  %v5193_v63 = vsel %vm4921_vm5, %v3423_v38, %v977_v58  ;;  %v4210_v16 = vld [vmem:[%s6037_s1 + $0x424] ss:$8 sps:$4 sm:$0xff]   ;;  %v4230_v38 = vld [vmem:[%s6037_s1 + $0x4f4] ss:$8 sps:$4 sm:$0xff]  }
  0x90   : > { %1547 = vmatprep.mubr.bf16.mxu1 %v3531_v59  ;;  %v5189_v59 = vsel %vm4921_vm5, %v3422_v36, %v973_v56  ;;  %v4213_v60 = vld [vmem:[%s6037_s1 + $0x524] ss:$8 sps:$4 sm:$0xff]   ;;  %v4225_v56 = vld [vmem:[%s6037_s1 + $0x500] ss:$8 sps:$4 sm:$0xff]   ;;  %v4233_v58 = vld [vmem:[%s6037_s1 + $0x5f4] ss:$8 sps:$4 sm:$0xff]  }
  0x91   : > { %1822 = vmatpush1.bf16.msra.mxu0 %v4180_v5  ;;  %v5196_v5 = vld [vmem:[%s4605_s10 + $0x80] sm:$0xff]  ;;  %v5209_v53 = vcombine.high %v5189_v59, %v5193_v63 }
  0x92   : > { %2127 = vmatpush1.bf16.msra.mxu1 %v4183_v13  ;;  %1823 = vmatprep.subr.bf16.mxu0 %v4188_v20  ;;  %v3535_v11 = vcombine.high %v4868_v1, %v5196_v5  ;;  %v4208_v13 = vld [vmem:[%s6037_s1 + $0x420] ss:$8 sps:$4 sm:$0xff]   ;;  %v4227_v36 = vld [vmem:[%s6037_s1 + $0x504] ss:$8 sps:$4 sm:$0xff]  }
  0x93   : > { %2128 = vmatprep.subr.bf16.mxu1 %v4191_v15  ;;  %v4211_v20 = vld [vmem:[%s6037_s1 + $0x520] ss:$8 sps:$4 sm:$0xff]   ;;  %v4216_v15 = vld [vmem:[%s6037_s1 + $0x414] ss:$8 sps:$4 sm:$0xff]  }
  0x94   : > { %1247 = vmatmul.mubr.bf16.gmra.mxu0 %v5130_v17 }
  0x95   : > { %1548 = vmatmul.mubr.bf16.gmra.mxu1 %v3530_v22  ;;  %1824 = vmatpush1.bf16.msra.mxu0 %v4186_v21  ;;  %v4219_v21 = vld [vmem:[%s6037_s1 + $0x514] ss:$8 sps:$4 sm:$0xff]   ;;  %v5229_v22 = vcombine.low %v5189_v59, %v5193_v63 }
  0x96   : > { %2129 = vmatpush1.bf16.msra.mxu1 %v4189_v29  ;;  %1825 = vmatprep.subr.bf16.mxu0 %v4196_v33  ;;  %v4214_v29 = vld [vmem:[%s6037_s1 + $0x410] ss:$8 sps:$4 sm:$0xff]   ;;  %v3534_v33 = vcombine.low %v4868_v1, %v5196_v5  ;;  %v4222_v1 = vld [vmem:[%s6037_s1 + $0x400] ss:$8 sps:$4 sm:$0xff]  }
  0x97   : > { %2130 = vmatprep.subr.bf16.mxu1 %v4199_v57  ;;  %1256 = vmatprep.mubr.bf16.mxu0 %v5156_v12  ;;  %v4217_v57 = vld [vmem:[%s6037_s1 + $0x510] ss:$8 sps:$4 sm:$0xff]  }
  0x98   : > { %1557 = vmatprep.mubr.bf16.mxu1 %v3533_v34  ;;  %v4224_v34 = vld [vmem:[%s6037_s1 + $0x404] ss:$8 sps:$4 sm:$0xff]  }
  0x99   : > { %1826 = vmatpush1.bf16.msra.mxu0 %v4194_v37  ;;  %v3674_v37 = vcombine.high %v4963_v8, %v5090_v46 }
  0x9a   : > { %2131 = vmatpush1.bf16.msra.mxu1 %v4197_v45  ;;  %1827 = vmatprep.subr.bf16.mxu0 %v4202_v4  ;;  %v4228_v45 = vld [vmem:[%s6037_s1 + $0x4f0] ss:$8 sps:$4 sm:$0xff]  }
  0x9b   : > { %2132 = vmatprep.subr.bf16.mxu1 %v4205_v0  ;;  %v4231_v4 = vld [vmem:[%s6037_s1 + $0x5f0] ss:$8 sps:$4 sm:$0xff]   ;;  %v4236_v0 = vld [vmem:[%s6037_s1 + $0x4e4] ss:$8 sps:$4 sm:$0xff]  }
  0x9c   : > { %1257 = vmatmul.mubr.bf16.gmra.mxu0 %v5180_v48 }
  0x9d   : > { %1558 = vmatmul.mubr.bf16.gmra.mxu1 %v3532_v55  ;;  %1828 = vmatpush1.bf16.msra.mxu0 %v4200_v52  ;;  %v4234_v52 = vld [vmem:[%s6037_s1 + $0x4e0] ss:$8 sps:$4 sm:$0xff]  }
  0x9e   : > { %2133 = vmatpush1.bf16.msra.mxu1 %v4203_v49  ;;  %1829 = vmatprep.subr.bf16.mxu0 %v4210_v16  ;;  %v4237_v55 = vld [vmem:[%s6037_s1 + $0x5e0] ss:$8 sps:$4 sm:$0xff]   ;;  %v4242_v49 = vld [vmem:[%s6037_s1 + $0x4d4] ss:$8 sps:$4 sm:$0xff]  }
  0x9f   : > { %2134 = vmatprep.subr.bf16.mxu1 %v4213_v60  ;;  %1266 = vmatprep.mubr.bf16.mxu0 %v5209_v53  ;;  %v4245_v16 = vld [vmem:[%s6037_s1 + $0x5d4] ss:$8 sps:$4 sm:$0xff]   ;;  %v4240_v60 = vld [vmem:[%s6037_s1 + $0x4d0] ss:$8 sps:$4 sm:$0xff]  }
  0xa0   : > { %1567 = vmatprep.mubr.bf16.mxu1 %v3535_v11  ;;  %v4243_v11 = vld [vmem:[%s6037_s1 + $0x5d0] ss:$8 sps:$4 sm:$0xff]  }
  0xa1   : > { %1830 = vmatpush1.bf16.msra.mxu0 %v4208_v13  ;;  %v4248_v13 = vld [vmem:[%s6037_s1 + $0x4c4] ss:$8 sps:$4 sm:$0xff]  }
  0xa2   : > { %2135 = vmatpush1.bf16.msra.mxu1 %v4211_v20  ;;  %1831 = vmatprep.subr.bf16.mxu0 %v4216_v15  ;;  %v4251_v20 = vld [vmem:[%s6037_s1 + $0x5c4] ss:$8 sps:$4 sm:$0xff]   ;;  %v4246_v15 = vld [vmem:[%s6037_s1 + $0x4c0] ss:$8 sps:$4 sm:$0xff]  }
  0xa3   : > { %2136 = vmatprep.subr.bf16.mxu1 %v4219_v21  ;;  %v4249_v21 = vld [vmem:[%s6037_s1 + $0x5c0] ss:$8 sps:$4 sm:$0xff]  }
  0xa4   : > { %1267 = vmatmul.mubr.bf16.gmra.mxu0 %v5229_v22 }
  0xa5   : > { %1568 = vmatmul.mubr.bf16.gmra.mxu1 %v3534_v33  ;;  %1832 = vmatpush1.bf16.msra.mxu0 %v4214_v29  ;;  %v4254_v29 = vld [vmem:[%s6037_s1 + $0x4b4] ss:$8 sps:$4 sm:$0xff]  }
  0xa6   : > { %2137 = vmatpush1.bf16.msra.mxu1 %v4217_v57  ;;  %1833 = vmatprep.subr.bf16.mxu0 %v4224_v34  ;;  %v4257_v33 = vld [vmem:[%s6037_s1 + $0x5b4] ss:$8 sps:$4 sm:$0xff]   ;;  %v4252_v57 = vld [vmem:[%s6037_s1 + $0x4b0] ss:$8 sps:$4 sm:$0xff]  }
  0xa7   : > { %2138 = vmatprep.subr.bf16.mxu1 %v4227_v36  ;;  %1851 = vmatprep.mubr.bf16.mxu0 %v3601_v44  ;;  %v4239_v44 = vld [vmem:[%s6037_s1 + $0x5e4] ss:$8 sps:$4 sm:$0xff]   ;;  %v4255_v34 = vld [vmem:[%s6037_s1 + $0x5b0] ss:$8 sps:$4 sm:$0xff]  }
  0xa8   : > { %2156 = vmatprep.mubr.bf16.mxu1 %v3674_v37  ;;  %v4260_v36 = vld [vmem:[%s6037_s1 + $0x4a4] ss:$8 sps:$4 sm:$0xff]  }
  0xa9   : > { %1834 = vmatpush1.bf16.msra.mxu0 %v4222_v1  ;;  %v4263_v37 = vld [vmem:[%s6037_s1 + $0x5a4] ss:$8 sps:$4 sm:$0xff]   ;;  %v4258_v1 = vld [vmem:[%s6037_s1 + $0x4a0] ss:$8 sps:$4 sm:$0xff]  }
  0xaa   : > { %2139 = vmatpush1.bf16.msra.mxu1 %v4225_v56  ;;  %1835 = vmatprep.subr.bf16.mxu0 %v4230_v38  ;;  %v4261_v56 = vld [vmem:[%s6037_s1 + $0x5a0] ss:$8 sps:$4 sm:$0xff]   ;;  %v4266_v38 = vld [vmem:[%s6037_s1 + $0x494] ss:$8 sps:$4 sm:$0xff]  }
  0xab   : > { %2140 = vmatprep.subr.bf16.mxu1 %v4233_v58  ;;  %v4269_v58 = vld [vmem:[%s6037_s1 + $0x594] ss:$8 sps:$4 sm:$0xff]  }
  0xad   : > { %1836 = vmatpush2.bf16.msra.mxu0 %v4228_v45  ;;  %v4264_v45 = vld [vmem:[%s6037_s1 + $0x490] ss:$8 sps:$4 sm:$0xff]  }
  0xae   : > { %2141 = vmatpush2.bf16.msra.mxu1 %v4231_v4  ;;  %1837 = vmatprep.subr.bf16.mxu0 %v4236_v0  ;;  %v4267_v4 = vld [vmem:[%s6037_s1 + $0x590] ss:$8 sps:$4 sm:$0xff]   ;;  %v4272_v0 = vld [vmem:[%s6037_s1 + $0x484] ss:$8 sps:$4 sm:$0xff]  }
  0xaf   : > { %2142 = vmatprep.subr.bf16.mxu1 %v4239_v44  ;;  %v4275_v44 = vld [vmem:[%s6037_s1 + $0x584] ss:$8 sps:$4 sm:$0xff]  }
  0xb1   : > { %1838 = vmatpush2.bf16.msra.mxu0 %v4234_v52  ;;  %v4270_v52 = vld [vmem:[%s6037_s1 + $0x480] ss:$8 sps:$4 sm:$0xff]  }
  0xb2   : > { %2143 = vmatpush2.bf16.msra.mxu1 %v4237_v55  ;;  %1839 = vmatprep.subr.bf16.mxu0 %v4242_v49  ;;  %v4273_v55 = vld [vmem:[%s6037_s1 + $0x580] ss:$8 sps:$4 sm:$0xff]   ;;  %v4278_v49 = vld [vmem:[%s6037_s1 + $0x674] ss:$8 sps:$4 sm:$0xff]  }
  0xb3   : > { %2144 = vmatprep.subr.bf16.mxu1 %v4245_v16  ;;  %v4281_v16 = vld [vmem:[%s6037_s1 + $0x774] ss:$8 sps:$4 sm:$0xff]  }
  0xb5   : > { %1840 = vmatpush2.bf16.msra.mxu0 %v4240_v60  ;;  %v1595_v60 = vshrl.u32 %v5196_v5, 16 }
  0xb6   : > { %2145 = vmatpush2.bf16.msra.mxu1 %v4243_v11  ;;  %1841 = vmatprep.subr.bf16.mxu0 %v4248_v13  ;;  %v3673_v11 = vcombine.low %v4963_v8, %v5090_v46  ;;  %v1598_v13 = vshll.u32 %v5196_v5, 16  ;;  %v4287_v8 = vld [vmem:[%s6037_s1 + $0x764] ss:$8 sps:$4 sm:$0xff]   ;;  %v3676_v46 = vcombine.high %v5094_v47, %v5139_v24 }
  0xb7   : > { %2146 = vmatprep.subr.bf16.mxu1 %v4251_v20  ;;  %v4276_v20 = vld [vmem:[%s6037_s1 + $0x670] ss:$8 sps:$4 sm:$0xff]  }
  0xb9   : > { %1842 = vmatpush2.bf16.msra.mxu0 %v4246_v15  ;;  %v4279_v15 = vld [vmem:[%s6037_s1 + $0x770] ss:$8 sps:$4 sm:$0xff]  }
  0xba   : > { %2147 = vmatpush2.bf16.msra.mxu1 %v4249_v21  ;;  %1843 = vmatprep.subr.bf16.mxu0 %v4254_v29  ;;  %v4284_v21 = vld [vmem:[%s6037_s1 + $0x664] ss:$8 sps:$4 sm:$0xff]   ;;  %v1597_v29 = vrot.slane %v1595_v60, 4 }
  0xbb   : > { %2148 = vmatprep.subr.bf16.mxu1 %v4257_v33  ;;  %v4282_v33 = vld [vmem:[%s6037_s1 + $0x660] ss:$8 sps:$4 sm:$0xff]  }
  0xbd   : > { %1844 = vmatpush2.bf16.msra.mxu0 %v4252_v57  ;;  %v4285_v57 = vld [vmem:[%s6037_s1 + $0x760] ss:$8 sps:$4 sm:$0xff]  }
  0xbe   : > { %2149 = vmatpush2.bf16.msra.mxu1 %v4255_v34  ;;  %1845 = vmatprep.subr.bf16.mxu0 %v4260_v36  ;;  %v1600_v34 = vrot.slane %v1598_v13, 5  ;;  %v4290_v36 = vld [vmem:[%s6037_s1 + $0x654] ss:$8 sps:$4 sm:$0xff]   ;;  %v4306_v13 = vld [vmem:[%s6037_s1 + $0x620] ss:$8 sps:$4 sm:$0xff]  }
  0xbf   : > { %2150 = vmatprep.subr.bf16.mxu1 %v4263_v37  ;;  %v215_v37 = vld [vmem:[%s4605_s10 + $0x88] sm:$0x11] }
  0xc1   : > { %1846 = vmatpush2.bf16.msra.mxu0 %v4258_v1  ;;  %v1601_v1 = vor.u32 %v1600_v34, %v1597_v29  ;;  %v4321_v29 = vld [vmem:[%s6037_s1 + $0x700] ss:$8 sps:$4 sm:$0xff]   ;;  %v4324_v34 = vld [vmem:[%s6037_s1 + $0x6f0] ss:$8 sps:$4 sm:$0xff]  }
  0xc2   : > { %2151 = vmatpush2.bf16.msra.mxu1 %v4261_v56  ;;  %1847 = vmatprep.subr.bf16.mxu0 %v4266_v38  ;;  %v1604_v56 = vshll.u32 %v215_v37, 16  ;;  %v4291_v38 = vld [vmem:[%s6037_s1 + $0x750] ss:$8 sps:$4 sm:$0xff]  }
  0xc3   : > { %2152 = vmatprep.subr.bf16.mxu1 %v4269_v58  ;;  %v4299_v58 = vld [vmem:[%s6037_s1 + $0x744] ss:$8 sps:$4 sm:$0xff]  }
  0xc5   : > { %1848 = vmatpush2.bf16.msra.mxu0 %v4264_v45  ;;  %v1606_v45 = vrot.slane %v1604_v56, 5  ;;  %v4339_v56 = vld [vmem:[%s6037_s1 + $0x7d0] ss:$8 sps:$4 sm:$0xff]  }
  0xc6   : > { %2153 = vmatpush2.bf16.msra.mxu1 %v4267_v4  ;;  %1849 = vmatprep.subr.bf16.mxu0 %v4272_v0  ;;  %v3640_v4 = vrot.slane %v5196_v5, 9  ;;  %v1911_v0 = vrot.slane %v215_v37, 5  ;;  %v4332_v37 = vld [vmem:[%s6037_s1 + $0x6e4] ss:$8 sps:$4 sm:$0xff]  }
  0xc7   : > { %2154 = vmatprep.subr.bf16.mxu1 %v4275_v44  ;;  %v4294_v44 = vld [vmem:[%s6037_s1 + $0x640] ss:$8 sps:$4 sm:$0xff]  }
  0xc9   : > { %1850 = vmatpush2.bf16.msra.mxu0 %v4270_v52  ;;  %v4297_v52 = vld [vmem:[%s6037_s1 + $0x740] ss:$8 sps:$4 sm:$0xff]  }
  0xca   : > { %2155 = vmatpush2.bf16.msra.mxu1 %v4273_v55  ;;  %2413 = vmatprep.subr.bf16.mxu0 %v4278_v49  ;;  %v5439_v49 = vsel %vm4921_vm5, %v3640_v4, %v1911_v0  ;;  %v4348_v4 = vld [vmem:[%s6037_s1 + $0x6b0] ss:$8 sps:$4 sm:$0xff]  }
  0xcb   : > { %2715 = vmatprep.subr.bf16.mxu1 %v4281_v16  ;;  %v4300_v16 = vld [vmem:[%s6037_s1 + $0x630] ss:$8 sps:$4 sm:$0xff]  }
  0xcc   : > { %1852 = vmatmul.mubr.bf16.vlgmr.msra.gmra.mxu0 %v3600_v32  ;;  %v3675_v32 = vcombine.low %v5094_v47, %v5139_v24  ;;  %v3678_v47 = vcombine.high %v5143_v25, %v5189_v59  ;;  %v1602_v24 = vrot.slane %v1601_v1, 4  ;;  %v4336_v1 = vld [vmem:[%s6037_s1 + $0x6d0] ss:$8 sps:$4 sm:$0xff]  }
  0xcd   : > { %2157 = vmatmul.mubr.bf16.vlgmr.msra.gmra.mxu1 %v3673_v11  ;;  %2414 = vmatpush1.bf16.msra.mxu0 %v4276_v20  ;;  %v3680_v11 = vcombine.high %v5193_v63, %v5439_v49  ;;  %v4309_v20 = vld [vmem:[%s6037_s1 + $0x720] ss:$8 sps:$4 sm:$0xff]   ;;  %v4351_v0 = vld [vmem:[%s6037_s1 + $0x7b0] ss:$8 sps:$4 sm:$0xff]  }
  0xce   : > { %2716 = vmatpush1.bf16.msra.mxu1 %v4279_v15  ;;  %2415 = vmatprep.subr.bf16.mxu0 %v4284_v21  ;;  %v5435_v55 = vsel %vm4668_vm2, %v1602_v24, %v1606_v45  ;;  %v4314_v15 = vld [vmem:[%s6037_s1 + $0x614] ss:$8 sps:$4 sm:$0xff]   ;;  %v4312_v21 = vld [vmem:[%s6037_s1 + $0x610] ss:$8 sps:$4 sm:$0xff]  }
  0xcf   : > { %2717 = vmatprep.subr.bf16.mxu1 %v4287_v8  ;;  %1861 = vmatprep.mubr.bf16.mxu0 %v3603_v42  ;;  %v4296_v42 = vld [vmem:[%s6037_s1 + $0x644] ss:$8 sps:$4 sm:$0xff]   ;;  %v3607_v60 = vcombine.high %v4956_v7, %v5435_v55  ;;  %v3606_v3 = vcombine.low %v4956_v7, %v5435_v55  ;;  %v4315_v8 = vld [vmem:[%s6037_s1 + $0x710] ss:$8 sps:$4 sm:$0xff]   ;;  %v4350_v24 = vld [vmem:[%s6037_s1 + $0x6b4] ss:$8 sps:$4 sm:$0xff]  }
  0xd0   : > { %2166 = vmatprep.mubr.bf16.mxu1 %v3676_v46  ;;  %v4320_v46 = vld [vmem:[%s6037_s1 + $0x604] ss:$8 sps:$4 sm:$0xff]   ;;  %v4353_v45 = vld [vmem:[%s6037_s1 + $0x7b4] ss:$8 sps:$4 sm:$0xff]  }
  0xd1   : > { %2416 = vmatpush1.bf16.msra.mxu0 %v4282_v33  ;;  %v4323_v7 = vld [vmem:[%s6037_s1 + $0x704] ss:$8 sps:$4 sm:$0xff]   ;;  %v4326_v33 = vld [vmem:[%s6037_s1 + $0x6f4] ss:$8 sps:$4 sm:$0xff]  }
  0xd2   : > { %2718 = vmatpush1.bf16.msra.mxu1 %v4285_v57  ;;  %2417 = vmatprep.subr.bf16.mxu0 %v4290_v36  ;;  %v4329_v57 = vld [vmem:[%s6037_s1 + $0x7f4] ss:$8 sps:$4 sm:$0xff]   ;;  %v4327_v36 = vld [vmem:[%s6037_s1 + $0x7f0] ss:$8 sps:$4 sm:$0xff]  }
  0xd3   : > { %2719 = vmatprep.subr.bf16.mxu1 %v4293_v27  ;;  %v4333_v27 = vld [vmem:[%s6037_s1 + $0x7e0] ss:$8 sps:$4 sm:$0xff]  }
  0xd4   : > { %1862 = vmatmul.mubr.bf16.gmra.mxu0 %v3602_v50  ;;  %v3677_v50 = vcombine.low %v5143_v25, %v5189_v59  ;;  %v4308_v25 = vld [vmem:[%s6037_s1 + $0x624] ss:$8 sps:$4 sm:$0xff]  }
  0xd5   : > { %2167 = vmatmul.mubr.bf16.gmra.mxu1 %v3675_v32  ;;  %2418 = vmatpush1.bf16.msra.mxu0 %v4288_v28  ;;  %v4311_v59 = vld [vmem:[%s6037_s1 + $0x724] ss:$8 sps:$4 sm:$0xff]   ;;  %v4338_v28 = vld [vmem:[%s6037_s1 + $0x6d4] ss:$8 sps:$4 sm:$0xff]  }
  0xd6   : > { %2720 = vmatpush1.bf16.msra.mxu1 %v4291_v38  ;;  %2419 = vmatprep.subr.bf16.mxu0 %v4296_v42  ;;  %v4341_v32 = vld [vmem:[%s6037_s1 + $0x7d4] ss:$8 sps:$4 sm:$0xff]   ;;  %v4344_v38 = vld [vmem:[%s6037_s1 + $0x6c4] ss:$8 sps:$4 sm:$0xff]  }
  0xd7   : > { %2721 = vmatprep.subr.bf16.mxu1 %v4299_v58  ;;  %1871 = vmatprep.mubr.bf16.mxu0 %v3605_v51  ;;  %v4303_v51 = vld [vmem:[%s6037_s1 + $0x730] ss:$8 sps:$4 sm:$0xff]   ;;  %v4347_v42 = vld [vmem:[%s6037_s1 + $0x7c4] ss:$8 sps:$4 sm:$0xff]   ;;  %v4342_v58 = vld [vmem:[%s6037_s1 + $0x6c0] ss:$8 sps:$4 sm:$0xff]  }
  0xd8   : > { %2176 = vmatprep.mubr.bf16.mxu1 %v3678_v47  ;;  %v4345_v47 = vld [vmem:[%s6037_s1 + $0x7c0] ss:$8 sps:$4 sm:$0xff]  }
  0xd9   : > { %2420 = vmatpush1.bf16.msra.mxu0 %v4294_v44  ;;  %v4356_v44 = vld [vmem:[%s6037_s1 + $0x6a4] ss:$8 sps:$4 sm:$0xff]  }
  0xda   : > { %2722 = vmatpush1.bf16.msra.mxu1 %v4297_v52  ;;  %2421 = vmatprep.subr.bf16.mxu0 %v4302_v23  ;;  %v4359_v52 = vld [vmem:[%s6037_s1 + $0x7a4] ss:$8 sps:$4 sm:$0xff]   ;;  %v4354_v23 = vld [vmem:[%s6037_s1 + $0x6a0] ss:$8 sps:$4 sm:$0xff]  }
  0xdb   : > { %2723 = vmatprep.subr.bf16.mxu1 %v4305_v2  ;;  %v4357_v2 = vld [vmem:[%s6037_s1 + $0x7a0] ss:$8 sps:$4 sm:$0xff]  }
  0xdc   : > { %1872 = vmatmul.mubr.bf16.gmra.mxu0 %v3604_v9  ;;  %v3679_v9 = vcombine.low %v5193_v63, %v5439_v49  ;;  %v4318_v63 = vld [vmem:[%s6037_s1 + $0x600] ss:$8 sps:$4 sm:$0xff]  }
  0xdd   : > { %2177 = vmatmul.mubr.bf16.gmra.mxu1 %v3677_v50  ;;  %2422 = vmatpush1.bf16.msra.mxu0 %v4300_v16  ;;  %v4362_v50 = vld [vmem:[%s6037_s1 + $0x694] ss:$8 sps:$4 sm:$0xff]  }
  0xde   : > { %2724 = vmatpush1.bf16.msra.mxu1 %v4303_v51  ;;  %2423 = vmatprep.subr.bf16.mxu0 %v4308_v25  ;;  %v4365_v16 = vld [vmem:[%s6037_s1 + $0x794] ss:$8 sps:$4 sm:$0xff]   ;;  %v4360_v51 = vld [vmem:[%s6037_s1 + $0x690] ss:$8 sps:$4 sm:$0xff]  }
  0xdf   : > { %2725 = vmatprep.subr.bf16.mxu1 %v4311_v59  ;;  %1881 = vmatprep.mubr.bf16.mxu0 %v3607_v60  ;;  %v4363_v25 = vld [vmem:[%s6037_s1 + $0x790] ss:$8 sps:$4 sm:$0xff]   ;;  %v4368_v59 = vld [vmem:[%s6037_s1 + $0x684] ss:$8 sps:$4 sm:$0xff]  }
  0xe0   : > { %2186 = vmatprep.mubr.bf16.mxu1 %v3680_v11  ;;  %v4371_v60 = vld [vmem:[%s6037_s1 + $0x784] ss:$8 sps:$4 sm:$0xff]   ;;  %v4366_v11 = vld [vmem:[%s6037_s1 + $0x680] ss:$8 sps:$4 sm:$0xff]  }
  0xe1   : > { %2424 = vmatpush1.bf16.msra.mxu0 %v4306_v13  ;;  %v4369_v13 = vld [vmem:[%s6037_s1 + $0x780] ss:$8 sps:$4 sm:$0xff]  }
  0xe2   : > { %2726 = vmatpush1.bf16.msra.mxu1 %v4309_v20  ;;  %2425 = vmatprep.subr.bf16.mxu0 %v4314_v15  ;;  %v5593_v20 = vld [vmem:[%s4605_s10 + $0x90] sm:$0xff] }
  0xe3   : > { %2727 = vmatprep.subr.bf16.mxu1 %v4317_v6  ;;  %v4374_v15 = vld [vmem:[%s6037_s1 + $0x874] ss:$8 sps:$4 sm:$0xff]   ;;  %v2503_v6 = vshrl.u32 %v5593_v20, 16 }
  0xe4   : > { %1882 = vmatmul.mubr.bf16.gmra.mxu0 %v3606_v3  ;;  %v2506_v3 = vshll.u32 %v5593_v20, 16 }
  0xe5   : > { %2187 = vmatmul.mubr.bf16.gmra.mxu1 %v3679_v9  ;;  %2426 = vmatpush1.bf16.msra.mxu0 %v4312_v21  ;;  %v4372_v9 = vld [vmem:[%s6037_s1 + $0x870] ss:$8 sps:$4 sm:$0xff]   ;;  %v4377_v21 = vld [vmem:[%s6037_s1 + $0x864] ss:$8 sps:$4 sm:$0xff]  }
  0xe6   : > { %2728 = vmatpush1.bf16.msra.mxu1 %v4315_v8  ;;  %2427 = vmatprep.subr.bf16.mxu0 %v4320_v46 }
  0xe7   : > { %2729 = vmatprep.subr.bf16.mxu1 %v4323_v7  ;;  %2445 = vmatprep.mubr.bf16.mxu0 %v4763_v61  ;;  %v4335_v61 = vld [vmem:[%s6037_s1 + $0x7e4] ss:$8 sps:$4 sm:$0xff]   ;;  %v2505_v7 = vrot.slane %v2503_v6, 4 }
  0xe8   : > { %2747 = vmatprep.mubr.bf16.mxu1 %v4828_v30  ;;  %v4330_v30 = vld [vmem:[%s6037_s1 + $0x6e0] ss:$8 sps:$4 sm:$0xff]  }
  0xe9   : > { %2428 = vmatpush1.bf16.msra.mxu0 %v4318_v63  ;;  %v2508_v63 = vrot.slane %v2506_v3, 5  ;;  %v4395_v3 = vld [vmem:[%s6037_s1 + $0x800] ss:$8 sps:$4 sm:$0xff]  }
  0xea   : > { %2730 = vmatpush1.bf16.msra.mxu1 %v4321_v29  ;;  %2429 = vmatprep.subr.bf16.mxu0 %v4326_v33  ;;  %v4375_v33 = vld [vmem:[%s6037_s1 + $0x860] ss:$8 sps:$4 sm:$0xff]  }
  0xeb   : > { %2731 = vmatprep.subr.bf16.mxu1 %v4329_v57  ;;  %v5614_v57 = vld [vmem:[%s4605_s10 + $0x98] sm:$0x11] }
  0xed   : > { %2430 = vmatpush2.bf16.msra.mxu0 %v4324_v34 }
  0xee   : > { %2732 = vmatpush2.bf16.msra.mxu1 %v4327_v36  ;;  %2431 = vmatprep.subr.bf16.mxu0 %v4332_v37 }
  0xef   : > { %2733 = vmatprep.subr.bf16.mxu1 %v4335_v61 }
  0xf1   : > { %2432 = vmatpush2.bf16.msra.mxu0 %v4330_v30  ;;  %v2509_v30 = vor.u32 %v2508_v63, %v2505_v7 }
  0xf2   : > { %2734 = vmatpush2.bf16.msra.mxu1 %v4333_v27  ;;  %2433 = vmatprep.subr.bf16.mxu0 %v4338_v28  ;;  %v2512_v27 = vshll.u32 %v5614_v57, 16 }
  0xf3   : > { %2735 = vmatprep.subr.bf16.mxu1 %v4341_v32  ;;  %v4378_v32 = vld [vmem:[%s6037_s1 + $0x850] ss:$8 sps:$4 sm:$0xff]  }
  0xf5   : > { %2434 = vmatpush2.bf16.msra.mxu0 %v4336_v1 }
  0xf6   : > { %2736 = vmatpush2.bf16.msra.mxu1 %v4339_v56  ;;  %2435 = vmatprep.subr.bf16.mxu0 %v4344_v38  ;;  %v2510_v38 = vrot.slane %v2509_v30, 4 }
  0xf7   : > { %2737 = vmatprep.subr.bf16.mxu1 %v4347_v42  ;;  %v2514_v42 = vrot.slane %v2512_v27, 5  ;;  %v4401_v27 = vld [vmem:[%s6037_s1 + $0x8e0] ss:$8 sps:$4 sm:$0xff]  }
  0xf9   : > { %2436 = vmatpush2.bf16.msra.mxu0 %v4342_v58 }
  0xfa   : > { %2738 = vmatpush2.bf16.msra.mxu1 %v4345_v47  ;;  %2437 = vmatprep.subr.bf16.mxu0 %v4350_v24  ;;  %v4381_v47 = vld [vmem:[%s6037_s1 + $0x840] ss:$8 sps:$4 sm:$0xff]   ;;  %v4386_v24 = vld [vmem:[%s6037_s1 + $0x834] ss:$8 sps:$4 sm:$0xff]  }
  0xfb   : > { %2739 = vmatprep.subr.bf16.mxu1 %v4353_v45 }
  0xfd   : > { %2438 = vmatpush2.bf16.msra.mxu0 %v4348_v4  ;;  %v4384_v4 = vld [vmem:[%s6037_s1 + $0x830] ss:$8 sps:$4 sm:$0xff]  }
  0xfe   : > { %2740 = vmatpush2.bf16.msra.mxu1 %v4351_v0  ;;  %2439 = vmatprep.subr.bf16.mxu0 %v4356_v44  ;;  %v4389_v0 = vld [vmem:[%s6037_s1 + $0x824] ss:$8 sps:$4 sm:$0xff]  }
  0xff   : > { %2741 = vmatprep.subr.bf16.mxu1 %v4359_v52  ;;  %v4387_v52 = vld [vmem:[%s6037_s1 + $0x820] ss:$8 sps:$4 sm:$0xff]  }
 0x101   : > { %2440 = vmatpush2.bf16.msra.mxu0 %v4354_v23 }
 0x102   : > { %2742 = vmatpush2.bf16.msra.mxu1 %v4357_v2  ;;  %2441 = vmatprep.subr.bf16.mxu0 %v4362_v50  ;;  %v4394_v2 = vld [vmem:[%s6037_s1 + $0x814] ss:$8 sps:$4 sm:$0xff]  }
 0x103   : > { %2743 = vmatprep.subr.bf16.mxu1 %v4365_v16  ;;  %v3745_v16 = vcombine.low %v5196_v5, %v5593_v20 }
 0x105   : > { %2442 = vmatpush2.bf16.msra.mxu0 %v4360_v51 }
 0x106   : > { %2744 = vmatpush2.bf16.msra.mxu1 %v4363_v25  ;;  %2443 = vmatprep.subr.bf16.mxu0 %v4368_v59  ;;  %v4392_v59 = vld [vmem:[%s6037_s1 + $0x810] ss:$8 sps:$4 sm:$0xff]  }
 0x107   : > { %2745 = vmatprep.subr.bf16.mxu1 %v4371_v60 }
 0x109   : > { %2444 = vmatpush2.bf16.msra.mxu0 %v4366_v11 }
 0x10a   : > { %2746 = vmatpush2.bf16.msra.mxu1 %v4369_v13  ;;  %3008 = vmatprep.subr.bf16.mxu0 %v4374_v15  ;;  %v4397_v13 = vld [vmem:[%s6037_s1 + $0x804] ss:$8 sps:$4 sm:$0xff]  }
 0x10b   : > { %3931 = vmatprep.subr.bf16.mxu1 %v4374_v15 }
 0x10c   : > { %v624_v8 = vpop.f32.mrf.mxu0  ;;  %2446 = vmatmul.mubr.bf16.vlgmr.msra.gmra.mxu0 %v4767_v62  ;;  %v4380_v62 = vld [vmem:[%s6037_s1 + $0x854] ss:$8 sps:$4 sm:$0xff]  }
 0x10d   : > { %v897_v46 = vpop.f32.mrf.mxu1  ;;  %2748 = vmatmul.mubr.bf16.vlgmr.msra.gmra.mxu1 %v4832_v31  ;;  %3009 = vmatpush1.bf16.msra.mxu0 %v4372_v9 }
 0x10e   : > { %v5608_v29 = vadd.f32 %v897_v46, %v624_v8  ;;  %3947 = vmatpush1.bf16.msra.mxu1 %v4372_v9  ;;  %v626_v34 = vpop.f32.mrf.mxu0  ;;  %3010 = vmatprep.subr.bf16.mxu0 %v4377_v21  ;;  %v4400_v8 = vld [vmem:[%s6037_s1 + $0x8f4] ss:$8 sps:$4 sm:$0xff]  }
 0x10f   : > { %v899_v36 = vpop.f32.mrf.mxu1  ;;  %3932 = vmatprep.subr.bf16.mxu1 %v4377_v21  ;;  %2455 = vmatprep.mubr.bf16.mxu0 %v4821_v26  ;;  %v4383_v26 = vld [vmem:[%s6037_s1 + $0x844] ss:$8 sps:$4 sm:$0xff]  }
 0x110   : > { %v5619_v31 = vadd.f32 %v899_v36, %v626_v34  ;;  %2757 = vmatprep.mubr.bf16.mxu1 %v4896_v18  ;;  %v628_v37 = vpop.f32.mrf.mxu0  ;;  %v4398_v34 = vld [vmem:[%s6037_s1 + $0x8f0] ss:$8 sps:$4 sm:$0xff]  }
 0x111   : > { %v901_v61 = vpop.f32.mrf.mxu1  ;;  %3011 = vmatpush1.bf16.msra.mxu0 %v4375_v33 }
 0x112   : > { %v5624_v28 = vadd.f32 %v901_v61, %v628_v37  ;;  %3948 = vmatpush1.bf16.msra.mxu1 %v4375_v33  ;;  %v630_v1 = vpop.f32.mrf.mxu0  ;;  %3012 = vmatprep.subr.bf16.mxu0 %v4380_v62 }
 0x113   : > { %v903_v56 = vpop.f32.mrf.mxu1  ;;  %3933 = vmatprep.subr.bf16.mxu1 %v4380_v62  ;;  %v4403_v62 = vld [vmem:[%s6037_s1 + $0x8e4] ss:$8 sps:$4 sm:$0xff]  }
 0x114   : > { %v5632_v18 = vadd.f32 %v903_v56, %v630_v1  ;;  %2456 = vmatmul.mubr.bf16.gmra.mxu0 %v4848_v43  ;;  %v2515_v43 = vsel %vm4668_vm2, %v2510_v38, %v2514_v42  ;;  %v634_v44 = vpop.f32.mrf.mxu0  ;;  %v4406_v1 = vld [vmem:[%s6037_s1 + $0x8d4] ss:$8 sps:$4 sm:$0xff]  }
 0x115   : > { %2758 = vmatmul.mubr.bf16.gmra.mxu1 %v4900_v19  ;;  %v907_v58 = vpop.f32.mrf.mxu1  ;;  %3013 = vmatpush1.bf16.msra.mxu0 %v4378_v32  ;;  %v3811_v51 = vcombine.low %v5435_v55, %v2515_v43 }
 0x116   : > { %3949 = vmatpush1.bf16.msra.mxu1 %v4378_v32  ;;  %3014 = vmatprep.subr.bf16.mxu0 %v4383_v26  ;;  %v5660_v23 = vadd.f32 %v907_v58, %v634_v44  ;;  %v636_v50 = vpop.f32.mrf.mxu0  ;;  %v4404_v58 = vld [vmem:[%s6037_s1 + $0x8d0] ss:$8 sps:$4 sm:$0xff]  }
 0x117   : > { %3934 = vmatprep.subr.bf16.mxu1 %v4383_v26  ;;  %v909_v45 = vpop.f32.mrf.mxu1  ;;  %2465 = vmatprep.mubr.bf16.mxu0 %v4911_v35  ;;  %v3746_v35 = vcombine.high %v5196_v5, %v5593_v20  ;;  %v4416_v44 = vld [vmem:[%s6037_s1 + $0x890] ss:$8 sps:$4 sm:$0xff]  }
 0x118   : > { %2767 = vmatprep.mubr.bf16.mxu1 %v4977_v39  ;;  %v3812_v39 = vcombine.high %v5435_v55, %v2515_v43  ;;  %v638_v25 = vpop.f32.mrf.mxu0 }
 0x119   : > { %v911_v19 = vpop.f32.mrf.mxu1  ;;  %3015 = vmatpush1.bf16.msra.mxu0 %v4381_v47 }
 0x11a   : > { %3950 = vmatpush1.bf16.msra.mxu1 %v4381_v47  ;;  %3016 = vmatprep.subr.bf16.mxu0 %v4386_v24  ;;  %v5673_v60 = vadd.f32 %v911_v19, %v638_v25  ;;  %v640_v15 = vpop.f32.mrf.mxu0  ;;  %v4407_v19 = vld [vmem:[%s6037_s1 + $0x8c0] ss:$8 sps:$4 sm:$0xff]  }
 0x11b   : > { %3935 = vmatprep.subr.bf16.mxu1 %v4386_v24  ;;  %v913_v14 = vpop.f32.mrf.mxu1  ;;  %v4409_v24 = vld [vmem:[%s6037_s1 + $0x8c4] ss:$8 sps:$4 sm:$0xff]  }
 0x11c   : > { %2466 = vmatmul.mubr.bf16.gmra.mxu0 %v4917_v40  ;;  %v5665_v40 = vadd.f32 %v909_v45, %v636_v50  ;;  %v5678_v5 = vadd.f32 %v913_v14, %v640_v15  ;;  %v4418_v14 = vld [vmem:[%s6037_s1 + $0x894] ss:$8 sps:$4 sm:$0xff]   ;;  %v2807_v50 = vrot.slane %v5614_v57, 5 }
 0x11d   : > { %2768 = vmatmul.mubr.bf16.gmra.mxu1 %v4981_v10  ;;  %3017 = vmatpush1.bf16.msra.mxu0 %v4384_v4  ;;  %v917_v10 = vpop.f32.mrf.mxu1 }
 0x11e   : > { %3951 = vmatpush1.bf16.msra.mxu1 %v4384_v4  ;;  %3018 = vmatprep.subr.bf16.mxu0 %v4389_v0  ;;  %v4412_v4 = vld [vmem:[%s6037_s1 + $0x8b4] ss:$8 sps:$4 sm:$0xff]  }
 0x11f   : > { %3936 = vmatprep.subr.bf16.mxu1 %v4389_v0  ;;  %2475 = vmatprep.mubr.bf16.mxu0 %v3746_v35  ;;  %v919_v11 = vpop.f32.mrf.mxu1  ;;  %v4410_v0 = vld [vmem:[%s6037_s1 + $0x8b0] ss:$8 sps:$4 sm:$0xff]   ;;  %v4415_v35 = vld [vmem:[%s6037_s1 + $0x8a4] ss:$8 sps:$4 sm:$0xff]  }
 0x120   : > { %2777 = vmatprep.mubr.bf16.mxu1 %v3812_v39  ;;  %v644_v6 = vpop.f32.mrf.mxu0  ;;  %v4413_v39 = vld [vmem:[%s6037_s1 + $0x8a0] ss:$8 sps:$4 sm:$0xff]  }
 0x121   : > { %3019 = vmatpush1.bf16.msra.mxu0 %v4387_v52  ;;  %v921_v55 = vpop.f32.mrf.mxu1  ;;  %v5683_v9 = vadd.f32 %v917_v10, %v644_v6  ;;  %v4419_v10 = vld [vmem:[%s6037_s1 + $0x880] ss:$8 sps:$4 sm:$0xff]  }
 0x122   : > { %3952 = vmatpush1.bf16.msra.mxu1 %v4387_v52  ;;  %3020 = vmatprep.subr.bf16.mxu0 %v4394_v2  ;;  %v646_v46 = vpop.f32.mrf.mxu0  ;;  %v4421_v52 = vld [vmem:[%s6037_s1 + $0x884] ss:$8 sps:$4 sm:$0xff]  }
 0x123   : > { %3937 = vmatprep.subr.bf16.mxu1 %v4394_v2  ;;  %v923_v21 = vpop.f32.mrf.mxu1  ;;  %v5688_v7 = vadd.f32 %v919_v11, %v646_v46  ;;  %v3845_v2 = vrot.slane %v5593_v20, 9 }
 0x124   : > { %2476 = vmatmul.mubr.bf16.gmra.mxu0 %v3745_v16  ;;  %v648_v63 = vpop.f32.mrf.mxu0 }
 0x125   : > { %2778 = vmatmul.mubr.bf16.gmra.mxu1 %v3811_v51  ;;  %3021 = vmatpush1.bf16.msra.mxu0 %v4392_v59  ;;  %v927_v33 = vpop.f32.mrf.mxu1  ;;  %v5695_v36 = vadd.f32 %v921_v55, %v648_v63  ;;  %v2808_v16 = vsel %vm4921_vm5, %v3845_v2, %v2807_v50 }
 0x126   : > { %3953 = vmatpush1.bf16.msra.mxu1 %v4392_v59  ;;  %3022 = vmatprep.subr.bf16.mxu0 %v4397_v13  ;;  %v650_v37 = vpop.f32.mrf.mxu0  ;;  %v3879_v51 = vcombine.high %v5439_v49, %v2808_v16  ;;  %v3878_v6 = vcombine.low %v5439_v49, %v2808_v16 }
 0x127   : > { %3938 = vmatprep.subr.bf16.mxu1 %v4397_v13  ;;  %3040 = vmatprep.mubr.bf16.mxu0 %v5107_v54  ;;  %v929_v54 = vpop.f32.mrf.mxu1  ;;  %v5700_v61 = vadd.f32 %v923_v21, %v650_v37 }
 0x128   : > { %3060 = vmatprep.mubr.bf16.mxu1 %v5209_v53  ;;  %v654_v53 = vpop.f32.mrf.mxu0 }
 0x129   : > { %3023 = vmatpush1.bf16.msra.mxu0 %v4395_v3  ;;  %v931_v30 = vpop.f32.mrf.mxu1  ;;  %v5705_v32 = vadd.f32 %v927_v33, %v654_v53 }
 0x12a   : > { %3954 = vmatpush1.bf16.msra.mxu1 %v4395_v3  ;;  %3024 = vmatprep.subr.bf16.mxu0 %v4400_v8  ;;  %v656_v56 = vpop.f32.mrf.mxu0 }
 0x12b   : > { %3939 = vmatprep.subr.bf16.mxu1 %v4400_v8  ;;  %v5710_v26 = vadd.f32 %v929_v54, %v656_v56  ;;  %v933_v42 = vpop.f32.mrf.mxu1 }
 0x12c   : > { %v658_v38 = vpop.f32.mrf.mxu0 }
 0x12d   : > { %3025 = vmatpush2.bf16.msra.mxu0 %v4398_v34  ;;  %v5715_v47 = vadd.f32 %v931_v30, %v658_v38 }
 0x12e   : > { %3955 = vmatpush2.bf16.msra.mxu1 %v4398_v34  ;;  %3026 = vmatprep.subr.bf16.mxu0 %v4403_v62  ;;  %v660_v45 = vpop.f32.mrf.mxu0 }
 0x12f   : > { %3940 = vmatprep.subr.bf16.mxu1 %v4403_v62  ;;  %v5720_v43 = vadd.f32 %v933_v42, %v660_v45 }
 0x131   : > { %3027 = vmatpush2.bf16.msra.mxu0 %v4401_v27 }
 0x132   : > { %3956 = vmatpush2.bf16.msra.mxu1 %v4401_v27  ;;  %3028 = vmatprep.subr.bf16.mxu0 %v4406_v1 }
 0x133   : > { %3941 = vmatprep.subr.bf16.mxu1 %v4406_v1 }
 0x135   : > { %3029 = vmatpush2.bf16.msra.mxu0 %v4404_v58 }
 0x136   : > { %3957 = vmatpush2.bf16.msra.mxu1 %v4404_v58  ;;  %3030 = vmatprep.subr.bf16.mxu0 %v4409_v24 }
 0x137   : > { %3942 = vmatprep.subr.bf16.mxu1 %v4409_v24 }
 0x139   : > { %3031 = vmatpush2.bf16.msra.mxu0 %v4407_v19 }
 0x13a   : > { %3958 = vmatpush2.bf16.msra.mxu1 %v4407_v19  ;;  %3032 = vmatprep.subr.bf16.mxu0 %v4412_v4 }
 0x13b   : > { %3943 = vmatprep.subr.bf16.mxu1 %v4412_v4 }
 0x13d   : > { %3033 = vmatpush2.bf16.msra.mxu0 %v4410_v0 }
 0x13e   : > { %3959 = vmatpush2.bf16.msra.mxu1 %v4410_v0  ;;  %3034 = vmatprep.subr.bf16.mxu0 %v4415_v35 }
 0x13f   : > { %3944 = vmatprep.subr.bf16.mxu1 %v4415_v35 }
 0x141   : > { %3035 = vmatpush2.bf16.msra.mxu0 %v4413_v39 }
 0x142   : > { %3960 = vmatpush2.bf16.msra.mxu1 %v4413_v39  ;;  %3036 = vmatprep.subr.bf16.mxu0 %v4418_v14 }
 0x143   : > { %3945 = vmatprep.subr.bf16.mxu1 %v4418_v14 }
 0x145   : > { %3037 = vmatpush2.bf16.msra.mxu0 %v4416_v44 }
 0x146   : > { %3961 = vmatpush2.bf16.msra.mxu1 %v4416_v44  ;;  %3038 = vmatprep.subr.bf16.mxu0 %v4421_v52 }
 0x147   : > { %3946 = vmatprep.subr.bf16.mxu1 %v4421_v52 }
 0x149   : > { %3039 = vmatpush2.bf16.msra.mxu0 %v4419_v10 }
 0x14a   : > { %3962 = vmatpush2.bf16.msra.mxu1 %v4419_v10 }
 0x14c   : > { %v1238_v25 = vpop.f32.mrf.mxu0  ;;  %3041 = vmatmul.mubr.bf16.vlgmr.msra.gmra.mxu0 %v5130_v17 }
 0x14d   : > { %v1539_v59 = vpop.f32.mrf.mxu1  ;;  %3061 = vmatmul.mubr.bf16.vlgmr.msra.gmra.mxu1 %v5229_v22  ;;  %v1277_v20 = vadd.f32 %v1238_v25, %v5608_v29  ;;  %3050 = vmatprep.mubr.bf16.mxu0 %v5156_v12 }
 0x14e   : > { %3070 = vmatprep.mubr.bf16.mxu1 %v3879_v51  ;;  %v1240_v57 = vpop.f32.mrf.mxu0 }
 0x14f   : > { %v1541_v11 = vpop.f32.mrf.mxu1  ;;  %v5758_v13 = vadd.f32 %v1539_v59, %v1277_v20  ;;  %v1278_v41 = vadd.f32 %v1240_v57, %v5619_v31 }
 0x150   : > { %v1242_v15 = vpop.f32.mrf.mxu0 }
 0x151   : > { %v1543_v55 = vpop.f32.mrf.mxu1  ;;  %v5762_v3 = vadd.f32 %v1541_v11, %v1278_v41  ;;  %v1279_v17 = vadd.f32 %v1242_v15, %v5624_v28 }
 0x152   : > { %v1244_v22 = vpop.f32.mrf.mxu0 }
 0x153   : > { %v1545_v21 = vpop.f32.mrf.mxu1  ;;  %v5765_v29 = vadd.f32 %v1543_v55, %v1279_v17  ;;  %v1280_v12 = vadd.f32 %v1244_v22, %v5632_v18 }
 0x154   : > { %v1248_v8 = vpop.f32.mrf.mxu0  ;;  %3051 = vmatmul.mubr.bf16.gmra.mxu0 %v5180_v48 }
 0x155   : > { %3071 = vmatmul.mubr.bf16.gmra.mxu1 %v3878_v6  ;;  %v1549_v46 = vpop.f32.mrf.mxu1  ;;  %v5769_v31 = vadd.f32 %v1545_v21, %v1280_v12  ;;  %v1281_v63 = vadd.f32 %v1248_v8, %v5660_v23 }
 0x156   : > { %v1250_v49 = vpop.f32.mrf.mxu0 }
 0x157   : > { %v1551_v33 = vpop.f32.mrf.mxu1  ;;  %v1282_v34 = vadd.f32 %v1250_v49, %v5665_v40  ;;  %v5773_v28 = vadd.f32 %v1549_v46, %v1281_v63 }
 0x158   : > { %v1252_v62 = vpop.f32.mrf.mxu0 }
 0x159   : > { %v1553_v37 = vpop.f32.mrf.mxu1  ;;  %v1283_v54 = vadd.f32 %v1252_v62, %v5673_v60  ;;  %v5776_v18 = vadd.f32 %v1551_v33, %v1282_v34 }
 0x15a   : > { %v1254_v53 = vpop.f32.mrf.mxu0 }
 0x15b   : > { %v1555_v48 = vpop.f32.mrf.mxu1  ;;  %v1284_v30 = vadd.f32 %v1254_v53, %v5678_v5  ;;  %v5779_v27 = vadd.f32 %v1553_v37, %v1283_v54 }
 0x15c   : > { %v1258_v1 = vpop.f32.mrf.mxu0 }
 0x15d   : > { %v1559_v23 = vpop.f32.mrf.mxu1  ;;  %v1285_v56 = vadd.f32 %v1258_v1, %v5683_v9  ;;  %v5782_v38 = vadd.f32 %v1555_v48, %v1284_v30 }
 0x15e   : > { %v1260_v40 = vpop.f32.mrf.mxu0 }
 0x15f   : > { %v1561_v42 = vpop.f32.mrf.mxu1  ;;  %v1286_v58 = vadd.f32 %v1260_v40, %v5688_v7  ;;  %v5785_v24 = vadd.f32 %v1559_v23, %v1285_v56 }
 0x160   : > { %v1262_v60 = vpop.f32.mrf.mxu0 }
 0x161   : > { %v1563_v45 = vpop.f32.mrf.mxu1  ;;  %v1287_v19 = vadd.f32 %v1262_v60, %v5695_v36  ;;  %v5788_v4 = vadd.f32 %v1561_v42, %v1286_v58 }
 0x162   : > { %v1264_v5 = vpop.f32.mrf.mxu0 }
 0x163   : > { %v1565_v0 = vpop.f32.mrf.mxu1  ;;  %v1288_v35 = vadd.f32 %v1264_v5, %v5700_v61  ;;  %v5791_v39 = vadd.f32 %v1563_v45, %v1287_v19 }
 0x164   : > { %v1268_v9 = vpop.f32.mrf.mxu0 }
 0x165   : > { %v1569_v14 = vpop.f32.mrf.mxu1  ;;  %v1289_v44 = vadd.f32 %v1268_v9, %v5705_v32  ;;  %v5794_v52 = vadd.f32 %v1565_v0, %v1288_v35 }
 0x166   : > { %v1270_v7 = vpop.f32.mrf.mxu0 }
 0x167   : > { %v1571_v2 = vpop.f32.mrf.mxu1  ;;  %v1290_v50 = vadd.f32 %v1270_v7, %v5710_v26  ;;  %v5797_v10 = vadd.f32 %v1569_v14, %v1289_v44 }
 0x168   : > { %v1272_v36 = vpop.f32.mrf.mxu0 }
 0x169   : > { %v1573_v16 = vpop.f32.mrf.mxu1  ;;  %v1291_v51 = vadd.f32 %v1272_v36, %v5715_v47  ;;  %v5800_v25 = vadd.f32 %v1571_v2, %v1290_v50 }
 0x16a   : > { %v1274_v61 = vpop.f32.mrf.mxu0 }
 0x16b   : > { %v1575_v59 = vpop.f32.mrf.mxu1  ;;  %v1292_v20 = vadd.f32 %v1274_v61, %v5720_v43  ;;  %v5803_v57 = vadd.f32 %v1573_v16, %v1291_v51 }
 0x16d   : > { %v5805_v32 = vadd.f32 %v1575_v59, %v1292_v20 }
 0x18c   : > { %v1853_v11 = vpop.f32.mrf.mxu0 }
 0x18d   : > { %v5807_v41 = vpop.f32.mrf.mxu1 }
 0x18e   : > { %v1855_v26 = vpop.f32.mrf.mxu0 }
 0x18f   : > { %v5809_v15 = vpop.f32.mrf.mxu1 }
 0x190   : > { %v1857_v55 = vpop.f32.mrf.mxu0 }
 0x191   : > { %v5811_v6 = vpop.f32.mrf.mxu1 }
 0x192   : > { %v1859_v47 = vpop.f32.mrf.mxu0 }
 0x193   : > { %v5813_v17 = vpop.f32.mrf.mxu1 }
 0x194   : > { %v1863_v22 = vpop.f32.mrf.mxu0 }
 0x195   : > { %v5815_v21 = vpop.f32.mrf.mxu1 }
 0x196   : > { %v1865_v43 = vpop.f32.mrf.mxu0 }
 0x197   : > { %v5817_v12 = vpop.f32.mrf.mxu1 }
 0x198   : > { %v5819_v8 = vpop.f32.mrf.mxu0 }
 0x199   : > { %v5821_v46 = vpop.f32.mrf.mxu1 }
 0x19a   : > { %v5823_v63 = vpop.f32.mrf.mxu0 }
 0x19b   : > { %v5825_v49 = vpop.f32.mrf.mxu1 }
 0x19c   : > { %v1873_v33 = vpop.f32.mrf.mxu0 }
 0x19d   : > { %v5827_v34 = vpop.f32.mrf.mxu1 }
 0x19e   : > { %v1875_v62 = vpop.f32.mrf.mxu0 }
 0x19f   : > { %v5829_v37 = vpop.f32.mrf.mxu1 }
 0x1a0   : > { %v5831_v54 = vpop.f32.mrf.mxu0 }
 0x1a1   : > { %v5833_v53 = vpop.f32.mrf.mxu1 }
 0x1a2   : > { %v5835_v48 = vpop.f32.mrf.mxu0 }
 0x1a3   : > { %v5837_v30 = vpop.f32.mrf.mxu1 }
 0x1a4   : > { %v5839_v1 = vpop.f32.mrf.mxu0 }
 0x1a5   : > { %v5841_v23 = vpop.f32.mrf.mxu1 }
 0x1a6   : > { %v5843_v56 = vpop.f32.mrf.mxu0 }
 0x1a7   : > { %v5845_v40 = vpop.f32.mrf.mxu1 }
 0x1a8   : > { %6045 = vst [vmem:[#allocation2_spill] sm:$0xff] %v5845_v40  ;;  %v5847_v42 = vpop.f32.mrf.mxu0 }
 0x1a9   : > { %v5849_v58 = vpop.f32.mrf.mxu1 }
 0x1aa   : > { %6046 = vst [vmem:[#allocation3_spill] sm:$0xff] %v5849_v58  ;;  %v5851_v60 = vpop.f32.mrf.mxu0 }
 0x1ab   : > { %v5853_v45 = vpop.f32.mrf.mxu1 }
 0x1ac   : > { %6047 = vst [vmem:[#allocation4_spill] sm:$0xff] %v5853_v45  ;;  %v3099_v45 = vlaneseq }
 0x1cc   : > { %v5855_v19 = vpop.f32.mrf.mxu0 }
 0x1cd   : > { %v5857_v5 = vpop.f32.mrf.mxu1 }
 0x1ce   : > { %6048 = vst [vmem:[#allocation5_spill] sm:$0xff] %v5857_v5  ;;  %v5859_v0 = vpop.f32.mrf.mxu0 }
 0x1cf   : > { %v5861_v35 = vpop.f32.mrf.mxu1 }
 0x1d0   : > { %6049 = vst [vmem:[#allocation6_spill] sm:$0xff] %v5861_v35  ;;  %v5863_v9 = vpop.f32.mrf.mxu0 }
 0x1d1   : > { %v5865_v14 = vpop.f32.mrf.mxu1 }
 0x1d2   : > { %6050 = vst [vmem:[#allocation7_spill] sm:$0xff] %v5865_v14  ;;  %v2453_v44 = vpop.f32.mrf.mxu0 }
 0x1d3   : > { %v5867_v7 = vpop.f32.mrf.mxu1 }
 0x1d4   : > { %6051 = vst [vmem:[#allocation8_spill] sm:$0xff] %v5867_v7  ;;  %v5869_v2 = vpop.f32.mrf.mxu0 }
 0x1d5   : > { %6052 = vst [vmem:[#allocation9_spill] sm:$0xff] %v5869_v2  ;;  %v5871_v50 = vpop.f32.mrf.mxu1 }
 0x1d6   : > { %6053 = vst [vmem:[#allocation10_spill] sm:$0xff] %v5871_v50  ;;  %v5873_v36 = vpop.f32.mrf.mxu0 }
 0x1d7   : > { %6054 = vst [vmem:[#allocation11_spill] sm:$0xff] %v5873_v36  ;;  %v5875_v16 = vpop.f32.mrf.mxu1 }
 0x1d8   : > { %6055 = vst [vmem:[#allocation12_spill] sm:$0xff] %v5875_v16  ;;  %v5877_v51 = vpop.f32.mrf.mxu0  ;;  %v3100_v16 = vshrl.u32 %v3099_v45, 7  ;;  %v3125_v45 = vld [vmem:[%s6039_s3] sm:$0x3] }
 0x1d9   : > { %6056 = vst [vmem:[#allocation13_spill] sm:$0xff] %v5877_v51  ;;  %v5879_v61 = vpop.f32.mrf.mxu1 }
 0x1da   : > { %6057 = vst [vmem:[#allocation14_spill] sm:$0xff] %v5879_v61  ;;  %v5881_v59 = vpop.f32.mrf.mxu0  ;;  %v3101_v61 = vsub.s32 0, %v3100_v16 }
 0x1db   : > { %6058 = vst [vmem:[#allocation15_spill] sm:$0xff] %v5881_v59  ;;  %v5883_v20 = vpop.f32.mrf.mxu1  ;;  %v1892_v59 = vadd.f32 %v1853_v11, %v5758_v13  ;;  %v1896_v13 = vadd.f32 %v1863_v22, %v5773_v28  ;;  %v1904_v22 = vadd.f32 %v5839_v1, %v5797_v10 }
 0x1dc   : > { %6059 = vst [vmem:[#allocation16_spill] sm:$0xff] %v5883_v20  ;;  %v2467_v14 = vpop.f32.mrf.mxu0  ;;  %v3097_v20 = vld [vmem:[%s6038_s2] sm:$0x3] }
 0x1dd   : > { %v5885_v35 = vpop.f32.mrf.mxu1  ;;  %v5910_v11 = vrot.slane %v3097_v20, %v3101_v61 }
 0x1de   : > { %6060 = vst [vmem:[#allocation17_spill] sm:$0xff] %v5885_v35  ;;  %v2469_v7 = vpop.f32.mrf.mxu0  ;;  %v1893_v35 = vadd.f32 %v1855_v26, %v5762_v3  ;;  %v1897_v3 = vadd.f32 %v1865_v43, %v5776_v18  ;;  %v1900_v26 = vadd.f32 %v1873_v33, %v5785_v24  ;;  %v2201_v24 = vadd.f32 %v5815_v21, %v1896_v13 }
 0x1df   : > { %v5887_v5 = vpop.f32.mrf.mxu1  ;;  %v1905_v21 = vadd.f32 %v5843_v56, %v5800_v25  ;;  %v1906_v43 = vadd.f32 %v5847_v42, %v5803_v57  ;;  %v6069_v56 = vld [vmem:[#allocation9_spill] sm:$0xff] }
 0x1e0   : > { %6061 = vst [vmem:[#allocation18_spill] sm:$0xff] %v5887_v5  ;;  %v5889_v50 = vpop.f32.mrf.mxu0  ;;  %v2198_v40 = vadd.f32 %v5809_v15, %v1893_v35  ;;  %v1899_v15 = vadd.f32 %v5823_v63, %v5782_v38  ;;  %v2490_v42 = vadd.f32 %v6069_v56, %v2201_v24 }
 0x1e1   : > { %6062 = vst [vmem:[#allocation19_spill] sm:$0xff] %v5889_v50  ;;  %v5891_v36 = vpop.f32.mrf.mxu1  ;;  %v2197_v50 = vadd.f32 %v5807_v41, %v1892_v59 }
 0x1e2   : > { %6063 = vst [vmem:[#allocation20_spill] sm:$0xff] %v5891_v36  ;;  %v5893_v2 = vpop.f32.mrf.mxu0  ;;  %v3105_v36 = vsub.s32 1, %v3100_v16  ;;  %v1898_v16 = vadd.f32 %v5819_v8, %v5779_v27  ;;  %v1902_v27 = vadd.f32 %v5831_v54, %v5791_v39  ;;  %v6067_v54 = vld [vmem:[#allocation2_spill] sm:$0xff] }
 0x1e3   : > { %6064 = vst [vmem:[#allocation21_spill] sm:$0xff] %v5893_v2  ;;  %v5895_v51 = vpop.f32.mrf.mxu1  ;;  %v1894_v2 = vadd.f32 %v1857_v55, %v5765_v29  ;;  %v1901_v29 = vadd.f32 %v1875_v62, %v5788_v4  ;;  %v1903_v4 = vadd.f32 %v5835_v48, %v5794_v52  ;;  %v1907_v52 = vadd.f32 %v5851_v60, %v5805_v32  ;;  %v6068_v48 = vld [vmem:[#allocation3_spill] sm:$0xff] }
 0x1e4   : > { %6065 = vst [vmem:[#allocation22_spill] sm:$0xff] %v5895_v51  ;;  %v2477_v5 = vpop.f32.mrf.mxu0  ;;  %v1895_v51 = vadd.f32 %v1859_v47, %v5769_v31  ;;  %v5923_v28 = vrot.slane %v3097_v20, %v3105_v36  ;;  %v5928_v47 = vrot.slane %v3125_v45, %v3105_v36  ;;  %v2203_v38 = vadd.f32 %v5821_v46, %v1898_v16 }
 0x1e5   : > { %v5902_v58 = vpop.f32.mrf.mxu1  ;;  %v2199_v41 = vadd.f32 %v5811_v6, %v1894_v2  ;;  %v2202_v6 = vadd.f32 %v5817_v12, %v1897_v3  ;;  %v2206_v39 = vadd.f32 %v5829_v37, %v1901_v29  ;;  %v2486_v8 = vadd.f32 %v5855_v19, %v2197_v50  ;;  %v6075_v50 = vld [vmem:[#allocation7_spill] sm:$0xff]  ;;  %v6077_v59 = vld [vmem:[#allocation17_spill] sm:$0xff] }
 0x1e6   : > { %6066 = vst [vmem:[#allocation23_spill] sm:$0xff] %v5902_v58  ;;  %v5915_v58 = vrot.slane %v3125_v45, %v3101_v61  ;;  %v2479_v31 = vpop.f32.mrf.mxu0  ;;  %v2200_v18 = vadd.f32 %v5813_v17, %v1895_v51  ;;  %v2205_v17 = vadd.f32 %v5827_v34, %v1900_v26  ;;  %v2487_v12 = vadd.f32 %v5859_v0, %v2198_v40  ;;  %v6070_v40 = vld [vmem:[#allocation4_spill] sm:$0xff]  ;;  %v6071_v0 = vld [vmem:[#allocation5_spill] sm:$0xff] }
 0x1e7   : > { %v5921_v55 = vpop.f32.mrf.mxu1  ;;  %v2488_v33 = vadd.f32 %v5863_v9, %v2199_v41  ;;  %v2204_v62 = vadd.f32 %v5825_v49, %v1899_v15  ;;  %v2207_v57 = vadd.f32 %v5833_v53, %v1902_v27  ;;  %v2208_v46 = vadd.f32 %v5837_v30, %v1903_v4  ;;  %v6072_v9 = vld [vmem:[#allocation11_spill] sm:$0xff]  ;;  %v6073_v49 = vld [vmem:[#allocation13_spill] sm:$0xff]  ;;  %v6074_v30 = vld [vmem:[#allocation6_spill] sm:$0xff] }
 0x1e8   : > { %v2481_v10 = vpop.f32.mrf.mxu0  ;;  %v2489_v34 = vadd.f32 %v2453_v44, %v2200_v18  ;;  %v2494_v25 = vadd.f32 %v2467_v14, %v2205_v17  ;;  %v2209_v37 = vadd.f32 %v5841_v23, %v1904_v22  ;;  %v2210_v32 = vadd.f32 %v6067_v54, %v1905_v21  ;;  %v6076_v51 = vld [vmem:[#allocation8_spill] sm:$0xff]  ;;  %v6080_v18 = vld [vmem:[#allocation10_spill] sm:$0xff]  ;;  %v6083_v21 = vld [vmem:[#allocation15_spill] sm:$0xff] }
 0x1e9   : > { %v2783_v63 = vpop.f32.mrf.mxu1  ;;  %v2211_v1 = vadd.f32 %v6068_v48, %v1906_v43  ;;  %v2495_v60 = vadd.f32 %v2469_v7, %v2206_v39  ;;  %v2212_v19 = vadd.f32 %v6070_v40, %v1907_v52  ;;  %v2788_v35 = vadd.f32 %v6071_v0, %v2486_v8  ;;  %v6078_v7 = vld [vmem:[#allocation19_spill] sm:$0xff]  ;;  %v6081_v15 = vld [vmem:[#allocation18_spill] sm:$0xff] }
 0x1ea   : > { %v2491_v14 = vadd.f32 %v6072_v9, %v2202_v6  ;;  %v2492_v44 = vadd.f32 %v6073_v49, %v2203_v38  ;;  %v2483_v53 = vpop.f32.mrf.mxu0  ;;  %v2789_v23 = vadd.f32 %v6074_v30, %v2487_v12  ;;  %v2790_v36 = vadd.f32 %v6075_v50, %v2488_v33  ;;  %v6079_v13 = vld [vmem:[#allocation21_spill] sm:$0xff]  ;;  %v6082_v6 = vld [vmem:[#allocation12_spill] sm:$0xff]  ;;  %v6084_v38 = vld [vmem:[#allocation14_spill] sm:$0xff] }
 0x1eb   : > { %v5962_v2 = vpop.f32.mrf.mxu1  ;;  %v2791_v61 = vadd.f32 %v6076_v51, %v2489_v34  ;;  %v2796_v20 = vadd.f32 %v6077_v59, %v2494_v25  ;;  %v2496_v45 = vadd.f32 %v6078_v7, %v2207_v57  ;;  %v2497_v3 = vadd.f32 %v6079_v13, %v2208_v46  ;;  %v6085_v25 = vld [vmem:[#allocation20_spill] sm:$0xff]  ;;  %v6086_v46 = vld [vmem:[#allocation22_spill] sm:$0xff] }
 0x1ec   : > { %v2498_v26 = vadd.f32 %v2477_v5, %v2209_v37  ;;  %v2499_v16 = vadd.f32 %v2479_v31, %v2210_v32  ;;  %v2792_v24 = vadd.f32 %v6080_v18, %v2490_v42  ;;  %v2797_v27 = vadd.f32 %v6081_v15, %v2495_v60 }
 0x1ed   : > { %v2793_v17 = vadd.f32 %v6082_v6, %v2491_v14  ;;  %v5974_v43 = vadd.f32 %v6083_v21, %v2204_v62  ;;  %v5977_v39 = vadd.f32 %v6084_v38, %v2492_v44  ;;  %v2500_v52 = vadd.f32 %v2481_v10, %v2211_v1  ;;  %v6087_v54 = vld [vmem:[#allocation23_spill] sm:$0xff] }
 0x1ee   : > { %v2798_v57 = vadd.f32 %v6085_v25, %v2496_v45  ;;  %v2799_v37 = vadd.f32 %v6086_v46, %v2497_v3  ;;  %v2800_v32 = vadd.f32 %v6087_v54, %v2498_v26  ;;  %v2801_v62 = vadd.f32 %v5921_v55, %v2499_v16 }
 0x1ef   : > { %v2501_v40 = vadd.f32 %v2483_v53, %v2212_v19  ;;  %v2802_v0 = vadd.f32 %v2783_v63, %v2500_v52 }
 0x20c   : > { %v3042_v29 = vpop.f32.mrf.mxu0 }
 0x20d   : > { %v3062_v41 = vpop.f32.mrf.mxu1  ;;  %v3081_v4 = vadd.f32 %v3042_v29, %v2788_v35 }
 0x20e   : > { %v3089_v22 = vadd.f32 %v3062_v41, %v2796_v20  ;;  %v3044_v8 = vpop.f32.mrf.mxu0 }
 0x20f   : > { %v3064_v5 = vpop.f32.mrf.mxu1  ;;  %v3109_v31 = vmul.f32 %v5910_v11, %v3081_v4  ;;  %v3082_v33 = vadd.f32 %v3044_v8, %v2789_v23 }
 0x210   : > { %v3117_v12 = vmul.f32 %v5910_v11, %v3089_v22  ;;  %v3090_v34 = vadd.f32 %v3064_v5, %v2797_v27  ;;  %v3046_v48 = vpop.f32.mrf.mxu0 }
 0x211   : > { %v3066_v56 = vpop.f32.mrf.mxu1  ;;  %v3137_v10 = vadd.f32 %v5915_v58, %v3109_v31  ;;  %v3110_v42 = vmul.f32 %v5923_v28, %v3082_v33  ;;  %v3083_v35 = vadd.f32 %v3046_v48, %v2790_v36 }
 0x212   : > { %v3145_v1 = vadd.f32 %v5915_v58, %v3117_v12  ;;  %v3118_v60 = vmul.f32 %v5923_v28, %v3090_v34  ;;  %v3091_v9 = vadd.f32 %v3066_v56, %v2798_v57  ;;  %v3048_v14 = vpop.f32.mrf.mxu0 }
 0x213   : > { %v3068_v49 = vpop.f32.mrf.mxu1  ;;  %v3153_v44 = vmax.f32 %v3137_v10, 0.0  ;;  %v3138_v55 = vadd.f32 %v5928_v47, %v3110_v42  ;;  %v3111_v50 = vmul.f32 %v5910_v11, %v3083_v35  ;;  %v3084_v59 = vadd.f32 %v3048_v14, %v2791_v61 }
 0x214   : > { %v3161_v30 = vmax.f32 %v3145_v1, 0.0  ;;  %v3146_v23 = vadd.f32 %v5928_v47, %v3118_v60  ;;  %v3119_v51 = vmul.f32 %v5910_v11, %v3091_v9  ;;  %v3092_v20 = vadd.f32 %v3068_v49, %v2799_v37  ;;  %v3052_v7 = vpop.f32.mrf.mxu0  ;;  %v6088_v37 = vld [vmem:[#allocation16_spill] sm:$0xff] }
 0x215   : > { %v3072_v19 = vpop.f32.mrf.mxu1  ;;  %v3154_v63 = vmax.f32 %v3138_v55, 0.0  ;;  %v3085_v36 = vadd.f32 %v3052_v7, %v2792_v24  ;;  %v3139_v13 = vadd.f32 %v5915_v58, %v3111_v50  ;;  %v3112_v61 = vmul.f32 %v5923_v28, %v3084_v59 }
 0x216   : > { %v3162_v53 = vmax.f32 %v3146_v23, 0.0  ;;  %v3093_v45 = vadd.f32 %v3072_v19, %v2800_v32  ;;  %v3147_v3 = vadd.f32 %v5915_v58, %v3119_v51  ;;  %v3120_v26 = vmul.f32 %v5923_v28, %v3092_v20  ;;  %v3054_v16 = vpop.f32.mrf.mxu0 }
 0x217   : > { %v3074_v29 = vpop.f32.mrf.mxu1  ;;  %v3923_v41 = vpack.c.bf16 %v3154_v63, %v3153_v44  ;;  %v3113_v24 = vmul.f32 %v5910_v11, %v3085_v36  ;;  %v3155_v27 = vmax.f32 %v3139_v13, 0.0  ;;  %v3140_v22 = vadd.f32 %v5928_v47, %v3112_v61 }
 0x218   : > { %v3927_v18 = vpack.c.bf16 %v3162_v53, %v3161_v30  ;;  %v3121_v15 = vmul.f32 %v5910_v11, %v3093_v45  ;;  %v3163_v4 = vmax.f32 %v3147_v3, 0.0  ;;  %v3148_v6 = vadd.f32 %v5928_v47, %v3120_v26  ;;  %v3056_v21 = vpop.f32.mrf.mxu0 }
 0x219   : > { %v3076_v38 = vpop.f32.mrf.mxu1  ;;  %3233 = vst [vmem:[%s5997_s16] sm:$0xff] %v3923_v41  ;;  %v3141_v52 = vadd.f32 %v5915_v58, %v3113_v24  ;;  %v3086_v5 = vadd.f32 %v3054_v16, %v2793_v17  ;;  %v3094_v31 = vadd.f32 %v3074_v29, %v2801_v62  ;;  %v3156_v12 = vmax.f32 %v3140_v22, 0.0 }
 0x21a   : > { %3237 = vst [vmem:[%s5997_s16 + $0x20] sm:$0xff] %v3927_v18  ;;  %v3149_v8 = vadd.f32 %v5915_v58, %v3121_v15  ;;  %v3164_v33 = vmax.f32 %v3148_v6, 0.0  ;;  %v3087_v34 = vadd.f32 %v3056_v21, %v5977_v39  ;;  %v3095_v25 = vadd.f32 %v3076_v38, %v2802_v0  ;;  %v3058_v57 = vpop.f32.mrf.mxu0 }
 0x21b   : > { %v3078_v46 = vpop.f32.mrf.mxu1  ;;  %v2795_v54 = vadd.f32 %v6088_v37, %v5974_v43  ;;  %v2803_v32 = vadd.f32 %v5962_v2, %v2501_v40  ;;  %v3114_v48 = vmul.f32 %v5923_v28, %v3086_v5  ;;  %v3122_v56 = vmul.f32 %v5923_v28, %v3094_v31 }
 0x21c   : > { %v3924_v17 = vpack.c.bf16 %v3156_v12, %v3155_v27  ;;  %v3928_v62 = vpack.c.bf16 %v3164_v33, %v3163_v4  ;;  %v3115_v10 = vmul.f32 %v5910_v11, %v3087_v34  ;;  %v3123_v39 = vmul.f32 %v5910_v11, %v3095_v25 }
 0x21d   : > { %v3142_v1 = vadd.f32 %v5928_v47, %v3114_v48  ;;  %v3150_v42 = vadd.f32 %v5928_v47, %v3122_v56  ;;  %v3088_v60 = vadd.f32 %v3058_v57, %v2795_v54  ;;  %v3096_v0 = vadd.f32 %v3078_v46, %v2803_v32 }
 0x21e   : > { %3234 = vst [vmem:[%s5997_s16 + $0x8] sm:$0xff] %v3924_v17  ;;  %3238 = vst [vmem:[%s5997_s16 + $0x28] sm:$0xff] %v3928_v62  ;;  %v3157_v2 = vmax.f32 %v3141_v52, 0.0  ;;  %v3165_v43 = vmax.f32 %v3149_v8, 0.0  ;;  %v3143_v40 = vadd.f32 %v5915_v58, %v3115_v10  ;;  %v3151_v35 = vadd.f32 %v5915_v58, %v3123_v39 }
 0x21f   : > { %v3158_v9 = vmax.f32 %v3142_v1, 0.0  ;;  %v3166_v14 = vmax.f32 %v3150_v42, 0.0  ;;  %v3116_v11 = vmul.f32 %v5923_v28, %v3088_v60  ;;  %v3124_v49 = vmul.f32 %v5923_v28, %v3096_v0 }
 0x220   : > { %v3159_v50 = vmax.f32 %v3143_v40, 0.0  ;;  %v3167_v51 = vmax.f32 %v3151_v35, 0.0 }
 0x221   : > { %v3925_v44 = vpack.c.bf16 %v3158_v9, %v3157_v2  ;;  %v3929_v30 = vpack.c.bf16 %v3166_v14, %v3165_v43  ;;  %v3144_v55 = vadd.f32 %v5928_v47, %v3116_v11  ;;  %v3152_v23 = vadd.f32 %v5928_v47, %v3124_v49 }
 0x223   : > { %3235 = vst [vmem:[%s5997_s16 + $0x10] sm:$0xff] %v3925_v44  ;;  %3239 = vst [vmem:[%s5997_s16 + $0x30] sm:$0xff] %v3929_v30  ;;  %v3160_v59 = vmax.f32 %v3144_v55, 0.0  ;;  %v3168_v58 = vmax.f32 %v3152_v23, 0.0 }
 0x225   : > { %v3926_v20 = vpack.c.bf16 %v3160_v59, %v3159_v50  ;;  %v3930_v7 = vpack.c.bf16 %v3168_v58, %v3167_v51 }
 0x227   : > { %3236 = vst [vmem:[%s5997_s16 + $0x18] sm:$0xff] %v3926_v20  ;;  %3240 = vst [vmem:[%s5997_s16 + $0x38] sm:$0xff] %v3930_v7 }
 0x228 PF: > { %s14_s15 = sadd.s32 1, %s4428_s15  }
 0x229   : > { %p11_p4 = scmp.ge.s32.totalorder %s14_s15, 4  }
 0x22b   :  { %13 = sbr.rel (!%p11_p4) target bundleno = 1 (0x1), region = 74 }

</bundles_post_ra>
